<compile_context>
chip_gen: v5e
topology: v5e:2x2
jax: 0.10.0
libtpu: 0.0.40
codegen_flags: <defaults>
</compile_context>

<pallas_src>
import functools

import jax
import jax.numpy as jnp
from jax.experimental import pallas as pl
from jax.experimental.pallas import tpu as pltpu


_ROW_ALIGN = 16                        # legal for f32 (8,128) and bf16 (16,128)
_VMEM_LIMIT = 32 * 1024 * 1024         # < v7x 64 MiB physical VMEM per TC


# ----------------------------------------------------------------------------
# helpers
# ----------------------------------------------------------------------------
def silu(x):
    # elementwise math in f32 (v5e has no bf16 VPU/EUP)
    return x * (1.0 / (1.0 + jnp.exp(-x)))


def _round_up(x, m):
    return ((x + m - 1) // m) * m


def _pick_tile(rows, max_tile):
    # >= 2 grid steps when possible so both v7x TensorCores get work.
    tile = _round_up(max(1, (rows + 1) // 2), _ROW_ALIGN)
    return max(_ROW_ALIGN, min(tile, max_tile, _round_up(rows, _ROW_ALIGN)))


def _pad_rows(x, rows):
    pad = rows - x.shape[0]
    if pad == 0:
        return x
    return jnp.pad(x, ((0, pad), (0, 0)))


def _bf(w):
    return w.astype(jnp.bfloat16)


def _init_linear(key, n_in, n_out, bias=True):
    k1, k2 = jax.random.split(key)
    bound = 1.0 / (n_in ** 0.5)
    w = jax.random.uniform(k1, (n_in, n_out), jnp.float32, -bound, bound)
    if not bias:
        return w
    b = jax.random.uniform(k2, (1, n_out), jnp.float32, -bound, bound)
    return w, b


# ----------------------------------------------------------------------------
# Kernel 1: DimeNetMPN.message — per-triplet dense compute
#   [x_j | rbf_j] @ blockdiag(Ws, Wrbf)  -> h (silu, lanes 0:D), rbf (lanes D:2D)
#   tmp = rbf * h ;  sbf = edge_attr @ Wsbf
#   z[w, l*D+i] = sbf[w,l] * tmp[w,i]   (bf16 VMEM scratch slab)
#   msg = z @ Wbi_flat                  (single K = L*D MXU matmul)
# ----------------------------------------------------------------------------
def message_kernel(xrbf_ref, sbf_ref, wsrbf_ref, bs_ref, wsbf_ref, wbi_ref,
                   out_ref, z_ref):
    D = out_ref.shape[-1]
    # fused (lin_s | lin_rbf): one K=(D+n_rbf), N=2D matmul; bf16 in, f32 acc
    hr = jnp.dot(xrbf_ref[...].astype(jnp.bfloat16), wsrbf_ref[...],
                 preferred_element_type=jnp.float32)              # [T, 2D] f32
    h = silu(hr[:, :D] + bs_ref[...])                             # act(lin_s(x_j))
    tmp = hr[:, D:] * h                                           # lin_rbf(rbf_j) * h
    sbf = jnp.dot(sbf_ref[...].astype(jnp.bfloat16), wsbf_ref[...],
                  preferred_element_type=jnp.float32)             # [T, L] f32

    L = sbf.shape[-1]
    # lane-aligned slab writes into bf16 VMEM scratch (no concat / extra copy)
    for l in range(L):
        z_ref[:, l * D:(l + 1) * D] = (sbf[:, l:l + 1] * tmp).astype(z_ref.dtype)

    # single MXU matmul with K = L*D (bf16 in, f32 acc), bf16 writeback
    out_ref[...] = jnp.dot(z_ref[...], wbi_ref[...],
                           preferred_element_type=jnp.float32
                           ).astype(out_ref.dtype)


def mpn_message(xrbf, sbf, Ws, bs, Wrbf, Wsbf, Wbi, *, max_tile=256):
    T, Din = xrbf.shape
    D = Ws.shape[0]
    n_rbf = Wrbf.shape[0]
    assert Din == D + n_rbf
    n_sbf = sbf.shape[1]
    L = Wbi.shape[0]

    # bf16 weights; fused block-diagonal [lin_s | lin_rbf] weight
    W_srbf = jnp.zeros((D + n_rbf, 2 * D), jnp.float32)
    W_srbf = W_srbf.at[:D, :D].set(Ws).at[D:, D:].set(Wrbf)
    W_srbf = _bf(W_srbf)
    Wsbf_bf = _bf(Wsbf)
    Wbi_flat = _bf(Wbi.reshape(L * D, D))          # row index = l*D + i

    tile_t = _pick_tile(T, max_tile)
    Tp = _round_up(T, tile_t)
    xrbf_p = _pad_rows(xrbf, Tp)
    sbf_p = _pad_rows(sbf, Tp)

    out = pl.pallas_call(
        message_kernel,
        out_shape=jax.ShapeDtypeStruct((Tp, D), jnp.bfloat16),
        grid=(Tp // tile_t,),
        in_specs=[
            pl.BlockSpec((tile_t, D + n_rbf), lambda i: (i, 0)),
            pl.BlockSpec((tile_t, n_sbf), lambda i: (i, 0)),
            # weights: constant block index -> DMA'd once, revisited per step
            pl.BlockSpec((D + n_rbf, 2 * D), lambda i: (0, 0)),
            pl.BlockSpec((1, D), lambda i: (0, 0)),
            pl.BlockSpec((n_sbf, L), lambda i: (0, 0)),
            pl.BlockSpec((L * D, D), lambda i: (0, 0)),
        ],
        out_specs=pl.BlockSpec((tile_t, D), lambda i: (i, 0)),
        scratch_shapes=[pltpu.VMEM((tile_t, L * D), jnp.bfloat16)],
        compiler_params=pltpu.CompilerParams(
            dimension_semantics=("parallel",),
            vmem_limit_bytes=_VMEM_LIMIT),
    )(xrbf_p, sbf_p, W_srbf, bs, Wsbf_bf, Wbi_flat)
    return out[:T]


# ----------------------------------------------------------------------------
# Kernel 2: update + residual-interaction stack + lin_interact + gated skip +
#           residual-msg stack + per-message output rbf gating
# Outputs: mji [N, D]  and  xmsg = (rbf @ W_out_rbf) * mji  [N, D]
# ----------------------------------------------------------------------------
def update_kernel(x_ref, aggr_ref, rbf_ref, gate_ref,
                  wt_ref, bt_ref,
                  wri1_ref, bri1_ref, wri2_ref, bri2_ref,
                  wint_ref, bint_ref,
                  wrm1_ref, brm1_ref, wrm2_ref, brm2_ref,
                  worbf_ref,
                  mji_ref, xmsg_ref):
    x = x_ref[...]

    # MPN.update: act(lin_t(x)) + aggr_out   (bf16 MXU in, f32 acc)
    h = silu(jnp.dot(x.astype(jnp.bfloat16), wt_ref[...],
                     preferred_element_type=jnp.float32)
             + bt_ref[...]) + aggr_ref[...]

    def res_block(h, w1, b1, w2, b2):
        t = silu(h)
        t = jnp.dot(t.astype(jnp.bfloat16), w1,
                    preferred_element_type=jnp.float32) + b1
        t = silu(t)
        t = jnp.dot(t.astype(jnp.bfloat16), w2,
                    preferred_element_type=jnp.float32) + b2
        return h + t

    for r in range(wri1_ref.shape[0]):          # res_interaction blocks
        h = res_block(h, wri1_ref[r], bri1_ref[r], wri2_ref[r], bri2_ref[r])

    h = silu(jnp.dot(h.astype(jnp.bfloat16), wint_ref[...],
                     preferred_element_type=jnp.float32) + bint_ref[...])
    # gated skip computed inline (short live range; x tile is still in VMEM)
    h = h + gate_ref[...] * x_ref[...]

    for r in range(wrm1_ref.shape[0]):          # res_msg blocks
        h = res_block(h, wrm1_ref[r], brm1_ref[r], wrm2_ref[r], brm2_ref[r])

    mji_ref[...] = h.astype(mji_ref.dtype)

    # OutputLayer per-message part: (lin_rbf(rbf)) * mji  (short live range)
    rbf_proj = jnp.dot(rbf_ref[...].astype(jnp.bfloat16), worbf_ref[...],
                       preferred_element_type=jnp.float32)
    xmsg_ref[...] = (rbf_proj * h).astype(xmsg_ref.dtype)


def update_and_residuals(x, aggr, rbf, gate,
                         Wt, bt, Wri1, bri1, Wri2, bri2,
                         Wint, bint, Wrm1, brm1, Wrm2, brm2,
                         Worbf, *, max_tile=256):
    N, D = x.shape
    n_rbf = rbf.shape[1]
    R1 = Wri1.shape[0]
    R2 = Wrm1.shape[0]

    tile_n = _pick_tile(N, max_tile)
    Np = _round_up(N, tile_n)
    x_p = _pad_rows(x, Np)
    aggr_p = _pad_rows(aggr, Np)
    rbf_p = _pad_rows(rbf, Np)

    full2 = lambda s: pl.BlockSpec(s, lambda i: (0, 0))
    full3 = lambda s: pl.BlockSpec(s, lambda i: (0, 0, 0))
    mji, xmsg = pl.pallas_call(
        update_kernel,
        out_shape=(jax.ShapeDtypeStruct((Np, D), jnp.float32),
                   jax.ShapeDtypeStruct((Np, D), jnp.float32)),
        grid=(Np // tile_n,),
        in_specs=[
            pl.BlockSpec((tile_n, D), lambda i: (i, 0)),
            pl.BlockSpec((tile_n, D), lambda i: (i, 0)),
            pl.BlockSpec((tile_n, n_rbf), lambda i: (i, 0)),
            full2((1, D)),
            full2((D, D)), full2((1, D)),
            full3((R1, D, D)), full3((R1, 1, D)),
            full3((R1, D, D)), full3((R1, 1, D)),
            full2((D, D)), full2((1, D)),
            full3((R2, D, D)), full3((R2, 1, D)),
            full3((R2, D, D)), full3((R2, 1, D)),
            full2((n_rbf, D)),
        ],
        out_specs=(pl.BlockSpec((tile_n, D), lambda i: (i, 0)),
                   pl.BlockSpec((tile_n, D), lambda i: (i, 0))),
        compiler_params=pltpu.CompilerParams(
            dimension_semantics=("parallel",),
            vmem_limit_bytes=_VMEM_LIMIT),
    )(x_p, aggr_p, rbf_p, gate,
      _bf(Wt), bt, _bf(Wri1), bri1, _bf(Wri2), bri2,
      _bf(Wint), bint, _bf(Wrm1), brm1, _bf(Wrm2), brm2, _bf(Worbf))
    return mji[:N], xmsg[:N]


# ----------------------------------------------------------------------------
# Kernel 3: OutputLayer atom-level MLP + final linear head (bias-free)
# Final head weight zero-padded to 128 output lanes (lane-dense store);
# the wrapper slices back to n_output.
# ----------------------------------------------------------------------------
def atom_out_kernel(xa_ref, wl_ref, bl_ref, wfin_ref, out_ref):
    h = xa_ref[...]
    for r in range(wl_ref.shape[0]):
        h = silu(jnp.dot(h.astype(jnp.bfloat16), wl_ref[r],
                         preferred_element_type=jnp.float32) + bl_ref[r])
    out_ref[...] = jnp.dot(h.astype(jnp.bfloat16), wfin_ref[...],
                           preferred_element_type=jnp.float32
                           ).astype(out_ref.dtype)


def atom_output(xa, Wl, bl, Wfin, *, max_tile=256):
    A, D = xa.shape
    n_lin = Wl.shape[0]
    n_out = Wfin.shape[1]
    n_out_p = _round_up(max(n_out, 128), 128)
    Wfin_p = _bf(jnp.pad(Wfin, ((0, 0), (0, n_out_p - n_out))))

    tile_a = _pick_tile(A, max_tile)
    Ap = _round_up(A, tile_a)
    xa_p = _pad_rows(xa, Ap)

    out = pl.pallas_call(
        atom_out_kernel,
        out_shape=jax.ShapeDtypeStruct((Ap, n_out_p), jnp.float32),
        grid=(Ap // tile_a,),
        in_specs=[
            pl.BlockSpec((tile_a, D), lambda i: (i, 0)),
            pl.BlockSpec((n_lin, D, D), lambda i: (0, 0, 0)),
            pl.BlockSpec((n_lin, 1, D), lambda i: (0, 0, 0)),
            pl.BlockSpec((D, n_out_p), lambda i: (0, 0)),
        ],
        out_specs=pl.BlockSpec((tile_a, n_out_p), lambda i: (i, 0)),
        compiler_params=pltpu.CompilerParams(
            dimension_semantics=("parallel",),
            vmem_limit_bytes=_VMEM_LIMIT),
    )(xa_p, _bf(Wl), bl, Wfin_p)
    return out[:A, :n_out]


# ----------------------------------------------------------------------------
# Parameter construction (deterministic, synthetic; f32 master weights)
# ----------------------------------------------------------------------------
def init_params(key, *, num_rbf, num_sbf, dim_msg, num_output,
                num_res_inter, num_res_msg, num_lin_out, dim_bi_linear):
    keys = jax.random.split(key, 32)
    D, L = dim_msg, dim_bi_linear
    p = {}
    p["gate"] = jnp.ones((1, D), jnp.float32)
    # DimeNetMPN
    p["Ws"], p["bs"] = _init_linear(keys[0], D, D)
    p["Wt"], p["bt"] = _init_linear(keys[1], D, D)
    p["Wrbf"] = _init_linear(keys[2], num_rbf, D, bias=False)
    p["Wsbf"] = _init_linear(keys[3], num_sbf, L, bias=False)
    # W_bi_linear stored transposed as [L, D_in, D_out]
    p["Wbi"] = jax.random.uniform(keys[4], (L, D, D), jnp.float32,
                                  -1.0 / D, 1.0 / D)

    def stack_res(kbase, n):
        w1s, b1s, w2s, b2s = [], [], [], []
        ks = jax.random.split(kbase, max(n, 1) * 2)
        for i in range(n):
            w1, b1 = _init_linear(ks[2 * i], D, D)
            w2, b2 = _init_linear(ks[2 * i + 1], D, D)
            w1s.append(w1); b1s.append(b1); w2s.append(w2); b2s.append(b2)
        return (jnp.stack(w1s), jnp.stack(b1s),
                jnp.stack(w2s), jnp.stack(b2s))

    p["Wri1"], p["bri1"], p["Wri2"], p["bri2"] = stack_res(keys[5], num_res_inter)
    p["Wint"], p["bint"] = _init_linear(keys[6], D, D)
    p["Wrm1"], p["brm1"], p["Wrm2"], p["brm2"] = stack_res(keys[7], num_res_msg)
    # OutputLayer
    p["Worbf"] = _init_linear(keys[8], num_rbf, D, bias=False)
    wls, bls = [], []
    ks = jax.random.split(keys[9], num_lin_out)
    for i in range(num_lin_out):
        w, b = _init_linear(ks[i], D, D)
        wls.append(w); bls.append(b)
    p["Wout_lin"] = jnp.stack(wls)
    p["bout_lin"] = jnp.stack(bls)
    p["Wout_fin"] = _init_linear(keys[10], D, num_output, bias=False)
    return p


# ----------------------------------------------------------------------------
# Full forward (Pallas kernels + JAX gather/scatter glue)
# ----------------------------------------------------------------------------
def dime_module_forward(params, msg_ji, rbf_ji, sbf_kji,
                        msg_edge_index, atom_edge_index, num_atoms,
                        *, max_tile_t=256, max_tile_n=256, max_tile_a=256):
    N = msg_ji.shape[0]
    src, dst = msg_edge_index[0], msg_edge_index[1]      # PyG: x_j = x[src]

    # gather (glue): per-triplet [x_j | rbf_j] rows, lane-concatenated so the
    # message kernel runs one fused (lin_s | lin_rbf) matmul.
    # TODO(synk): fuse this gather into the kernel (scalar-prefetch + DMA).
    xrbf = jnp.take(jnp.concatenate([msg_ji, rbf_ji], axis=1), src, axis=0)

    # Pallas: DimeNetMPN.message (fused bilinear, single K=L*D matmul, bf16 out)
    per_edge_msg = mpn_message(xrbf, sbf_kji,
                               params["Ws"], params["bs"], params["Wrbf"],
                               params["Wsbf"], params["Wbi"],
                               max_tile=max_tile_t)

    # scatter-add (glue): bf16 writeback halves HBM traffic; accumulate in f32
    aggr = jax.ops.segment_sum(per_edge_msg.astype(jnp.float32), dst,
                               num_segments=N)

    # Pallas: update + residual stacks + interaction linear + gated skip +
    #         per-message output gating
    mji, xmsg = update_and_residuals(
        msg_ji, aggr, rbf_ji, params["gate"],
        params["Wt"], params["bt"],
        params["Wri1"], params["bri1"], params["Wri2"], params["bri2"],
        params["Wint"], params["bint"],
        params["Wrm1"], params["brm1"], params["Wrm2"], params["brm2"],
        params["Worbf"], max_tile=max_tile_n)

    # scatter-add (glue): aggregate gated messages onto atoms
    atom_feat = jax.ops.segment_sum(xmsg, atom_edge_index[1],
                                    num_segments=num_atoms)

    # Pallas: OutputLayer MLP + head (lane-dense padded output, sliced here)
    out = atom_output(atom_feat, params["Wout_lin"], params["bout_lin"],
                      params["Wout_fin"], max_tile=max_tile_a)
    return mji, out


# ----------------------------------------------------------------------------
# Pure-JAX reference.  Mirrors the kernel arithmetic (bf16 MXU inputs, f32
# accumulation, f32 elementwise, bf16 message writeback) so the structural
# correctness of the Pallas path can be asserted tightly.
# ----------------------------------------------------------------------------
def _bdot(a, w_bf16):
    return jnp.dot(a.astype(jnp.bfloat16), w_bf16,
                   preferred_element_type=jnp.float32)


def dime_module_reference(params, msg_ji, rbf_ji, sbf_kji,
                          msg_edge_index, atom_edge_index, num_atoms):
    N, D = msg_ji.shape
    src, dst = msg_edge_index[0], msg_edge_index[1]
    xj = msg_ji[src]
    rbfj = rbf_ji[src]

    h = silu(_bdot(xj, _bf(params["Ws"])) + params["bs"])
    rbf = _bdot(rbfj, _bf(params["Wrbf"]))
    tmp = rbf * h
    sbf = _bdot(sbf_kji, _bf(params["Wsbf"]))
    L = sbf.shape[1]
    z = jnp.concatenate([sbf[:, l:l + 1] * tmp for l in range(L)], axis=-1)
    Wbi_flat = params["Wbi"].reshape(L * D, D)
    msg = _bdot(z, _bf(Wbi_flat)).astype(jnp.bfloat16)       # bf16 writeback
    aggr = jax.ops.segment_sum(msg.astype(jnp.float32), dst, num_segments=N)

    h = silu(_bdot(msg_ji, _bf(params["Wt"])) + params["bt"]) + aggr

    def res_block(h, w1, b1, w2, b2):
        t = silu(h)
        t = _bdot(t, _bf(w1)) + b1
        t = silu(t)
        t = _bdot(t, _bf(w2)) + b2
        return h + t

    for r in range(params["Wri1"].shape[0]):
        h = res_block(h, params["Wri1"][r], params["bri1"][r],
                      params["Wri2"][r], params["bri2"][r])
    h = silu(_bdot(h, _bf(params["Wint"])) + params["bint"])
    h = h + params["gate"] * msg_ji
    for r in range(params["Wrm1"].shape[0]):
        h = res_block(h, params["Wrm1"][r], params["brm1"][r],
                      params["Wrm2"][r], params["brm2"][r])
    mji = h

    xmsg = _bdot(rbf_ji, _bf(params["Worbf"])) * mji
    atom_feat = jax.ops.segment_sum(xmsg, atom_edge_index[1],
                                    num_segments=num_atoms)
    a = atom_feat
    for r in range(params["Wout_lin"].shape[0]):
        a = silu(_bdot(a, _bf(params["Wout_lin"][r])) + params["bout_lin"][r])
    out = _bdot(a, _bf(params["Wout_fin"]))
    return mji, out


# ----------------------------------------------------------------------------
if __name__ == "__main__":
    # small shapes consistent with the module's forward (D = DimeNet's 128)
    num_rbf, num_sbf = 8, 8
    dim_msg = 128
    num_output = 4
    num_res_inter, num_res_msg, num_lin_out = 1, 2, 2
    dim_bi_linear = 8
    N_MSG = 100       # number of message (ji) edges   (not a tile multiple)
    N_TRIP = 200      # number of triplet (kji) edges  (not a tile multiple)
    N_ATOM = 20       # number of atoms

    key = jax.random.PRNGKey(0)
    kp, k1, k2, k3, k4, k5 = jax.random.split(key, 6)

    params = init_params(kp, num_rbf=num_rbf, num_sbf=num_sbf,
                         dim_msg=dim_msg, num_output=num_output,
                         num_res_inter=num_res_inter, num_res_msg=num_res_msg,
                         num_lin_out=num_lin_out, dim_bi_linear=dim_bi_linear)

    msg_ji = jax.random.normal(k1, (N_MSG, dim_msg), jnp.float32)
    rbf_ji = jax.random.normal(k2, (N_MSG, num_rbf), jnp.float32)
    sbf_kji = jax.random.normal(k3, (N_TRIP, num_sbf), jnp.float32)
    msg_edge_index = jax.random.randint(k4, (2, N_TRIP), 0, N_MSG, jnp.int32)
    atom_edge_index = jax.random.randint(k5, (2, N_MSG), 0, N_ATOM, jnp.int32)

    fwd = jax.jit(functools.partial(dime_module_forward, num_atoms=N_ATOM))
    mji, out = fwd(params, msg_ji, rbf_ji, sbf_kji,
                   msg_edge_index, atom_edge_index)
    jax.block_until_ready((mji, out))

    mji_ref, out_ref = dime_module_reference(params, msg_ji, rbf_ji, sbf_kji,
                                             msg_edge_index, atom_edge_index,
                                             N_ATOM)
    assert jnp.allclose(mji, mji_ref, rtol=5e-3, atol=5e-3)
    assert jnp.allclose(out, out_ref, rtol=5e-3, atol=5e-3)
    print("KERNEL_OK")
</pallas_src>

<mosaic_0001>
module attributes {stable_mosaic.version = 11 : i64} {
  func.func @message_kernel(%arg0: i32, %arg1: memref<112x136xf32, #tpu.memory_space<vmem>>, %arg2: memref<112x8xf32, #tpu.memory_space<vmem>>, %arg3: memref<136x256xbf16, #tpu.memory_space<vmem>>, %arg4: memref<1x128xf32, #tpu.memory_space<vmem>>, %arg5: memref<8x8xbf16, #tpu.memory_space<vmem>>, %arg6: memref<1024x128xbf16, #tpu.memory_space<vmem>>, %arg7: memref<112x128xbf16, #tpu.memory_space<vmem>>, %arg8: memref<112x1024xbf16, #tpu.memory_space<vmem>>) attributes {dimension_semantics = [#tpu.dimension_semantics<parallel>], iteration_bounds = array<i64: 2>, scalar_prefetch = 0 : i64, scratch_operands = 1 : i64, tpu.core_type = #tpu.core_type<tc>, window_params = [{transform_indices = @transform_0, window_bounds = array<i64: 112, 136>}, {transform_indices = @transform_1, window_bounds = array<i64: 112, 8>}, {pipeline_mode = #tpu.pipeline_mode<synchronous>, transform_indices = @transform_2, window_bounds = array<i64: 136, 256>}, {pipeline_mode = #tpu.pipeline_mode<synchronous>, transform_indices = @transform_3, window_bounds = array<i64: 1, 128>}, {pipeline_mode = #tpu.pipeline_mode<synchronous>, transform_indices = @transform_4, window_bounds = array<i64: 8, 8>}, {pipeline_mode = #tpu.pipeline_mode<synchronous>, transform_indices = @transform_5, window_bounds = array<i64: 1024, 128>}, {transform_indices = @transform_6, window_bounds = array<i64: 112, 128>}]} {
    %c0 = arith.constant 0 : index
    %c0_0 = arith.constant 0 : index
    %0 = vector.load %arg1[%c0, %c0_0] : memref<112x136xf32, #tpu.memory_space<vmem>>, vector<112x136xf32>
    %1 = arith.truncf %0 : vector<112x136xf32> to vector<112x136xbf16>
    %c0_1 = arith.constant 0 : index
    %c0_2 = arith.constant 0 : index
    %2 = vector.load %arg3[%c0_1, %c0_2] : memref<136x256xbf16, #tpu.memory_space<vmem>>, vector<136x256xbf16>
    %cst = arith.constant dense<0.000000e+00> : vector<112x256xf32>
    %3 = tpu.matmul %1, %2, %cst {dimension_numbers = #tpu.dot_dimension_numbers<[1], [0], [0], [1], [0, 0, 1, 1], [], []>} : vector<112x136xbf16>, vector<136x256xbf16>, vector<112x256xf32> -> vector<112x256xf32>
    %4 = vector.extract_strided_slice %3 {offsets = [0, 0], sizes = [112, 128], strides = [1, 1]} : vector<112x256xf32> to vector<112x128xf32>
    %c0_3 = arith.constant 0 : index
    %c0_4 = arith.constant 0 : index
    %5 = vector.load %arg4[%c0_3, %c0_4] : memref<1x128xf32, #tpu.memory_space<vmem>>, vector<1x128xf32>
    %6 = vector.broadcast %5 : vector<1x128xf32> to vector<112x128xf32>
    %7 = arith.addf %4, %6 : vector<112x128xf32>
    %cst_5 = arith.constant 0.000000e+00 : f32
    %8 = vector.broadcast %cst_5 : f32 to vector<112x128xf32>
    %9 = arith.subf %8, %7 : vector<112x128xf32>
    %10 = math.exp %9 : vector<112x128xf32>
    %cst_6 = arith.constant 1.000000e+00 : f32
    %11 = vector.broadcast %cst_6 : f32 to vector<112x128xf32>
    %12 = arith.addf %11, %10 : vector<112x128xf32>
    %cst_7 = arith.constant 1.000000e+00 : f32
    %13 = vector.broadcast %cst_7 : f32 to vector<112x128xf32>
    %14 = arith.divf %13, %12 : vector<112x128xf32>
    %15 = arith.mulf %7, %14 : vector<112x128xf32>
    %16 = vector.extract_strided_slice %3 {offsets = [0, 128], sizes = [112, 128], strides = [1, 1]} : vector<112x256xf32> to vector<112x128xf32>
    %17 = arith.mulf %16, %15 : vector<112x128xf32>
    %c0_8 = arith.constant 0 : index
    %c0_9 = arith.constant 0 : index
    %18 = vector.load %arg2[%c0_8, %c0_9] : memref<112x8xf32, #tpu.memory_space<vmem>>, vector<112x8xf32>
    %19 = arith.truncf %18 : vector<112x8xf32> to vector<112x8xbf16>
    %c0_10 = arith.constant 0 : index
    %c0_11 = arith.constant 0 : index
    %20 = vector.load %arg5[%c0_10, %c0_11] : memref<8x8xbf16, #tpu.memory_space<vmem>>, vector<8x8xbf16>
    %cst_12 = arith.constant dense<0.000000e+00> : vector<112x8xf32>
    %21 = tpu.matmul %19, %20, %cst_12 {dimension_numbers = #tpu.dot_dimension_numbers<[1], [0], [0], [1], [0, 0, 1, 1], [], []>} : vector<112x8xbf16>, vector<8x8xbf16>, vector<112x8xf32> -> vector<112x8xf32>
    %22 = vector.extract_strided_slice %21 {offsets = [0, 0], sizes = [112, 1], strides = [1, 1]} : vector<112x8xf32> to vector<112x1xf32>
    %23 = vector.broadcast %22 : vector<112x1xf32> to vector<112x128xf32>
    %24 = arith.mulf %23, %17 : vector<112x128xf32>
    %25 = arith.truncf %24 : vector<112x128xf32> to vector<112x128xbf16>
    %c0_13 = arith.constant 0 : index
    %c0_14 = arith.constant 0 : index
    %26 = vector.load %arg8[%c0_13, %c0_14] : memref<112x1024xbf16, #tpu.memory_space<vmem>>, vector<112x128xbf16>
    tpu.vector_store %arg8[%c0_13, %c0_14], %25 {strides = array<i32>} : memref<112x1024xbf16, #tpu.memory_space<vmem>>, vector<112x128xbf16>,
    %27 = vector.extract_strided_slice %21 {offsets = [0, 1], sizes = [112, 1], strides = [1, 1]} : vector<112x8xf32> to vector<112x1xf32>
    %28 = vector.broadcast %27 : vector<112x1xf32> to vector<112x128xf32>
    %29 = arith.mulf %28, %17 : vector<112x128xf32>
    %30 = arith.truncf %29 : vector<112x128xf32> to vector<112x128xbf16>
    %c0_15 = arith.constant 0 : index
    %c128 = arith.constant 128 : index
    %31 = vector.load %arg8[%c0_15, %c128] : memref<112x1024xbf16, #tpu.memory_space<vmem>>, vector<112x128xbf16>
    tpu.vector_store %arg8[%c0_15, %c128], %30 {strides = array<i32>} : memref<112x1024xbf16, #tpu.memory_space<vmem>>, vector<112x128xbf16>,
    %32 = vector.extract_strided_slice %21 {offsets = [0, 2], sizes = [112, 1], strides = [1, 1]} : vector<112x8xf32> to vector<112x1xf32>
    %33 = vector.broadcast %32 : vector<112x1xf32> to vector<112x128xf32>
    %34 = arith.mulf %33, %17 : vector<112x128xf32>
    %35 = arith.truncf %34 : vector<112x128xf32> to vector<112x128xbf16>
    %c0_16 = arith.constant 0 : index
    %c256 = arith.constant 256 : index
    %36 = vector.load %arg8[%c0_16, %c256] : memref<112x1024xbf16, #tpu.memory_space<vmem>>, vector<112x128xbf16>
    tpu.vector_store %arg8[%c0_16, %c256], %35 {strides = array<i32>} : memref<112x1024xbf16, #tpu.memory_space<vmem>>, vector<112x128xbf16>,
    %37 = vector.extract_strided_slice %21 {offsets = [0, 3], sizes = [112, 1], strides = [1, 1]} : vector<112x8xf32> to vector<112x1xf32>
    %38 = vector.broadcast %37 : vector<112x1xf32> to vector<112x128xf32>
    %39 = arith.mulf %38, %17 : vector<112x128xf32>
    %40 = arith.truncf %39 : vector<112x128xf32> to vector<112x128xbf16>
    %c0_17 = arith.constant 0 : index
    %c384 = arith.constant 384 : index
    %41 = vector.load %arg8[%c0_17, %c384] : memref<112x1024xbf16, #tpu.memory_space<vmem>>, vector<112x128xbf16>
    tpu.vector_store %arg8[%c0_17, %c384], %40 {strides = array<i32>} : memref<112x1024xbf16, #tpu.memory_space<vmem>>, vector<112x128xbf16>,
    %42 = vector.extract_strided_slice %21 {offsets = [0, 4], sizes = [112, 1], strides = [1, 1]} : vector<112x8xf32> to vector<112x1xf32>
    %43 = vector.broadcast %42 : vector<112x1xf32> to vector<112x128xf32>
    %44 = arith.mulf %43, %17 : vector<112x128xf32>
    %45 = arith.truncf %44 : vector<112x128xf32> to vector<112x128xbf16>
    %c0_18 = arith.constant 0 : index
    %c512 = arith.constant 512 : index
    %46 = vector.load %arg8[%c0_18, %c512] : memref<112x1024xbf16, #tpu.memory_space<vmem>>, vector<112x128xbf16>
    tpu.vector_store %arg8[%c0_18, %c512], %45 {strides = array<i32>} : memref<112x1024xbf16, #tpu.memory_space<vmem>>, vector<112x128xbf16>,
    %47 = vector.extract_strided_slice %21 {offsets = [0, 5], sizes = [112, 1], strides = [1, 1]} : vector<112x8xf32> to vector<112x1xf32>
    %48 = vector.broadcast %47 : vector<112x1xf32> to vector<112x128xf32>
    %49 = arith.mulf %48, %17 : vector<112x128xf32>
    %50 = arith.truncf %49 : vector<112x128xf32> to vector<112x128xbf16>
    %c0_19 = arith.constant 0 : index
    %c640 = arith.constant 640 : index
    %51 = vector.load %arg8[%c0_19, %c640] : memref<112x1024xbf16, #tpu.memory_space<vmem>>, vector<112x128xbf16>
    tpu.vector_store %arg8[%c0_19, %c640], %50 {strides = array<i32>} : memref<112x1024xbf16, #tpu.memory_space<vmem>>, vector<112x128xbf16>,
    %52 = vector.extract_strided_slice %21 {offsets = [0, 6], sizes = [112, 1], strides = [1, 1]} : vector<112x8xf32> to vector<112x1xf32>
    %53 = vector.broadcast %52 : vector<112x1xf32> to vector<112x128xf32>
    %54 = arith.mulf %53, %17 : vector<112x128xf32>
    %55 = arith.truncf %54 : vector<112x128xf32> to vector<112x128xbf16>
    %c0_20 = arith.constant 0 : index
    %c768 = arith.constant 768 : index
    %56 = vector.load %arg8[%c0_20, %c768] : memref<112x1024xbf16, #tpu.memory_space<vmem>>, vector<112x128xbf16>
    tpu.vector_store %arg8[%c0_20, %c768], %55 {strides = array<i32>} : memref<112x1024xbf16, #tpu.memory_space<vmem>>, vector<112x128xbf16>,
    %57 = vector.extract_strided_slice %21 {offsets = [0, 7], sizes = [112, 1], strides = [1, 1]} : vector<112x8xf32> to vector<112x1xf32>
    %58 = vector.broadcast %57 : vector<112x1xf32> to vector<112x128xf32>
    %59 = arith.mulf %58, %17 : vector<112x128xf32>
    %60 = arith.truncf %59 : vector<112x128xf32> to vector<112x128xbf16>
    %c0_21 = arith.constant 0 : index
    %c896 = arith.constant 896 : index
    %61 = vector.load %arg8[%c0_21, %c896] : memref<112x1024xbf16, #tpu.memory_space<vmem>>, vector<112x128xbf16>
    tpu.vector_store %arg8[%c0_21, %c896], %60 {strides = array<i32>} : memref<112x1024xbf16, #tpu.memory_space<vmem>>, vector<112x128xbf16>,
    %c0_22 = arith.constant 0 : index
    %c0_23 = arith.constant 0 : index
    %62 = vector.load %arg8[%c0_22, %c0_23] : memref<112x1024xbf16, #tpu.memory_space<vmem>>, vector<112x1024xbf16>
    %c0_24 = arith.constant 0 : index
    %c0_25 = arith.constant 0 : index
    %63 = vector.load %arg6[%c0_24, %c0_25] : memref<1024x128xbf16, #tpu.memory_space<vmem>>, vector<1024x128xbf16>
    %cst_26 = arith.constant dense<0.000000e+00> : vector<112x128xf32>
    %64 = tpu.matmul %62, %63, %cst_26 {dimension_numbers = #tpu.dot_dimension_numbers<[1], [0], [0], [1], [0, 0, 1, 1], [], []>} : vector<112x1024xbf16>, vector<1024x128xbf16>, vector<112x128xf32> -> vector<112x128xf32>
    %65 = arith.truncf %64 : vector<112x128xf32> to vector<112x128xbf16>
    %c0_27 = arith.constant 0 : index
    %c0_28 = arith.constant 0 : index
    %66 = vector.load %arg7[%c0_27, %c0_28] : memref<112x128xbf16, #tpu.memory_space<vmem>>, vector<112x128xbf16>
    tpu.vector_store %arg7[%c0_27, %c0_28], %65 {strides = array<i32>} : memref<112x128xbf16, #tpu.memory_space<vmem>>, vector<112x128xbf16>,
    return
  }
  func.func @transform_0(%arg0: i32) -> (i32, i32) {
    %c0_i32 = arith.constant 0 : i32
    %c0_i32_0 = arith.constant 0 : i32
    return %arg0, %c0_i32 : i32, i32
  }
  func.func @transform_1(%arg0: i32) -> (i32, i32) {
    %c0_i32 = arith.constant 0 : i32
    %c0_i32_0 = arith.constant 0 : i32
    return %arg0, %c0_i32 : i32, i32
  }
  func.func @transform_2(%arg0: i32) -> (i32, i32) {
    %c0_i32 = arith.constant 0 : i32
    %c0_i32_0 = arith.constant 0 : i32
    %c0_i32_1 = arith.constant 0 : i32
    return %c0_i32, %c0_i32_0 : i32, i32
  }
  func.func @transform_3(%arg0: i32) -> (i32, i32) {
    %c0_i32 = arith.constant 0 : i32
    %c0_i32_0 = arith.constant 0 : i32
    %c0_i32_1 = arith.constant 0 : i32
    return %c0_i32, %c0_i32_0 : i32, i32
  }
  func.func @transform_4(%arg0: i32) -> (i32, i32) {
    %c0_i32 = arith.constant 0 : i32
    %c0_i32_0 = arith.constant 0 : i32
    %c0_i32_1 = arith.constant 0 : i32
    return %c0_i32, %c0_i32_0 : i32, i32
  }
  func.func @transform_5(%arg0: i32) -> (i32, i32) {
    %c0_i32 = arith.constant 0 : i32
    %c0_i32_0 = arith.constant 0 : i32
    %c0_i32_1 = arith.constant 0 : i32
    return %c0_i32, %c0_i32_0 : i32, i32
  }
  func.func @transform_6(%arg0: i32) -> (i32, i32) {
    %c0_i32 = arith.constant 0 : i32
    %c0_i32_0 = arith.constant 0 : i32
    return %arg0, %c0_i32 : i32, i32
  }
}

module attributes {stable_mosaic.version = 11 : i64} {
  func.func @update_kernel(%arg0: i32, %arg1: memref<64x128xf32, #tpu.memory_space<vmem>>, %arg2: memref<64x128xf32, #tpu.memory_space<vmem>>, %arg3: memref<64x8xf32, #tpu.memory_space<vmem>>, %arg4: memref<1x128xf32, #tpu.memory_space<vmem>>, %arg5: memref<128x128xbf16, #tpu.memory_space<vmem>>, %arg6: memref<1x128xf32, #tpu.memory_space<vmem>>, %arg7: memref<1x128x128xbf16, #tpu.memory_space<vmem>>, %arg8: memref<1x1x128xf32, #tpu.memory_space<vmem>>, %arg9: memref<1x128x128xbf16, #tpu.memory_space<vmem>>, %arg10: memref<1x1x128xf32, #tpu.memory_space<vmem>>, %arg11: memref<128x128xbf16, #tpu.memory_space<vmem>>, %arg12: memref<1x128xf32, #tpu.memory_space<vmem>>, %arg13: memref<2x128x128xbf16, #tpu.memory_space<vmem>>, %arg14: memref<2x1x128xf32, #tpu.memory_space<vmem>>, %arg15: memref<2x128x128xbf16, #tpu.memory_space<vmem>>, %arg16: memref<2x1x128xf32, #tpu.memory_space<vmem>>, %arg17: memref<8x128xbf16, #tpu.memory_space<vmem>>, %arg18: memref<64x128xf32, #tpu.memory_space<vmem>>, %arg19: memref<64x128xf32, #tpu.memory_space<vmem>>) attributes {dimension_semantics = [#tpu.dimension_semantics<parallel>], iteration_bounds = array<i64: 2>, scalar_prefetch = 0 : i64, scratch_operands = 0 : i64, tpu.core_type = #tpu.core_type<tc>, window_params = [{transform_indices = @transform_0, window_bounds = array<i64: 64, 128>}, {transform_indices = @transform_1, window_bounds = array<i64: 64, 128>}, {transform_indices = @transform_2, window_bounds = array<i64: 64, 8>}, {pipeline_mode = #tpu.pipeline_mode<synchronous>, transform_indices = @transform_3, window_bounds = array<i64: 1, 128>}, {pipeline_mode = #tpu.pipeline_mode<synchronous>, transform_indices = @transform_4, window_bounds = array<i64: 128, 128>}, {pipeline_mode = #tpu.pipeline_mode<synchronous>, transform_indices = @transform_5, window_bounds = array<i64: 1, 128>}, {pipeline_mode = #tpu.pipeline_mode<synchronous>, transform_indices = @transform_6, window_bounds = array<i64: 1, 128, 128>}, {pipeline_mode = #tpu.pipeline_mode<synchronous>, transform_indices = @transform_7, window_bounds = array<i64: 1, 1, 128>}, {pipeline_mode = #tpu.pipeline_mode<synchronous>, transform_indices = @transform_8, window_bounds = array<i64: 1, 128, 128>}, {pipeline_mode = #tpu.pipeline_mode<synchronous>, transform_indices = @transform_9, window_bounds = array<i64: 1, 1, 128>}, {pipeline_mode = #tpu.pipeline_mode<synchronous>, transform_indices = @transform_10, window_bounds = array<i64: 128, 128>}, {pipeline_mode = #tpu.pipeline_mode<synchronous>, transform_indices = @transform_11, window_bounds = array<i64: 1, 128>}, {pipeline_mode = #tpu.pipeline_mode<synchronous>, transform_indices = @transform_12, window_bounds = array<i64: 2, 128, 128>}, {pipeline_mode = #tpu.pipeline_mode<synchronous>, transform_indices = @transform_13, window_bounds = array<i64: 2, 1, 128>}, {pipeline_mode = #tpu.pipeline_mode<synchronous>, transform_indices = @transform_14, window_bounds = array<i64: 2, 128, 128>}, {pipeline_mode = #tpu.pipeline_mode<synchronous>, transform_indices = @transform_15, window_bounds = array<i64: 2, 1, 128>}, {pipeline_mode = #tpu.pipeline_mode<synchronous>, transform_indices = @transform_16, window_bounds = array<i64: 8, 128>}, {transform_indices = @transform_17, window_bounds = array<i64: 64, 128>}, {transform_indices = @transform_18, window_bounds = array<i64: 64, 128>}]} {
    %c0 = arith.constant 0 : index
    %c0_0 = arith.constant 0 : index
    %0 = vector.load %arg1[%c0, %c0_0] : memref<64x128xf32, #tpu.memory_space<vmem>>, vector<64x128xf32>
    %1 = arith.truncf %0 : vector<64x128xf32> to vector<64x128xbf16>
    %c0_1 = arith.constant 0 : index
    %c0_2 = arith.constant 0 : index
    %2 = vector.load %arg5[%c0_1, %c0_2] : memref<128x128xbf16, #tpu.memory_space<vmem>>, vector<128x128xbf16>
    %cst = arith.constant dense<0.000000e+00> : vector<64x128xf32>
    %3 = tpu.matmul %1, %2, %cst {dimension_numbers = #tpu.dot_dimension_numbers<[1], [0], [0], [1], [0, 0, 1, 1], [], []>} : vector<64x128xbf16>, vector<128x128xbf16>, vector<64x128xf32> -> vector<64x128xf32>
    %c0_3 = arith.constant 0 : index
    %c0_4 = arith.constant 0 : index
    %4 = vector.load %arg6[%c0_3, %c0_4] : memref<1x128xf32, #tpu.memory_space<vmem>>, vector<1x128xf32>
    %5 = vector.broadcast %4 : vector<1x128xf32> to vector<64x128xf32>
    %6 = arith.addf %3, %5 : vector<64x128xf32>
    %cst_5 = arith.constant 0.000000e+00 : f32
    %7 = vector.broadcast %cst_5 : f32 to vector<64x128xf32>
    %8 = arith.subf %7, %6 : vector<64x128xf32>
    %9 = math.exp %8 : vector<64x128xf32>
    %cst_6 = arith.constant 1.000000e+00 : f32
    %10 = vector.broadcast %cst_6 : f32 to vector<64x128xf32>
    %11 = arith.addf %10, %9 : vector<64x128xf32>
    %cst_7 = arith.constant 1.000000e+00 : f32
    %12 = vector.broadcast %cst_7 : f32 to vector<64x128xf32>
    %13 = arith.divf %12, %11 : vector<64x128xf32>
    %14 = arith.mulf %6, %13 : vector<64x128xf32>
    %c0_8 = arith.constant 0 : index
    %c0_9 = arith.constant 0 : index
    %15 = vector.load %arg2[%c0_8, %c0_9] : memref<64x128xf32, #tpu.memory_space<vmem>>, vector<64x128xf32>
    %16 = arith.addf %14, %15 : vector<64x128xf32>
    %c0_10 = arith.constant 0 : index
    %c0_11 = arith.constant 0 : index
    %c0_12 = arith.constant 0 : index
    %17 = vector.load %arg7[%c0_10, %c0_11, %c0_12] : memref<1x128x128xbf16, #tpu.memory_space<vmem>>, vector<1x128x128xbf16>
    %18 = vector.shape_cast %17 : vector<1x128x128xbf16> to vector<128x128xbf16>
    %c0_13 = arith.constant 0 : index
    %c0_14 = arith.constant 0 : index
    %c0_15 = arith.constant 0 : index
    %19 = vector.load %arg8[%c0_13, %c0_14, %c0_15] : memref<1x1x128xf32, #tpu.memory_space<vmem>>, vector<1x1x128xf32>
    %20 = vector.shape_cast %19 : vector<1x1x128xf32> to vector<1x128xf32>
    %c0_16 = arith.constant 0 : index
    %c0_17 = arith.constant 0 : index
    %c0_18 = arith.constant 0 : index
    %21 = vector.load %arg9[%c0_16, %c0_17, %c0_18] : memref<1x128x128xbf16, #tpu.memory_space<vmem>>, vector<1x128x128xbf16>
    %22 = vector.shape_cast %21 : vector<1x128x128xbf16> to vector<128x128xbf16>
    %c0_19 = arith.constant 0 : index
    %c0_20 = arith.constant 0 : index
    %c0_21 = arith.constant 0 : index
    %23 = vector.load %arg10[%c0_19, %c0_20, %c0_21] : memref<1x1x128xf32, #tpu.memory_space<vmem>>, vector<1x1x128xf32>
    %24 = vector.shape_cast %23 : vector<1x1x128xf32> to vector<1x128xf32>
    %cst_22 = arith.constant 0.000000e+00 : f32
    %25 = vector.broadcast %cst_22 : f32 to vector<64x128xf32>
    %26 = arith.subf %25, %16 : vector<64x128xf32>
    %27 = math.exp %26 : vector<64x128xf32>
    %cst_23 = arith.constant 1.000000e+00 : f32
    %28 = vector.broadcast %cst_23 : f32 to vector<64x128xf32>
    %29 = arith.addf %28, %27 : vector<64x128xf32>
    %cst_24 = arith.constant 1.000000e+00 : f32
    %30 = vector.broadcast %cst_24 : f32 to vector<64x128xf32>
    %31 = arith.divf %30, %29 : vector<64x128xf32>
    %32 = arith.mulf %16, %31 : vector<64x128xf32>
    %33 = arith.truncf %32 : vector<64x128xf32> to vector<64x128xbf16>
    %cst_25 = arith.constant dense<0.000000e+00> : vector<64x128xf32>
    %34 = tpu.matmul %33, %18, %cst_25 {dimension_numbers = #tpu.dot_dimension_numbers<[1], [0], [0], [1], [0, 0, 1, 1], [], []>} : vector<64x128xbf16>, vector<128x128xbf16>, vector<64x128xf32> -> vector<64x128xf32>
    %35 = vector.broadcast %20 : vector<1x128xf32> to vector<64x128xf32>
    %36 = arith.addf %34, %35 : vector<64x128xf32>
    %cst_26 = arith.constant 0.000000e+00 : f32
    %37 = vector.broadcast %cst_26 : f32 to vector<64x128xf32>
    %38 = arith.subf %37, %36 : vector<64x128xf32>
    %39 = math.exp %38 : vector<64x128xf32>
    %cst_27 = arith.constant 1.000000e+00 : f32
    %40 = vector.broadcast %cst_27 : f32 to vector<64x128xf32>
    %41 = arith.addf %40, %39 : vector<64x128xf32>
    %cst_28 = arith.constant 1.000000e+00 : f32
    %42 = vector.broadcast %cst_28 : f32 to vector<64x128xf32>
    %43 = arith.divf %42, %41 : vector<64x128xf32>
    %44 = arith.mulf %36, %43 : vector<64x128xf32>
    %45 = arith.truncf %44 : vector<64x128xf32> to vector<64x128xbf16>
    %cst_29 = arith.constant dense<0.000000e+00> : vector<64x128xf32>
    %46 = tpu.matmul %45, %22, %cst_29 {dimension_numbers = #tpu.dot_dimension_numbers<[1], [0], [0], [1], [0, 0, 1, 1], [], []>} : vector<64x128xbf16>, vector<128x128xbf16>, vector<64x128xf32> -> vector<64x128xf32>
    %47 = vector.broadcast %24 : vector<1x128xf32> to vector<64x128xf32>
    %48 = arith.addf %46, %47 : vector<64x128xf32>
    %49 = arith.addf %16, %48 : vector<64x128xf32>
    %50 = arith.truncf %49 : vector<64x128xf32> to vector<64x128xbf16>
    %c0_30 = arith.constant 0 : index
    %c0_31 = arith.constant 0 : index
    %51 = vector.load %arg11[%c0_30, %c0_31] : memref<128x128xbf16, #tpu.memory_space<vmem>>, vector<128x128xbf16>
    %cst_32 = arith.constant dense<0.000000e+00> : vector<64x128xf32>
    %52 = tpu.matmul %50, %51, %cst_32 {dimension_numbers = #tpu.dot_dimension_numbers<[1], [0], [0], [1], [0, 0, 1, 1], [], []>} : vector<64x128xbf16>, vector<128x128xbf16>, vector<64x128xf32> -> vector<64x128xf32>
    %c0_33 = arith.constant 0 : index
    %c0_34 = arith.constant 0 : index
    %53 = vector.load %arg12[%c0_33, %c0_34] : memref<1x128xf32, #tpu.memory_space<vmem>>, vector<1x128xf32>
    %54 = vector.broadcast %53 : vector<1x128xf32> to vector<64x128xf32>
    %55 = arith.addf %52, %54 : vector<64x128xf32>
    %cst_35 = arith.constant 0.000000e+00 : f32
    %56 = vector.broadcast %cst_35 : f32 to vector<64x128xf32>
    %57 = arith.subf %56, %55 : vector<64x128xf32>
    %58 = math.exp %57 : vector<64x128xf32>
    %cst_36 = arith.constant 1.000000e+00 : f32
    %59 = vector.broadcast %cst_36 : f32 to vector<64x128xf32>
    %60 = arith.addf %59, %58 : vector<64x128xf32>
    %cst_37 = arith.constant 1.000000e+00 : f32
    %61 = vector.broadcast %cst_37 : f32 to vector<64x128xf32>
    %62 = arith.divf %61, %60 : vector<64x128xf32>
    %63 = arith.mulf %55, %62 : vector<64x128xf32>
    %c0_38 = arith.constant 0 : index
    %c0_39 = arith.constant 0 : index
    %64 = vector.load %arg4[%c0_38, %c0_39] : memref<1x128xf32, #tpu.memory_space<vmem>>, vector<1x128xf32>
    %c0_40 = arith.constant 0 : index
    %c0_41 = arith.constant 0 : index
    %65 = vector.load %arg1[%c0_40, %c0_41] : memref<64x128xf32, #tpu.memory_space<vmem>>, vector<64x128xf32>
    %66 = vector.broadcast %64 : vector<1x128xf32> to vector<64x128xf32>
    %67 = arith.mulf %66, %65 : vector<64x128xf32>
    %68 = arith.addf %63, %67 : vector<64x128xf32>
    %c0_42 = arith.constant 0 : index
    %c0_43 = arith.constant 0 : index
    %c0_44 = arith.constant 0 : index
    %69 = vector.load %arg13[%c0_42, %c0_43, %c0_44] : memref<2x128x128xbf16, #tpu.memory_space<vmem>>, vector<1x128x128xbf16>
    %70 = vector.shape_cast %69 : vector<1x128x128xbf16> to vector<128x128xbf16>
    %c0_45 = arith.constant 0 : index
    %c0_46 = arith.constant 0 : index
    %c0_47 = arith.constant 0 : index
    %71 = vector.load %arg14[%c0_45, %c0_46, %c0_47] : memref<2x1x128xf32, #tpu.memory_space<vmem>>, vector<1x1x128xf32>
    %72 = vector.shape_cast %71 : vector<1x1x128xf32> to vector<1x128xf32>
    %c0_48 = arith.constant 0 : index
    %c0_49 = arith.constant 0 : index
    %c0_50 = arith.constant 0 : index
    %73 = vector.load %arg15[%c0_48, %c0_49, %c0_50] : memref<2x128x128xbf16, #tpu.memory_space<vmem>>, vector<1x128x128xbf16>
    %74 = vector.shape_cast %73 : vector<1x128x128xbf16> to vector<128x128xbf16>
    %c0_51 = arith.constant 0 : index
    %c0_52 = arith.constant 0 : index
    %c0_53 = arith.constant 0 : index
    %75 = vector.load %arg16[%c0_51, %c0_52, %c0_53] : memref<2x1x128xf32, #tpu.memory_space<vmem>>, vector<1x1x128xf32>
    %76 = vector.shape_cast %75 : vector<1x1x128xf32> to vector<1x128xf32>
    %cst_54 = arith.constant 0.000000e+00 : f32
    %77 = vector.broadcast %cst_54 : f32 to vector<64x128xf32>
    %78 = arith.subf %77, %68 : vector<64x128xf32>
    %79 = math.exp %78 : vector<64x128xf32>
    %cst_55 = arith.constant 1.000000e+00 : f32
    %80 = vector.broadcast %cst_55 : f32 to vector<64x128xf32>
    %81 = arith.addf %80, %79 : vector<64x128xf32>
    %cst_56 = arith.constant 1.000000e+00 : f32
    %82 = vector.broadcast %cst_56 : f32 to vector<64x128xf32>
    %83 = arith.divf %82, %81 : vector<64x128xf32>
    %84 = arith.mulf %68, %83 : vector<64x128xf32>
    %85 = arith.truncf %84 : vector<64x128xf32> to vector<64x128xbf16>
    %cst_57 = arith.constant dense<0.000000e+00> : vector<64x128xf32>
    %86 = tpu.matmul %85, %70, %cst_57 {dimension_numbers = #tpu.dot_dimension_numbers<[1], [0], [0], [1], [0, 0, 1, 1], [], []>} : vector<64x128xbf16>, vector<128x128xbf16>, vector<64x128xf32> -> vector<64x128xf32>
    %87 = vector.broadcast %72 : vector<1x128xf32> to vector<64x128xf32>
    %88 = arith.addf %86, %87 : vector<64x128xf32>
    %cst_58 = arith.constant 0.000000e+00 : f32
    %89 = vector.broadcast %cst_58 : f32 to vector<64x128xf32>
    %90 = arith.subf %89, %88 : vector<64x128xf32>
    %91 = math.exp %90 : vector<64x128xf32>
    %cst_59 = arith.constant 1.000000e+00 : f32
    %92 = vector.broadcast %cst_59 : f32 to vector<64x128xf32>
    %93 = arith.addf %92, %91 : vector<64x128xf32>
    %cst_60 = arith.constant 1.000000e+00 : f32
    %94 = vector.broadcast %cst_60 : f32 to vector<64x128xf32>
    %95 = arith.divf %94, %93 : vector<64x128xf32>
    %96 = arith.mulf %88, %95 : vector<64x128xf32>
    %97 = arith.truncf %96 : vector<64x128xf32> to vector<64x128xbf16>
    %cst_61 = arith.constant dense<0.000000e+00> : vector<64x128xf32>
    %98 = tpu.matmul %97, %74, %cst_61 {dimension_numbers = #tpu.dot_dimension_numbers<[1], [0], [0], [1], [0, 0, 1, 1], [], []>} : vector<64x128xbf16>, vector<128x128xbf16>, vector<64x128xf32> -> vector<64x128xf32>
    %99 = vector.broadcast %76 : vector<1x128xf32> to vector<64x128xf32>
    %100 = arith.addf %98, %99 : vector<64x128xf32>
    %101 = arith.addf %68, %100 : vector<64x128xf32>
    %c1 = arith.constant 1 : index
    %c0_62 = arith.constant 0 : index
    %c0_63 = arith.constant 0 : index
    %102 = vector.load %arg13[%c1, %c0_62, %c0_63] : memref<2x128x128xbf16, #tpu.memory_space<vmem>>, vector<1x128x128xbf16>
    %103 = vector.shape_cast %102 : vector<1x128x128xbf16> to vector<128x128xbf16>
    %c1_64 = arith.constant 1 : index
    %c0_65 = arith.constant 0 : index
    %c0_66 = arith.constant 0 : index
    %104 = vector.load %arg14[%c1_64, %c0_65, %c0_66] : memref<2x1x128xf32, #tpu.memory_space<vmem>>, vector<1x1x128xf32>
    %105 = vector.shape_cast %104 : vector<1x1x128xf32> to vector<1x128xf32>
    %c1_67 = arith.constant 1 : index
    %c0_68 = arith.constant 0 : index
    %c0_69 = arith.constant 0 : index
    %106 = vector.load %arg15[%c1_67, %c0_68, %c0_69] : memref<2x128x128xbf16, #tpu.memory_space<vmem>>, vector<1x128x128xbf16>
    %107 = vector.shape_cast %106 : vector<1x128x128xbf16> to vector<128x128xbf16>
    %c1_70 = arith.constant 1 : index
    %c0_71 = arith.constant 0 : index
    %c0_72 = arith.constant 0 : index
    %108 = vector.load %arg16[%c1_70, %c0_71, %c0_72] : memref<2x1x128xf32, #tpu.memory_space<vmem>>, vector<1x1x128xf32>
    %109 = vector.shape_cast %108 : vector<1x1x128xf32> to vector<1x128xf32>
    %cst_73 = arith.constant 0.000000e+00 : f32
    %110 = vector.broadcast %cst_73 : f32 to vector<64x128xf32>
    %111 = arith.subf %110, %101 : vector<64x128xf32>
    %112 = math.exp %111 : vector<64x128xf32>
    %cst_74 = arith.constant 1.000000e+00 : f32
    %113 = vector.broadcast %cst_74 : f32 to vector<64x128xf32>
    %114 = arith.addf %113, %112 : vector<64x128xf32>
    %cst_75 = arith.constant 1.000000e+00 : f32
    %115 = vector.broadcast %cst_75 : f32 to vector<64x128xf32>
    %116 = arith.divf %115, %114 : vector<64x128xf32>
    %117 = arith.mulf %101, %116 : vector<64x128xf32>
    %118 = arith.truncf %117 : vector<64x128xf32> to vector<64x128xbf16>
    %cst_76 = arith.constant dense<0.000000e+00> : vector<64x128xf32>
    %119 = tpu.matmul %118, %103, %cst_76 {dimension_numbers = #tpu.dot_dimension_numbers<[1], [0], [0], [1], [0, 0, 1, 1], [], []>} : vector<64x128xbf16>, vector<128x128xbf16>, vector<64x128xf32> -> vector<64x128xf32>
    %120 = vector.broadcast %105 : vector<1x128xf32> to vector<64x128xf32>
    %121 = arith.addf %119, %120 : vector<64x128xf32>
    %cst_77 = arith.constant 0.000000e+00 : f32
    %122 = vector.broadcast %cst_77 : f32 to vector<64x128xf32>
    %123 = arith.subf %122, %121 : vector<64x128xf32>
    %124 = math.exp %123 : vector<64x128xf32>
    %cst_78 = arith.constant 1.000000e+00 : f32
    %125 = vector.broadcast %cst_78 : f32 to vector<64x128xf32>
    %126 = arith.addf %125, %124 : vector<64x128xf32>
    %cst_79 = arith.constant 1.000000e+00 : f32
    %127 = vector.broadcast %cst_79 : f32 to vector<64x128xf32>
    %128 = arith.divf %127, %126 : vector<64x128xf32>
    %129 = arith.mulf %121, %128 : vector<64x128xf32>
    %130 = arith.truncf %129 : vector<64x128xf32> to vector<64x128xbf16>
    %cst_80 = arith.constant dense<0.000000e+00> : vector<64x128xf32>
    %131 = tpu.matmul %130, %107, %cst_80 {dimension_numbers = #tpu.dot_dimension_numbers<[1], [0], [0], [1], [0, 0, 1, 1], [], []>} : vector<64x128xbf16>, vector<128x128xbf16>, vector<64x128xf32> -> vector<64x128xf32>
    %132 = vector.broadcast %109 : vector<1x128xf32> to vector<64x128xf32>
    %133 = arith.addf %131, %132 : vector<64x128xf32>
    %134 = arith.addf %101, %133 : vector<64x128xf32>
    %c0_81 = arith.constant 0 : index
    %c0_82 = arith.constant 0 : index
    %135 = vector.load %arg18[%c0_81, %c0_82] : memref<64x128xf32, #tpu.memory_space<vmem>>, vector<64x128xf32>
    tpu.vector_store %arg18[%c0_81, %c0_82], %134 {strides = array<i32>} : memref<64x128xf32, #tpu.memory_space<vmem>>, vector<64x128xf32>,
    %c0_83 = arith.constant 0 : index
    %c0_84 = arith.constant 0 : index
    %136 = vector.load %arg3[%c0_83, %c0_84] : memref<64x8xf32, #tpu.memory_space<vmem>>, vector<64x8xf32>
    %137 = arith.truncf %136 : vector<64x8xf32> to vector<64x8xbf16>
    %c0_85 = arith.constant 0 : index
    %c0_86 = arith.constant 0 : index
    %138 = vector.load %arg17[%c0_85, %c0_86] : memref<8x128xbf16, #tpu.memory_space<vmem>>, vector<8x128xbf16>
    %cst_87 = arith.constant dense<0.000000e+00> : vector<64x128xf32>
    %139 = tpu.matmul %137, %138, %cst_87 {dimension_numbers = #tpu.dot_dimension_numbers<[1], [0], [0], [1], [0, 0, 1, 1], [], []>} : vector<64x8xbf16>, vector<8x128xbf16>, vector<64x128xf32> -> vector<64x128xf32>
    %140 = arith.mulf %139, %134 : vector<64x128xf32>
    %c0_88 = arith.constant 0 : index
    %c0_89 = arith.constant 0 : index
    %141 = vector.load %arg19[%c0_88, %c0_89] : memref<64x128xf32, #tpu.memory_space<vmem>>, vector<64x128xf32>
    tpu.vector_store %arg19[%c0_88, %c0_89], %140 {strides = array<i32>} : memref<64x128xf32, #tpu.memory_space<vmem>>, vector<64x128xf32>,
    return
  }
  func.func @transform_0(%arg0: i32) -> (i32, i32) {
    %c0_i32 = arith.constant 0 : i32
    %c0_i32_0 = arith.constant 0 : i32
    return %arg0, %c0_i32 : i32, i32
  }
  func.func @transform_1(%arg0: i32) -> (i32, i32) {
    %c0_i32 = arith.constant 0 : i32
    %c0_i32_0 = arith.constant 0 : i32
    return %arg0, %c0_i32 : i32, i32
  }
  func.func @transform_2(%arg0: i32) -> (i32, i32) {
    %c0_i32 = arith.constant 0 : i32
    %c0_i32_0 = arith.constant 0 : i32
    return %arg0, %c0_i32 : i32, i32
  }
  func.func @transform_3(%arg0: i32) -> (i32, i32) {
    %c0_i32 = arith.constant 0 : i32
    %c0_i32_0 = arith.constant 0 : i32
    %c0_i32_1 = arith.constant 0 : i32
    return %c0_i32, %c0_i32_0 : i32, i32
  }
  func.func @transform_4(%arg0: i32) -> (i32, i32) {
    %c0_i32 = arith.constant 0 : i32
    %c0_i32_0 = arith.constant 0 : i32
    %c0_i32_1 = arith.constant 0 : i32
    return %c0_i32, %c0_i32_0 : i32, i32
  }
  func.func @transform_5(%arg0: i32) -> (i32, i32) {
    %c0_i32 = arith.constant 0 : i32
    %c0_i32_0 = arith.constant 0 : i32
    %c0_i32_1 = arith.constant 0 : i32
    return %c0_i32, %c0_i32_0 : i32, i32
  }
  func.func @transform_6(%arg0: i32) -> (i32, i32, i32) {
    %c0_i32 = arith.constant 0 : i32
    %c0_i32_0 = arith.constant 0 : i32
    %c0_i32_1 = arith.constant 0 : i32
    %c0_i32_2 = arith.constant 0 : i32
    return %c0_i32, %c0_i32_0, %c0_i32_1 : i32, i32, i32
  }
  func.func @transform_7(%arg0: i32) -> (i32, i32, i32) {
    %c0_i32 = arith.constant 0 : i32
    %c0_i32_0 = arith.constant 0 : i32
    %c0_i32_1 = arith.constant 0 : i32
    %c0_i32_2 = arith.constant 0 : i32
    return %c0_i32, %c0_i32_0, %c0_i32_1 : i32, i32, i32
  }
  func.func @transform_8(%arg0: i32) -> (i32, i32, i32) {
    %c0_i32 = arith.constant 0 : i32
    %c0_i32_0 = arith.constant 0 : i32
    %c0_i32_1 = arith.constant 0 : i32
    %c0_i32_2 = arith.constant 0 : i32
    return %c0_i32, %c0_i32_0, %c0_i32_1 : i32, i32, i32
  }
  func.func @transform_9(%arg0: i32) -> (i32, i32, i32) {
    %c0_i32 = arith.constant 0 : i32
    %c0_i32_0 = arith.constant 0 : i32
    %c0_i32_1 = arith.constant 0 : i32
    %c0_i32_2 = arith.constant 0 : i32
    return %c0_i32, %c0_i32_0, %c0_i32_1 : i32, i32, i32
  }
  func.func @transform_10(%arg0: i32) -> (i32, i32) {
    %c0_i32 = arith.constant 0 : i32
    %c0_i32_0 = arith.constant 0 : i32
    %c0_i32_1 = arith.constant 0 : i32
    return %c0_i32, %c0_i32_0 : i32, i32
  }
  func.func @transform_11(%arg0: i32) -> (i32, i32) {
    %c0_i32 = arith.constant 0 : i32
    %c0_i32_0 = arith.constant 0 : i32
    %c0_i32_1 = arith.constant 0 : i32
    return %c0_i32, %c0_i32_0 : i32, i32
  }
  func.func @transform_12(%arg0: i32) -> (i32, i32, i32) {
    %c0_i32 = arith.constant 0 : i32
    %c0_i32_0 = arith.constant 0 : i32
    %c0_i32_1 = arith.constant 0 : i32
    %c0_i32_2 = arith.constant 0 : i32
    return %c0_i32, %c0_i32_0, %c0_i32_1 : i32, i32, i32
  }
  func.func @transform_13(%arg0: i32) -> (i32, i32, i32) {
    %c0_i32 = arith.constant 0 : i32
    %c0_i32_0 = arith.constant 0 : i32
    %c0_i32_1 = arith.constant 0 : i32
    %c0_i32_2 = arith.constant 0 : i32
    return %c0_i32, %c0_i32_0, %c0_i32_1 : i32, i32, i32
  }
  func.func @transform_14(%arg0: i32) -> (i32, i32, i32) {
    %c0_i32 = arith.constant 0 : i32
    %c0_i32_0 = arith.constant 0 : i32
    %c0_i32_1 = arith.constant 0 : i32
    %c0_i32_2 = arith.constant 0 : i32
    return %c0_i32, %c0_i32_0, %c0_i32_1 : i32, i32, i32
  }
  func.func @transform_15(%arg0: i32) -> (i32, i32, i32) {
    %c0_i32 = arith.constant 0 : i32
    %c0_i32_0 = arith.constant 0 : i32
    %c0_i32_1 = arith.constant 0 : i32
    %c0_i32_2 = arith.constant 0 : i32
    return %c0_i32, %c0_i32_0, %c0_i32_1 : i32, i32, i32
  }
  func.func @transform_16(%arg0: i32) -> (i32, i32) {
    %c0_i32 = arith.constant 0 : i32
    %c0_i32_0 = arith.constant 0 : i32
    %c0_i32_1 = arith.constant 0 : i32
    return %c0_i32, %c0_i32_0 : i32, i32
  }
  func.func @transform_17(%arg0: i32) -> (i32, i32) {
    %c0_i32 = arith.constant 0 : i32
    %c0_i32_0 = arith.constant 0 : i32
    return %arg0, %c0_i32 : i32, i32
  }
  func.func @transform_18(%arg0: i32) -> (i32, i32) {
    %c0_i32 = arith.constant 0 : i32
    %c0_i32_0 = arith.constant 0 : i32
    return %arg0, %c0_i32 : i32, i32
  }
}

module attributes {stable_mosaic.version = 11 : i64} {
  func.func @atom_out_kernel(%arg0: i32, %arg1: memref<16x128xf32, #tpu.memory_space<vmem>>, %arg2: memref<2x128x128xbf16, #tpu.memory_space<vmem>>, %arg3: memref<2x1x128xf32, #tpu.memory_space<vmem>>, %arg4: memref<128x128xbf16, #tpu.memory_space<vmem>>, %arg5: memref<16x128xf32, #tpu.memory_space<vmem>>) attributes {dimension_semantics = [#tpu.dimension_semantics<parallel>], iteration_bounds = array<i64: 2>, scalar_prefetch = 0 : i64, scratch_operands = 0 : i64, tpu.core_type = #tpu.core_type<tc>, window_params = [{transform_indices = @transform_0, window_bounds = array<i64: 16, 128>}, {pipeline_mode = #tpu.pipeline_mode<synchronous>, transform_indices = @transform_1, window_bounds = array<i64: 2, 128, 128>}, {pipeline_mode = #tpu.pipeline_mode<synchronous>, transform_indices = @transform_2, window_bounds = array<i64: 2, 1, 128>}, {pipeline_mode = #tpu.pipeline_mode<synchronous>, transform_indices = @transform_3, window_bounds = array<i64: 128, 128>}, {transform_indices = @transform_4, window_bounds = array<i64: 16, 128>}]} {
    %c0 = arith.constant 0 : index
    %c0_0 = arith.constant 0 : index
    %0 = vector.load %arg1[%c0, %c0_0] : memref<16x128xf32, #tpu.memory_space<vmem>>, vector<16x128xf32>
    %1 = arith.truncf %0 : vector<16x128xf32> to vector<16x128xbf16>
    %c0_1 = arith.constant 0 : index
    %c0_2 = arith.constant 0 : index
    %c0_3 = arith.constant 0 : index
    %2 = vector.load %arg2[%c0_1, %c0_2, %c0_3] : memref<2x128x128xbf16, #tpu.memory_space<vmem>>, vector<1x128x128xbf16>
    %3 = vector.shape_cast %2 : vector<1x128x128xbf16> to vector<128x128xbf16>
    %cst = arith.constant dense<0.000000e+00> : vector<16x128xf32>
    %4 = tpu.matmul %1, %3, %cst {dimension_numbers = #tpu.dot_dimension_numbers<[1], [0], [0], [1], [0, 0, 1, 1], [], []>} : vector<16x128xbf16>, vector<128x128xbf16>, vector<16x128xf32> -> vector<16x128xf32>
    %c0_4 = arith.constant 0 : index
    %c0_5 = arith.constant 0 : index
    %c0_6 = arith.constant 0 : index
    %5 = vector.load %arg3[%c0_4, %c0_5, %c0_6] : memref<2x1x128xf32, #tpu.memory_space<vmem>>, vector<1x1x128xf32>
    %6 = vector.shape_cast %5 : vector<1x1x128xf32> to vector<1x128xf32>
    %7 = vector.broadcast %6 : vector<1x128xf32> to vector<16x128xf32>
    %8 = arith.addf %4, %7 : vector<16x128xf32>
    %cst_7 = arith.constant 0.000000e+00 : f32
    %9 = vector.broadcast %cst_7 : f32 to vector<16x128xf32>
    %10 = arith.subf %9, %8 : vector<16x128xf32>
    %11 = math.exp %10 : vector<16x128xf32>
    %cst_8 = arith.constant 1.000000e+00 : f32
    %12 = vector.broadcast %cst_8 : f32 to vector<16x128xf32>
    %13 = arith.addf %12, %11 : vector<16x128xf32>
    %cst_9 = arith.constant 1.000000e+00 : f32
    %14 = vector.broadcast %cst_9 : f32 to vector<16x128xf32>
    %15 = arith.divf %14, %13 : vector<16x128xf32>
    %16 = arith.mulf %8, %15 : vector<16x128xf32>
    %17 = arith.truncf %16 : vector<16x128xf32> to vector<16x128xbf16>
    %c1 = arith.constant 1 : index
    %c0_10 = arith.constant 0 : index
    %c0_11 = arith.constant 0 : index
    %18 = vector.load %arg2[%c1, %c0_10, %c0_11] : memref<2x128x128xbf16, #tpu.memory_space<vmem>>, vector<1x128x128xbf16>
    %19 = vector.shape_cast %18 : vector<1x128x128xbf16> to vector<128x128xbf16>
    %cst_12 = arith.constant dense<0.000000e+00> : vector<16x128xf32>
    %20 = tpu.matmul %17, %19, %cst_12 {dimension_numbers = #tpu.dot_dimension_numbers<[1], [0], [0], [1], [0, 0, 1, 1], [], []>} : vector<16x128xbf16>, vector<128x128xbf16>, vector<16x128xf32> -> vector<16x128xf32>
    %c1_13 = arith.constant 1 : index
    %c0_14 = arith.constant 0 : index
    %c0_15 = arith.constant 0 : index
    %21 = vector.load %arg3[%c1_13, %c0_14, %c0_15] : memref<2x1x128xf32, #tpu.memory_space<vmem>>, vector<1x1x128xf32>
    %22 = vector.shape_cast %21 : vector<1x1x128xf32> to vector<1x128xf32>
    %23 = vector.broadcast %22 : vector<1x128xf32> to vector<16x128xf32>
    %24 = arith.addf %20, %23 : vector<16x128xf32>
    %cst_16 = arith.constant 0.000000e+00 : f32
    %25 = vector.broadcast %cst_16 : f32 to vector<16x128xf32>
    %26 = arith.subf %25, %24 : vector<16x128xf32>
    %27 = math.exp %26 : vector<16x128xf32>
    %cst_17 = arith.constant 1.000000e+00 : f32
    %28 = vector.broadcast %cst_17 : f32 to vector<16x128xf32>
    %29 = arith.addf %28, %27 : vector<16x128xf32>
    %cst_18 = arith.constant 1.000000e+00 : f32
    %30 = vector.broadcast %cst_18 : f32 to vector<16x128xf32>
    %31 = arith.divf %30, %29 : vector<16x128xf32>
    %32 = arith.mulf %24, %31 : vector<16x128xf32>
    %33 = arith.truncf %32 : vector<16x128xf32> to vector<16x128xbf16>
    %c0_19 = arith.constant 0 : index
    %c0_20 = arith.constant 0 : index
    %34 = vector.load %arg4[%c0_19, %c0_20] : memref<128x128xbf16, #tpu.memory_space<vmem>>, vector<128x128xbf16>
    %cst_21 = arith.constant dense<0.000000e+00> : vector<16x128xf32>
    %35 = tpu.matmul %33, %34, %cst_21 {dimension_numbers = #tpu.dot_dimension_numbers<[1], [0], [0], [1], [0, 0, 1, 1], [], []>} : vector<16x128xbf16>, vector<128x128xbf16>, vector<16x128xf32> -> vector<16x128xf32>
    %c0_22 = arith.constant 0 : index
    %c0_23 = arith.constant 0 : index
    %36 = vector.load %arg5[%c0_22, %c0_23] : memref<16x128xf32, #tpu.memory_space<vmem>>, vector<16x128xf32>
    tpu.vector_store %arg5[%c0_22, %c0_23], %35 {strides = array<i32>} : memref<16x128xf32, #tpu.memory_space<vmem>>, vector<16x128xf32>,
    return
  }
  func.func @transform_0(%arg0: i32) -> (i32, i32) {
    %c0_i32 = arith.constant 0 : i32
    %c0_i32_0 = arith.constant 0 : i32
    return %arg0, %c0_i32 : i32, i32
  }
  func.func @transform_1(%arg0: i32) -> (i32, i32, i32) {
    %c0_i32 = arith.constant 0 : i32
    %c0_i32_0 = arith.constant 0 : i32
    %c0_i32_1 = arith.constant 0 : i32
    %c0_i32_2 = arith.constant 0 : i32
    return %c0_i32, %c0_i32_0, %c0_i32_1 : i32, i32, i32
  }
  func.func @transform_2(%arg0: i32) -> (i32, i32, i32) {
    %c0_i32 = arith.constant 0 : i32
    %c0_i32_0 = arith.constant 0 : i32
    %c0_i32_1 = arith.constant 0 : i32
    %c0_i32_2 = arith.constant 0 : i32
    return %c0_i32, %c0_i32_0, %c0_i32_1 : i32, i32, i32
  }
  func.func @transform_3(%arg0: i32) -> (i32, i32) {
    %c0_i32 = arith.constant 0 : i32
    %c0_i32_0 = arith.constant 0 : i32
    %c0_i32_1 = arith.constant 0 : i32
    return %c0_i32, %c0_i32_0 : i32, i32
  }
  func.func @transform_4(%arg0: i32) -> (i32, i32) {
    %c0_i32 = arith.constant 0 : i32
    %c0_i32_0 = arith.constant 0 : i32
    return %arg0, %c0_i32 : i32, i32
  }
}

</mosaic_0001>

<bundles_post_ra>
// kernel: dime_module_forward.4
= control target key start
LH: loop header
LB: loop body
LE: loop exit
PB: predicated region body
PF: predicated region fallthrough
CT: control target
= control target key end

     0   :  { %s3763_s27 = smov 0   ;;  %s4808_s0 = inlined_call_operand.vmem [shape: f32[128,128], index: 0, kind: input, shape index: {}]   ;;  %s4809_s1 = inlined_call_operand.vmem [shape: f32[128,128], index: 1, kind: input, shape index: {}]   ;;  %s4810_s2 = inlined_call_operand.vmem [shape: f32[128,8], index: 2, kind: input, shape index: {}]   ;;  %s4811_s3 = inlined_call_operand.vmem [shape: f32[1,128], index: 3, kind: input, shape index: {}]   ;;  %s4812_s4 = inlined_call_operand.vmem [shape: bf16[128,128], index: 4, kind: input, shape index: {}]   ;;  %s4813_s5 = inlined_call_operand.vmem [shape: f32[1,128], index: 5, kind: input, shape index: {}]   ;;  %s4814_s6 = inlined_call_operand.vmem [shape: bf16[1,128,128], index: 6, kind: input, shape index: {}]   ;;  %s4815_s7 = inlined_call_operand.vmem [shape: f32[1,1,128], index: 7, kind: input, shape index: {}]   ;;  %s4816_s8 = inlined_call_operand.vmem [shape: bf16[1,128,128], index: 8, kind: input, shape index: {}]   ;;  %s4817_s9 = inlined_call_operand.vmem [shape: f32[1,1,128], index: 9, kind: input, shape index: {}]   ;;  %s4818_s10 = inlined_call_operand.vmem [shape: bf16[128,128], index: 10, kind: input, shape index: {}]   ;;  %s4819_s11 = inlined_call_operand.vmem [shape: f32[1,128], index: 11, kind: input, shape index: {}]   ;;  %s4820_s12 = inlined_call_operand.vmem [shape: bf16[2,128,128], index: 12, kind: input, shape index: {}]   ;;  %s4821_s13 = inlined_call_operand.vmem [shape: f32[2,1,128], index: 13, kind: input, shape index: {}]   ;;  %s4822_s14 = inlined_call_operand.vmem [shape: bf16[2,128,128], index: 14, kind: input, shape index: {}]   ;;  %s4823_s15 = inlined_call_operand.vmem [shape: f32[2,1,128], index: 15, kind: input, shape index: {}]   ;;  %s4824_s16 = inlined_call_operand.vmem [shape: bf16[8,128], index: 16, kind: input, shape index: {}]   ;;  %s4825_s17 = inlined_call_operand.vmem [shape: f32[128,128], index: 17, kind: output, shape index: {0}]   ;;  %s4826_s18 = inlined_call_operand.vmem [shape: f32[128,128], index: 18, kind: output, shape index: {1}]  }
   0x1   :  { %4827 = sst [smem:[#allocation2_spill]] %s4808_s0 }
   0x2   :  { %4828 = sst [smem:[#allocation3_spill]] %s4809_s1 }
   0x3   :  { %4829 = sst [smem:[#allocation4_spill]] %s4810_s2 }
   0x4 LB: > { %s2995_s28 = sadd.s32 4294967295, %s3666_s27   ;;  %p2999_p0 = scmp.ge.s32.totalorder %s3666_s27, 1  ;;  %s3666_s27 = sphi %s3763_s27, %s29_s27  }
   0x5   : > { %p538_p1 = scmp.lt.s32.totalorder %s3666_s27, 3 }
   0x7   : > { %p539_p2 = pnand %p2999_p0, %p538_p1 }
   0x8   : > { %s3000_s21 = sshll.u32 (!%p539_p2), %s2995_s28, 3  ;;  %s4830_s1 = sld [smem:[#allocation2_spill]] (!%p539_p2) }
   0x9   : > { %542 = sbr.rel (%p539_p2) target bundleno = 1497 (0x5d9), region = 88  ;;  %p608_p3 = scmp.lt.s32.totalorder (!%p539_p2), %s3000_s21, 15 }
   0xa   : > { %s4833_s19 = sld [smem:[#allocation3_spill]] (!%p539_p2) }
   0xb   : > { %s4870_s2 = sld [smem:[#allocation4_spill]] (!%p539_p2) }
   0xe   : > { %v3313_v0 = vld [vmem:[%s4812_s4 + $0x38] sm:$0xff]  ;;  %v3312_v1 = vld [vmem:[%s4812_s4 + $0x30] sm:$0xff]  ;;  %v3311_v2 = vld [vmem:[%s4812_s4 + $0x28] sm:$0xff]  ;;  %s4874_s21 = smov (!%p608_p3, %s3000_s21), 15 }
   0xf   : > { %718 = vmatpush.bf16.msra.mxu0 %v3313_v0  ;;  %3370 = vmatpush.bf16.msra.mxu1 %v3313_v0  ;;  %v3310_v3 = vld [vmem:[%s4812_s4 + $0x20] sm:$0xff]  ;;  %v3309_v4 = vld [vmem:[%s4812_s4 + $0x18] sm:$0xff]  ;;  %v3308_v5 = vld [vmem:[%s4812_s4 + $0x10] sm:$0xff]  ;;  %s3789_s28 = sshll.u32 %s4874_s21, 3 }
  0x10   : > { %v3307_v6 = vld [vmem:[%s4812_s4 + $0x8] sm:$0xff]  ;;  %s3798_s20 = scalar_lea.vmem %s4830_s1, %s3789_s28  ;;  %v3306_v7 = vld [vmem:[%s4812_s4] sm:$0xff]  ;;  %v3321_v48 = vld [vmem:[%s4814_s6 + $0x38] sm:$0xff]  ;;  %s3861_s1 = scalar_lea.vmem %s4833_s19, %s3789_s28 }
  0x11   : > { %v638_v8 = vld [vmem:[%s3798_s20] sm:$0xff]  ;;  %v639_v9 = vld [vmem:[%s3798_s20 + $0x8] sm:$0xff]  ;;  %v640_v14 = vld [vmem:[%s3798_s20 + $0x10] sm:$0xff]  ;;  %s4715_s21 = scalar_lea.vmem %s4870_s2, %s3789_s28  ;;  %s4773_s29 = scalar_lea.vmem %s4825_s17, %s3789_s28 }
  0x12   : > { %v642_v10 = vld [vmem:[%s3798_s20 + $0x20] sm:$0xff]  ;;  %v643_v11 = vld [vmem:[%s3798_s20 + $0x28] sm:$0xff]  ;;  %v646_v12 = vpack.c.bf16 %v639_v9, %v638_v8  ;;  %v641_v15 = vld [vmem:[%s3798_s20 + $0x18] sm:$0xff]  ;;  %s4780_s0 = scalar_lea.vmem %s4826_s18, %s3789_s28 }
  0x13   : > { %719 = vmatpush.bf16.msra.mxu0 %v3312_v1  ;;  %3371 = vmatpush.bf16.msra.mxu1 %v3312_v1  ;;  %v648_v13 = vpack.c.bf16 %v643_v11, %v642_v10  ;;  %v644_v16 = vld [vmem:[%s3798_s20 + $0x30] sm:$0xff]  ;;  %v645_v17 = vld [vmem:[%s3798_s20 + $0x38] sm:$0xff]  ;;  %v647_v18 = vpack.c.bf16 %v641_v15, %v640_v14  ;;  %v3388_v20 = vld [vmem:[%s4813_s5] ss:$0 sm:$0xff] }
  0x14   : > { %v649_v19 = vpack.c.bf16 %v645_v17, %v644_v16 }
  0x17   : > { %720 = vmatpush.bf16.msra.mxu0 %v3311_v2  ;;  %3372 = vmatpush.bf16.msra.mxu1 %v3311_v2 }
  0x1b   : > { %721 = vmatpush.bf16.msra.mxu0 %v3310_v3  ;;  %3373 = vmatpush.bf16.msra.mxu1 %v3310_v3 }
  0x1f   : > { %722 = vmatpush.bf16.msra.mxu0 %v3309_v4  ;;  %3374 = vmatpush.bf16.msra.mxu1 %v3309_v4  ;;  %v3320_v4 = vld [vmem:[%s4814_s6 + $0x30] sm:$0xff] }
  0x23   : > { %723 = vmatpush.bf16.msra.mxu0 %v3308_v5  ;;  %3375 = vmatpush.bf16.msra.mxu1 %v3308_v5 }
  0x27   : > { %724 = vmatpush.bf16.msra.mxu0 %v3307_v6  ;;  %3376 = vmatpush.bf16.msra.mxu1 %v3307_v6 }
  0x2b   : > { %725 = vmatpush.bf16.msra.mxu0 %v3306_v7  ;;  %3377 = vmatpush.bf16.msra.mxu1 %v3306_v7 }
  0x2e   : > { %726 = vmatmul.bf16.vlgmr.msra.gmra.mxu0 %v646_v12  ;;  %736 = vmatmul.bf16.vlgmr.msra.gmra.mxu1 %v648_v13  ;;  %v3319_v12 = vld [vmem:[%s4814_s6 + $0x28] sm:$0xff] }
  0x2f   : > { %1172 = vmatpush.bf16.msrb.mxu1 %v3321_v48 }
  0x33   : > { %1173 = vmatpush.bf16.msrb.mxu1 %v3320_v4 }
  0x37   : > { %1174 = vmatpush.bf16.msrb.mxu1 %v3319_v12 }
  0x3e   : > { %731 = vmatmul.bf16.gmra.mxu0 %v647_v18  ;;  %741 = vmatmul.bf16.gmra.mxu1 %v649_v19 }
  0xab   : > { %v727_v21 = vpop.f32.mrf.mxu0  ;;  %v737_v22 = vpop.f32.mrf.mxu1 }
  0xac   : > { %v3814_v23 = vadd.f32 %v3388_v20, %v727_v21  ;;  %v3816_v24 = vadd.f32 %v3388_v20, %v737_v22 }
  0xae   : > { %v747_v25 = vsub.f32 0.0, %v3814_v23  ;;  %v751_v26 = vsub.f32 0.0, %v3816_v24 }
  0xb0   : > { %v755_v27 = vmul.f32 1.442695, %v747_v25  ;;  %v763_v28 = vmul.f32 1.442695, %v751_v26  ;;  %v907_v25 = vld [vmem:[%s3861_s1] sm:$0xff] }
  0xb2   : > { %3396 = vpow2.f32 %v755_v27 }
  0xb3   : > { %3398 = vpow2.f32 %v763_v28  ;;  %v729_v29 = vpop.f32.mrf.mxu0  ;;  %v739_v30 = vpop.f32.mrf.mxu1 }
  0xb4   : > { %v3820_v31 = vadd.f32 %v3388_v20, %v729_v29  ;;  %v3822_v32 = vadd.f32 %v3388_v20, %v739_v30 }
  0xb6   : > { %v748_v33 = vsub.f32 0.0, %v3820_v31  ;;  %v752_v34 = vsub.f32 0.0, %v3822_v32 }
  0xb8   : > { %v3397_v35 = vpop.eup %3396  ;;  %v757_v36 = vmul.f32 1.442695, %v748_v33  ;;  %v765_v39 = vmul.f32 1.442695, %v752_v34 }
  0xb9   : > { %v3399_v37 = vpop.eup %3398  ;;  %v771_v38 = vadd.f32 1.0, %v3397_v35 }
  0xba   : > { %v775_v40 = vadd.f32 1.0, %v3399_v37  ;;  %3400 = vpow2.f32 %v757_v36  ;;  %v3318_v36 = vld [vmem:[%s4814_s6 + $0x20] sm:$0xff] }
  0xbb   : > { %3402 = vrcp.f32 %v771_v38  ;;  %v732_v41 = vpop.f32.mrf.mxu0  ;;  %v742_v42 = vpop.f32.mrf.mxu1  ;;  %v788_v54 = vand.u32 2147483647, %v771_v38  ;;  %v790_v55 = vand.u32 2147483648, %v771_v38  ;;  %vm784_vm3 = vweird.f32 %v771_v38  ;;  %1175 = vmatpush.bf16.msrb.mxu1 %v3318_v36 }
  0xbc   : > { %3404 = vrcp.f32 %v775_v40  ;;  %v3826_v43 = vadd.f32 %v3388_v20, %v732_v41  ;;  %v3828_v44 = vadd.f32 %v3388_v20, %v742_v42  ;;  %vm844_vm0 = vweird.f32 %v775_v40 }
  0xbd   : > { %3406 = vpow2.f32 %v765_v39  ;;  %v848_v58 = vand.u32 2147483647, %v775_v40  ;;  %v850_v59 = vand.u32 2147483648, %v775_v40  ;;  %vm3852_vm4 = vcmp.eq.f32.partialorder %v788_v54, 8.507059e+37 }
  0xbe   : > { %v749_v45 = vsub.f32 0.0, %v3826_v43  ;;  %v753_v47 = vsub.f32 0.0, %v3828_v44  ;;  %v791_v14 = vor.u32 1.1754944e-38, %v790_v55 }
  0xbf   : > { %vm3876_vm7 = vcmp.eq.f32.partialorder %v848_v58, 8.507059e+37  ;;  %v851_v17 = vor.u32 1.1754944e-38, %v850_v59  ;;  %v908_v59 = vld [vmem:[%s3861_s1 + $0x8] sm:$0xff] }
  0xc0   : > { %v3401_v46 = vpop.eup %3400  ;;  %v759_v51 = vmul.f32 1.442695, %v749_v45  ;;  %v767_v0 = vmul.f32 1.442695, %v753_v47 }
  0xc1   : > { %v3403_v49 = vpop.eup %3402  ;;  %v3835_v50 = vadd.f32 1.0, %v3401_v46 }
  0xc2   : > { %v3837_v52 = vpop.eup %3404  ;;  %v780_v53 = vmul.f32 %v3403_v49, %v771_v38  ;;  %vm785_vm2 = vweird.f32 %v3403_v49 }
  0xc3   : > { %v3407_v56 = vpop.eup %3406  ;;  %v840_v57 = vmul.f32 %v3837_v52, %v775_v40  ;;  %3408 = vrcp.f32 %v3835_v50  ;;  %v734_v60 = vpop.f32.mrf.mxu0  ;;  %vm845_vm1 = vweird.f32 %v3837_v52  ;;  %vm786_vm6 = vmor %vm784_vm3, %vm785_vm2  ;;  %vm799_vm8 = vweird.f32 %v3835_v50 }
  0xc4   : > { %v744_v61 = vpop.f32.mrf.mxu1  ;;  %v781_v62 = vsub.f32 1.0, %v780_v53  ;;  %v3842_v63 = vadd.f32 1.0, %v3407_v56  ;;  %3410 = vpow2.f32 %v759_v51  ;;  %v3844_v2 = vadd.f32 %v3388_v20, %v734_v60  ;;  %vm3866_vm5 = vmor %vm844_vm0, %vm845_vm1 }
  0xc5   : > { %v841_v1 = vsub.f32 1.0, %v840_v57  ;;  %v3846_v3 = vadd.f32 %v3388_v20, %v744_v61  ;;  %v803_v27 = vand.u32 2147483647, %v3835_v50  ;;  %v805_v28 = vand.u32 2147483648, %v3835_v50 }
  0xc6   : > { %v782_v5 = vmul.f32 %v3403_v49, %v781_v62  ;;  %3412 = vrcp.f32 %v3842_v63  ;;  %v750_v10 = vsub.f32 0.0, %v3844_v2  ;;  %vm859_vm9 = vweird.f32 %v3842_v63  ;;  %v911_v62 = vld [vmem:[%s3861_s1 + $0x20] sm:$0xff] }
  0xc7   : > { %v842_v7 = vmul.f32 %v3837_v52, %v841_v1  ;;  %3414 = vpow2.f32 %v767_v0  ;;  %v754_v11 = vsub.f32 0.0, %v3846_v3  ;;  %v865_v38 = vand.u32 2147483648, %v3842_v63  ;;  %v3316_v1 = vld [vmem:[%s4814_s6 + $0x10] sm:$0xff] }
  0xc8   : > { %v783_v8 = vadd.f32 %v3403_v49, %v782_v5  ;;  %v761_v20 = vmul.f32 1.442695, %v750_v10  ;;  %v863_v45 = vand.u32 2147483647, %v3842_v63  ;;  %vm804_vm13 = vcmp.eq.f32.partialorder %v803_v27, 8.507059e+37 }
  0xc9   : > { %v3409_v13 = vpop.eup %3408  ;;  %v843_v15 = vadd.f32 %v3837_v52, %v842_v7  ;;  %v769_v35 = vmul.f32 1.442695, %v754_v11  ;;  %v806_v51 = vor.u32 1.1754944e-38, %v805_v28  ;;  %v866_v56 = vor.u32 1.1754944e-38, %v865_v38  ;;  %v3314_v28 = vld [vmem:[%s4814_s6] sm:$0xff] }
  0xca   : > { %v787_v18 = vsel %vm786_vm6, %v3403_v49, %v783_v8  ;;  %v795_v19 = vmul.f32 %v3409_v13, %v3835_v50  ;;  %v3411_v21 = vpop.eup %3410  ;;  %3416 = vpow2.f32 %v761_v20  ;;  %vm800_vm10 = vweird.f32 %v3409_v13  ;;  %v3317_v49 = vld [vmem:[%s4814_s6 + $0x18] sm:$0xff]  ;;  %v912_v20 = vld [vmem:[%s3861_s1 + $0x28] sm:$0xff] }
  0xcb   : > { %v792_v22 = vsel %vm3852_vm4, %v791_v14, %v787_v18  ;;  %v847_v26 = vsel %vm3866_vm5, %v3837_v52, %v843_v15  ;;  %v3891_v34 = vadd.f32 1.0, %v3411_v21  ;;  %vm801_vm12 = vmor %vm799_vm8, %vm800_vm10  ;;  %vm864_vm15 = vcmp.eq.f32.partialorder %v863_v45, 8.507059e+37  ;;  %1176 = vmatpush.bf16.msrb.mxu1 %v3317_v49  ;;  %v3315_v14 = vld [vmem:[%s4814_s6 + $0x8] sm:$0xff] }
  0xcc   : > { %v3413_v29 = vpop.eup %3412  ;;  %v899_v30 = vmul.f32 %v792_v22, %v3814_v23  ;;  %v796_v33 = vsub.f32 1.0, %v795_v19  ;;  %v852_v23 = vsel %vm3876_vm7, %v851_v17, %v847_v26 }
  0xcd   : > { %v855_v37 = vmul.f32 %v3413_v29, %v3842_v63  ;;  %v3415_v39 = vpop.eup %3414  ;;  %3418 = vrcp.f32 %v3891_v34  ;;  %vm860_vm11 = vweird.f32 %v3413_v29  ;;  %v903_v58 = vmul.f32 %v852_v23, %v3816_v24 }
  0xce   : > { %v3899_v40 = vadd.f32 %v907_v25, %v899_v30  ;;  %v797_v41 = vmul.f32 %v3409_v13, %v796_v33  ;;  %v3906_v48 = vadd.f32 1.0, %v3415_v39  ;;  %3420 = vpow2.f32 %v769_v35  ;;  %vm3915_vm14 = vmor %vm859_vm9, %vm860_vm11  ;;  %v909_v35 = vld [vmem:[%s3861_s1 + $0x10] sm:$0xff] }
  0xcf   : > { %v856_v42 = vsub.f32 1.0, %v855_v37  ;;  %v3934_v8 = vadd.f32 %v911_v62, %v903_v58  ;;  %1177 = vmatpush.bf16.msrb.mxu1 %v3316_v1  ;;  %v818_v11 = vand.u32 2147483647, %v3891_v34  ;;  %v820_v12 = vand.u32 2147483648, %v3891_v34 }
  0xd0   : > { %v957_v46 = vsub.f32 0.0, %v3899_v40  ;;  %v798_v47 = vadd.f32 %v3409_v13, %v797_v41  ;;  %3422 = vrcp.f32 %v3906_v48  ;;  %v3417_v57 = vpop.eup %3416  ;;  %vm814_vm1 = vweird.f32 %v3891_v34 }
  0xd1   : > { %v857_v52 = vmul.f32 %v3413_v29, %v856_v42  ;;  %v3924_v0 = vadd.f32 1.0, %v3417_v57  ;;  %v880_v25 = vand.u32 2147483648, %v3906_v48  ;;  %v821_v26 = vor.u32 1.1754944e-38, %v820_v12 }
  0xd2   : > { %v965_v53 = vmul.f32 1.442695, %v957_v46  ;;  %v802_v54 = vsel %vm801_vm12, %v3409_v13, %v798_v47  ;;  %vm819_vm3 = vcmp.eq.f32.partialorder %v818_v11, 8.507059e+37  ;;  %vm874_vm4 = vweird.f32 %v3906_v48 }
  0xd3   : > { %v807_v50 = vsel %vm804_vm13, %v806_v51, %v802_v54  ;;  %v858_v60 = vadd.f32 %v3413_v29, %v857_v52  ;;  %v3419_v61 = vpop.eup %3418  ;;  %1178 = vmatpush.bf16.msrb.mxu1 %v3315_v14  ;;  %v878_v36 = vand.u32 2147483647, %v3906_v48  ;;  %v881_v39 = vor.u32 1.1754944e-38, %v880_v25 }
  0xd4   : > { %3424 = vpow2.f32 %v965_v53  ;;  %v900_v63 = vmul.f32 %v807_v50, %v3820_v31  ;;  %v810_v24 = vmul.f32 %v3419_v61, %v3891_v34  ;;  %v3421_v5 = vpop.eup %3420  ;;  %vm815_vm0 = vweird.f32 %v3419_v61 }
  0xd5   : > { %v862_v4 = vsel %vm3915_vm14, %v3413_v29, %v858_v60  ;;  %3426 = vrcp.f32 %v3924_v0  ;;  %v3942_v13 = vadd.f32 1.0, %v3421_v5  ;;  %vm816_vm2 = vmor %vm814_vm1, %vm815_vm0  ;;  %vm829_vm5 = vweird.f32 %v3924_v0 }
  0xd6   : > { %v3932_v6 = vadd.f32 %v908_v59, %v900_v63  ;;  %v867_v7 = vsel %vm864_vm15, %v866_v56, %v862_v4  ;;  %v811_v9 = vsub.f32 1.0, %v810_v24  ;;  %v3937_v31 = vpop.eup %3422  ;;  %v833_v41 = vand.u32 2147483647, %v3924_v0 }
  0xd7   : > { %v904_v15 = vmul.f32 %v867_v7, %v3822_v32  ;;  %v870_v17 = vmul.f32 %v3937_v31, %v3906_v48  ;;  %3428 = vrcp.f32 %v3942_v13  ;;  %v961_v32 = vsub.f32 0.0, %v3934_v8  ;;  %1179 = vmatpush.bf16.msrb.mxu1 %v3314_v28 }
  0xd8   : > { %v958_v10 = vsub.f32 0.0, %v3932_v6  ;;  %v812_v16 = vmul.f32 %v3419_v61, %v811_v9  ;;  %vm875_vm6 = vweird.f32 %v3937_v31  ;;  %v835_v46 = vand.u32 2147483648, %v3924_v0 }
  0xd9   : > { %v871_v27 = vsub.f32 1.0, %v870_v17  ;;  %v3961_v30 = vadd.f32 %v912_v20, %v904_v15  ;;  %vm889_vm7 = vweird.f32 %v3942_v13  ;;  %v893_v53 = vand.u32 2147483647, %v3942_v13  ;;  %vm3990_vm10 = vmor %vm874_vm4, %vm875_vm6 }
  0xda   : > { %v3425_v18 = vpop.eup %3424  ;;  %v967_v19 = vmul.f32 1.442695, %v958_v10  ;;  %v813_v22 = vadd.f32 %v3419_v61, %v812_v16  ;;  %v895_v54 = vand.u32 2147483648, %v3942_v13  ;;  %vm834_vm11 = vcmp.eq.f32.partialorder %v833_v41, 8.507059e+37  ;;  %v910_v10 = vld [vmem:[%s3861_s1 + $0x18] sm:$0xff] }
  0xdb   : > { %v3952_v21 = vadd.f32 1.0, %v3425_v18  ;;  %v3427_v29 = vpop.eup %3426  ;;  %v872_v42 = vmul.f32 %v3937_v31, %v871_v27  ;;  %v962_v47 = vsub.f32 0.0, %v3961_v30  ;;  %v836_v63 = vor.u32 1.1754944e-38, %v835_v46 }
  0xdc   : > { %3430 = vpow2.f32 %v967_v19  ;;  %v817_v33 = vsel %vm816_vm2, %v3419_v61, %v813_v22  ;;  %v825_v37 = vmul.f32 %v3427_v29, %v3924_v0  ;;  %vm830_vm8 = vweird.f32 %v3427_v29 }
  0xdd   : > { %3432 = vrcp.f32 %v3952_v21  ;;  %v822_v34 = vsel %vm819_vm3, %v821_v26, %v817_v33  ;;  %v3429_v23 = vpop.eup %3428  ;;  %v873_v50 = vadd.f32 %v3937_v31, %v872_v42  ;;  %vm831_vm12 = vmor %vm829_vm5, %vm830_vm8  ;;  %v975_v48 = vmul.f32 1.442695, %v962_v47 }
  0xde   : > { %v901_v38 = vmul.f32 %v822_v34, %v3826_v43  ;;  %v826_v45 = vsub.f32 1.0, %v825_v37  ;;  %v885_v43 = vmul.f32 %v3429_v23, %v3942_v13  ;;  %vm890_vm9 = vweird.f32 %v3429_v23  ;;  %v913_v37 = vld [vmem:[%s3861_s1 + $0x30] sm:$0xff] }
  0xdf   : > { %vm4002_vm13 = vmor %vm889_vm7, %vm890_vm9  ;;  %v896_v5 = vor.u32 1.1754944e-38, %v895_v54  ;;  %vm894_vm14 = vcmp.eq.f32.partialorder %v893_v53, 8.507059e+37  ;;  %v877_v0 = vsel %vm3990_vm10, %v3937_v31, %v873_v50  ;;  %vm879_vm15 = vcmp.eq.f32.partialorder %v878_v36, 8.507059e+37 }
  0xe0   : > { %v3974_v49 = vadd.f32 %v909_v35, %v901_v38  ;;  %v827_v52 = vmul.f32 %v3427_v29, %v826_v45  ;;  %v886_v58 = vsub.f32 1.0, %v885_v43  ;;  %v973_v14 = vmul.f32 1.442695, %v961_v32  ;;  %v914_v32 = vld [vmem:[%s3861_s1 + $0x38] sm:$0xff] }
  0xe1   : > { %v882_v19 = vsel %vm879_vm15, %v881_v39, %v877_v0  ;;  %vm994_vm1 = vweird.f32 %v3952_v21  ;;  %v1000_v26 = vand.u32 2147483648, %v3952_v21 }
  0xe2   : > { %v3431_v51 = vpop.eup %3430  ;;  %v959_v57 = vsub.f32 0.0, %v3974_v49  ;;  %v828_v60 = vadd.f32 %v3427_v29, %v827_v52  ;;  %v887_v1 = vmul.f32 %v3429_v23, %v886_v58  ;;  %v905_v34 = vmul.f32 %v882_v19, %v3828_v44 }
  0xe3   : > { %v3980_v55 = vpop.eup %3432  ;;  %v3982_v56 = vadd.f32 1.0, %v3431_v51  ;;  %v1001_v41 = vor.u32 1.1754944e-38, %v1000_v26 }
  0xe4   : > { %v990_v61 = vmul.f32 %v3980_v55, %v3952_v21  ;;  %v969_v62 = vmul.f32 1.442695, %v959_v57  ;;  %v832_v4 = vsel %vm831_vm12, %v3427_v29, %v828_v60  ;;  %v888_v11 = vadd.f32 %v3429_v23, %v887_v1 }
  0xe5   : > { %3434 = vrcp.f32 %v3982_v56  ;;  %v837_v9 = vsel %vm834_vm11, %v836_v63, %v832_v4  ;;  %vm995_vm0 = vweird.f32 %v3980_v55  ;;  %v998_v29 = vand.u32 2147483647, %v3952_v21 }
  0xe6   : > { %v991_v7 = vsub.f32 1.0, %v990_v61  ;;  %3436 = vpow2.f32 %v969_v62  ;;  %v902_v12 = vmul.f32 %v837_v9, %v3844_v2  ;;  %v892_v15 = vsel %vm4002_vm13, %v3429_v23, %v888_v11  ;;  %vm4030_vm2 = vmor %vm994_vm1, %vm995_vm0 }
  0xe7   : > { %v897_v17 = vsel %vm894_vm14, %v896_v5, %v892_v15  ;;  %3438 = vpow2.f32 %v975_v48  ;;  %v1013_v36 = vand.u32 2147483647, %v3982_v56  ;;  %vm999_vm4 = vcmp.eq.f32.partialorder %v998_v29, 8.507059e+37 }
  0xe8   : > { %v992_v13 = vmul.f32 %v3980_v55, %v991_v7  ;;  %v4016_v16 = vadd.f32 %v910_v10, %v902_v12  ;;  %3440 = vpow2.f32 %v973_v14  ;;  %v906_v25 = vmul.f32 %v897_v17, %v3846_v3 }
  0xe9   : > { %v1015_v3 = vand.u32 2147483648, %v3982_v56  ;;  %vm1009_vm5 = vweird.f32 %v3982_v56  ;;  %v4044_v45 = vadd.f32 %v913_v37, %v905_v34  ;;  %vm1014_vm7 = vcmp.eq.f32.partialorder %v1013_v36, 8.507059e+37 }
  0xea   : > { %v960_v31 = vsub.f32 0.0, %v4016_v16  ;;  %v993_v20 = vadd.f32 %v3980_v55, %v992_v13  ;;  %v4041_v44 = vadd.f32 %v914_v32, %v906_v25 }
  0xeb   : > { %v3435_v18 = vpop.eup %3434  ;;  %v1016_v47 = vor.u32 1.1754944e-38, %v1015_v3  ;;  %v963_v50 = vsub.f32 0.0, %v4044_v45 }
  0xec   : > { %v1005_v2 = vmul.f32 %v3435_v18, %v3982_v56  ;;  %v3437_v22 = vpop.eup %3436  ;;  %v971_v28 = vmul.f32 1.442695, %v960_v31  ;;  %v997_v38 = vsel %vm4030_vm2, %v3980_v55, %v993_v20  ;;  %vm1010_vm3 = vweird.f32 %v3435_v18 }
  0xed   : > { %v4026_v27 = vadd.f32 1.0, %v3437_v22  ;;  %v3439_v21 = vpop.eup %3438  ;;  %v1002_v46 = vsel %vm999_vm4, %v1001_v41, %v997_v38  ;;  %vm1011_vm6 = vmor %vm1009_vm5, %vm1010_vm3  ;;  %v964_v52 = vsub.f32 0.0, %v4041_v44  ;;  %v977_v1 = vmul.f32 1.442695, %v963_v50 }
  0xee   : > { %v1006_v33 = vsub.f32 1.0, %v1005_v2  ;;  %v3441_v42 = vpop.eup %3440  ;;  %v4046_v51 = vadd.f32 1.0, %v3439_v21  ;;  %v1109_v55 = vmul.f32 %v1002_v46, %v3899_v40 }
  0xef   : > { %3442 = vrcp.f32 %v4026_v27  ;;  %v4051_v56 = vadd.f32 1.0, %v3441_v42  ;;  %v979_v62 = vmul.f32 1.442695, %v964_v52  ;;  %v1030_v10 = vand.u32 2147483648, %v4026_v27 }
  0xf0   : > { %v1007_v39 = vmul.f32 %v3435_v18, %v1006_v33  ;;  %3444 = vpow2.f32 %v971_v28  ;;  %vm1024_vm9 = vweird.f32 %v4026_v27  ;;  %v1028_v0 = vand.u32 2147483647, %v4026_v27 }
  0xf1   : > { %3446 = vrcp.f32 %v4046_v51  ;;  %v1031_v22 = vor.u32 1.1754944e-38, %v1030_v10  ;;  %v1075_v41 = vand.u32 2147483648, %v4046_v51  ;;  %vm1069_vm2 = vweird.f32 %v4046_v51 }
  0xf2   : > { %v1008_v23 = vadd.f32 %v3435_v18, %v1007_v39  ;;  %vm1029_vm12 = vcmp.eq.f32.partialorder %v1028_v0, 8.507059e+37  ;;  %v1073_v42 = vand.u32 2147483647, %v4046_v51  ;;  %vm1054_vm4 = vweird.f32 %v4051_v56 }
  0xf4   : > { %v1012_v43 = vsel %vm1011_vm6, %v3435_v18, %v1008_v23  ;;  %vm1074_vm6 = vcmp.eq.f32.partialorder %v1073_v42, 8.507059e+37 }
  0xf5   : > { %v1017_v53 = vsel %vm1014_vm7, %v1016_v47, %v1012_v43  ;;  %v3443_v54 = vpop.eup %3442  ;;  %v1060_v47 = vand.u32 2147483648, %v4051_v56  ;;  %v1058_v43 = vand.u32 2147483647, %v4051_v56 }
  0xf6   : > { %v1110_v57 = vmul.f32 %v1017_v53, %v3932_v6  ;;  %v3445_v58 = vpop.eup %3444  ;;  %v1020_v59 = vmul.f32 %v3443_v54, %v4026_v27  ;;  %vm1025_vm8 = vweird.f32 %v3443_v54 }
  0xf7   : > { %v984_v60 = vadd.f32 1.0, %v3445_v58  ;;  %v4057_v4 = vpop.eup %3446  ;;  %vm4066_vm10 = vmor %vm1024_vm9, %vm1025_vm8  ;;  %vm1059_vm7 = vcmp.eq.f32.partialorder %v1058_v43, 8.507059e+37 }
  0xf8   : > { %v1117_v61 = vpack.c.bf16 %v1110_v57, %v1109_v55  ;;  %v1021_v63 = vsub.f32 1.0, %v1020_v59  ;;  %v1065_v13 = vmul.f32 %v4057_v4, %v4046_v51  ;;  %vm1070_vm0 = vweird.f32 %v4057_v4 }
  0xf9   : > { %3448 = vrcp.f32 %v984_v60  ;;  %v1045_v15 = vand.u32 2147483648, %v984_v60  ;;  %v1043_v20 = vand.u32 2147483647, %v984_v60  ;;  %vm1039_vm13 = vweird.f32 %v984_v60  ;;  %vm1071_vm3 = vmor %vm1069_vm2, %vm1070_vm0 }
  0xfa   : > { %1180 = vmatmul.bf16.vlgmr.msrb.gmra.mxu1 %v1117_v61  ;;  %3450 = vrcp.f32 %v4051_v56  ;;  %v1022_v48 = vmul.f32 %v3443_v54, %v1021_v63  ;;  %v1066_v32 = vsub.f32 1.0, %v1065_v13  ;;  %v1061_v51 = vor.u32 1.1754944e-38, %v1060_v47 }
  0xfb   : > { %3452 = vpow2.f32 %v979_v62  ;;  %v1046_v28 = vor.u32 1.1754944e-38, %v1045_v15  ;;  %vm1044_vm15 = vcmp.eq.f32.partialorder %v1043_v20, 8.507059e+37  ;;  %v3329_v20 = vld [vmem:[%s4816_s8 + $0x38] sm:$0xff] }
  0xfc   : > { %3454 = vpow2.f32 %v977_v1  ;;  %v1023_v7 = vadd.f32 %v3443_v54, %v1022_v48  ;;  %v1067_v3 = vmul.f32 %v4057_v4, %v1066_v32  ;;  %1416 = vmatpush.bf16.msra.mxu2 %v3329_v20 }
  0xfe   : > { %v1027_v19 = vsel %vm4066_vm10, %v3443_v54, %v1023_v7  ;;  %v1068_v39 = vadd.f32 %v4057_v4, %v1067_v3  ;;  %v1076_v54 = vor.u32 1.1754944e-38, %v1075_v41  ;;  %v3325_v3 = vld [vmem:[%s4816_s8 + $0x18] sm:$0xff] }
  0xff   : > { %v3449_v24 = vpop.eup %3448  ;;  %v1032_v27 = vsel %vm1029_vm12, %v1031_v22, %v1027_v19  ;;  %v4111_v19 = vld [vmem:[%s4815_s7] ss:$0 sm:$0xff] }
 0x100   : > { %v4059_v5 = vpop.eup %3450  ;;  %v1035_v9 = vmul.f32 %v3449_v24, %v984_v60  ;;  %vm1040_vm11 = vweird.f32 %v3449_v24  ;;  %v1111_v35 = vmul.f32 %v1032_v27, %v3974_v49  ;;  %v1072_v52 = vsel %vm1071_vm3, %v4057_v4, %v1068_v39  ;;  %v3327_v27 = vld [vmem:[%s4816_s8 + $0x28] sm:$0xff] }
 0x101   : > { %v3453_v11 = vpop.eup %3452  ;;  %v1050_v17 = vmul.f32 %v4059_v5, %v4051_v56  ;;  %vm1041_vm14 = vmor %vm1039_vm13, %vm1040_vm11  ;;  %vm1055_vm1 = vweird.f32 %v4059_v5  ;;  %v1077_v58 = vsel %vm1074_vm6, %v1076_v54, %v1072_v52  ;;  %v3322_v54 = vld [vmem:[%s4816_s8] sm:$0xff] }
 0x102   : > { %v1036_v12 = vsub.f32 1.0, %v1035_v9  ;;  %v3455_v18 = vpop.eup %3454  ;;  %v4074_v2 = vadd.f32 1.0, %v3453_v11  ;;  %vm1056_vm5 = vmor %vm1054_vm4, %vm1055_vm1  ;;  %v1114_v60 = vmul.f32 %v1077_v58, %v3961_v30 }
 0x103   : > { %v4076_v26 = vadd.f32 1.0, %v3455_v18  ;;  %v1051_v33 = vsub.f32 1.0, %v1050_v17 }
 0x104   : > { %v1037_v31 = vmul.f32 %v3449_v24, %v1036_v12  ;;  %3456 = vrcp.f32 %v4074_v2  ;;  %v1105_v4 = vand.u32 2147483648, %v4074_v2  ;;  %vm1099_vm10 = vweird.f32 %v4074_v2 }
 0x105   : > { %3458 = vrcp.f32 %v4076_v26  ;;  %v1052_v38 = vmul.f32 %v4059_v5, %v1051_v33  ;;  %v1090_v7 = vand.u32 2147483648, %v4076_v26  ;;  %vm1084_vm12 = vweird.f32 %v4076_v26  ;;  %v3326_v33 = vld [vmem:[%s4816_s8 + $0x20] sm:$0xff] }
 0x106   : > { %v1038_v25 = vadd.f32 %v3449_v24, %v1037_v31  ;;  %v1088_v9 = vand.u32 2147483647, %v4076_v26  ;;  %v1106_v11 = vor.u32 1.1754944e-38, %v1105_v4 }
 0x107   : > { %v1053_v23 = vadd.f32 %v4059_v5, %v1052_v38  ;;  %v1091_v12 = vor.u32 1.1754944e-38, %v1090_v7 }
 0x108   : > { %v1042_v29 = vsel %vm1041_vm14, %v3449_v24, %v1038_v25  ;;  %v3328_v25 = vld [vmem:[%s4816_s8 + $0x30] sm:$0xff] }
 0x109   : > { %v1047_v34 = vsel %vm1044_vm15, %v1046_v28, %v1042_v29  ;;  %v1057_v55 = vsel %vm1056_vm5, %v4059_v5, %v1053_v23  ;;  %v1103_v5 = vand.u32 2147483647, %v4074_v2  ;;  %vm1089_vm15 = vcmp.eq.f32.partialorder %v1088_v9, 8.507059e+37  ;;  %1417 = vmatpush.bf16.msra.mxu2 %v3328_v25 }
 0x10a   : > { %v1112_v36 = vmul.f32 %v1047_v34, %v4016_v16  ;;  %v3457_v21 = vpop.eup %3456  ;;  %v1062_v59 = vsel %vm1059_vm7, %v1061_v51, %v1057_v55 }
 0x10b   : > { %v3459_v46 = vpop.eup %3458  ;;  %v1095_v53 = vmul.f32 %v3457_v21, %v4074_v2  ;;  %v1113_v56 = vmul.f32 %v1062_v59, %v3934_v8  ;;  %vm1100_vm8 = vweird.f32 %v3457_v21  ;;  %vm1104_vm14 = vcmp.eq.f32.partialorder %v1103_v5, 8.507059e+37 }
 0x10c   : > { %v1118_v37 = vpack.c.bf16 %v1112_v36, %v1111_v35  ;;  %v1080_v57 = vmul.f32 %v3459_v46, %v4076_v26  ;;  %vm1085_vm9 = vweird.f32 %v3459_v46  ;;  %vm1101_vm11 = vmor %vm1099_vm10, %vm1100_vm8 }
 0x10d   : > { %v1096_v50 = vsub.f32 1.0, %v1095_v53  ;;  %v1119_v63 = vpack.c.bf16 %v1114_v60, %v1113_v56  ;;  %vm1086_vm13 = vmor %vm1084_vm12, %vm1085_vm9  ;;  %1418 = vmatpush.bf16.msra.mxu2 %v3327_v27 }
 0x10e   : > { %1185 = vmatmul.bf16.gmra.mxu1 %v1118_v37  ;;  %v1081_v61 = vsub.f32 1.0, %v1080_v57  ;;  %v3324_v37 = vld [vmem:[%s4816_s8 + $0x10] sm:$0xff] }
 0x10f   : > { %v1097_v62 = vmul.f32 %v3457_v21, %v1096_v50 }
 0x110   : > { %v1082_v1 = vmul.f32 %v3459_v46, %v1081_v61 }
 0x111   : > { %v1098_v48 = vadd.f32 %v3457_v21, %v1097_v62  ;;  %1419 = vmatpush.bf16.msra.mxu2 %v3326_v33 }
 0x112   : > { %v1083_v24 = vadd.f32 %v3459_v46, %v1082_v1 }
 0x113   : > { %v1102_v10 = vsel %vm1101_vm11, %v3457_v21, %v1098_v48 }
 0x114   : > { %v1087_v0 = vsel %vm1086_vm13, %v3459_v46, %v1083_v24  ;;  %v1107_v13 = vsel %vm1104_vm14, %v1106_v11, %v1102_v10  ;;  %v3323_v46 = vld [vmem:[%s4816_s8 + $0x8] sm:$0xff] }
 0x115   : > { %v1092_v14 = vsel %vm1089_vm15, %v1091_v12, %v1087_v0  ;;  %v1116_v15 = vmul.f32 %v1107_v13, %v4041_v44  ;;  %1420 = vmatpush.bf16.msra.mxu2 %v3325_v3 }
 0x116   : > { %v1115_v17 = vmul.f32 %v1092_v14, %v4044_v45 }
 0x118   : > { %v1120_v18 = vpack.c.bf16 %v1116_v15, %v1115_v17 }
 0x119   : > { %1421 = vmatpush.bf16.msra.mxu2 %v3324_v37 }
 0x11d   : > { %1422 = vmatpush.bf16.msra.mxu2 %v3323_v46 }
 0x11e   : > { %1190 = vmatmul.bf16.gmra.mxu1 %v1119_v63 }
 0x121   : > { %1423 = vmatpush.bf16.msra.mxu2 %v3322_v54 }
 0x12e   : > { %1195 = vmatmul.bf16.gmra.mxu1 %v1120_v18 }
 0x177   : > { %v1181_v31 = vpop.f32.mrf.mxu1 }
 0x178   : > { %v4117_v2 = vadd.f32 %v4111_v19, %v1181_v31 }
 0x17a   : > { %v1201_v22 = vsub.f32 0.0, %v4117_v2 }
 0x17c   : > { %v1209_v32 = vmul.f32 1.442695, %v1201_v22 }
 0x17e   : > { %3460 = vpow2.f32 %v1209_v32 }
 0x17f   : > { %v1183_v26 = vpop.f32.mrf.mxu1 }
 0x180   : > { %v4127_v28 = vadd.f32 %v4111_v19, %v1183_v26 }
 0x182   : > { %v1202_v29 = vsub.f32 0.0, %v4127_v28 }
 0x184   : > { %v3461_v34 = vpop.eup %3460  ;;  %v1211_v35 = vmul.f32 1.442695, %v1202_v29 }
 0x185   : > { %v1225_v36 = vadd.f32 1.0, %v3461_v34 }
 0x186   : > { %3462 = vpow2.f32 %v1211_v35 }
 0x187   : > { %3464 = vrcp.f32 %v1225_v36  ;;  %v1244_v59 = vand.u32 2147483648, %v1225_v36  ;;  %vm1238_vm1 = vweird.f32 %v1225_v36  ;;  %v1242_v61 = vand.u32 2147483647, %v1225_v36 }
 0x189   : > { %v1245_v7 = vor.u32 1.1754944e-38, %v1244_v59  ;;  %vm1243_vm4 = vcmp.eq.f32.partialorder %v1242_v61, 8.507059e+37 }
 0x18b   : > { %v1186_v39 = vpop.f32.mrf.mxu1 }
 0x18c   : > { %v3463_v38 = vpop.eup %3462  ;;  %v4140_v23 = vadd.f32 %v4111_v19, %v1186_v39 }
 0x18d   : > { %v3465_v21 = vpop.eup %3464  ;;  %v1226_v41 = vadd.f32 1.0, %v3463_v38 }
 0x18e   : > { %v1234_v42 = vmul.f32 %v3465_v21, %v1225_v36  ;;  %v1203_v43 = vsub.f32 0.0, %v4140_v23  ;;  %vm1239_vm0 = vweird.f32 %v3465_v21 }
 0x18f   : > { %3466 = vrcp.f32 %v1226_v41  ;;  %vm4153_vm2 = vmor %vm1238_vm1, %vm1239_vm0  ;;  %v1259_v63 = vand.u32 2147483648, %v1226_v41  ;;  %v1257_v5 = vand.u32 2147483647, %v1226_v41  ;;  %vm1253_vm5 = vweird.f32 %v1226_v41 }
 0x190   : > { %v1235_v47 = vsub.f32 1.0, %v1234_v42  ;;  %v1213_v53 = vmul.f32 1.442695, %v1203_v43 }
 0x191   : > { %v1260_v12 = vor.u32 1.1754944e-38, %v1259_v63  ;;  %vm1258_vm7 = vcmp.eq.f32.partialorder %v1257_v5, 8.507059e+37 }
 0x192   : > { %v1236_v52 = vmul.f32 %v3465_v21, %v1235_v47  ;;  %3468 = vpow2.f32 %v1213_v53 }
 0x193   : > { %v1188_v55 = vpop.f32.mrf.mxu1 }
 0x194   : > { %v4150_v51 = vadd.f32 %v4111_v19, %v1188_v55  ;;  %v1237_v58 = vadd.f32 %v3465_v21, %v1236_v52 }
 0x195   : > { %v3467_v57 = vpop.eup %3466 }
 0x196   : > { %v1249_v50 = vmul.f32 %v3467_v57, %v1226_v41  ;;  %v1204_v60 = vsub.f32 0.0, %v4150_v51  ;;  %v1241_v4 = vsel %vm4153_vm2, %v3465_v21, %v1237_v58  ;;  %vm1254_vm3 = vweird.f32 %v3467_v57 }
 0x197   : > { %v1246_v0 = vsel %vm1243_vm4, %v1245_v7, %v1241_v4  ;;  %vm1255_vm6 = vmor %vm1253_vm5, %vm1254_vm3 }
 0x198   : > { %v1250_v56 = vsub.f32 1.0, %v1249_v50  ;;  %v1215_v1 = vmul.f32 1.442695, %v1204_v60  ;;  %v3469_v48 = vpop.eup %3468  ;;  %v1353_v17 = vmul.f32 %v1246_v0, %v4117_v2 }
 0x199   : > { %v1227_v9 = vadd.f32 1.0, %v3469_v48 }
 0x19a   : > { %v1251_v24 = vmul.f32 %v3467_v57, %v1250_v56  ;;  %3470 = vpow2.f32 %v1215_v1 }
 0x19b   : > { %v1191_v11 = vpop.f32.mrf.mxu1  ;;  %3472 = vrcp.f32 %v1227_v9  ;;  %v1274_v39 = vand.u32 2147483648, %v1227_v9  ;;  %vm1268_vm9 = vweird.f32 %v1227_v9  ;;  %v1272_v42 = vand.u32 2147483647, %v1227_v9 }
 0x19c   : > { %v1252_v10 = vadd.f32 %v3467_v57, %v1251_v24  ;;  %v4160_v14 = vadd.f32 %v4111_v19, %v1191_v11 }
 0x19d   : > { %vm1273_vm12 = vcmp.eq.f32.partialorder %v1272_v42, 8.507059e+37 }
 0x19e   : > { %v1256_v13 = vsel %vm1255_vm6, %v3467_v57, %v1252_v10  ;;  %v1205_v31 = vsub.f32 0.0, %v4160_v14  ;;  %v1275_v57 = vor.u32 1.1754944e-38, %v1274_v39 }
 0x19f   : > { %v1261_v15 = vsel %vm1258_vm7, %v1260_v12, %v1256_v13 }
 0x1a0   : > { %v1354_v18 = vmul.f32 %v1261_v15, %v4127_v28  ;;  %v3471_v20 = vpop.eup %3470  ;;  %v1217_v25 = vmul.f32 1.442695, %v1205_v31 }
 0x1a1   : > { %v1228_v22 = vadd.f32 1.0, %v3471_v20  ;;  %v3473_v26 = vpop.eup %3472 }
 0x1a2   : > { %v1361_v32 = vpack.c.bf16 %v1354_v18, %v1353_v17  ;;  %v1264_v27 = vmul.f32 %v3473_v26, %v1227_v9  ;;  %vm1269_vm8 = vweird.f32 %v3473_v26 }
 0x1a3   : > { %3474 = vrcp.f32 %v1228_v22  ;;  %v1193_v29 = vpop.f32.mrf.mxu1  ;;  %vm1270_vm10 = vmor %vm1268_vm9, %vm1269_vm8  ;;  %v1287_v43 = vand.u32 2147483647, %v1228_v22  ;;  %v1289_v52 = vand.u32 2147483648, %v1228_v22  ;;  %vm1283_vm13 = vweird.f32 %v1228_v22 }
 0x1a4   : > { %1424 = vmatmul.bf16.vlgmr.msra.gmra.mxu2 %v1361_v32  ;;  %3476 = vpow2.f32 %v1217_v25  ;;  %v4166_v33 = vadd.f32 %v4111_v19, %v1193_v29  ;;  %v1265_v34 = vsub.f32 1.0, %v1264_v27 }
 0x1a5   : > { %v1290_v61 = vor.u32 1.1754944e-38, %v1289_v52  ;;  %vm1288_vm15 = vcmp.eq.f32.partialorder %v1287_v43, 8.507059e+37  ;;  %v3334_v43 = vld [vmem:[%s4818_s10 + $0x20] sm:$0xff] }
 0x1a6   : > { %v1206_v2 = vsub.f32 0.0, %v4166_v33  ;;  %v1266_v35 = vmul.f32 %v3473_v26, %v1265_v34 }
 0x1a8   : > { %v1219_v28 = vmul.f32 1.442695, %v1206_v2  ;;  %v1267_v37 = vadd.f32 %v3473_v26, %v1266_v35  ;;  %v3335_v2 = vld [vmem:[%s4818_s10 + $0x28] sm:$0xff] }
 0x1a9   : > { %v3475_v36 = vpop.eup %3474 }
 0x1aa   : > { %v3477_v3 = vpop.eup %3476  ;;  %v1279_v38 = vmul.f32 %v3475_v36, %v1228_v22  ;;  %3478 = vpow2.f32 %v1219_v28  ;;  %v1271_v53 = vsel %vm1270_vm10, %v3473_v26, %v1267_v37  ;;  %vm1284_vm11 = vweird.f32 %v3475_v36  ;;  %v3336_v22 = vld [vmem:[%s4818_s10 + $0x30] sm:$0xff] }
 0x1ab   : > { %v4169_v21 = vadd.f32 1.0, %v3477_v3  ;;  %v1196_v41 = vpop.f32.mrf.mxu1  ;;  %v1276_v60 = vsel %vm1273_vm12, %v1275_v57, %v1271_v53  ;;  %vm1285_vm14 = vmor %vm1283_vm13, %vm1284_vm11 }
 0x1ac   : > { %v1280_v46 = vsub.f32 1.0, %v1279_v38  ;;  %v4172_v47 = vadd.f32 %v4111_v19, %v1196_v41  ;;  %v1355_v4 = vmul.f32 %v1276_v60, %v4140_v23 }
 0x1ad   : > { %3480 = vrcp.f32 %v4169_v21  ;;  %vm1298_vm1 = vweird.f32 %v4169_v21  ;;  %v1302_v31 = vand.u32 2147483647, %v4169_v21 }
 0x1ae   : > { %v1281_v54 = vmul.f32 %v3475_v36, %v1280_v46  ;;  %v1207_v55 = vsub.f32 0.0, %v4172_v47 }
 0x1af   : > { %vm1303_vm4 = vcmp.eq.f32.partialorder %v1302_v31, 8.507059e+37 }
 0x1b0   : > { %v3479_v58 = vpop.eup %3478  ;;  %v1282_v50 = vadd.f32 %v3475_v36, %v1281_v54  ;;  %v1221_v59 = vmul.f32 1.442695, %v1207_v55 }
 0x1b1   : > { %v1230_v56 = vadd.f32 1.0, %v3479_v58 }
 0x1b2   : > { %v1286_v62 = vsel %vm1285_vm14, %v3475_v36, %v1282_v50  ;;  %3482 = vpow2.f32 %v1221_v59 }
 0x1b3   : > { %v3481_v63 = vpop.eup %3480  ;;  %v1291_v1 = vsel %vm1288_vm15, %v1290_v61, %v1286_v62  ;;  %3484 = vrcp.f32 %v1230_v56  ;;  %v1198_v48 = vpop.f32.mrf.mxu1  ;;  %v1319_v25 = vand.u32 2147483648, %v1230_v56  ;;  %v1317_v27 = vand.u32 2147483647, %v1230_v56 }
 0x1b4   : > { %v1356_v24 = vmul.f32 %v1291_v1, %v4150_v51  ;;  %v1294_v5 = vmul.f32 %v3481_v63, %v4169_v21  ;;  %v4180_v7 = vadd.f32 %v4111_v19, %v1198_v48  ;;  %vm1299_vm0 = vweird.f32 %v3481_v63  ;;  %v3337_v51 = vld [vmem:[%s4818_s10 + $0x38] sm:$0xff] }
 0x1b5   : > { %v1304_v19 = vand.u32 2147483648, %v4169_v21  ;;  %1525 = vmatpush.bf16.msra.mxu3 %v3337_v51  ;;  %vm1300_vm2 = vmor %vm1298_vm1, %vm1299_vm0  ;;  %vm1313_vm5 = vweird.f32 %v1230_v56  ;;  %v1320_v36 = vor.u32 1.1754944e-38, %v1319_v25  ;;  %vm1318_vm7 = vcmp.eq.f32.partialorder %v1317_v27, 8.507059e+37 }
 0x1b6   : > { %v1295_v9 = vsub.f32 1.0, %v1294_v5  ;;  %v1362_v10 = vpack.c.bf16 %v1356_v24, %v1355_v4  ;;  %v1208_v11 = vsub.f32 0.0, %v4180_v7 }
 0x1b7   : > { %v1305_v29 = vor.u32 1.1754944e-38, %v1304_v19 }
 0x1b8   : > { %v3483_v0 = vpop.eup %3482  ;;  %v1296_v12 = vmul.f32 %v3481_v63, %v1295_v9  ;;  %1429 = vmatmul.bf16.gmra.mxu2 %v1362_v10  ;;  %v1223_v17 = vmul.f32 1.442695, %v1208_v11  ;;  %v3333_v10 = vld [vmem:[%s4818_s10 + $0x18] sm:$0xff]  ;;  %v3332_v11 = vld [vmem:[%s4818_s10 + $0x10] sm:$0xff] }
 0x1b9   : > { %v3485_v13 = vpop.eup %3484  ;;  %v1231_v15 = vadd.f32 1.0, %v3483_v0  ;;  %1526 = vmatpush.bf16.msra.mxu3 %v3336_v22  ;;  %v3331_v0 = vld [vmem:[%s4818_s10 + $0x8] sm:$0xff] }
 0x1ba   : > { %v1297_v18 = vadd.f32 %v3481_v63, %v1296_v12  ;;  %v1309_v23 = vmul.f32 %v3485_v13, %v1230_v56  ;;  %vm1314_vm3 = vweird.f32 %v3485_v13  ;;  %v3390_v12 = vld [vmem:[%s4817_s9] ss:$0 sm:$0xff] }
 0x1bb   : > { %3486 = vrcp.f32 %v1231_v15  ;;  %vm1315_vm6 = vmor %vm1313_vm5, %vm1314_vm3  ;;  %v1334_v58 = vand.u32 2147483648, %v1231_v15  ;;  %vm1328_vm9 = vweird.f32 %v1231_v15 }
 0x1bc   : > { %v1310_v20 = vsub.f32 1.0, %v1309_v23  ;;  %3488 = vpow2.f32 %v1223_v17  ;;  %v1301_v32 = vsel %vm1300_vm2, %v3481_v63, %v1297_v18 }
 0x1bd   : > { %v1306_v28 = vsel %vm1303_vm4, %v1305_v29, %v1301_v32  ;;  %1527 = vmatpush.bf16.msra.mxu3 %v3335_v2  ;;  %v1335_v56 = vor.u32 1.1754944e-38, %v1334_v58 }
 0x1be   : > { %v1311_v26 = vmul.f32 %v3485_v13, %v1310_v20  ;;  %v1357_v41 = vmul.f32 %v1306_v28, %v4160_v14  ;;  %v1332_v14 = vand.u32 2147483647, %v1231_v15 }
 0x1c0   : > { %v1312_v34 = vadd.f32 %v3485_v13, %v1311_v26  ;;  %vm1333_vm12 = vcmp.eq.f32.partialorder %v1332_v14, 8.507059e+37 }
 0x1c1   : > { %v3487_v35 = vpop.eup %3486  ;;  %1528 = vmatpush.bf16.msra.mxu3 %v3334_v43 }
 0x1c2   : > { %v3489_v3 = vpop.eup %3488  ;;  %v1316_v37 = vsel %vm1315_vm6, %v3485_v13, %v1312_v34  ;;  %v1324_v38 = vmul.f32 %v3487_v35, %v1231_v15  ;;  %vm1329_vm8 = vweird.f32 %v3487_v35 }
 0x1c3   : > { %v1321_v39 = vsel %vm1318_vm7, %v1320_v36, %v1316_v37  ;;  %v1232_v21 = vadd.f32 1.0, %v3489_v3  ;;  %vm1330_vm10 = vmor %vm1328_vm9, %vm1329_vm8 }
 0x1c4   : > { %v1358_v42 = vmul.f32 %v1321_v39, %v4166_v33  ;;  %v1325_v46 = vsub.f32 1.0, %v1324_v38  ;;  %v4228_v39 = vld [vmem:[%s4819_s11] ss:$0 sm:$0xff] }
 0x1c5   : > { %3490 = vrcp.f32 %v1232_v21  ;;  %v1349_v33 = vand.u32 2147483648, %v1232_v21  ;;  %v1347_v61 = vand.u32 2147483647, %v1232_v21  ;;  %vm1343_vm13 = vweird.f32 %v1232_v21  ;;  %1529 = vmatpush.bf16.msra.mxu3 %v3333_v10 }
 0x1c6   : > { %v1363_v52 = vpack.c.bf16 %v1358_v42, %v1357_v41  ;;  %v1326_v53 = vmul.f32 %v3487_v35, %v1325_v46 }
 0x1c7   : > { %v1350_v1 = vor.u32 1.1754944e-38, %v1349_v33  ;;  %vm1348_vm15 = vcmp.eq.f32.partialorder %v1347_v61, 8.507059e+37 }
 0x1c8   : > { %1434 = vmatmul.bf16.gmra.mxu2 %v1363_v52  ;;  %v1327_v55 = vadd.f32 %v3487_v35, %v1326_v53 }
 0x1c9   : > { %1530 = vmatpush.bf16.msra.mxu3 %v3332_v11 }
 0x1ca   : > { %v1331_v59 = vsel %vm1330_vm10, %v3487_v35, %v1327_v55 }
 0x1cb   : > { %v3491_v54 = vpop.eup %3490  ;;  %v1336_v63 = vsel %vm1333_vm12, %v1335_v56, %v1331_v59 }
 0x1cc   : > { %v1339_v57 = vmul.f32 %v3491_v54, %v1232_v21  ;;  %vm1344_vm11 = vweird.f32 %v3491_v54  ;;  %v1359_v24 = vmul.f32 %v1336_v63, %v4172_v47  ;;  %v3330_v47 = vld [vmem:[%s4818_s10] sm:$0xff] }
 0x1cd   : > { %vm1345_vm14 = vmor %vm1343_vm13, %vm1344_vm11  ;;  %1531 = vmatpush.bf16.msra.mxu3 %v3331_v0 }
 0x1ce   : > { %v1340_v50 = vsub.f32 1.0, %v1339_v57 }
 0x1d0   : > { %v1341_v60 = vmul.f32 %v3491_v54, %v1340_v50 }
 0x1d1   : > { %1532 = vmatpush.bf16.msra.mxu3 %v3330_v47 }
 0x1d2   : > { %v1342_v62 = vadd.f32 %v3491_v54, %v1341_v60  ;;  %v4242_v60 = vld [vmem:[%s4811_s3] ss:$0 sm:$0xff] }
 0x1d4   : > { %v1346_v48 = vsel %vm1345_vm14, %v3491_v54, %v1342_v62 }
 0x1d5   : > { %v1351_v4 = vsel %vm1348_vm15, %v1350_v1, %v1346_v48 }
 0x1d6   : > { %v1360_v5 = vmul.f32 %v1351_v4, %v4180_v7 }
 0x1d8   : > { %v1364_v9 = vpack.c.bf16 %v1360_v5, %v1359_v24  ;;  %v3652_v5 = vld [vmem:[%s3798_s20] sm:$0xff] }
 0x1da   : > { %1439 = vmatmul.bf16.gmra.mxu2 %v1364_v9  ;;  %v1718_v9 = vmul.f32 %v3652_v5, %v4242_v60 }
 0x227   : > { %v1425_v7 = vpop.f32.mrf.mxu2 }
 0x228   : > { %v1426_v13 = vadd.f32 %v3390_v12, %v1425_v7 }
 0x22a   : > { %v1445_v18 = vadd.f32 %v1426_v13, %v3899_v40 }
 0x22f   : > { %v1427_v15 = vpop.f32.mrf.mxu2 }
 0x230   : > { %v1428_v17 = vadd.f32 %v3390_v12, %v1427_v15 }
 0x232   : > { %v1446_v23 = vadd.f32 %v1428_v17, %v3932_v6  ;;  %v3345_v17 = vld [vmem:[%s4820_s12 + $0x38] sm:$0xff] }
 0x233   : > { %1983 = vmatpush.bf16.msrb.mxu0 %v3345_v17 }
 0x234   : > { %v1453_v51 = vpack.c.bf16 %v1446_v23, %v1445_v18 }
 0x236   : > { %1533 = vmatmul.bf16.vlgmr.msra.gmra.mxu3 %v1453_v51 }
 0x23b   : > { %v1430_v19 = vpop.f32.mrf.mxu2 }
 0x23c   : > { %v1431_v31 = vadd.f32 %v3390_v12, %v1430_v19 }
 0x23e   : > { %v1447_v25 = vadd.f32 %v1431_v31, %v3974_v49 }
 0x243   : > { %v1432_v20 = vpop.f32.mrf.mxu2 }
 0x244   : > { %v1433_v22 = vadd.f32 %v3390_v12, %v1432_v20 }
 0x246   : > { %v1448_v32 = vadd.f32 %v1433_v22, %v4016_v16 }
 0x248   : > { %v1454_v26 = vpack.c.bf16 %v1448_v32, %v1447_v25  ;;  %v3653_v32 = vld [vmem:[%s3798_s20 + $0x8] sm:$0xff] }
 0x24a   : > { %1538 = vmatmul.bf16.gmra.mxu3 %v1454_v26  ;;  %v1719_v26 = vmul.f32 %v3653_v32, %v4242_v60 }
 0x24b   : > { %v1435_v27 = vpop.f32.mrf.mxu2 }
 0x24c   : > { %v1436_v29 = vadd.f32 %v3390_v12, %v1435_v27 }
 0x24e   : > { %v1449_v40 = vadd.f32 %v1436_v29, %v3934_v8  ;;  %v3344_v29 = vld [vmem:[%s4820_s12 + $0x30] sm:$0xff] }
 0x24f   : > { %1984 = vmatpush.bf16.msrb.mxu0 %v3344_v29 }
 0x253   : > { %v1437_v34 = vpop.f32.mrf.mxu2 }
 0x254   : > { %v1438_v2 = vadd.f32 %v3390_v12, %v1437_v34 }
 0x256   : > { %v1450_v6 = vadd.f32 %v1438_v2, %v3961_v30 }
 0x258   : > { %v1455_v35 = vpack.c.bf16 %v1450_v6, %v1449_v40 }
 0x25a   : > { %1543 = vmatmul.bf16.gmra.mxu3 %v1455_v35 }
 0x25d   : > { %v1440_v28 = vpop.f32.mrf.mxu2 }
 0x25e   : > { %v1441_v36 = vadd.f32 %v3390_v12, %v1440_v28 }
 0x260   : > { %v1451_v49 = vadd.f32 %v1441_v36, %v4044_v45 }
 0x265   : > { %v1442_v3 = vpop.f32.mrf.mxu2 }
 0x266   : > { %v1443_v37 = vadd.f32 %v3390_v12, %v1442_v3  ;;  %v3343_v3 = vld [vmem:[%s4820_s12 + $0x28] sm:$0xff] }
 0x267   : > { %1985 = vmatpush.bf16.msrb.mxu0 %v3343_v3 }
 0x268   : > { %v1452_v16 = vadd.f32 %v1443_v37, %v4041_v44 }
 0x26a   : > { %v1456_v38 = vpack.c.bf16 %v1452_v16, %v1451_v49 }
 0x26c   : > { %1548 = vmatmul.bf16.gmra.mxu3 %v1456_v38 }
 0x2b9   : > { %v1534_v8 = vpop.f32.mrf.mxu3 }
 0x2ba   : > { %v1535_v30 = vadd.f32 %v4228_v39, %v1534_v8 }
 0x2bc   : > { %v1554_v21 = vsub.f32 0.0, %v1535_v30 }
 0x2be   : > { %v1562_v41 = vmul.f32 1.442695, %v1554_v21 }
 0x2c0   : > { %3492 = vpow2.f32 %v1562_v41  ;;  %v3342_v41 = vld [vmem:[%s4820_s12 + $0x20] sm:$0xff] }
 0x2c1   : > { %v1536_v42 = vpop.f32.mrf.mxu3  ;;  %1986 = vmatpush.bf16.msrb.mxu0 %v3342_v41 }
 0x2c2   : > { %v4232_v46 = vadd.f32 %v4228_v39, %v1536_v42 }
 0x2c4   : > { %v1555_v45 = vsub.f32 0.0, %v4232_v46 }
 0x2c6   : > { %v3493_v44 = vpop.eup %3492  ;;  %v1564_v43 = vmul.f32 1.442695, %v1555_v45 }
 0x2c7   : > { %v1578_v52 = vadd.f32 1.0, %v3493_v44 }
 0x2c8   : > { %3494 = vpow2.f32 %v1564_v43 }
 0x2c9   : > { %3496 = vrcp.f32 %v1578_v52  ;;  %v1597_v59 = vand.u32 2147483648, %v1578_v52  ;;  %v1595_v56 = vand.u32 2147483647, %v1578_v52  ;;  %vm1591_vm1 = vweird.f32 %v1578_v52 }
 0x2cb   : > { %v1598_v4 = vor.u32 1.1754944e-38, %v1597_v59  ;;  %vm1596_vm3 = vcmp.eq.f32.partialorder %v1595_v56, 8.507059e+37 }
 0x2cd   : > { %v1539_v54 = vpop.f32.mrf.mxu3 }
 0x2ce   : > { %v3495_v53 = vpop.eup %3494  ;;  %v4236_v58 = vadd.f32 %v4228_v39, %v1539_v54 }
 0x2cf   : > { %v3497_v55 = vpop.eup %3496  ;;  %v1579_v57 = vadd.f32 1.0, %v3495_v53 }
 0x2d0   : > { %v1587_v14 = vmul.f32 %v3497_v55, %v1578_v52  ;;  %v1556_v33 = vsub.f32 0.0, %v4236_v58  ;;  %vm1592_vm0 = vweird.f32 %v3497_v55 }
 0x2d1   : > { %3498 = vrcp.f32 %v1579_v57  ;;  %vm1593_vm2 = vmor %vm1591_vm1, %vm1592_vm0  ;;  %v1612_v13 = vand.u32 2147483648, %v1579_v57  ;;  %v1610_v19 = vand.u32 2147483647, %v1579_v57  ;;  %vm1606_vm5 = vweird.f32 %v1579_v57 }
 0x2d2   : > { %v1588_v50 = vsub.f32 1.0, %v1587_v14  ;;  %v1566_v62 = vmul.f32 1.442695, %v1556_v33 }
 0x2d3   : > { %v1613_v27 = vor.u32 1.1754944e-38, %v1612_v13  ;;  %vm1611_vm7 = vcmp.eq.f32.partialorder %v1610_v19, 8.507059e+37 }
 0x2d4   : > { %v1589_v61 = vmul.f32 %v3497_v55, %v1588_v50  ;;  %3500 = vpow2.f32 %v1566_v62 }
 0x2d5   : > { %v1541_v1 = vpop.f32.mrf.mxu3 }
 0x2d6   : > { %v1590_v63 = vadd.f32 %v3497_v55, %v1589_v61  ;;  %v4245_v24 = vadd.f32 %v4228_v39, %v1541_v1  ;;  %v3654_v61 = vld [vmem:[%s3798_s20 + $0x10] sm:$0xff] }
 0x2d7   : > { %v3499_v48 = vpop.eup %3498  ;;  %v1720_v56 = vmul.f32 %v3654_v61, %v4242_v60 }
 0x2d8   : > { %v1594_v10 = vsel %vm1593_vm2, %v3497_v55, %v1590_v63  ;;  %v1602_v11 = vmul.f32 %v3499_v48, %v1579_v57  ;;  %v1557_v47 = vsub.f32 0.0, %v4245_v24  ;;  %vm1607_vm4 = vweird.f32 %v3499_v48  ;;  %v3341_v57 = vld [vmem:[%s4820_s12 + $0x18] sm:$0xff] }
 0x2d9   : > { %v1599_v0 = vsel %vm1596_vm3, %v1598_v4, %v1594_v10  ;;  %vm1608_vm6 = vmor %vm1606_vm5, %vm1607_vm4  ;;  %1987 = vmatpush.bf16.msrb.mxu0 %v3341_v57 }
 0x2da   : > { %v1706_v7 = vmul.f32 %v1599_v0, %v1535_v30  ;;  %v1603_v12 = vsub.f32 1.0, %v1602_v11  ;;  %v1568_v15 = vmul.f32 1.442695, %v1557_v47  ;;  %v3501_v18 = vpop.eup %3500  ;;  %v3340_v11 = vld [vmem:[%s4820_s12 + $0x10] sm:$0xff]  ;;  %v3655_v47 = vld [vmem:[%s3798_s20 + $0x20] sm:$0xff] }
 0x2db   : > { %v1580_v31 = vadd.f32 1.0, %v3501_v18 }
 0x2dc   : > { %v4253_v23 = vadd.f32 %v1718_v9, %v1706_v7  ;;  %v1604_v51 = vmul.f32 %v3499_v48, %v1603_v12  ;;  %3502 = vpow2.f32 %v1568_v15  ;;  %v4300_v7 = vmul.f32 %v3655_v47, %v4242_v60  ;;  %v3656_v12 = vld [vmem:[%s3798_s20 + $0x18] sm:$0xff] }
 0x2dd   : > { %v1544_v25 = vpop.f32.mrf.mxu3  ;;  %3504 = vrcp.f32 %v1580_v31  ;;  %v1625_v52 = vand.u32 2147483647, %v1580_v31  ;;  %v1627_v53 = vand.u32 2147483648, %v1580_v31  ;;  %vm1621_vm9 = vweird.f32 %v1580_v31  ;;  %1988 = vmatpush.bf16.msrb.mxu0 %v3340_v11 }
 0x2de   : > { %v1768_v20 = vsub.f32 0.0, %v4253_v23  ;;  %v1605_v22 = vadd.f32 %v3499_v48, %v1604_v51  ;;  %v4262_v40 = vadd.f32 %v4228_v39, %v1544_v25  ;;  %v1721_v13 = vmul.f32 %v3656_v12, %v4242_v60 }
 0x2df   : > { %vm1626_vm11 = vcmp.eq.f32.partialorder %v1625_v52, 8.507059e+37  ;;  %v1628_v62 = vor.u32 1.1754944e-38, %v1627_v53 }
 0x2e0   : > { %v1776_v34 = vmul.f32 1.442695, %v1768_v20  ;;  %v1609_v2 = vsel %vm1608_vm6, %v3499_v48, %v1605_v22  ;;  %v1558_v28 = vsub.f32 0.0, %v4262_v40 }
 0x2e1   : > { %v1614_v6 = vsel %vm1611_vm7, %v1613_v27, %v1609_v2  ;;  %v3339_v27 = vld [vmem:[%s4820_s12 + $0x8] sm:$0xff] }
 0x2e2   : > { %3506 = vpow2.f32 %v1776_v34  ;;  %v1707_v35 = vmul.f32 %v1614_v6, %v4232_v46  ;;  %v3503_v36 = vpop.eup %3502  ;;  %v1570_v16 = vmul.f32 1.442695, %v1558_v28  ;;  %1989 = vmatpush.bf16.msrb.mxu0 %v3339_v27 }
 0x2e3   : > { %v4271_v49 = vadd.f32 1.0, %v3503_v36  ;;  %v3505_v38 = vpop.eup %3504 }
 0x2e4   : > { %v4269_v37 = vadd.f32 %v1719_v26, %v1707_v35  ;;  %v1617_v30 = vmul.f32 %v3505_v38, %v1580_v31  ;;  %vm1622_vm8 = vweird.f32 %v3505_v38 }
 0x2e5   : > { %3508 = vrcp.f32 %v4271_v49  ;;  %v1546_v21 = vpop.f32.mrf.mxu3  ;;  %vm1623_vm10 = vmor %vm1621_vm9, %vm1622_vm8  ;;  %v1640_v48 = vand.u32 2147483647, %v4271_v49  ;;  %v1642_v10 = vand.u32 2147483648, %v4271_v49  ;;  %vm1636_vm13 = vweird.f32 %v4271_v49 }
 0x2e6   : > { %v1769_v8 = vsub.f32 0.0, %v4269_v37  ;;  %3510 = vpow2.f32 %v1570_v16  ;;  %v1618_v45 = vsub.f32 1.0, %v1617_v30  ;;  %v4279_v44 = vadd.f32 %v4228_v39, %v1546_v21 }
 0x2e7   : > { %vm4316_vm14 = vcmp.eq.f32.partialorder %v1640_v48, 8.507059e+37  ;;  %v1643_v32 = vor.u32 1.1754944e-38, %v1642_v10 }
 0x2e8   : > { %v3507_v42 = vpop.eup %3506  ;;  %v1778_v46 = vmul.f32 1.442695, %v1769_v8  ;;  %v1619_v54 = vmul.f32 %v3505_v38, %v1618_v45  ;;  %v1559_v55 = vsub.f32 0.0, %v4279_v44 }
 0x2e9   : > { %v4281_v43 = vadd.f32 1.0, %v3507_v42  ;;  %v3338_v42 = vld [vmem:[%s4820_s12] sm:$0xff] }
 0x2ea   : > { %3512 = vpow2.f32 %v1778_v46  ;;  %v1620_v50 = vadd.f32 %v3505_v38, %v1619_v54  ;;  %v1572_v33 = vmul.f32 1.442695, %v1559_v55  ;;  %1990 = vmatpush.bf16.msrb.mxu0 %v3338_v42 }
 0x2eb   : > { %3514 = vrcp.f32 %v4281_v43  ;;  %v3509_v14 = vpop.eup %3508  ;;  %v1811_v35 = vand.u32 2147483648, %v4281_v43  ;;  %vm1805_vm0 = vweird.f32 %v4281_v43 }
 0x2ec   : > { %v3511_v59 = vpop.eup %3510  ;;  %v1632_v63 = vmul.f32 %v3509_v14, %v4271_v49  ;;  %v1624_v1 = vsel %vm1623_vm10, %v3505_v38, %v1620_v50  ;;  %3516 = vpow2.f32 %v1572_v33  ;;  %vm1637_vm12 = vweird.f32 %v3509_v14 }
 0x2ed   : > { %v4292_v4 = vadd.f32 1.0, %v3511_v59  ;;  %v1629_v5 = vsel %vm1626_vm11, %v1628_v62, %v1624_v1  ;;  %vm1638_vm15 = vmor %vm1636_vm13, %vm1637_vm12  ;;  %v1809_v49 = vand.u32 2147483647, %v4281_v43  ;;  %v1812_v53 = vor.u32 1.1754944e-38, %v1811_v35 }
 0x2ee   : > { %v1633_v9 = vsub.f32 1.0, %v1632_v63  ;;  %v1708_v15 = vmul.f32 %v1629_v5, %v4236_v58 }
 0x2ef   : > { %3518 = vrcp.f32 %v4292_v4  ;;  %v1549_v17 = vpop.f32.mrf.mxu3  ;;  %v1655_v2 = vand.u32 2147483647, %v4292_v4  ;;  %v1657_v30 = vand.u32 2147483648, %v4292_v4  ;;  %vm1651_vm1 = vweird.f32 %v4292_v4 }
 0x2f0   : > { %v3513_v0 = vpop.eup %3512  ;;  %v1634_v19 = vmul.f32 %v3509_v14, %v1633_v9  ;;  %v4311_v31 = vadd.f32 %v4228_v39, %v1549_v17  ;;  %v4313_v20 = vadd.f32 %v1720_v56, %v1708_v15  ;;  %vm4354_vm3 = vcmp.eq.f32.partialorder %v1809_v49, 8.507059e+37 }
 0x2f1   : > { %v4306_v18 = vpop.eup %3514  ;;  %v4308_v51 = vadd.f32 1.0, %v3513_v0  ;;  %vm4345_vm2 = vcmp.eq.f32.partialorder %v1655_v2, 8.507059e+37  ;;  %v1658_v50 = vor.u32 1.1754944e-38, %v1657_v30 }
 0x2f2   : > { %v1801_v58 = vmul.f32 %v4306_v18, %v4281_v43  ;;  %v1635_v25 = vadd.f32 %v3509_v14, %v1634_v19  ;;  %v1560_v26 = vsub.f32 0.0, %v4311_v31  ;;  %v3517_v29 = vpop.eup %3516  ;;  %v1770_v34 = vsub.f32 0.0, %v4313_v20 }
 0x2f3   : > { %3520 = vrcp.f32 %v4308_v51  ;;  %v4330_v36 = vadd.f32 1.0, %v3517_v29  ;;  %vm1806_vm5 = vweird.f32 %v4306_v18  ;;  %vm1820_vm6 = vweird.f32 %v4308_v51 }
 0x2f4   : > { %v1802_v6 = vsub.f32 1.0, %v1801_v58  ;;  %v1639_v28 = vsel %vm1638_vm15, %v3509_v14, %v1635_v25  ;;  %v1574_v3 = vmul.f32 1.442695, %v1560_v26  ;;  %v1780_v38 = vmul.f32 1.442695, %v1770_v34  ;;  %vm4371_vm7 = vmor %vm1805_vm0, %vm1806_vm5 }
 0x2f5   : > { %v3519_v16 = vpop.eup %3518  ;;  %v1644_v8 = vsel %vm4316_vm14, %v1643_v32, %v1639_v28  ;;  %3522 = vrcp.f32 %v4330_v36  ;;  %v1824_v63 = vand.u32 2147483647, %v4308_v51  ;;  %v1826_v1 = vand.u32 2147483648, %v4308_v51 }
 0x2f6   : > { %v1709_v21 = vmul.f32 %v1644_v8, %v4245_v24  ;;  %v1647_v41 = vmul.f32 %v3519_v16, %v4292_v4  ;;  %v1803_v46 = vmul.f32 %v4306_v18, %v1802_v6  ;;  %3524 = vpow2.f32 %v1780_v38  ;;  %v3657_v38 = vld [vmem:[%s3798_s20 + $0x28] sm:$0xff] }
 0x2f7   : > { %v1551_v52 = vpop.f32.mrf.mxu3  ;;  %3526 = vpow2.f32 %v1574_v3  ;;  %vm1652_vm4 = vweird.f32 %v3519_v16  ;;  %v1670_v10 = vand.u32 2147483647, %v4330_v36  ;;  %v1827_v27 = vor.u32 1.1754944e-38, %v1826_v1 }
 0x2f8   : > { %v4349_v54 = vadd.f32 %v1721_v13, %v1709_v21  ;;  %v1648_v55 = vsub.f32 1.0, %v1647_v41  ;;  %v4352_v57 = vadd.f32 %v4228_v39, %v1551_v52  ;;  %v1804_v62 = vadd.f32 %v4306_v18, %v1803_v46  ;;  %vm1653_vm8 = vmor %vm1651_vm1, %vm1652_vm4 }
 0x2f9   : > { %v3521_v24 = vpop.eup %3520  ;;  %v1672_v13 = vand.u32 2147483648, %v4330_v36  ;;  %vm1825_vm12 = vcmp.eq.f32.partialorder %v1824_v63, 8.507059e+37  ;;  %vm1666_vm13 = vweird.f32 %v4330_v36  ;;  %vm1671_vm15 = vcmp.eq.f32.partialorder %v1670_v10, 8.507059e+37 }
 0x2fa   : > { %v1816_v33 = vmul.f32 %v3521_v24, %v4308_v51  ;;  %v1771_v59 = vsub.f32 0.0, %v4349_v54  ;;  %v1649_v61 = vmul.f32 %v3519_v16, %v1648_v55  ;;  %v1561_v56 = vsub.f32 0.0, %v4352_v57 }
 0x2fb   : > { %v3523_v48 = vpop.eup %3522  ;;  %vm1821_vm9 = vweird.f32 %v3521_v24  ;;  %v1808_v22 = vsel %vm4371_vm7, %v4306_v18, %v1804_v62  ;;  %v1673_v3 = vor.u32 1.1754944e-38, %v1672_v13 }
 0x2fc   : > { %v1817_v39 = vsub.f32 1.0, %v1816_v33  ;;  %v1782_v5 = vmul.f32 1.442695, %v1771_v59  ;;  %v1650_v9 = vadd.f32 %v3519_v16, %v1649_v61  ;;  %v1576_v11 = vmul.f32 1.442695, %v1561_v56  ;;  %v3525_v47 = vpop.eup %3524  ;;  %vm1822_vm11 = vmor %vm1820_vm6, %vm1821_vm9  ;;  %v3658_v61 = vld [vmem:[%s3798_s20 + $0x30] sm:$0xff] }
 0x2fd   : > { %v1662_v12 = vmul.f32 %v3523_v48, %v4330_v36  ;;  %v3527_v17 = vpop.eup %3526  ;;  %v4380_v19 = vadd.f32 1.0, %v3525_v47  ;;  %vm1667_vm10 = vweird.f32 %v3523_v48  ;;  %v1813_v18 = vsel %vm4354_vm3, %v1812_v53, %v1808_v22 }
 0x2fe   : > { %v1818_v15 = vmul.f32 %v3521_v24, %v1817_v39  ;;  %3528 = vpow2.f32 %v1782_v5  ;;  %v1654_v43 = vsel %vm1653_vm8, %v3519_v16, %v1650_v9  ;;  %v4387_v25 = vadd.f32 1.0, %v3527_v17  ;;  %vm1668_vm14 = vmor %vm1666_vm13, %vm1667_vm10 }
 0x2ff   : > { %v1659_v58 = vsel %vm4345_vm2, %v1658_v50, %v1654_v43  ;;  %v1663_v4 = vsub.f32 1.0, %v1662_v12  ;;  %3530 = vpow2.f32 %v1576_v11  ;;  %v1920_v49 = vmul.f32 %v1813_v18, %v4253_v23  ;;  %v3351_v43 = vld [vmem:[%s4822_s14 + $0x28] sm:$0xff] }
 0x300   : > { %3532 = vrcp.f32 %v4380_v19  ;;  %v1710_v32 = vmul.f32 %v1659_v58, %v4262_v40  ;;  %v1819_v26 = vadd.f32 %v3521_v24, %v1818_v15  ;;  %v1685_v50 = vand.u32 2147483647, %v4387_v25 }
 0x301   : > { %v1664_v29 = vmul.f32 %v3523_v48, %v1663_v4  ;;  %3534 = vrcp.f32 %v4387_v25  ;;  %v1687_v33 = vand.u32 2147483648, %v4387_v25  ;;  %v1839_v63 = vand.u32 2147483647, %v4380_v19 }
 0x302   : > { %v4398_v34 = vadd.f32 %v4300_v7, %v1710_v32  ;;  %v1823_v2 = vsel %vm1822_vm11, %v3521_v24, %v1819_v26  ;;  %v1723_v7 = vmul.f32 %v3657_v38, %v4242_v60  ;;  %vm1681_vm1 = vweird.f32 %v4387_v25 }
 0x303   : > { %v1665_v40 = vadd.f32 %v3523_v48, %v1664_v29  ;;  %v1828_v6 = vsel %vm1825_vm12, %v1827_v27, %v1823_v2  ;;  %vm1835_vm2 = vweird.f32 %v4380_v19  ;;  %vm1686_vm3 = vcmp.eq.f32.partialorder %v1685_v50, 8.507059e+37 }
 0x304   : > { %v3529_v35 = vpop.eup %3528  ;;  %v1772_v28 = vsub.f32 0.0, %v4398_v34  ;;  %v1921_v16 = vmul.f32 %v1828_v6, %v4269_v37  ;;  %v1688_v0 = vor.u32 1.1754944e-38, %v1687_v33  ;;  %vm4440_vm6 = vcmp.eq.f32.partialorder %v1839_v63, 8.507059e+37 }
 0x305   : > { %v3531_v51 = vpop.eup %3530  ;;  %v4406_v8 = vadd.f32 1.0, %v3529_v35  ;;  %v1669_v30 = vsel %vm1668_vm14, %v3523_v48, %v1665_v40  ;;  %v3659_v48 = vld [vmem:[%s3798_s20 + $0x38] sm:$0xff]  ;;  %v1841_v22 = vand.u32 2147483648, %v4380_v19 }
 0x306   : > { %v4408_v21 = vpop.eup %3532  ;;  %v1784_v36 = vmul.f32 1.442695, %v1772_v28  ;;  %v1674_v41 = vsel %vm1671_vm15, %v1673_v3, %v1669_v30  ;;  %v4410_v42 = vadd.f32 1.0, %v3531_v51  ;;  %v1928_v46 = vpack.c.bf16 %v1921_v16, %v1920_v49 }
 0x307   : > { %v3535_v45 = vpop.eup %3534  ;;  %3536 = vrcp.f32 %v4406_v8  ;;  %v1711_v52 = vmul.f32 %v1674_v41, %v4279_v44  ;;  %v1831_v53 = vmul.f32 %v4408_v21, %v4380_v19  ;;  %v1724_v44 = vmul.f32 %v3658_v61, %v4242_v60 }
 0x308   : > { %3538 = vpow2.f32 %v1784_v36  ;;  %v1677_v24 = vmul.f32 %v3535_v45, %v4387_v25  ;;  %1991 = vmatmul.bf16.vlgmr.msrb.gmra.mxu0 %v1928_v46  ;;  %vm1682_vm0 = vweird.f32 %v3535_v45  ;;  %v4429_v5 = vmul.f32 %v3659_v48, %v4242_v60 }
 0x309   : > { %v4417_v55 = vadd.f32 %v1723_v7, %v1711_v52  ;;  %3540 = vrcp.f32 %v4410_v42  ;;  %v1832_v59 = vsub.f32 1.0, %v1831_v53  ;;  %vm1683_vm4 = vmor %vm1681_vm1, %vm1682_vm0  ;;  %vm1836_vm5 = vweird.f32 %v4408_v21 }
 0x30a   : > { %v1678_v14 = vsub.f32 1.0, %v1677_v24  ;;  %v1856_v25 = vand.u32 2147483648, %v4406_v8  ;;  %v1700_v27 = vand.u32 2147483647, %v4410_v42  ;;  %v1702_v29 = vand.u32 2147483648, %v4410_v42  ;;  %vm4452_vm7 = vmor %vm1835_vm2, %vm1836_vm5 }
 0x30b   : > { %v1773_v56 = vsub.f32 0.0, %v4417_v55  ;;  %v1833_v39 = vmul.f32 %v4408_v21, %v1832_v59  ;;  %v1854_v6 = vand.u32 2147483647, %v4406_v8  ;;  %v1842_v28 = vor.u32 1.1754944e-38, %v1841_v22 }
 0x30c   : > { %v1679_v62 = vmul.f32 %v3535_v45, %v1678_v14  ;;  %vm1696_vm10 = vweird.f32 %v4410_v42  ;;  %vm1850_vm11 = vweird.f32 %v4406_v8  ;;  %v1857_v49 = vor.u32 1.1754944e-38, %v1856_v25 }
 0x30d   : > { %v3537_v1 = vpop.eup %3536  ;;  %v1786_v9 = vmul.f32 1.442695, %v1773_v56  ;;  %v1834_v60 = vadd.f32 %v4408_v21, %v1833_v39  ;;  %vm1701_vm14 = vcmp.eq.f32.partialorder %v1700_v27, 8.507059e+37  ;;  %vm1855_vm15 = vcmp.eq.f32.partialorder %v1854_v6, 8.507059e+37 }
 0x30e   : > { %v3539_v10 = vpop.eup %3538  ;;  %v1680_v11 = vadd.f32 %v3535_v45, %v1679_v62  ;;  %v1846_v47 = vmul.f32 %v3537_v1, %v4406_v8  ;;  %vm1851_vm8 = vweird.f32 %v3537_v1 }
 0x30f   : > { %v3541_v12 = vpop.eup %3540  ;;  %v4434_v13 = vadd.f32 1.0, %v3539_v10  ;;  %3542 = vpow2.f32 %v1786_v9  ;;  %v1838_v2 = vsel %vm4452_vm7, %v4408_v21, %v1834_v60  ;;  %vm1852_vm12 = vmor %vm1850_vm11, %vm1851_vm8  ;;  %v1703_v21 = vor.u32 1.1754944e-38, %v1702_v29 }
 0x310   : > { %v1684_v15 = vsel %vm1683_vm4, %v3535_v45, %v1680_v11  ;;  %v1692_v17 = vmul.f32 %v3541_v12, %v4410_v42  ;;  %v1847_v4 = vsub.f32 1.0, %v1846_v47  ;;  %vm1697_vm9 = vweird.f32 %v3541_v12 }
 0x311   : > { %3544 = vrcp.f32 %v4434_v13  ;;  %v1689_v58 = vsel %vm1686_vm3, %v1688_v0, %v1684_v15  ;;  %v1843_v7 = vsel %vm4440_vm6, %v1842_v28, %v1838_v2  ;;  %vm1698_vm13 = vmor %vm1696_vm10, %vm1697_vm9  ;;  %vm1865_vm1 = vweird.f32 %v4434_v13  ;;  %v3352_v0 = vld [vmem:[%s4822_s14 + $0x30] sm:$0xff] }
 0x312   : > { %v1712_v32 = vmul.f32 %v1689_v58, %v4311_v31  ;;  %v1693_v26 = vsub.f32 1.0, %v1692_v17  ;;  %v1848_v40 = vmul.f32 %v3537_v1, %v1847_v4  ;;  %v1922_v45 = vmul.f32 %v1843_v7, %v4313_v20 }
 0x314   : > { %v4460_v31 = vadd.f32 %v1724_v44, %v1712_v32  ;;  %v1694_v35 = vmul.f32 %v3541_v12, %v1693_v26  ;;  %v1849_v19 = vadd.f32 %v3537_v1, %v1848_v40 }
 0x315   : > { %v3543_v3 = vpop.eup %3542 }
 0x316   : > { %v1797_v16 = vadd.f32 1.0, %v3543_v3  ;;  %v1774_v51 = vsub.f32 0.0, %v4460_v31  ;;  %v1695_v38 = vadd.f32 %v3541_v12, %v1694_v35  ;;  %v1853_v36 = vsel %vm1852_vm12, %v3537_v1, %v1849_v19 }
 0x317   : > { %v3545_v30 = vpop.eup %3544  ;;  %v1858_v8 = vsel %vm1855_vm15, %v1857_v49, %v1853_v36  ;;  %v1871_v1 = vand.u32 2147483648, %v4434_v13 }
 0x318   : > { %3546 = vrcp.f32 %v1797_v16  ;;  %v1788_v41 = vmul.f32 1.442695, %v1774_v51  ;;  %v1699_v42 = vsel %vm1698_vm13, %v3541_v12, %v1695_v38  ;;  %v1923_v52 = vmul.f32 %v1858_v8, %v4349_v54 }
 0x319   : > { %v1704_v46 = vsel %vm1701_vm14, %v1703_v21, %v1699_v42  ;;  %v1861_v53 = vmul.f32 %v3545_v30, %v4434_v13  ;;  %vm1866_vm0 = vweird.f32 %v3545_v30  ;;  %v1884_v10 = vand.u32 2147483647, %v1797_v16 }
 0x31a   : > { %3548 = vpow2.f32 %v1788_v41  ;;  %v1713_v24 = vmul.f32 %v1704_v46, %v4352_v57  ;;  %v1929_v14 = vpack.c.bf16 %v1923_v52, %v1922_v45  ;;  %v3353_v57 = vld [vmem:[%s4822_s14 + $0x38] sm:$0xff]  ;;  %vm1867_vm2 = vmor %vm1865_vm1, %vm1866_vm0  ;;  %v1886_v11 = vand.u32 2147483648, %v1797_v16 }
 0x31b   : > { %v1862_v50 = vsub.f32 1.0, %v1861_v53  ;;  %2227 = vmatpush.bf16.msra.mxu1 %v3353_v57  ;;  %v1872_v60 = vor.u32 1.1754944e-38, %v1871_v1  ;;  %vm1880_vm5 = vweird.f32 %v1797_v16  ;;  %vm1885_vm7 = vcmp.eq.f32.partialorder %v1884_v10, 8.507059e+37  ;;  %v4495_v53 = vld [vmem:[%s4821_s13] ss:$0 sm:$0xff] }
 0x31c   : > { %v4473_v33 = vadd.f32 %v4429_v5, %v1713_v24  ;;  %1996 = vmatmul.bf16.gmra.mxu0 %v1929_v14  ;;  %v1869_v5 = vand.u32 2147483647, %v4434_v13  ;;  %v1887_v13 = vor.u32 1.1754944e-38, %v1886_v11 }
 0x31d   : > { %v1863_v59 = vmul.f32 %v3545_v30, %v1862_v50  ;;  %v3350_v50 = vld [vmem:[%s4822_s14 + $0x20] sm:$0xff] }
 0x31e   : > { %v3547_v61 = vpop.eup %3546  ;;  %v1775_v44 = vsub.f32 0.0, %v4473_v33  ;;  %vm1870_vm4 = vcmp.eq.f32.partialorder %v1869_v5, 8.507059e+37 }
 0x31f   : > { %v1864_v56 = vadd.f32 %v3545_v30, %v1863_v59  ;;  %v1876_v62 = vmul.f32 %v3547_v61, %v1797_v16  ;;  %vm1881_vm3 = vweird.f32 %v3547_v61  ;;  %2228 = vmatpush.bf16.msra.mxu1 %v3352_v0 }
 0x320   : > { %v3549_v39 = vpop.eup %3548  ;;  %v1790_v63 = vmul.f32 1.442695, %v1775_v44  ;;  %vm1882_vm6 = vmor %vm1880_vm5, %vm1881_vm3 }
 0x321   : > { %v1798_v48 = vadd.f32 1.0, %v3549_v39  ;;  %v1877_v9 = vsub.f32 1.0, %v1876_v62  ;;  %v1868_v47 = vsel %vm1867_vm2, %v3545_v30, %v1864_v56  ;;  %v3349_v39 = vld [vmem:[%s4822_s14 + $0x18] sm:$0xff] }
 0x322   : > { %3550 = vpow2.f32 %v1790_v63  ;;  %v1873_v17 = vsel %vm1870_vm4, %v1872_v60, %v1868_v47 }
 0x323   : > { %3552 = vrcp.f32 %v1798_v48  ;;  %v1878_v12 = vmul.f32 %v3547_v61, %v1877_v9  ;;  %v1924_v26 = vmul.f32 %v1873_v17, %v4398_v34  ;;  %2229 = vmatpush.bf16.msra.mxu1 %v3351_v43  ;;  %v1901_v3 = vand.u32 2147483648, %v1798_v48  ;;  %v3346_v43 = vld [vmem:[%s4822_s14] sm:$0xff] }
 0x324   : > { %vm1895_vm9 = vweird.f32 %v1798_v48  ;;  %v1899_v19 = vand.u32 2147483647, %v1798_v48 }
 0x325   : > { %v1879_v15 = vadd.f32 %v3547_v61, %v1878_v12  ;;  %v1902_v30 = vor.u32 1.1754944e-38, %v1901_v3  ;;  %v3347_v12 = vld [vmem:[%s4822_s14 + $0x8] sm:$0xff] }
 0x326   : > { %vm1900_vm12 = vcmp.eq.f32.partialorder %v1899_v19, 8.507059e+37 }
 0x327   : > { %v1883_v22 = vsel %vm1882_vm6, %v3547_v61, %v1879_v15  ;;  %2230 = vmatpush.bf16.msra.mxu1 %v3350_v50 }
 0x328   : > { %v3551_v58 = vpop.eup %3550  ;;  %v1888_v4 = vsel %vm1885_vm7, %v1887_v13, %v1883_v22 }
 0x329   : > { %v3553_v25 = vpop.eup %3552  ;;  %v1799_v32 = vadd.f32 1.0, %v3551_v58  ;;  %v1925_v27 = vmul.f32 %v1888_v4, %v4417_v55 }
 0x32a   : > { %v1891_v29 = vmul.f32 %v3553_v25, %v1798_v48  ;;  %vm1896_vm8 = vweird.f32 %v3553_v25  ;;  %v3348_v48 = vld [vmem:[%s4822_s14 + $0x10] sm:$0xff] }
 0x32b   : > { %3554 = vrcp.f32 %v1799_v32  ;;  %v1930_v18 = vpack.c.bf16 %v1925_v27, %v1924_v26  ;;  %vm1897_vm10 = vmor %vm1895_vm9, %vm1896_vm8  ;;  %v1916_v16 = vand.u32 2147483648, %v1799_v32  ;;  %v1914_v7 = vand.u32 2147483647, %v1799_v32  ;;  %2231 = vmatpush.bf16.msra.mxu1 %v3349_v39 }
 0x32c   : > { %v1892_v2 = vsub.f32 1.0, %v1891_v29  ;;  %vm1910_vm13 = vweird.f32 %v1799_v32 }
 0x32d   : > { %2001 = vmatmul.bf16.gmra.mxu0 %v1930_v18  ;;  %v1917_v41 = vor.u32 1.1754944e-38, %v1916_v16  ;;  %vm1915_vm15 = vcmp.eq.f32.partialorder %v1914_v7, 8.507059e+37 }
 0x32e   : > { %v1893_v40 = vmul.f32 %v3553_v25, %v1892_v2 }
 0x32f   : > { %2232 = vmatpush.bf16.msra.mxu1 %v3348_v48 }
 0x330   : > { %v1894_v35 = vadd.f32 %v3553_v25, %v1893_v40 }
 0x331   : > { %v3555_v6 = vpop.eup %3554 }
 0x332   : > { %v1906_v28 = vmul.f32 %v3555_v6, %v1799_v32  ;;  %v1898_v51 = vsel %vm1897_vm10, %v3553_v25, %v1894_v35  ;;  %vm1911_vm11 = vweird.f32 %v3555_v6 }
 0x333   : > { %v1903_v36 = vsel %vm1900_vm12, %v1902_v30, %v1898_v51  ;;  %vm1912_vm14 = vmor %vm1910_vm13, %vm1911_vm11  ;;  %2233 = vmatpush.bf16.msra.mxu1 %v3347_v12 }
 0x334   : > { %v1907_v49 = vsub.f32 1.0, %v1906_v28  ;;  %v1926_v46 = vmul.f32 %v1903_v36, %v4460_v31 }
 0x336   : > { %v1908_v38 = vmul.f32 %v3555_v6, %v1907_v49 }
 0x337   : > { %2234 = vmatpush.bf16.msra.mxu1 %v3346_v43 }
 0x338   : > { %v1909_v21 = vadd.f32 %v3555_v6, %v1908_v38 }
 0x33a   : > { %v1913_v42 = vsel %vm1912_vm14, %v3555_v6, %v1909_v21 }
 0x33b   : > { %v1918_v8 = vsel %vm1915_vm15, %v1917_v41, %v1913_v42 }
 0x33c   : > { %v1927_v45 = vmul.f32 %v1918_v8, %v4473_v33 }
 0x33e   : > { %v1931_v52 = vpack.c.bf16 %v1927_v45, %v1926_v46 }
 0x340   : > { %2006 = vmatmul.bf16.gmra.mxu0 %v1931_v52 }
 0x385   : > { %v1992_v24 = vpop.f32.mrf.mxu0 }
 0x386   : > { %v4498_v14 = vadd.f32 %v4495_v53, %v1992_v24 }
 0x388   : > { %v2012_v59 = vsub.f32 0.0, %v4498_v14 }
 0x38a   : > { %v2020_v61 = vmul.f32 1.442695, %v2012_v59 }
 0x38c   : > { %3556 = vpow2.f32 %v2020_v61 }
 0x38d   : > { %v1994_v44 = vpop.f32.mrf.mxu0 }
 0x38e   : > { %v1995_v56 = vadd.f32 %v4495_v53, %v1994_v44 }
 0x390   : > { %v2013_v62 = vsub.f32 0.0, %v1995_v56 }
 0x392   : > { %v3557_v63 = vpop.eup %3556  ;;  %v2022_v1 = vmul.f32 1.442695, %v2013_v62 }
 0x393   : > { %v2036_v57 = vadd.f32 1.0, %v3557_v63 }
 0x394   : > { %3558 = vpow2.f32 %v2022_v1 }
 0x395   : > { %3560 = vrcp.f32 %v2036_v57  ;;  %v2055_v26 = vand.u32 2147483648, %v2036_v57  ;;  %vm2049_vm1 = vweird.f32 %v2036_v57  ;;  %v2053_v29 = vand.u32 2147483647, %v2036_v57 }
 0x397   : > { %v2056_v49 = vor.u32 1.1754944e-38, %v2055_v26  ;;  %vm2054_vm4 = vcmp.eq.f32.partialorder %v2053_v29, 8.507059e+37 }
 0x399   : > { %v1997_v9 = vpop.f32.mrf.mxu0 }
 0x39a   : > { %v3559_v5 = vpop.eup %3558  ;;  %v4512_v0 = vadd.f32 %v4495_v53, %v1997_v9 }
 0x39b   : > { %v3561_v10 = vpop.eup %3560  ;;  %v2037_v11 = vadd.f32 1.0, %v3559_v5 }
 0x39c   : > { %v2045_v47 = vmul.f32 %v3561_v10, %v2036_v57  ;;  %v2014_v15 = vsub.f32 0.0, %v4512_v0  ;;  %vm2050_vm0 = vweird.f32 %v3561_v10 }
 0x39d   : > { %3562 = vrcp.f32 %v2037_v11  ;;  %vm4525_vm2 = vmor %vm2049_vm1, %vm2050_vm0  ;;  %v2070_v40 = vand.u32 2147483648, %v2037_v11  ;;  %v2068_v19 = vand.u32 2147483647, %v2037_v11  ;;  %vm2064_vm5 = vweird.f32 %v2037_v11 }
 0x39e   : > { %v2046_v60 = vsub.f32 1.0, %v2045_v47  ;;  %v2024_v13 = vmul.f32 1.442695, %v2014_v15 }
 0x39f   : > { %v2071_v30 = vor.u32 1.1754944e-38, %v2070_v40  ;;  %vm2069_vm7 = vcmp.eq.f32.partialorder %v2068_v19, 8.507059e+37 }
 0x3a0   : > { %v2047_v17 = vmul.f32 %v3561_v10, %v2046_v60  ;;  %3564 = vpow2.f32 %v2024_v13 }
 0x3a1   : > { %v1999_v22 = vpop.f32.mrf.mxu0 }
 0x3a2   : > { %v4522_v4 = vadd.f32 %v4495_v53, %v1999_v22  ;;  %v2048_v25 = vadd.f32 %v3561_v10, %v2047_v17 }
 0x3a3   : > { %v3563_v58 = vpop.eup %3562 }
 0x3a4   : > { %v2060_v32 = vmul.f32 %v3563_v58, %v2037_v11  ;;  %v2015_v27 = vsub.f32 0.0, %v4522_v4  ;;  %v2052_v28 = vsel %vm4525_vm2, %v3561_v10, %v2048_v25  ;;  %vm2065_vm3 = vweird.f32 %v3563_v58 }
 0x3a5   : > { %v2057_v7 = vsel %vm2054_vm4, %v2056_v49, %v2052_v28  ;;  %vm2066_vm6 = vmor %vm2064_vm5, %vm2065_vm3 }
 0x3a6   : > { %v2061_v18 = vsub.f32 1.0, %v2060_v32  ;;  %v2026_v6 = vmul.f32 1.442695, %v2015_v27  ;;  %v3565_v35 = vpop.eup %3564  ;;  %v2164_v42 = vmul.f32 %v2057_v7, %v4498_v14 }
 0x3a7   : > { %v2038_v16 = vadd.f32 1.0, %v3565_v35 }
 0x3a8   : > { %v2062_v3 = vmul.f32 %v3563_v58, %v2061_v18  ;;  %3566 = vpow2.f32 %v2026_v6 }
 0x3a9   : > { %3568 = vrcp.f32 %v2038_v16  ;;  %v2085_v9 = vand.u32 2147483648, %v2038_v16  ;;  %vm2079_vm9 = vweird.f32 %v2038_v16  ;;  %v2083_v11 = vand.u32 2147483647, %v2038_v16 }
 0x3aa   : > { %v2063_v51 = vadd.f32 %v3563_v58, %v2062_v3  ;;  %v2002_v38 = vpop.f32.mrf.mxu0 }
 0x3ab   : > { %v4532_v36 = vadd.f32 %v4495_v53, %v2002_v38  ;;  %v2086_v43 = vor.u32 1.1754944e-38, %v2085_v9  ;;  %vm2084_vm12 = vcmp.eq.f32.partialorder %v2083_v11, 8.507059e+37 }
 0x3ac   : > { %v2067_v21 = vsel %vm2066_vm6, %v3563_v58, %v2063_v51 }
 0x3ad   : > { %v2072_v41 = vsel %vm2069_vm7, %v2071_v30, %v2067_v21  ;;  %v2016_v46 = vsub.f32 0.0, %v4532_v36 }
 0x3ae   : > { %v2165_v8 = vmul.f32 %v2072_v41, %v1995_v56  ;;  %v3567_v45 = vpop.eup %3566 }
 0x3af   : > { %v2039_v24 = vadd.f32 1.0, %v3567_v45  ;;  %v2028_v50 = vmul.f32 1.442695, %v2016_v46  ;;  %v3569_v59 = vpop.eup %3568 }
 0x3b0   : > { %v2172_v52 = vpack.c.bf16 %v2165_v8, %v2164_v42  ;;  %v2075_v61 = vmul.f32 %v3569_v59, %v2038_v16  ;;  %vm2080_vm8 = vweird.f32 %v3569_v59 }
 0x3b1   : > { %3570 = vrcp.f32 %v2039_v24  ;;  %vm2081_vm10 = vmor %vm2079_vm9, %vm2080_vm8  ;;  %v2100_v12 = vand.u32 2147483648, %v2039_v24  ;;  %v2098_v17 = vand.u32 2147483647, %v2039_v24  ;;  %vm2094_vm13 = vweird.f32 %v2039_v24 }
 0x3b2   : > { %v2004_v44 = vpop.f32.mrf.mxu0  ;;  %2235 = vmatmul.bf16.vlgmr.msra.gmra.mxu1 %v2172_v52  ;;  %3572 = vpow2.f32 %v2028_v50  ;;  %v2076_v39 = vsub.f32 1.0, %v2075_v61  ;;  %v3360_v52 = vld [vmem:[%s4820_s12 + $0x70] sm:$0xff] }
 0x3b3   : > { %v4537_v62 = vadd.f32 %v4495_v53, %v2004_v44  ;;  %v2101_v26 = vor.u32 1.1754944e-38, %v2100_v12  ;;  %vm2099_vm15 = vcmp.eq.f32.partialorder %v2098_v17, 8.507059e+37 }
 0x3b4   : > { %v2077_v14 = vmul.f32 %v3569_v59, %v2076_v39 }
 0x3b5   : > { %v2017_v63 = vsub.f32 0.0, %v4537_v62 }
 0x3b6   : > { %v2078_v48 = vadd.f32 %v3569_v59, %v2077_v14 }
 0x3b7   : > { %v2030_v56 = vmul.f32 1.442695, %v2017_v63  ;;  %v3571_v1 = vpop.eup %3570 }
 0x3b8   : > { %v3573_v57 = vpop.eup %3572  ;;  %v2090_v5 = vmul.f32 %v3571_v1, %v2039_v24  ;;  %v2082_v60 = vsel %vm2081_vm10, %v3569_v59, %v2078_v48  ;;  %vm2095_vm11 = vweird.f32 %v3571_v1 }
 0x3b9   : > { %3574 = vpow2.f32 %v2030_v56  ;;  %v4540_v10 = vadd.f32 1.0, %v3573_v57  ;;  %v2087_v32 = vsel %vm2084_vm12, %v2086_v43, %v2082_v60  ;;  %vm2096_vm14 = vmor %vm2094_vm13, %vm2095_vm11  ;;  %v3359_v56 = vld [vmem:[%s4820_s12 + $0x68] sm:$0xff] }
 0x3ba   : > { %v2091_v47 = vsub.f32 1.0, %v2090_v5  ;;  %v2166_v6 = vmul.f32 %v2087_v32, %v4512_v0 }
 0x3bb   : > { %3576 = vrcp.f32 %v4540_v10  ;;  %v2115_v42 = vand.u32 2147483648, %v4540_v10  ;;  %vm2109_vm1 = vweird.f32 %v4540_v10 }
 0x3bc   : > { %v2092_v15 = vmul.f32 %v3571_v1, %v2091_v47 }
 0x3bd   : > { %v2007_v13 = vpop.f32.mrf.mxu0  ;;  %v2116_v39 = vor.u32 1.1754944e-38, %v2115_v42 }
 0x3be   : > { %v4544_v22 = vadd.f32 %v4495_v53, %v2007_v13  ;;  %v2093_v25 = vadd.f32 %v3571_v1, %v2092_v15 }
 0x3bf   : > { %v3575_v58 = vpop.eup %3574 }
 0x3c0   : > { %v2041_v27 = vadd.f32 1.0, %v3575_v58  ;;  %v2018_v29 = vsub.f32 0.0, %v4544_v22  ;;  %v2097_v18 = vsel %vm2096_vm14, %v3571_v1, %v2093_v25 }
 0x3c1   : > { %v3577_v2 = vpop.eup %3576  ;;  %v2102_v40 = vsel %vm2099_vm15, %v2101_v26, %v2097_v18 }
 0x3c2   : > { %3578 = vrcp.f32 %v2041_v27  ;;  %v2167_v35 = vmul.f32 %v2102_v40, %v4522_v4  ;;  %v2105_v28 = vmul.f32 %v3577_v2, %v4540_v10  ;;  %v2032_v3 = vmul.f32 1.442695, %v2018_v29  ;;  %v3361_v4 = vld [vmem:[%s4820_s12 + $0x78] sm:$0xff] }
 0x3c3   : > { %vm2110_vm0 = vweird.f32 %v3577_v2  ;;  %v2130_v45 = vand.u32 2147483648, %v2041_v27  ;;  %2517 = vmatpush.bf16.msrb.mxu2 %v3361_v4  ;;  %v2128_v59 = vand.u32 2147483647, %v2041_v27  ;;  %vm2124_vm4 = vweird.f32 %v2041_v27 }
 0x3c4   : > { %v2106_v19 = vsub.f32 1.0, %v2105_v28  ;;  %v2173_v16 = vpack.c.bf16 %v2167_v35, %v2166_v6  ;;  %3580 = vpow2.f32 %v2032_v3  ;;  %vm4563_vm2 = vmor %vm2109_vm1, %vm2110_vm0 }
 0x3c5   : > { %v2009_v49 = vpop.f32.mrf.mxu0  ;;  %v2131_v14 = vor.u32 1.1754944e-38, %v2130_v45  ;;  %vm2129_vm7 = vcmp.eq.f32.partialorder %v2128_v59, 8.507059e+37  ;;  %v3355_v45 = vld [vmem:[%s4820_s12 + $0x48] sm:$0xff] }
 0x3c6   : > { %v4551_v51 = vadd.f32 %v4495_v53, %v2009_v49  ;;  %v2107_v38 = vmul.f32 %v3577_v2, %v2106_v19  ;;  %2240 = vmatmul.bf16.gmra.mxu1 %v2173_v16  ;;  %v2113_v53 = vand.u32 2147483647, %v4540_v10  ;;  %v3358_v16 = vld [vmem:[%s4820_s12 + $0x60] sm:$0xff] }
 0x3c7   : > { %2518 = vmatpush.bf16.msrb.mxu2 %v3360_v52 }
 0x3c8   : > { %v3579_v7 = vpop.eup %3578  ;;  %v2019_v30 = vsub.f32 0.0, %v4551_v51  ;;  %v2108_v41 = vadd.f32 %v3577_v2, %v2107_v38  ;;  %vm2114_vm5 = vcmp.eq.f32.partialorder %v2113_v53, 8.507059e+37  ;;  %v3357_v38 = vld [vmem:[%s4820_s12 + $0x58] sm:$0xff] }
 0x3c9   : > { %v2120_v21 = vmul.f32 %v3579_v7, %v2041_v27  ;;  %vm2125_vm3 = vweird.f32 %v3579_v7 }
 0x3ca   : > { %v2034_v0 = vmul.f32 1.442695, %v2019_v30  ;;  %v3581_v46 = vpop.eup %3580  ;;  %v2112_v44 = vsel %vm4563_vm2, %v3577_v2, %v2108_v41  ;;  %vm2126_vm6 = vmor %vm2124_vm4, %vm2125_vm3 }
 0x3cb   : > { %v2121_v8 = vsub.f32 1.0, %v2120_v21  ;;  %v2042_v61 = vadd.f32 1.0, %v3581_v46  ;;  %v2117_v1 = vsel %vm2114_vm5, %v2116_v39, %v2112_v44  ;;  %2519 = vmatpush.bf16.msrb.mxu2 %v3359_v56  ;;  %v3354_v39 = vld [vmem:[%s4820_s12 + $0x40] sm:$0xff] }
 0x3cc   : > { %3582 = vpow2.f32 %v2034_v0  ;;  %v2168_v11 = vmul.f32 %v2117_v1, %v4532_v36  ;;  %v3356_v0 = vld [vmem:[%s4820_s12 + $0x50] sm:$0xff] }
 0x3cd   : > { %v2122_v50 = vmul.f32 %v3579_v7, %v2121_v8  ;;  %3584 = vrcp.f32 %v2042_v61  ;;  %v2145_v25 = vand.u32 2147483648, %v2042_v61  ;;  %vm2139_vm9 = vweird.f32 %v2042_v61 }
 0x3ce   : > { %v2143_v32 = vand.u32 2147483647, %v2042_v61 }
 0x3cf   : > { %v2123_v63 = vadd.f32 %v3579_v7, %v2122_v50  ;;  %v2146_v18 = vor.u32 1.1754944e-38, %v2145_v25  ;;  %2520 = vmatpush.bf16.msrb.mxu2 %v3358_v16 }
 0x3d0   : > { %vm2144_vm12 = vcmp.eq.f32.partialorder %v2143_v32, 8.507059e+37 }
 0x3d1   : > { %v2127_v57 = vsel %vm2126_vm6, %v3579_v7, %v2123_v63  ;;  %v4585_v7 = vld [vmem:[%s4823_s15] ss:$0 sm:$0xff] }
 0x3d2   : > { %v3583_v48 = vpop.eup %3582  ;;  %v2132_v5 = vsel %vm2129_vm7, %v2131_v14, %v2127_v57 }
 0x3d3   : > { %v2169_v9 = vmul.f32 %v2132_v5, %v4537_v62  ;;  %v2043_v10 = vadd.f32 1.0, %v3583_v48  ;;  %v3585_v47 = vpop.eup %3584  ;;  %2521 = vmatpush.bf16.msrb.mxu2 %v3357_v38 }
 0x3d4   : > { %v2135_v12 = vmul.f32 %v3585_v47, %v2042_v61  ;;  %vm2140_vm8 = vweird.f32 %v3585_v47 }
 0x3d5   : > { %3586 = vrcp.f32 %v2043_v10  ;;  %v2174_v60 = vpack.c.bf16 %v2169_v9, %v2168_v11  ;;  %vm2141_vm10 = vmor %vm2139_vm9, %vm2140_vm8  ;;  %v2160_v62 = vand.u32 2147483648, %v2043_v10  ;;  %v2158_v29 = vand.u32 2147483647, %v2043_v10 }
 0x3d6   : > { %v2136_v15 = vsub.f32 1.0, %v2135_v12  ;;  %vm2154_vm13 = vweird.f32 %v2043_v10 }
 0x3d7   : > { %2245 = vmatmul.bf16.gmra.mxu1 %v2174_v60  ;;  %v2161_v6 = vor.u32 1.1754944e-38, %v2160_v62  ;;  %vm2159_vm15 = vcmp.eq.f32.partialorder %v2158_v29, 8.507059e+37  ;;  %2522 = vmatpush.bf16.msrb.mxu2 %v3356_v0 }
 0x3d8   : > { %v2137_v17 = vmul.f32 %v3585_v47, %v2136_v15 }
 0x3da   : > { %v2138_v43 = vadd.f32 %v3585_v47, %v2137_v17 }
 0x3db   : > { %v3587_v13 = vpop.eup %3586  ;;  %2523 = vmatpush.bf16.msrb.mxu2 %v3355_v45 }
 0x3dc   : > { %v2150_v58 = vmul.f32 %v3587_v13, %v2043_v10  ;;  %v2142_v27 = vsel %vm2141_vm10, %v3585_v47, %v2138_v43  ;;  %vm2155_vm11 = vweird.f32 %v3587_v13 }
 0x3dd   : > { %v2147_v40 = vsel %vm2144_vm12, %v2146_v18, %v2142_v27  ;;  %vm2156_vm14 = vmor %vm2154_vm13, %vm2155_vm11 }
 0x3de   : > { %v2151_v26 = vsub.f32 1.0, %v2150_v58  ;;  %v2170_v3 = vmul.f32 %v2147_v40, %v4544_v22 }
 0x3df   : > { %2524 = vmatpush.bf16.msrb.mxu2 %v3354_v39 }
 0x3e0   : > { %v2152_v36 = vmul.f32 %v3587_v13, %v2151_v26 }
 0x3e2   : > { %v2153_v2 = vadd.f32 %v3587_v13, %v2152_v36 }
 0x3e4   : > { %v2157_v35 = vsel %vm2156_vm14, %v3587_v13, %v2153_v2 }
 0x3e5   : > { %v2162_v28 = vsel %vm2159_vm15, %v2161_v6, %v2157_v35 }
 0x3e6   : > { %v2171_v19 = vmul.f32 %v2162_v28, %v4551_v51 }
 0x3e8   : > { %v2175_v49 = vpack.c.bf16 %v2171_v19, %v2170_v3 }
 0x3ea   : > { %2250 = vmatmul.bf16.gmra.mxu1 %v2175_v49 }
 0x42f   : > { %v2236_v22 = vpop.f32.mrf.mxu1 }
 0x430   : > { %v2237_v51 = vadd.f32 %v4585_v7, %v2236_v22 }
 0x432   : > { %v4589_v30 = vadd.f32 %v2237_v51, %v4253_v23 }
 0x434   : > { %v2302_v21 = vsub.f32 0.0, %v4589_v30 }
 0x436   : > { %v2310_v41 = vmul.f32 1.442695, %v2302_v21 }
 0x437   : > { %v2238_v4 = vpop.f32.mrf.mxu1 }
 0x438   : > { %3588 = vpow2.f32 %v2310_v41  ;;  %v2239_v42 = vadd.f32 %v4585_v7, %v2238_v4 }
 0x43a   : > { %v4597_v8 = vadd.f32 %v2239_v42, %v4269_v37 }
 0x43c   : > { %v2303_v46 = vsub.f32 0.0, %v4597_v8 }
 0x43e   : > { %v3589_v53 = vpop.eup %3588  ;;  %v2312_v23 = vmul.f32 1.442695, %v2303_v46 }
 0x43f   : > { %v2326_v52 = vadd.f32 1.0, %v3589_v53 }
 0x440   : > { %3590 = vpow2.f32 %v2312_v23 }
 0x441   : > { %3592 = vrcp.f32 %v2326_v52  ;;  %v2343_v12 = vand.u32 2147483647, %v2326_v52  ;;  %v2345_v60 = vand.u32 2147483648, %v2326_v52  ;;  %vm2339_vm1 = vweird.f32 %v2326_v52 }
 0x443   : > { %v2241_v24 = vpop.f32.mrf.mxu1  ;;  %vm2344_vm4 = vcmp.eq.f32.partialorder %v2343_v12, 8.507059e+37  ;;  %v2346_v27 = vor.u32 1.1754944e-38, %v2345_v60 }
 0x444   : > { %v2242_v50 = vadd.f32 %v4585_v7, %v2241_v24 }
 0x446   : > { %v3591_v59 = vpop.eup %3590  ;;  %v4605_v37 = vadd.f32 %v2242_v50, %v4313_v20 }
 0x447   : > { %v3593_v61 = vpop.eup %3592  ;;  %v2327_v44 = vadd.f32 1.0, %v3591_v59 }
 0x448   : > { %v2335_v63 = vmul.f32 %v3593_v61, %v2326_v52  ;;  %v2304_v14 = vsub.f32 0.0, %v4605_v37  ;;  %vm2340_vm0 = vweird.f32 %v3593_v61 }
 0x449   : > { %3594 = vrcp.f32 %v2327_v44  ;;  %vm4616_vm2 = vmor %vm2339_vm1, %vm2340_vm0  ;;  %v2358_v58 = vand.u32 2147483647, %v2327_v44  ;;  %v2360_v25 = vand.u32 2147483648, %v2327_v44  ;;  %vm2354_vm5 = vweird.f32 %v2327_v44 }
 0x44a   : > { %v2336_v56 = vsub.f32 1.0, %v2335_v63  ;;  %v2314_v1 = vmul.f32 1.442695, %v2304_v14 }
 0x44b   : > { %v2243_v57 = vpop.f32.mrf.mxu1  ;;  %v2361_v2 = vor.u32 1.1754944e-38, %v2360_v25  ;;  %vm2359_vm7 = vcmp.eq.f32.partialorder %v2358_v58, 8.507059e+37 }
 0x44c   : > { %v2337_v48 = vmul.f32 %v3593_v61, %v2336_v56  ;;  %3596 = vpow2.f32 %v2314_v1  ;;  %v2244_v5 = vadd.f32 %v4585_v7, %v2243_v57 }
 0x44e   : > { %v4613_v20 = vadd.f32 %v2244_v5, %v4349_v54  ;;  %v2338_v10 = vadd.f32 %v3593_v61, %v2337_v48 }
 0x44f   : > { %v3595_v9 = vpop.eup %3594 }
 0x450   : > { %v2350_v11 = vmul.f32 %v3595_v9, %v2327_v44  ;;  %v2305_v47 = vsub.f32 0.0, %v4613_v20  ;;  %v2342_v54 = vsel %vm4616_vm2, %v3593_v61, %v2338_v10  ;;  %vm2355_vm3 = vweird.f32 %v3595_v9 }
 0x451   : > { %v2347_v18 = vsel %vm2344_vm4, %v2346_v27, %v2342_v54  ;;  %vm2356_vm6 = vmor %vm2354_vm5, %vm2355_vm3 }
 0x452   : > { %v2351_v15 = vsub.f32 1.0, %v2350_v11  ;;  %v3597_v17 = vpop.eup %3596  ;;  %v2316_v13 = vmul.f32 1.442695, %v2305_v47  ;;  %v2454_v3 = vmul.f32 %v2347_v18, %v4589_v30 }
 0x453   : > { %v2328_v32 = vadd.f32 1.0, %v3597_v17 }
 0x454   : > { %v2352_v26 = vmul.f32 %v3595_v9, %v2351_v15  ;;  %3598 = vpow2.f32 %v2316_v13  ;;  %v2246_v62 = vpop.f32.mrf.mxu1 }
 0x455   : > { %3600 = vrcp.f32 %v2328_v32  ;;  %v2247_v36 = vadd.f32 %v4585_v7, %v2246_v62  ;;  %v2375_v59 = vand.u32 2147483648, %v2328_v32  ;;  %vm2369_vm9 = vweird.f32 %v2328_v32 }
 0x456   : > { %v2353_v29 = vadd.f32 %v3595_v9, %v2352_v26  ;;  %v2373_v44 = vand.u32 2147483647, %v2328_v32 }
 0x457   : > { %v4624_v40 = vadd.f32 %v2247_v36, %v4398_v34  ;;  %v2376_v48 = vor.u32 1.1754944e-38, %v2375_v59 }
 0x458   : > { %v2357_v6 = vsel %vm2356_vm6, %v3595_v9, %v2353_v29  ;;  %vm2374_vm12 = vcmp.eq.f32.partialorder %v2373_v44, 8.507059e+37 }
 0x459   : > { %v2362_v35 = vsel %vm2359_vm7, %v2361_v2, %v2357_v6  ;;  %v2306_v28 = vsub.f32 0.0, %v4624_v40 }
 0x45a   : > { %v2455_v19 = vmul.f32 %v2362_v35, %v4597_v8  ;;  %v3599_v49 = vpop.eup %3598 }
 0x45b   : > { %v3601_v16 = vpop.eup %3600  ;;  %v2329_v38 = vadd.f32 1.0, %v3599_v49  ;;  %v2318_v22 = vmul.f32 1.442695, %v2306_v28  ;;  %v3369_v28 = vld [vmem:[%s4822_s14 + $0x78] sm:$0xff]  ;;  %v3368_v49 = vld [vmem:[%s4822_s14 + $0x70] sm:$0xff] }
 0x45c   : > { %v2462_v51 = vpack.c.bf16 %v2455_v19, %v2454_v3  ;;  %v2248_v21 = vpop.f32.mrf.mxu1  ;;  %v2365_v41 = vmul.f32 %v3601_v16, %v2328_v32  ;;  %vm2370_vm8 = vweird.f32 %v3601_v16  ;;  %2761 = vmatpush.bf16.msrb.mxu3 %v3369_v28 }
 0x45d   : > { %3602 = vrcp.f32 %v2329_v38  ;;  %v2249_v34 = vadd.f32 %v4585_v7, %v2248_v21  ;;  %vm2371_vm10 = vmor %vm2369_vm9, %vm2370_vm8  ;;  %v2390_v63 = vand.u32 2147483648, %v2329_v38  ;;  %v2388_v1 = vand.u32 2147483647, %v2329_v38 }
 0x45e   : > { %2525 = vmatmul.bf16.vlgmr.msrb.gmra.mxu2 %v2462_v51  ;;  %3604 = vpow2.f32 %v2318_v22  ;;  %v2366_v0 = vsub.f32 1.0, %v2365_v41  ;;  %vm2384_vm13 = vweird.f32 %v2329_v38 }
 0x45f   : > { %v4631_v4 = vadd.f32 %v2249_v34, %v4417_v55  ;;  %v2391_v47 = vor.u32 1.1754944e-38, %v2390_v63  ;;  %vm2389_vm15 = vcmp.eq.f32.partialorder %v2388_v1, 8.507059e+37  ;;  %v3367_v34 = vld [vmem:[%s4822_s14 + $0x68] sm:$0xff] }
 0x460   : > { %v2367_v42 = vmul.f32 %v3601_v16, %v2366_v0  ;;  %2762 = vmatpush.bf16.msrb.mxu3 %v3368_v49 }
 0x461   : > { %v2307_v46 = vsub.f32 0.0, %v4631_v4 }
 0x462   : > { %v2368_v52 = vadd.f32 %v3601_v16, %v2367_v42 }
 0x463   : > { %v3603_v53 = vpop.eup %3602  ;;  %v2320_v23 = vmul.f32 1.442695, %v2307_v46 }
 0x464   : > { %v3605_v45 = vpop.eup %3604  ;;  %v2380_v24 = vmul.f32 %v3603_v53, %v2329_v38  ;;  %v2372_v14 = vsel %vm2371_vm10, %v3601_v16, %v2368_v52  ;;  %vm2385_vm11 = vweird.f32 %v3603_v53  ;;  %2763 = vmatpush.bf16.msrb.mxu3 %v3367_v34 }
 0x465   : > { %v4634_v50 = vadd.f32 1.0, %v3605_v45  ;;  %3606 = vpow2.f32 %v2320_v23  ;;  %v2377_v11 = vsel %vm2374_vm12, %v2376_v48, %v2372_v14  ;;  %vm2386_vm14 = vmor %vm2384_vm13, %vm2385_vm11 }
 0x466   : > { %v2381_v39 = vsub.f32 1.0, %v2380_v24 }
 0x467   : > { %v2251_v61 = vpop.f32.mrf.mxu1  ;;  %3608 = vrcp.f32 %v4634_v50  ;;  %v2405_v3 = vand.u32 2147483648, %v4634_v50  ;;  %vm2399_vm1 = vweird.f32 %v4634_v50 }
 0x468   : > { %v2252_v55 = vadd.f32 %v4585_v7, %v2251_v61  ;;  %v2382_v56 = vmul.f32 %v3603_v53, %v2381_v39 }
 0x469   : > { %v2406_v21 = vor.u32 1.1754944e-38, %v2405_v3 }
 0x46a   : > { %v4639_v57 = vadd.f32 %v2252_v55, %v4460_v31  ;;  %v2383_v5 = vadd.f32 %v3603_v53, %v2382_v56  ;;  %v2456_v31 = vmul.f32 %v2377_v11, %v4605_v37 }
 0x46b   : > { %v3607_v9 = vpop.eup %3606 }
 0x46c   : > { %v2308_v10 = vsub.f32 0.0, %v4639_v57  ;;  %v2331_v12 = vadd.f32 1.0, %v3607_v9  ;;  %v2387_v60 = vsel %vm2386_vm14, %v3603_v53, %v2383_v5 }
 0x46d   : > { %v3609_v15 = vpop.eup %3608  ;;  %v2392_v13 = vsel %vm2389_vm15, %v2391_v47, %v2387_v60 }
 0x46e   : > { %v2322_v17 = vmul.f32 1.442695, %v2308_v10  ;;  %3610 = vrcp.f32 %v2331_v12  ;;  %v2457_v58 = vmul.f32 %v2392_v13, %v4613_v20  ;;  %v2395_v25 = vmul.f32 %v3609_v15, %v4634_v50 }
 0x46f   : > { %v2253_v43 = vpop.f32.mrf.mxu1  ;;  %vm2400_vm0 = vweird.f32 %v3609_v15  ;;  %v2420_v16 = vand.u32 2147483648, %v2331_v12  ;;  %v2418_v51 = vand.u32 2147483647, %v2331_v12  ;;  %vm2414_vm5 = vweird.f32 %v2331_v12 }
 0x470   : > { %3612 = vpow2.f32 %v2322_v17  ;;  %v2254_v32 = vadd.f32 %v4585_v7, %v2253_v43  ;;  %v2463_v54 = vpack.c.bf16 %v2457_v58, %v2456_v31  ;;  %v2396_v26 = vsub.f32 1.0, %v2395_v25  ;;  %vm2401_vm2 = vmor %vm2399_vm1, %vm2400_vm0  ;;  %v4669_v25 = vld [vmem:[%s4821_s13 + $0x1] ss:$0 sm:$0xff] }
 0x471   : > { %v2421_v42 = vor.u32 1.1754944e-38, %v2420_v16  ;;  %vm2419_vm7 = vcmp.eq.f32.partialorder %v2418_v51, 8.507059e+37  ;;  %vm2832_vm0 = vcmask 1043456  }
 0x472   : > { %v4647_v62 = vadd.f32 %v2254_v32, %v4473_v33  ;;  %2530 = vmatmul.bf16.gmra.mxu2 %v2463_v54  ;;  %v2397_v27 = vmul.f32 %v3609_v15, %v2396_v26  ;;  %v2403_v33 = vand.u32 2147483647, %v4634_v50  ;;  %v3366_v26 = vld [vmem:[%s4822_s14 + $0x60] sm:$0xff] }
 0x473   : > { %2764 = vmatpush.bf16.msrb.mxu3 %v3366_v26 }
 0x474   : > { %v2309_v36 = vsub.f32 0.0, %v4647_v62  ;;  %v3611_v29 = vpop.eup %3610  ;;  %v2398_v6 = vadd.f32 %v3609_v15, %v2397_v27  ;;  %vm2404_vm4 = vcmp.eq.f32.partialorder %v2403_v33, 8.507059e+37  ;;  %v2818_v27 = vld [vmem:[%s4824_s16] sm:$0xf] }
 0x475   : > { %v2410_v35 = vmul.f32 %v3611_v29, %v2331_v12  ;;  %vm2415_vm3 = vweird.f32 %v3611_v29 }
 0x476   : > { %v3613_v18 = vpop.eup %3612  ;;  %v2324_v2 = vmul.f32 1.442695, %v2309_v36  ;;  %v2402_v38 = vsel %vm2401_vm2, %v3609_v15, %v2398_v6  ;;  %vm2416_vm6 = vmor %vm2414_vm5, %vm2415_vm3  ;;  %v2834_v36 = vsel %vm2832_vm0, %v2818_v27, 0 }
 0x477   : > { %v2332_v7 = vadd.f32 1.0, %v3613_v18  ;;  %v2411_v19 = vsub.f32 1.0, %v2410_v35  ;;  %v2407_v0 = vsel %vm2404_vm4, %v2406_v21, %v2402_v38  ;;  %2843 = vmatpush.bf16.msra.mxu0 %v2834_v36  ;;  %3378 = vmatpush.bf16.msra.mxu2 %v2834_v36  ;;  %v3365_v35 = vld [vmem:[%s4822_s14 + $0x58] sm:$0xff] }
 0x478   : > { %3614 = vpow2.f32 %v2324_v2  ;;  %v2458_v24 = vmul.f32 %v2407_v0, %v4624_v40  ;;  %2765 = vmatpush.bf16.msrb.mxu3 %v3365_v35 }
 0x479   : > { %3616 = vrcp.f32 %v2332_v7  ;;  %v2412_v22 = vmul.f32 %v3611_v29, %v2411_v19  ;;  %v2435_v56 = vand.u32 2147483648, %v2332_v7  ;;  %vm2429_vm9 = vweird.f32 %v2332_v7  ;;  %v3364_v19 = vld [vmem:[%s4822_s14 + $0x50] sm:$0xff] }
 0x47a   : > { %v2433_v1 = vand.u32 2147483647, %v2332_v7 }
 0x47b   : > { %v2413_v41 = vadd.f32 %v3611_v29, %v2412_v22  ;;  %v2436_v47 = vor.u32 1.1754944e-38, %v2435_v56 }
 0x47c   : > { %vm2434_vm12 = vcmp.eq.f32.partialorder %v2433_v1, 8.507059e+37  ;;  %2766 = vmatpush.bf16.msrb.mxu3 %v3364_v19 }
 0x47d   : > { %v2417_v53 = vsel %vm2416_vm6, %v3611_v29, %v2413_v41  ;;  %v3363_v41 = vld [vmem:[%s4822_s14 + $0x48] sm:$0xff] }
 0x47e   : > { %v3615_v46 = vpop.eup %3614  ;;  %v2422_v52 = vsel %vm2419_vm7, %v2421_v42, %v2417_v53  ;;  %v3362_v53 = vld [vmem:[%s4822_s14 + $0x40] sm:$0xff] }
 0x47f   : > { %v3617_v23 = vpop.eup %3616  ;;  %v2333_v45 = vadd.f32 1.0, %v3615_v46  ;;  %v2459_v50 = vmul.f32 %v2422_v52, %v4631_v4 }
 0x480   : > { %v2425_v59 = vmul.f32 %v3617_v23, %v2332_v7  ;;  %vm2430_vm8 = vweird.f32 %v3617_v23  ;;  %2767 = vmatpush.bf16.msrb.mxu3 %v3363_v41 }
 0x481   : > { %3618 = vrcp.f32 %v2333_v45  ;;  %v2464_v61 = vpack.c.bf16 %v2459_v50, %v2458_v24  ;;  %vm2431_vm10 = vmor %vm2429_vm9, %vm2430_vm8  ;;  %v2450_v5 = vand.u32 2147483648, %v2333_v45  ;;  %v2448_v11 = vand.u32 2147483647, %v2333_v45 }
 0x482   : > { %v2426_v44 = vsub.f32 1.0, %v2425_v59  ;;  %vm2444_vm13 = vweird.f32 %v2333_v45  ;;  %vm2819_vm9 = vcmask 64512  }
 0x483   : > { %2535 = vmatmul.bf16.gmra.mxu2 %v2464_v61  ;;  %v2451_v15 = vor.u32 1.1754944e-38, %v2450_v5  ;;  %vm2449_vm15 = vcmp.eq.f32.partialorder %v2448_v11, 8.507059e+37 }
 0x484   : > { %v2427_v39 = vmul.f32 %v3617_v23, %v2426_v44  ;;  %2768 = vmatpush.bf16.msrb.mxu3 %v3362_v53 }
 0x486   : > { %v2428_v63 = vadd.f32 %v3617_v23, %v2427_v39 }
 0x487   : > { %v3619_v55 = vpop.eup %3618 }
 0x488   : > { %v2440_v14 = vmul.f32 %v3619_v55, %v2333_v45  ;;  %v2432_v9 = vsel %vm2431_vm10, %v3617_v23, %v2428_v63  ;;  %vm2445_vm11 = vweird.f32 %v3619_v55 }
 0x489   : > { %v2437_v60 = vsel %vm2434_vm12, %v2436_v47, %v2432_v9  ;;  %vm2446_vm14 = vmor %vm2444_vm13, %vm2445_vm11 }
 0x48a   : > { %v2441_v48 = vsub.f32 1.0, %v2440_v14  ;;  %v2460_v43 = vmul.f32 %v2437_v60, %v4639_v57 }
 0x48c   : > { %v2442_v10 = vmul.f32 %v3619_v55, %v2441_v48 }
 0x48e   : > { %v2443_v12 = vadd.f32 %v3619_v55, %v2442_v10 }
 0x490   : > { %v2447_v17 = vsel %vm2446_vm14, %v3619_v55, %v2443_v12 }
 0x491   : > { %v2452_v13 = vsel %vm2449_vm15, %v2451_v15, %v2447_v17 }
 0x492   : > { %v2461_v31 = vmul.f32 %v2452_v13, %v4647_v62  ;;  %v2806_v13 = vld [vmem:[%s4715_s21] sm:$0xff] }
 0x494   : > { %v2465_v58 = vpack.c.bf16 %v2461_v31, %v2460_v43  ;;  %v2807_v43 = vld [vmem:[%s4715_s21 + $0x8] sm:$0xff] }
 0x496   : > { %2540 = vmatmul.bf16.gmra.mxu2 %v2465_v58  ;;  %v2814_v58 = vpack.c.bf16 %v2807_v43, %v2806_v13 }
 0x498   : > { %3300 = vmatmul.msk.bf16.vlgmr.msra.gmra.mxu0 %vm2819_vm9, %v2814_v58  ;;  %v2812_v58 = vld [vmem:[%s4715_s21 + $0x30] sm:$0xff] }
 0x4e1   : > { %v2526_v32 = vpop.f32.mrf.mxu2 }
 0x4e2   : > { %v4672_v54 = vadd.f32 %v4669_v25, %v2526_v32 }
 0x4e4   : > { %v2546_v29 = vsub.f32 0.0, %v4672_v54 }
 0x4e6   : > { %v2554_v18 = vmul.f32 1.442695, %v2546_v29 }
 0x4e8   : > { %3620 = vpow2.f32 %v2554_v18 }
 0x4e9   : > { %v2528_v2 = vpop.f32.mrf.mxu2 }
 0x4ea   : > { %v4682_v6 = vadd.f32 %v4669_v25, %v2528_v2 }
 0x4ec   : > { %v2547_v28 = vsub.f32 0.0, %v4682_v6 }
 0x4ee   : > { %v3621_v7 = vpop.eup %3620  ;;  %v2556_v3 = vmul.f32 1.442695, %v2547_v28 }
 0x4ef   : > { %v2570_v33 = vadd.f32 1.0, %v3621_v7 }
 0x4f0   : > { %3622 = vpow2.f32 %v2556_v3 }
 0x4f1   : > { %3624 = vrcp.f32 %v2570_v33  ;;  %v2589_v59 = vand.u32 2147483648, %v2570_v33  ;;  %vm2583_vm2 = vweird.f32 %v2570_v33  ;;  %v2587_v44 = vand.u32 2147483647, %v2570_v33 }
 0x4f3   : > { %v2590_v9 = vor.u32 1.1754944e-38, %v2589_v59  ;;  %vm2588_vm5 = vcmp.eq.f32.partialorder %v2587_v44, 8.507059e+37 }
 0x4f5   : > { %v2531_v16 = vpop.f32.mrf.mxu2 }
 0x4f6   : > { %v3623_v49 = vpop.eup %3622  ;;  %v4692_v51 = vadd.f32 %v4669_v25, %v2531_v16 }
 0x4f7   : > { %v3625_v38 = vpop.eup %3624  ;;  %v2571_v22 = vadd.f32 1.0, %v3623_v49 }
 0x4f8   : > { %v2579_v21 = vmul.f32 %v3625_v38, %v2570_v33  ;;  %v2548_v0 = vsub.f32 0.0, %v4692_v51  ;;  %vm2584_vm1 = vweird.f32 %v3625_v38 }
 0x4f9   : > { %3626 = vrcp.f32 %v2571_v22  ;;  %vm4705_vm3 = vmor %vm2583_vm2, %vm2584_vm1  ;;  %v2604_v63 = vand.u32 2147483648, %v2571_v22  ;;  %v2602_v5 = vand.u32 2147483647, %v2571_v22  ;;  %vm2598_vm6 = vweird.f32 %v2571_v22 }
 0x4fa   : > { %v2580_v34 = vsub.f32 1.0, %v2579_v21  ;;  %v2558_v46 = vmul.f32 1.442695, %v2548_v0 }
 0x4fb   : > { %v2605_v12 = vor.u32 1.1754944e-38, %v2604_v63  ;;  %vm2603_vm8 = vcmp.eq.f32.partialorder %v2602_v5, 8.507059e+37 }
 0x4fc   : > { %v2581_v42 = vmul.f32 %v3625_v38, %v2580_v34  ;;  %3628 = vpow2.f32 %v2558_v46 }
 0x4fd   : > { %v2533_v23 = vpop.f32.mrf.mxu2 }
 0x4fe   : > { %v4702_v52 = vadd.f32 %v4669_v25, %v2533_v23  ;;  %v2582_v24 = vadd.f32 %v3625_v38, %v2581_v42  ;;  %v2808_v23 = vld [vmem:[%s4715_s21 + $0x10] sm:$0xff] }
 0x4ff   : > { %v3627_v45 = vpop.eup %3626 }
 0x500   : > { %v2594_v50 = vmul.f32 %v3627_v45, %v2571_v22  ;;  %v2549_v61 = vsub.f32 0.0, %v4702_v52  ;;  %v2586_v1 = vsel %vm4705_vm3, %v3625_v38, %v2582_v24  ;;  %vm2599_vm4 = vweird.f32 %v3627_v45 }
 0x501   : > { %v2591_v47 = vsel %vm2588_vm5, %v2590_v9, %v2586_v1  ;;  %vm2600_vm7 = vmor %vm2598_vm6, %vm2599_vm4 }
 0x502   : > { %v2595_v39 = vsub.f32 1.0, %v2594_v50  ;;  %v2560_v14 = vmul.f32 1.442695, %v2549_v61  ;;  %v3629_v56 = vpop.eup %3628  ;;  %v2698_v32 = vmul.f32 %v2591_v47, %v4672_v54 }
 0x503   : > { %v2572_v10 = vadd.f32 1.0, %v3629_v56 }
 0x504   : > { %v2596_v48 = vmul.f32 %v3627_v45, %v2595_v39  ;;  %3630 = vpow2.f32 %v2560_v14 }
 0x505   : > { %3632 = vrcp.f32 %v2572_v10  ;;  %v2619_v21 = vand.u32 2147483648, %v2572_v10  ;;  %vm2613_vm11 = vweird.f32 %v2572_v10  ;;  %v2617_v34 = vand.u32 2147483647, %v2572_v10 }
 0x506   : > { %v2597_v11 = vadd.f32 %v3627_v45, %v2596_v48  ;;  %v2536_v60 = vpop.f32.mrf.mxu2 }
 0x507   : > { %v4718_v17 = vadd.f32 %v4669_v25, %v2536_v60  ;;  %v2620_v44 = vor.u32 1.1754944e-38, %v2619_v21  ;;  %vm2618_vm14 = vcmp.eq.f32.partialorder %v2617_v34, 8.507059e+37 }
 0x508   : > { %v2601_v15 = vsel %vm2600_vm7, %v3627_v45, %v2597_v11  ;;  %v2809_v45 = vld [vmem:[%s4715_s21 + $0x18] sm:$0xff] }
 0x509   : > { %v2606_v31 = vsel %vm2603_vm8, %v2605_v12, %v2601_v15  ;;  %v2550_v27 = vsub.f32 0.0, %v4718_v17  ;;  %v2815_v61 = vpack.c.bf16 %v2809_v45, %v2808_v23 }
 0x50a   : > { %v2699_v26 = vmul.f32 %v2606_v31, %v4682_v6  ;;  %v3631_v36 = vpop.eup %3630 }
 0x50b   : > { %v2573_v29 = vadd.f32 1.0, %v3631_v36  ;;  %v2562_v18 = vmul.f32 1.442695, %v2550_v27  ;;  %v3633_v35 = vpop.eup %3632  ;;  %3301 = vmatmul.msk.bf16.gmra.mxu0 %vm2819_vm9, %v2815_v61  ;;  %v2810_v36 = vld [vmem:[%s4715_s21 + $0x20] sm:$0xff] }
 0x50c   : > { %v2706_v2 = vpack.c.bf16 %v2699_v26, %v2698_v32  ;;  %v2609_v28 = vmul.f32 %v3633_v35, %v2572_v10  ;;  %vm2614_vm10 = vweird.f32 %v3633_v35  ;;  %v2813_v26 = vld [vmem:[%s4715_s21 + $0x38] sm:$0xff] }
 0x50d   : > { %3634 = vrcp.f32 %v2573_v29  ;;  %vm4732_vm12 = vmor %vm2613_vm11, %vm2614_vm10  ;;  %v2632_v46 = vand.u32 2147483647, %v2573_v29  ;;  %v2634_v53 = vand.u32 2147483648, %v2573_v29  ;;  %vm2628_vm15 = vweird.f32 %v2573_v29 }
 0x50e   : > { %2769 = vmatmul.bf16.vlgmr.msrb.gmra.mxu3 %v2706_v2  ;;  %3636 = vpow2.f32 %v2562_v18  ;;  %v2538_v7 = vpop.f32.mrf.mxu2  ;;  %v2610_v3 = vsub.f32 1.0, %v2609_v28 }
 0x50f   : > { %v4727_v54 = vadd.f32 %v4669_v25, %v2538_v7  ;;  %v2635_v56 = vor.u32 1.1754944e-38, %v2634_v53  ;;  %vm2633_vm1 = vcmp.eq.f32.partialorder %v2632_v46, 8.507059e+37 }
 0x510   : > { %v2611_v6 = vmul.f32 %v3633_v35, %v2610_v3 }
 0x511   : > { %v2551_v33 = vsub.f32 0.0, %v4727_v54 }
 0x512   : > { %v2612_v38 = vadd.f32 %v3633_v35, %v2611_v6 }
 0x513   : > { %v3635_v19 = vpop.eup %3634  ;;  %v2564_v49 = vmul.f32 1.442695, %v2551_v33 }
 0x514   : > { %v3637_v16 = vpop.eup %3636  ;;  %v2624_v22 = vmul.f32 %v3635_v19, %v2573_v29  ;;  %v2616_v24 = vsel %vm4732_vm12, %v3633_v35, %v2612_v38  ;;  %vm2629_vm13 = vweird.f32 %v3635_v19  ;;  %v2817_v29 = vpack.c.bf16 %v2813_v26, %v2812_v58 }
 0x515   : > { %v4730_v41 = vadd.f32 1.0, %v3637_v16  ;;  %3638 = vpow2.f32 %v2564_v49  ;;  %v2621_v14 = vsel %vm2618_vm14, %v2620_v44, %v2616_v24  ;;  %vm2630_vm0 = vmor %vm2628_vm15, %vm2629_vm13  ;;  %v2845_v26 = vpop.f32.mrf.mxu0 }
 0x516   : > { %v2625_v0 = vsub.f32 1.0, %v2624_v22  ;;  %v2700_v47 = vmul.f32 %v2621_v14, %v4692_v51  ;;  %v2811_v51 = vld [vmem:[%s4715_s21 + $0x28] sm:$0xff]  ;;  %3303 = vmatmul.msk.bf16.vlgmr.msra.gmra.mxu2 %vm2819_vm9, %v2817_v29 }
 0x517   : > { %3640 = vrcp.f32 %v4730_v41  ;;  %v2816_v3 = vpack.c.bf16 %v2811_v51, %v2810_v36  ;;  %vm2643_vm3 = vweird.f32 %v4730_v41  ;;  %v2647_v6 = vand.u32 2147483647, %v4730_v41 }
 0x518   : > { %v2626_v50 = vmul.f32 %v3635_v19, %v2625_v0 }
 0x519   : > { %v2541_v59 = vpop.f32.mrf.mxu2  ;;  %vm2648_vm6 = vcmp.eq.f32.partialorder %v2647_v6, 8.507059e+37 }
 0x51a   : > { %v4742_v39 = vadd.f32 %v4669_v25, %v2541_v59  ;;  %v2627_v55 = vadd.f32 %v3635_v19, %v2626_v50 }
 0x51b   : > { %v3639_v63 = vpop.eup %3638  ;;  %3302 = vmatmul.msk.bf16.gmra.mxu0 %vm2819_vm9, %v2816_v3 }
 0x51c   : > { %v2552_v1 = vsub.f32 0.0, %v4742_v39  ;;  %v2631_v48 = vsel %vm2630_vm0, %v3635_v19, %v2627_v55  ;;  %v2575_v5 = vadd.f32 1.0, %v3639_v63 }
 0x51d   : > { %v3641_v9 = vpop.eup %3640  ;;  %v2636_v10 = vsel %vm2633_vm1, %v2635_v56, %v2631_v48  ;;  %v2847_v29 = vpop.f32.mrf.mxu0 }
 0x51e   : > { %v2566_v11 = vmul.f32 1.442695, %v2552_v1  ;;  %v2701_v12 = vmul.f32 %v2636_v10, %v4702_v52  ;;  %v2639_v60 = vmul.f32 %v3641_v9, %v4730_v41  ;;  %3642 = vrcp.f32 %v2575_v5 }
 0x51f   : > { %vm2644_vm2 = vweird.f32 %v3641_v9  ;;  %v2664_v19 = vand.u32 2147483648, %v2575_v5  ;;  %v2662_v38 = vand.u32 2147483647, %v2575_v5  ;;  %vm2658_vm7 = vweird.f32 %v2575_v5 }
 0x520   : > { %3644 = vpow2.f32 %v2566_v11  ;;  %v2640_v15 = vsub.f32 1.0, %v2639_v60  ;;  %v2707_v43 = vpack.c.bf16 %v2701_v12, %v2700_v47  ;;  %vm2645_vm4 = vmor %vm2643_vm3, %vm2644_vm2 }
 0x521   : > { %v2543_v13 = vpop.f32.mrf.mxu2  ;;  %v2665_v0 = vor.u32 1.1754944e-38, %v2664_v19  ;;  %vm2663_vm10 = vcmp.eq.f32.partialorder %v2662_v38, 8.507059e+37 }
 0x522   : > { %v4750_v31 = vadd.f32 %v4669_v25, %v2543_v13  ;;  %v2641_v32 = vmul.f32 %v3641_v9, %v2640_v15  ;;  %2774 = vmatmul.bf16.gmra.mxu3 %v2707_v43  ;;  %v2649_v25 = vand.u32 2147483648, %v4730_v41 }
 0x524   : > { %v2553_v27 = vsub.f32 0.0, %v4750_v31  ;;  %v3643_v52 = vpop.eup %3642  ;;  %v2642_v2 = vadd.f32 %v3641_v9, %v2641_v32  ;;  %v2650_v22 = vor.u32 1.1754944e-38, %v2649_v25  ;;  %v3395_v32 = vld [vmem:[%s4823_s15 + $0x1] ss:$0 sm:$0xff] }
 0x525   : > { %v2654_v35 = vmul.f32 %v3643_v52, %v2575_v5  ;;  %vm2659_vm5 = vweird.f32 %v3643_v52 }
 0x526   : > { %v3645_v18 = vpop.eup %3644  ;;  %v2568_v28 = vmul.f32 1.442695, %v2553_v27  ;;  %v2646_v49 = vsel %vm2645_vm4, %v3641_v9, %v2642_v2  ;;  %vm2660_vm8 = vmor %vm2658_vm7, %vm2659_vm5 }
 0x527   : > { %v2576_v7 = vadd.f32 1.0, %v3645_v18  ;;  %v2655_v33 = vsub.f32 1.0, %v2654_v35  ;;  %v2651_v34 = vsel %vm2648_vm6, %v2650_v22, %v2646_v49 }
 0x528   : > { %3646 = vpow2.f32 %v2568_v28  ;;  %v2702_v45 = vmul.f32 %v2651_v34, %v4718_v17 }
 0x529   : > { %3648 = vrcp.f32 %v2576_v7  ;;  %v2656_v16 = vmul.f32 %v3643_v52, %v2655_v33  ;;  %v2679_v56 = vand.u32 2147483648, %v2576_v7  ;;  %vm2673_vm11 = vweird.f32 %v2576_v7 }
 0x52a   : > { %v2677_v1 = vand.u32 2147483647, %v2576_v7 }
 0x52b   : > { %v2657_v21 = vadd.f32 %v3643_v52, %v2656_v16  ;;  %v2680_v10 = vor.u32 1.1754944e-38, %v2679_v56 }
 0x52c   : > { %vm2678_vm14 = vcmp.eq.f32.partialorder %v2677_v1, 8.507059e+37 }
 0x52d   : > { %v2661_v41 = vsel %vm2660_vm8, %v3643_v52, %v2657_v21 }
 0x52e   : > { %v3647_v42 = vpop.eup %3646  ;;  %v2666_v53 = vsel %vm2663_vm10, %v2665_v0, %v2661_v41 }
 0x52f   : > { %v3649_v46 = vpop.eup %3648  ;;  %v2577_v23 = vadd.f32 1.0, %v3647_v42  ;;  %v2703_v24 = vmul.f32 %v2666_v53, %v4727_v54 }
 0x530   : > { %v2669_v50 = vmul.f32 %v3649_v46, %v2576_v7  ;;  %vm2674_vm9 = vweird.f32 %v3649_v46 }
 0x531   : > { %3650 = vrcp.f32 %v2577_v23  ;;  %v2708_v61 = vpack.c.bf16 %v2703_v24, %v2702_v45  ;;  %vm2675_vm12 = vmor %vm2673_vm11, %vm2674_vm9  ;;  %v2694_v5 = vand.u32 2147483648, %v2577_v23  ;;  %v2692_v54 = vand.u32 2147483647, %v2577_v23 }
 0x532   : > { %v2670_v59 = vsub.f32 1.0, %v2669_v50  ;;  %vm2688_vm15 = vweird.f32 %v2577_v23 }
 0x533   : > { %2779 = vmatmul.bf16.gmra.mxu3 %v2708_v61  ;;  %v2695_v12 = vor.u32 1.1754944e-38, %v2694_v5  ;;  %vm2693_vm1 = vcmp.eq.f32.partialorder %v2692_v54, 8.507059e+37 }
 0x534   : > { %v2671_v44 = vmul.f32 %v3649_v46, %v2670_v59 }
 0x536   : > { %v2672_v63 = vadd.f32 %v3649_v46, %v2671_v44 }
 0x537   : > { %v3651_v55 = vpop.eup %3650 }
 0x538   : > { %v2684_v14 = vmul.f32 %v3651_v55, %v2577_v23  ;;  %v2676_v9 = vsel %vm2675_vm12, %v3649_v46, %v2672_v63  ;;  %vm2689_vm13 = vweird.f32 %v3651_v55 }
 0x539   : > { %v2681_v47 = vsel %vm2678_vm14, %v2680_v10, %v2676_v9  ;;  %vm2690_vm0 = vmor %vm2688_vm15, %vm2689_vm13 }
 0x53a   : > { %v2685_v48 = vsub.f32 1.0, %v2684_v14  ;;  %v2704_v13 = vmul.f32 %v2681_v47, %v4742_v39 }
 0x53c   : > { %v2686_v17 = vmul.f32 %v3651_v55, %v2685_v48 }
 0x53e   : > { %v2687_v11 = vadd.f32 %v3651_v55, %v2686_v17 }
 0x540   : > { %v2691_v60 = vsel %vm2690_vm0, %v3651_v55, %v2687_v11 }
 0x541   : > { %v2696_v15 = vsel %vm2693_vm1, %v2695_v12, %v2691_v60 }
 0x542   : > { %v2705_v43 = vmul.f32 %v2696_v15, %v4750_v31 }
 0x544   : > { %v2709_v58 = vpack.c.bf16 %v2705_v43, %v2704_v13 }
 0x546   : > { %2784 = vmatmul.bf16.gmra.mxu3 %v2709_v58 }
 0x588   : > { %v2850_v2 = vpop.f32.mrf.mxu0 }
 0x590   : > { %v2852_v3 = vpop.f32.mrf.mxu0 }
 0x591   : > { %v2770_v27 = vpop.f32.mrf.mxu3 }
 0x592   : > { %v2771_v36 = vadd.f32 %v3395_v32, %v2770_v27 }
 0x594   : > { %v2790_v39 = vadd.f32 %v2771_v36, %v4589_v30 }
 0x596   : > { %2798 = vst [vmem:[%s4773_s29] sm:$0xff] %v2790_v39  ;;  %v2865_v31 = vmul.f32 %v2845_v26, %v2790_v39 }
 0x598   : > { %2873 = vst [vmem:[%s4780_s0] sm:$0xff] %v2865_v31  ;;  %v2855_v16 = vpop.f32.mrf.mxu0 }
 0x599   : > { %v2772_v51 = vpop.f32.mrf.mxu3  ;;  %v2860_v53 = vpop.f32.mrf.mxu2 }
 0x59a   : > { %v2773_v52 = vadd.f32 %v3395_v32, %v2772_v51 }
 0x59c   : > { %v2791_v18 = vadd.f32 %v2773_v52, %v4597_v8 }
 0x59e   : > { %2799 = vst [vmem:[%s4773_s29 + $0x8] sm:$0xff] %v2791_v18  ;;  %v2866_v30 = vmul.f32 %v2847_v29, %v2791_v18 }
 0x5a0   : > { %2874 = vst [vmem:[%s4780_s0 + $0x8] sm:$0xff] %v2866_v30  ;;  %v2857_v0 = vpop.f32.mrf.mxu0 }
 0x5a1   : > { %v2862_v59 = vpop.f32.mrf.mxu2 }
 0x5a5   : > { %v2775_v35 = vpop.f32.mrf.mxu3 }
 0x5a6   : > { %v2776_v28 = vadd.f32 %v3395_v32, %v2775_v35 }
 0x5a8   : > { %v2792_v25 = vadd.f32 %v2776_v28, %v4605_v37 }
 0x5aa   : > { %2800 = vst [vmem:[%s4773_s29 + $0x10] sm:$0xff] %v2792_v25  ;;  %v2867_v7 = vmul.f32 %v2850_v2, %v2792_v25 }
 0x5ac   : > { %2875 = vst [vmem:[%s4780_s0 + $0x10] sm:$0xff] %v2867_v7 }
 0x5ad   : > { %v2777_v6 = vpop.f32.mrf.mxu3 }
 0x5ae   : > { %v2778_v33 = vadd.f32 %v3395_v32, %v2777_v6 }
 0x5b0   : > { %v2793_v8 = vadd.f32 %v2778_v33, %v4613_v20 }
 0x5b2   : > { %2801 = vst [vmem:[%s4773_s29 + $0x18] sm:$0xff] %v2793_v8  ;;  %v2868_v19 = vmul.f32 %v2852_v3, %v2793_v8 }
 0x5b4   : > { %2876 = vst [vmem:[%s4780_s0 + $0x18] sm:$0xff] %v2868_v19 }
 0x5b6   : > { %v2780_v49 = vpop.f32.mrf.mxu3 }
 0x5b7   : > { %v2781_v38 = vadd.f32 %v3395_v32, %v2780_v49 }
 0x5b9   : > { %v2794_v37 = vadd.f32 %v2781_v38, %v4624_v40 }
 0x5bb   : > { %2802 = vst [vmem:[%s4773_s29 + $0x20] sm:$0xff] %v2794_v37  ;;  %v2869_v22 = vmul.f32 %v2855_v16, %v2794_v37 }
 0x5bd   : > { %2877 = vst [vmem:[%s4780_s0 + $0x20] sm:$0xff] %v2869_v22 }
 0x5be   : > { %v2782_v21 = vpop.f32.mrf.mxu3 }
 0x5bf   : > { %v2783_v34 = vadd.f32 %v3395_v32, %v2782_v21 }
 0x5c1   : > { %v2795_v20 = vadd.f32 %v2783_v34, %v4631_v4 }
 0x5c3   : > { %2803 = vst [vmem:[%s4773_s29 + $0x28] sm:$0xff] %v2795_v20  ;;  %v2870_v42 = vmul.f32 %v2857_v0, %v2795_v20 }
 0x5c5   : > { %2878 = vst [vmem:[%s4780_s0 + $0x28] sm:$0xff] %v2870_v42 }
 0x5c9   : > { %v2785_v41 = vpop.f32.mrf.mxu3 }
 0x5ca   : > { %v2786_v46 = vadd.f32 %v3395_v32, %v2785_v41 }
 0x5cc   : > { %v2796_v23 = vadd.f32 %v2786_v46, %v4639_v57 }
 0x5ce   : > { %2804 = vst [vmem:[%s4773_s29 + $0x30] sm:$0xff] %v2796_v23  ;;  %v2871_v40 = vmul.f32 %v2860_v53, %v2796_v23 }
 0x5d0   : > { %2879 = vst [vmem:[%s4780_s0 + $0x30] sm:$0xff] %v2871_v40 }
 0x5d1   : > { %v2787_v45 = vpop.f32.mrf.mxu3 }
 0x5d2   : > { %v2788_v24 = vadd.f32 %v3395_v32, %v2787_v45 }
 0x5d4   : > { %v2797_v50 = vadd.f32 %v2788_v24, %v4647_v62 }
 0x5d6   : > { %2805 = vst [vmem:[%s4773_s29 + $0x38] sm:$0xff] %v2797_v50  ;;  %v2872_v61 = vmul.f32 %v2862_v59, %v2797_v50 }
 0x5d8   : > { %2880 = vst [vmem:[%s4780_s0 + $0x38] sm:$0xff] %v2872_v61 }
 0x5d9 PF: > { %s29_s27 = sadd.s32 1, %s3666_s27  }
 0x5da   : > { %p26_p4 = scmp.ge.s32.totalorder %s29_s27, 4  }
 0x5dc   :  { %28 = sbr.rel (!%p26_p4) target bundleno = 4 (0x4), region = 140 }

// kernel: dime_module_forward.5
= control target key start
LH: loop header
LB: loop body
LE: loop exit
PB: predicated region body
PF: predicated region fallthrough
CT: control target
= control target key end

     0   :  { %s795_s15 = smov 0   ;;  %s897_s0 = inlined_call_operand.vmem [shape: f32[32,128], index: 0, kind: input, shape index: {}]   ;;  %s898_s1 = inlined_call_operand.vmem [shape: bf16[2,128,128], index: 1, kind: input, shape index: {}]   ;;  %s899_s2 = inlined_call_operand.vmem [shape: f32[2,1,128], index: 2, kind: input, shape index: {}]   ;;  %s900_s3 = inlined_call_operand.vmem [shape: bf16[128,128], index: 3, kind: input, shape index: {}]   ;;  %s901_s4 = inlined_call_operand.vmem [shape: f32[32,128], index: 4, kind: output, shape index: {}]  }
   0x1 LB: > { %s588_s16 = sadd.s32 4294967295, %s768_s15   ;;  %p592_p0 = scmp.ge.s32.totalorder %s768_s15, 1  ;;  %s768_s15 = sphi %s795_s15, %s14_s15  }
   0x2   : > { %p163_p1 = scmp.lt.s32.totalorder %s768_s15, 3 }
   0x4   : > { %p164_p2 = pnand %p592_p0, %p163_p1 }
   0x5   : > { %s593_s23 = sshll.u32 (!%p164_p2), %s588_s16, 1 }
   0x6   : > { %167 = sbr.rel (%p164_p2) target bundleno = 524 (0x20c), region = 36  ;;  %p190_p3 = scmp.lt.s32.totalorder (!%p164_p2), %s593_s23, 3 }
   0xb   : > { %v719_v0 = vld [vmem:[%s898_s1 + $0x38] sm:$0xff]  ;;  %v718_v1 = vld [vmem:[%s898_s1 + $0x30] sm:$0xff]  ;;  %v717_v2 = vld [vmem:[%s898_s1 + $0x28] sm:$0xff]  ;;  %s903_s23 = smov (!%p190_p3, %s593_s23), 3 }
   0xc   : > { %272 = vmatpush.bf16.msra.mxu0 %v719_v0  ;;  %v716_v3 = vld [vmem:[%s898_s1 + $0x20] sm:$0xff]  ;;  %v715_v4 = vld [vmem:[%s898_s1 + $0x18] sm:$0xff]  ;;  %v714_v5 = vld [vmem:[%s898_s1 + $0x10] sm:$0xff]  ;;  %s594_s30 = sshll.u32 %s903_s23, 3 }
   0xd   : > { %v713_v6 = vld [vmem:[%s898_s1 + $0x8] sm:$0xff]  ;;  %s193_s9 = scalar_lea.vmem %s897_s0, %s594_s30  ;;  %v712_v7 = vld [vmem:[%s898_s1] sm:$0xff]  ;;  %v727_v11 = vld [vmem:[%s898_s1 + $0x78] sm:$0xff]  ;;  %s199_s29 = scalar_lea.vmem %s901_s4, %s594_s30 }
   0xe   : > { %v201_v8 = vld [vmem:[%s193_s9] sm:$0xff]  ;;  %v202_v9 = vld [vmem:[%s193_s9 + $0x8] sm:$0xff]  ;;  %397 = vmatpush.bf16.msra.mxu1 %v727_v11  ;;  %v726_v12 = vld [vmem:[%s898_s1 + $0x70] sm:$0xff] }
   0xf   : > { %v203_v10 = vpack.c.bf16 %v202_v9, %v201_v8  ;;  %v725_v13 = vld [vmem:[%s898_s1 + $0x68] sm:$0xff]  ;;  %v724_v14 = vld [vmem:[%s898_s1 + $0x60] sm:$0xff]  ;;  %v723_v15 = vld [vmem:[%s898_s1 + $0x58] sm:$0xff] }
  0x10   : > { %273 = vmatpush.bf16.msra.mxu0 %v718_v1  ;;  %v744_v16 = vld [vmem:[%s899_s2] ss:$0 sm:$0xff]  ;;  %v722_v18 = vld [vmem:[%s898_s1 + $0x50] sm:$0xff]  ;;  %v721_v21 = vld [vmem:[%s898_s1 + $0x48] sm:$0xff] }
  0x11   : > { %v720_v24 = vld [vmem:[%s898_s1 + $0x40] sm:$0xff]  ;;  %v735_v55 = vld [vmem:[%s900_s3 + $0x38] sm:$0xff]  ;;  %v734_v56 = vld [vmem:[%s900_s3 + $0x30] sm:$0xff] }
  0x12   : > { %398 = vmatpush.bf16.msra.mxu1 %v726_v12  ;;  %516 = vmatpush.bf16.msra.mxu2 %v735_v55  ;;  %v733_v57 = vld [vmem:[%s900_s3 + $0x28] sm:$0xff]  ;;  %v732_v58 = vld [vmem:[%s900_s3 + $0x20] sm:$0xff]  ;;  %v731_v59 = vld [vmem:[%s900_s3 + $0x18] sm:$0xff] }
  0x13   : > { %v745_v60 = vld [vmem:[%s899_s2 + $0x1] ss:$0 sm:$0xff]  ;;  %v730_v62 = vld [vmem:[%s900_s3 + $0x10] sm:$0xff]  ;;  %v729_v1 = vld [vmem:[%s900_s3 + $0x8] sm:$0xff] }
  0x14   : > { %274 = vmatpush.bf16.msra.mxu0 %v717_v2 }
  0x16   : > { %399 = vmatpush.bf16.msra.mxu1 %v725_v13  ;;  %517 = vmatpush.bf16.msra.mxu2 %v734_v56 }
  0x18   : > { %275 = vmatpush.bf16.msra.mxu0 %v716_v3 }
  0x1a   : > { %400 = vmatpush.bf16.msra.mxu1 %v724_v14  ;;  %518 = vmatpush.bf16.msra.mxu2 %v733_v57 }
  0x1c   : > { %276 = vmatpush.bf16.msra.mxu0 %v715_v4  ;;  %v728_v4 = vld [vmem:[%s900_s3] sm:$0xff] }
  0x1e   : > { %401 = vmatpush.bf16.msra.mxu1 %v723_v15  ;;  %519 = vmatpush.bf16.msra.mxu2 %v732_v58 }
  0x20   : > { %277 = vmatpush.bf16.msra.mxu0 %v714_v5 }
  0x22   : > { %402 = vmatpush.bf16.msra.mxu1 %v722_v18  ;;  %520 = vmatpush.bf16.msra.mxu2 %v731_v59 }
  0x24   : > { %278 = vmatpush.bf16.msra.mxu0 %v713_v6 }
  0x26   : > { %403 = vmatpush.bf16.msra.mxu1 %v721_v21  ;;  %521 = vmatpush.bf16.msra.mxu2 %v730_v62 }
  0x28   : > { %279 = vmatpush.bf16.msra.mxu0 %v712_v7 }
  0x2a   : > { %404 = vmatpush.bf16.msra.mxu1 %v720_v24  ;;  %522 = vmatpush.bf16.msra.mxu2 %v729_v1 }
  0x2b   : > { %280 = vmatmul.bf16.vlgmr.msra.gmra.mxu0 %v203_v10 }
  0x2e   : > { %523 = vmatpush.bf16.msra.mxu2 %v728_v4 }
  0xa8   : > { %v281_v17 = vpop.f32.mrf.mxu0 }
  0xa9   : > { %v282_v19 = vadd.f32 %v744_v16, %v281_v17 }
  0xab   : > { %v286_v20 = vsub.f32 0.0, %v282_v19 }
  0xad   : > { %v288_v22 = vmul.f32 1.442695, %v286_v20 }
  0xaf   : > { %746 = vpow2.f32 %v288_v22 }
  0xb0   : > { %v283_v23 = vpop.f32.mrf.mxu0 }
  0xb1   : > { %v284_v25 = vadd.f32 %v744_v16, %v283_v23 }
  0xb3   : > { %v287_v26 = vsub.f32 0.0, %v284_v25 }
  0xb5   : > { %v747_v27 = vpop.eup %746  ;;  %v290_v28 = vmul.f32 1.442695, %v287_v26 }
  0xb6   : > { %v292_v29 = vadd.f32 1.0, %v747_v27 }
  0xb7   : > { %748 = vpow2.f32 %v290_v28 }
  0xb8   : > { %750 = vrcp.f32 %v292_v29  ;;  %v305_v39 = vand.u32 2147483648, %v292_v29  ;;  %vm299_vm1 = vweird.f32 %v292_v29  ;;  %v303_v40 = vand.u32 2147483647, %v292_v29 }
  0xba   : > { %v306_v46 = vor.u32 1.1754944e-38, %v305_v39  ;;  %vm304_vm4 = vcmp.eq.f32.partialorder %v303_v40, 8.507059e+37 }
  0xbd   : > { %v749_v30 = vpop.eup %748 }
  0xbe   : > { %v751_v31 = vpop.eup %750  ;;  %v293_v32 = vadd.f32 1.0, %v749_v30 }
  0xbf   : > { %v295_v33 = vmul.f32 %v751_v31, %v292_v29  ;;  %vm300_vm0 = vweird.f32 %v751_v31 }
  0xc0   : > { %752 = vrcp.f32 %v293_v32  ;;  %vm301_vm2 = vmor %vm299_vm1, %vm300_vm0  ;;  %v320_v42 = vand.u32 2147483648, %v293_v32  ;;  %v318_v45 = vand.u32 2147483647, %v293_v32  ;;  %vm314_vm5 = vweird.f32 %v293_v32 }
  0xc1   : > { %v296_v34 = vsub.f32 1.0, %v295_v33 }
  0xc2   : > { %v321_v49 = vor.u32 1.1754944e-38, %v320_v42  ;;  %vm319_vm7 = vcmp.eq.f32.partialorder %v318_v45, 8.507059e+37 }
  0xc3   : > { %v297_v35 = vmul.f32 %v751_v31, %v296_v34 }
  0xc5   : > { %v298_v37 = vadd.f32 %v751_v31, %v297_v35 }
  0xc6   : > { %v753_v36 = vpop.eup %752 }
  0xc7   : > { %v310_v38 = vmul.f32 %v753_v36, %v293_v32  ;;  %v302_v43 = vsel %vm301_vm2, %v751_v31, %v298_v37  ;;  %vm315_vm3 = vweird.f32 %v753_v36 }
  0xc8   : > { %v307_v48 = vsel %vm304_vm4, %v306_v46, %v302_v43  ;;  %vm316_vm6 = vmor %vm314_vm5, %vm315_vm3 }
  0xc9   : > { %v311_v41 = vsub.f32 1.0, %v310_v38  ;;  %v324_v52 = vmul.f32 %v307_v48, %v282_v19 }
  0xcb   : > { %v312_v44 = vmul.f32 %v753_v36, %v311_v41 }
  0xcd   : > { %v313_v47 = vadd.f32 %v753_v36, %v312_v44 }
  0xcf   : > { %v317_v50 = vsel %vm316_vm6, %v753_v36, %v313_v47 }
  0xd0   : > { %v322_v51 = vsel %vm319_vm7, %v321_v49, %v317_v50 }
  0xd1   : > { %v325_v53 = vmul.f32 %v322_v51, %v284_v25 }
  0xd3   : > { %v326_v54 = vpack.c.bf16 %v325_v53, %v324_v52 }
  0xd5   : > { %405 = vmatmul.bf16.vlgmr.msra.gmra.mxu1 %v326_v54 }
 0x152   : > { %v406_v61 = vpop.f32.mrf.mxu1 }
 0x153   : > { %v407_v63 = vadd.f32 %v745_v60, %v406_v61 }
 0x155   : > { %v411_v0 = vsub.f32 0.0, %v407_v63 }
 0x157   : > { %v413_v2 = vmul.f32 1.442695, %v411_v0 }
 0x159   : > { %754 = vpow2.f32 %v413_v2 }
 0x15a   : > { %v408_v3 = vpop.f32.mrf.mxu1 }
 0x15b   : > { %v409_v5 = vadd.f32 %v745_v60, %v408_v3 }
 0x15d   : > { %v412_v6 = vsub.f32 0.0, %v409_v5 }
 0x15f   : > { %v755_v7 = vpop.eup %754  ;;  %v415_v8 = vmul.f32 1.442695, %v412_v6 }
 0x160   : > { %v417_v9 = vadd.f32 1.0, %v755_v7 }
 0x161   : > { %756 = vpow2.f32 %v415_v8 }
 0x162   : > { %758 = vrcp.f32 %v417_v9  ;;  %v430_v19 = vand.u32 2147483648, %v417_v9  ;;  %vm424_vm9 = vweird.f32 %v417_v9  ;;  %v428_v20 = vand.u32 2147483647, %v417_v9 }
 0x164   : > { %v431_v26 = vor.u32 1.1754944e-38, %v430_v19  ;;  %vm429_vm12 = vcmp.eq.f32.partialorder %v428_v20, 8.507059e+37 }
 0x167   : > { %v757_v10 = vpop.eup %756 }
 0x168   : > { %v759_v11 = vpop.eup %758  ;;  %v418_v12 = vadd.f32 1.0, %v757_v10 }
 0x169   : > { %v420_v13 = vmul.f32 %v759_v11, %v417_v9  ;;  %vm425_vm8 = vweird.f32 %v759_v11 }
 0x16a   : > { %760 = vrcp.f32 %v418_v12  ;;  %vm426_vm10 = vmor %vm424_vm9, %vm425_vm8  ;;  %v445_v22 = vand.u32 2147483648, %v418_v12  ;;  %v443_v25 = vand.u32 2147483647, %v418_v12  ;;  %vm439_vm13 = vweird.f32 %v418_v12 }
 0x16b   : > { %v421_v14 = vsub.f32 1.0, %v420_v13 }
 0x16c   : > { %v446_v29 = vor.u32 1.1754944e-38, %v445_v22  ;;  %vm444_vm15 = vcmp.eq.f32.partialorder %v443_v25, 8.507059e+37 }
 0x16d   : > { %v422_v15 = vmul.f32 %v759_v11, %v421_v14 }
 0x16f   : > { %v423_v17 = vadd.f32 %v759_v11, %v422_v15 }
 0x170   : > { %v761_v16 = vpop.eup %760 }
 0x171   : > { %v435_v18 = vmul.f32 %v761_v16, %v418_v12  ;;  %v427_v23 = vsel %vm426_vm10, %v759_v11, %v423_v17  ;;  %vm440_vm11 = vweird.f32 %v761_v16 }
 0x172   : > { %v432_v28 = vsel %vm429_vm12, %v431_v26, %v427_v23  ;;  %vm441_vm14 = vmor %vm439_vm13, %vm440_vm11 }
 0x173   : > { %v436_v21 = vsub.f32 1.0, %v435_v18  ;;  %v449_v32 = vmul.f32 %v432_v28, %v407_v63 }
 0x175   : > { %v437_v24 = vmul.f32 %v761_v16, %v436_v21 }
 0x177   : > { %v438_v27 = vadd.f32 %v761_v16, %v437_v24 }
 0x179   : > { %v442_v30 = vsel %vm441_vm14, %v761_v16, %v438_v27 }
 0x17a   : > { %v447_v31 = vsel %vm444_vm15, %v446_v29, %v442_v30 }
 0x17b   : > { %v450_v33 = vmul.f32 %v447_v31, %v409_v5 }
 0x17d   : > { %v451_v34 = vpack.c.bf16 %v450_v33, %v449_v32 }
 0x17f   : > { %524 = vmatmul.bf16.vlgmr.msra.gmra.mxu2 %v451_v34 }
 0x202   : > { %v525_v35 = vpop.f32.mrf.mxu2 }
 0x203   : > { %530 = vst [vmem:[%s199_s29] sm:$0xff] %v525_v35 }
 0x20a   : > { %v527_v36 = vpop.f32.mrf.mxu2 }
 0x20b   : > { %531 = vst [vmem:[%s199_s29 + $0x8] sm:$0xff] %v527_v36 }
 0x20c PF: > { %s14_s15 = sadd.s32 1, %s768_s15  }
 0x20d   : > { %p11_p4 = scmp.ge.s32.totalorder %s14_s15, 4  }
 0x20f   :  { %13 = sbr.rel (!%p11_p4) target bundleno = 1 (0x1), region = 68 }

// kernel: dime_module_forward.3
= control target key start
LH: loop header
LB: loop body
LE: loop exit
PB: predicated region body
PF: predicated region fallthrough
CT: control target
= control target key end

     0   :  { %s4113_s21 = smov 0   ;;  %s5447_s0 = inlined_call_operand.vmem [shape: f32[224,136], index: 0, kind: input, shape index: {}]   ;;  %s5448_s1 = inlined_call_operand.vmem [shape: f32[224,8], index: 1, kind: input, shape index: {}]   ;;  %s5449_s2 = inlined_call_operand.vmem [shape: bf16[136,256], index: 2, kind: input, shape index: {}]   ;;  %s5450_s3 = inlined_call_operand.vmem [shape: f32[1,128], index: 3, kind: input, shape index: {}]   ;;  %s5451_s4 = inlined_call_operand.vmem [shape: bf16[8,8], index: 4, kind: input, shape index: {}]   ;;  %s5452_s5 = inlined_call_operand.vmem [shape: bf16[1024,128], index: 5, kind: input, shape index: {}]   ;;  %s5453_s6 = inlined_call_operand.vmem [shape: bf16[224,128], index: 6, kind: output, shape index: {}]  }
   0x1 LB: > { %s3126_s22 = sadd.s32 4294967295, %s4068_s21   ;;  %p3130_p0 = scmp.ge.s32.totalorder %s4068_s21, 1  ;;  %s4068_s21 = sphi %s4113_s21, %s16_s21  }
   0x2   : > { %p225_p1 = scmp.lt.s32.totalorder %s4068_s21, 3 }
   0x4   : > { %p226_p2 = pnand %p3130_p0, %p225_p1 }
   0x5   : > { %s261_s9 = smul.u32 (!%p226_p2), 14, %s3126_s22 }
   0x6   : > { %229 = sbr.rel (%p226_p2) target bundleno = 835 (0x343), region = 44 }
   0x7   : > { %p262_p3 = scmp.lt.s32.totalorder (!%p226_p2), %s261_s9, 27 }
   0xb   : > { %v3193_v0 = vld [vmem:[%s5449_s2 + $0x70] sm:$0xf]  ;;  %v3718_v1 = vld [vmem:[%s5449_s2 + $0x74] sm:$0xf0]  ;;  %v3185_v2 = vld [vmem:[%s5449_s2 + $0x60] sm:$0xf] }
   0xc   : > { %v3194_v3 = vor.u32 %v3718_v1, %v3193_v0  ;;  %v3716_v4 = vld [vmem:[%s5449_s2 + $0x64] sm:$0xf0]  ;;  %v4136_v5 = vld [vmem:[%s5449_s2 + $0x80] sm:$0xff]  ;;  %vm447_vm0 = vcmask 1043456   ;;  %v3177_v10 = vld [vmem:[%s5449_s2 + $0x50] sm:$0xf] }
   0xd   : > { %v389_v6 = vunpack.c.l.b16 %v4136_v5  ;;  %v963_v7 = vld [vmem:[%s5451_s4] sm:$0xf]  ;;  %v3186_v8 = vor.u32 %v3716_v4, %v3185_v2  ;;  %v3714_v11 = vld [vmem:[%s5449_s2 + $0x54] sm:$0xf0]  ;;  %s5489_s9 = smov (!%p262_p3, %s261_s9), 27  ;;  %vm425_vm1 = vcmask 64512   ;;  %v390_v63 = vunpack.c.h.b16 %v4136_v5 }
   0xe   : > { %454 = vmatpush.bf16.msra.mxu0 %v3194_v3  ;;  %v986_v12 = vsel %vm447_vm0, %v963_v7, 0  ;;  %v3178_v14 = vor.u32 %v3714_v11, %v3177_v10  ;;  %s3702_s16 = sshll.u32 %s5489_s9, 4  ;;  %v3169_v15 = vld [vmem:[%s5449_s2 + $0x40] sm:$0xf]  ;;  %v3712_v16 = vld [vmem:[%s5449_s2 + $0x44] sm:$0xf0] }
   0xf   : > { %v407_v9 = vpack.c.b16 %v389_v6, %v389_v6  ;;  %s4162_s24 = scalar_lea.vmem %s5447_s0, %s3702_s16  ;;  %v3170_v22 = vor.u32 %v3712_v16, %v3169_v15  ;;  %v3161_v24 = vld [vmem:[%s5449_s2 + $0x30] sm:$0xf]  ;;  %v3710_v25 = vld [vmem:[%s5449_s2 + $0x34] sm:$0xf0]  ;;  %v3717_v26 = vld [vmem:[%s5449_s2 + $0x74] sm:$0xf]  ;;  %v408_v2 = vpack.c.b16 %v390_v63, %v390_v63 }
  0x10   : > { %v282_v17 = vld [vmem:[%s4162_s24 + $0x8] sm:$0xff]  ;;  %v284_v18 = vld [vmem:[%s4162_s24 + $0x18] sm:$0xff]  ;;  %v3162_v27 = vor.u32 %v3710_v25, %v3161_v24  ;;  %v3715_v29 = vld [vmem:[%s5449_s2 + $0x64] sm:$0xf]  ;;  %s3133_s7 = sshll.u32 %s5489_s9, 3  ;;  %s3134_s12 = sshll.u32 %s5489_s9, 2 }
  0x11   : > { %v449_v13 = vsel %vm447_vm0, %v407_v9, 0  ;;  %v294_v19 = vld [vmem:[%s4162_s24 + $0x68] sm:$0xff]  ;;  %v4167_v20 = vpack.c.bf16 %v284_v18, %v282_v17  ;;  %v296_v21 = vld [vmem:[%s4162_s24 + $0x78] sm:$0xff]  ;;  %v3153_v31 = vld [vmem:[%s5449_s2 + $0x20] sm:$0xf]  ;;  %s4276_s11 = scalar_lea.vmem %s5448_s1, %s3133_s7  ;;  %s5423_s14 = scalar_lea.vmem %s5453_s6, %s3134_s12 }
  0x12   : > { %455 = vmatpush.bf16.msra.mxu0 %v3186_v8  ;;  %505 = vmatpush.bf16.msra.mxu1 %v449_v13  ;;  %v4170_v23 = vpack.c.bf16 %v296_v21, %v294_v19  ;;  %v3195_v28 = vld [vmem:[%s5449_s2 + $0x78] sm:$0xf0]  ;;  %v3187_v30 = vld [vmem:[%s5449_s2 + $0x68] sm:$0xf0]  ;;  %v3708_v32 = vld [vmem:[%s5449_s2 + $0x24] sm:$0xf0] }
  0x13   : > { %3880 = vmatpush.bf16.msra.mxu3 %v449_v13  ;;  %v3198_v33 = vor.u32 %v3717_v26, %v3195_v28  ;;  %v3190_v34 = vor.u32 %v3715_v29, %v3187_v30  ;;  %v3154_v35 = vor.u32 %v3708_v32, %v3153_v31  ;;  %v3713_v36 = vld [vmem:[%s5449_s2 + $0x54] sm:$0xf]  ;;  %v3179_v37 = vld [vmem:[%s5449_s2 + $0x58] sm:$0xf0]  ;;  %v3145_v38 = vld [vmem:[%s5449_s2 + $0x10] sm:$0xf] }
  0x14   : > { %v3706_v39 = vld [vmem:[%s5449_s2 + $0x14] sm:$0xf0]  ;;  %v286_v40 = vld [vmem:[%s4162_s24 + $0x28] sm:$0xff]  ;;  %v3182_v43 = vor.u32 %v3713_v36, %v3179_v37  ;;  %v3711_v46 = vld [vmem:[%s5449_s2 + $0x44] sm:$0xf]  ;;  %v452_v8 = vsel %vm447_vm0, %v408_v2, 0 }
  0x15   : > { %3199 = vmatmul.msk.bf16.vlgmr.msra.gmra.mxu1 %vm425_vm1, %v4167_v20  ;;  %542 = vmatpush.bf16.msra.mxu2 %v3198_v33  ;;  %v288_v41 = vld [vmem:[%s4162_s24 + $0x38] sm:$0xff]  ;;  %v298_v42 = vld [vmem:[%s4162_s24 + $0x88] sm:$0xff]  ;;  %v3146_v44 = vor.u32 %v3706_v39, %v3145_v38  ;;  %v3137_v48 = vld [vmem:[%s5449_s2] sm:$0xf]  ;;  %v4076_v2 = vmov 7  }
  0x16   : > { %995 = vmatpush.bf16.msrb.mxu1 %v986_v12  ;;  %456 = vmatpush.bf16.msra.mxu0 %v3178_v14  ;;  %v300_v45 = vld [vmem:[%s4162_s24 + $0x98] sm:$0xff]  ;;  %v3171_v47 = vld [vmem:[%s5449_s2 + $0x48] sm:$0xf0]  ;;  %v3704_v49 = vld [vmem:[%s5449_s2 + $0x4] sm:$0xf0]  ;;  %v4228_v50 = vpack.c.bf16 %v288_v41, %v286_v40 }
  0x17   : > { %3202 = vmatmul.msk.bf16.vlgmr.msra.gmra.mxu3 %vm425_vm1, %v4170_v23  ;;  %v4230_v51 = vpack.c.bf16 %v300_v45, %v298_v42  ;;  %v3174_v52 = vor.u32 %v3711_v46, %v3171_v47  ;;  %v3138_v53 = vor.u32 %v3704_v49, %v3137_v48  ;;  %v281_v54 = vld [vmem:[%s4162_s24] sm:$0xff]  ;;  %v283_v55 = vld [vmem:[%s4162_s24 + $0x10] sm:$0xff]  ;;  %v3163_v57 = vld [vmem:[%s5449_s2 + $0x38] sm:$0xf0]  ;;  %v4070_v42 = vmov 6  }
  0x18   : > { %v3709_v56 = vld [vmem:[%s5449_s2 + $0x34] sm:$0xf]  ;;  %v309_v58 = vpack.c.bf16 %v283_v55, %v281_v54  ;;  %v3707_v60 = vld [vmem:[%s5449_s2 + $0x24] sm:$0xf]  ;;  %v3155_v61 = vld [vmem:[%s5449_s2 + $0x28] sm:$0xf0]  ;;  %593 = vmatpush.bf16.msrb.mxu3 %v452_v8  ;;  %3902 = vset.pattern.permute.xlu1 %v4070_v42 }
  0x19   : > { %543 = vmatpush.bf16.msra.mxu2 %v3190_v34  ;;  %v3166_v59 = vor.u32 %v3709_v56, %v3163_v57  ;;  %v3158_v62 = vor.u32 %v3707_v60, %v3155_v61  ;;  %v3705_v0 = vld [vmem:[%s5449_s2 + $0x14] sm:$0xf]  ;;  %v3147_v1 = vld [vmem:[%s5449_s2 + $0x18] sm:$0xf0]  ;;  %v290_v3 = vld [vmem:[%s4162_s24 + $0x48] sm:$0xff]  ;;  %v4074_v60 = vmov 2  }
  0x1a   : > { %457 = vmatpush.bf16.msra.mxu0 %v3170_v22  ;;  %v292_v4 = vld [vmem:[%s4162_s24 + $0x58] sm:$0xff]  ;;  %v302_v6 = vld [vmem:[%s4162_s24 + $0xa8] sm:$0xff]  ;;  %v3150_v7 = vor.u32 %v3705_v0, %v3147_v1  ;;  %v3703_v9 = vld [vmem:[%s5449_s2 + $0x4] sm:$0xf]  ;;  %v4075_v1 = vmov 3  }
  0x1b   : > { %v304_v5 = vld [vmem:[%s4162_s24 + $0xb8] sm:$0xff]  ;;  %v3139_v10 = vld [vmem:[%s5449_s2 + $0x8] sm:$0xf0]  ;;  %v314_v11 = vpack.c.bf16 %v292_v4, %v290_v3  ;;  %v285_v14 = vld [vmem:[%s4162_s24 + $0x20] sm:$0xff] }
  0x1c   : > { %v320_v12 = vpack.c.bf16 %v304_v5, %v302_v6  ;;  %v3142_v13 = vor.u32 %v3703_v9, %v3139_v10  ;;  %v287_v15 = vld [vmem:[%s4162_s24 + $0x30] sm:$0xff]  ;;  %v942_v17 = vld [vmem:[%s4276_s11] sm:$0xff]  ;;  %v943_v18 = vld [vmem:[%s4276_s11 + $0x8] sm:$0xff]  ;;  %v5456_v10 = vmov 4  }
  0x1d   : > { %544 = vmatpush.bf16.msra.mxu2 %v3182_v43  ;;  %v311_v16 = vpack.c.bf16 %v287_v15, %v285_v14  ;;  %v306_v19 = vld [vmem:[%s4162_s24 + $0xc8] sm:$0xff]  ;;  %v308_v21 = vld [vmem:[%s4162_s24 + $0xd8] sm:$0xff]  ;;  %v956_v22 = vpack.c.bf16 %v943_v18, %v942_v17  ;;  %v289_v25 = vld [vmem:[%s4162_s24 + $0x40] sm:$0xff]  ;;  %v4071_v43 = vmov 1  }
  0x1e   : > { %458 = vmatpush.bf16.msra.mxu0 %v3162_v27  ;;  %v322_v24 = vpack.c.bf16 %v308_v21, %v306_v19  ;;  %v291_v26 = vld [vmem:[%s4162_s24 + $0x50] sm:$0xff]  ;;  %v945_v29 = vld [vmem:[%s4276_s11 + $0x18] sm:$0xff]  ;;  %v946_v31 = vld [vmem:[%s4276_s11 + $0x20] sm:$0xff]  ;;  %3898 = vset.pattern.permute.xlu2 %v4071_v43 }
  0x1f   : > { %v313_v27 = vpack.c.bf16 %v291_v26, %v289_v25  ;;  %v944_v28 = vld [vmem:[%s4276_s11 + $0x10] sm:$0xff]  ;;  %v947_v32 = vld [vmem:[%s4276_s11 + $0x28] sm:$0xff]  ;;  %v950_v37 = vld [vmem:[%s4276_s11 + $0x40] sm:$0xff] }
  0x20   : > { %v957_v30 = vpack.c.bf16 %v945_v29, %v944_v28  ;;  %v958_v33 = vpack.c.bf16 %v947_v32, %v946_v31  ;;  %v948_v34 = vld [vmem:[%s4276_s11 + $0x30] sm:$0xff]  ;;  %v951_v38 = vld [vmem:[%s4276_s11 + $0x48] sm:$0xff]  ;;  %v953_v46 = vld [vmem:[%s4276_s11 + $0x58] sm:$0xff] }
  0x21   : > { %545 = vmatpush.bf16.msra.mxu2 %v3174_v52  ;;  %v952_v45 = vld [vmem:[%s4276_s11 + $0x50] sm:$0xff]  ;;  %v955_v54 = vld [vmem:[%s4276_s11 + $0x68] sm:$0xff]  ;;  %v297_v61 = vld [vmem:[%s4162_s24 + $0x80] sm:$0xff] }
  0x22   : > { %459 = vmatpush.bf16.msra.mxu0 %v3154_v35  ;;  %v949_v35 = vld [vmem:[%s4276_s11 + $0x38] sm:$0xff]  ;;  %v961_v47 = vpack.c.bf16 %v953_v46, %v952_v45  ;;  %v301_v6 = vld [vmem:[%s4162_s24 + $0xa0] sm:$0xff]  ;;  %v307_v18 = vld [vmem:[%s4162_s24 + $0xd0] sm:$0xff] }
  0x23   : > { %v959_v36 = vpack.c.bf16 %v949_v35, %v948_v34  ;;  %v4354_v9 = vld [vmem:[%s5450_s3] ss:$0 sm:$0xff] }
  0x24   : > { %v305_v17 = vld [vmem:[%s4162_s24 + $0xc0] sm:$0xff] }
  0x25   : > { %3200 = vmatmul.msk.bf16.gmra.mxu1 %vm425_vm1, %v4228_v50  ;;  %546 = vmatpush.bf16.msra.mxu2 %v3166_v59  ;;  %v5454_v59 = vmov 5   ;;  %v321_v21 = vpack.c.bf16 %v307_v18, %v305_v17 }
  0x26   : > { %460 = vmatpush.bf16.msra.mxu0 %v3146_v44  ;;  %v4072_v44 = vmov 0  }
  0x27   : > { %3203 = vmatmul.msk.bf16.gmra.mxu3 %vm425_vm1, %v4230_v51  ;;  %3897 = vset.pattern.permute.xlu0 %v4072_v44 }
  0x29   : > { %547 = vmatpush.bf16.msra.mxu2 %v3158_v62  ;;  %v299_v62 = vld [vmem:[%s4162_s24 + $0x90] sm:$0xff] }
  0x2a   : > { %461 = vmatpush.bf16.msra.mxu0 %v3138_v53  ;;  %v954_v53 = vld [vmem:[%s4276_s11 + $0x60] sm:$0xff]  ;;  %v317_v63 = vpack.c.bf16 %v299_v62, %v297_v61  ;;  %v3782_v61 = vld [vmem:[%s5452_s5 + $0x38] sm:$0xff] }
  0x2b   : > { %v962_v55 = vpack.c.bf16 %v955_v54, %v954_v53  ;;  %2678 = vmatpush.bf16.msra.mxu3 %v3782_v61 }
  0x2d   : > { %462 = vmatmul.bf16.vlgmr.msra.gmra.mxu0 %v309_v58  ;;  %548 = vmatpush.bf16.msra.mxu2 %v3150_v7  ;;  %v303_v7 = vld [vmem:[%s4162_s24 + $0xb0] sm:$0xff] }
  0x2e   : > { %v319_v8 = vpack.c.bf16 %v303_v7, %v301_v6 }
  0x31   : > { %549 = vmatpush.bf16.msra.mxu2 %v3142_v13 }
  0x34   : > { %550 = vmatmul.bf16.vlgmr.msra.gmra.mxu2 %v309_v58 }
  0x35   : > { %3201 = vmatmul.msk.bf16.gmra.mxu1 %vm425_vm1, %v314_v11 }
  0x37   : > { %3204 = vmatmul.msk.bf16.gmra.mxu3 %vm425_vm1, %v320_v12 }
  0x3d   : > { %467 = vmatmul.bf16.gmra.mxu0 %v311_v16 }
  0x44   : > { %555 = vmatmul.bf16.gmra.mxu2 %v311_v16 }
  0x45   : > { %3213 = vmatmul.msk.bf16.vlgmr.msrb.gmra.mxu1 %vm425_vm1, %v956_v22 }
  0x47   : > { %3205 = vmatmul.msk.bf16.gmra.mxu3 %vm425_vm1, %v322_v24 }
  0x4d   : > { %472 = vmatmul.bf16.gmra.mxu0 %v313_v27 }
  0x54   : > { %560 = vmatmul.bf16.gmra.mxu2 %v313_v27 }
  0x55   : > { %3214 = vmatmul.msk.bf16.gmra.mxu1 %vm425_vm1, %v957_v30 }
  0x57   : > { %3206 = vmatmul.msk.bf16.vlgmr.msrb.gmra.mxu3 %vm425_vm1, %v4167_v20  ;;  %v960_v20 = vpack.c.bf16 %v951_v38, %v950_v37 }
  0x65   : > { %3215 = vmatmul.msk.bf16.gmra.mxu1 %vm425_vm1, %v958_v33 }
  0x67   : > { %3207 = vmatmul.msk.bf16.gmra.mxu3 %vm425_vm1, %v4228_v50  ;;  %v293_v50 = vld [vmem:[%s4162_s24 + $0x60] sm:$0xff] }
  0x75   : > { %3216 = vmatmul.msk.bf16.gmra.mxu1 %vm425_vm1, %v959_v36 }
  0x77   : > { %3208 = vmatmul.msk.bf16.gmra.mxu3 %vm425_vm1, %v314_v11 }
  0x85   : > { %3217 = vmatmul.msk.bf16.gmra.mxu1 %vm425_vm1, %v960_v20 }
  0x87   : > { %3209 = vmatmul.msk.bf16.gmra.mxu3 %vm425_vm1, %v4170_v23 }
  0x92   : > { %v507_v39 = vpop.f32.mrf.mxu1 }
  0x95   : > { %3218 = vmatmul.msk.bf16.gmra.mxu1 %vm425_vm1, %v961_v47 }
  0x97   : > { %3210 = vmatmul.msk.bf16.gmra.mxu3 %vm425_vm1, %v4230_v51  ;;  %v295_v51 = vld [vmem:[%s4162_s24 + $0x70] sm:$0xff] }
  0x98   : > { %v315_v52 = vpack.c.bf16 %v295_v51, %v293_v50 }
  0x9a   : > { %v4307_v40 = vpop.f32.mrf.mxu1  ;;  %477 = vmatmul.bf16.gmra.mxu0 %v315_v52  ;;  %565 = vmatmul.bf16.gmra.mxu2 %v315_v52  ;;  %v4330_v57 = vpop.f32.mrf.mxu3 }
  0xa2   : > { %v4309_v41 = vpop.f32.mrf.mxu1  ;;  %v4340_v0 = vpop.f32.mrf.mxu3 }
  0xa5   : > { %3219 = vmatmul.msk.bf16.gmra.mxu1 %vm425_vm1, %v962_v55 }
  0xa7   : > { %3211 = vmatmul.msk.bf16.gmra.mxu3 %vm425_vm1, %v320_v12 }
  0xaa   : > { %v4315_v23 = vpop.f32.mrf.mxu1  ;;  %482 = vmatmul.bf16.gmra.mxu0 %v317_v63  ;;  %570 = vmatmul.bf16.gmra.mxu2 %v317_v63  ;;  %v4347_v3 = vpop.f32.mrf.mxu3 }
  0xab   : > { %v463_v4 = vpop.f32.mrf.mxu0 }
  0xac   : > { %v508_v5 = vadd.f32 %v507_v39, %v463_v4 }
  0xae   : > { %v4364_v12 = vadd.f32 %v4354_v9, %v508_v5  ;;  %v3781_v5 = vld [vmem:[%s5452_s5 + $0x30] sm:$0xff] }
  0xaf   : > { %2679 = vmatpush.bf16.msra.mxu3 %v3781_v5 }
  0xb0   : > { %v648_v14 = vsub.f32 0.0, %v4364_v12 }
  0xb2   : > { %v4320_v48 = vpop.f32.mrf.mxu1  ;;  %v4366_v13 = vpop.f32.mrf.mxu3  ;;  %v662_v15 = vmul.f32 1.442695, %v648_v14 }
  0xb3   : > { %v465_v27 = vpop.f32.mrf.mxu0 }
  0xb4   : > { %4005 = vpow2.f32 %v662_v15  ;;  %v510_v28 = vadd.f32 %v4307_v40, %v465_v27  ;;  %v3779_v27 = vld [vmem:[%s5452_s5 + $0x20] sm:$0xff] }
  0xb6   : > { %v4403_v32 = vadd.f32 %v4354_v9, %v510_v28  ;;  %v3789_v28 = vld [vmem:[%s5452_s5 + $0x70] sm:$0xff] }
  0xb7   : > { %3212 = vmatmul.msk.bf16.gmra.mxu3 %vm425_vm1, %v322_v24  ;;  %v551_v52 = vpop.f32.mrf.mxu2 }
  0xb8   : > { %v649_v34 = vsub.f32 0.0, %v4403_v32 }
  0xba   : > { %v4323_v49 = vpop.f32.mrf.mxu1  ;;  %487 = vmatmul.bf16.gmra.mxu0 %v319_v8  ;;  %575 = vmatmul.bf16.gmra.mxu2 %v319_v8  ;;  %v4374_v16 = vpop.f32.mrf.mxu3  ;;  %v664_v38 = vmul.f32 1.442695, %v649_v34 }
  0xbb   : > { %v4006_v22 = vpop.eup %4005  ;;  %v468_v39 = vpop.f32.mrf.mxu0 }
  0xbc   : > { %v690_v25 = vadd.f32 1.0, %v4006_v22  ;;  %v513_v50 = vadd.f32 %v4309_v41, %v468_v39  ;;  %v3778_v39 = vld [vmem:[%s5452_s5 + $0x18] sm:$0xff] }
  0xbe   : > { %4007 = vrcp.f32 %v690_v25  ;;  %v715_v45 = vand.u32 2147483648, %v690_v25  ;;  %vm709_vm3 = vweird.f32 %v690_v25  ;;  %v713_v46 = vand.u32 2147483647, %v690_v25 }
  0xbf   : > { %4009 = vpow2.f32 %v664_v38 }
  0xc0   : > { %v716_v54 = vor.u32 1.1754944e-38, %v715_v45  ;;  %vm714_vm5 = vcmp.eq.f32.partialorder %v713_v46, 8.507059e+37  ;;  %v3788_v46 = vld [vmem:[%s5452_s5 + $0x68] sm:$0xff] }
  0xc2   : > { %v997_v56 = vpop.f32.mrf.mxu1  ;;  %v4388_v26 = vpop.f32.mrf.mxu3 }
  0xc3   : > { %1635 = vperm.xlu1 %3902, %v997_v56   ;;  %1145 = vperm.xlu2 %3898, %v997_v56   ;;  %v470_v6 = vpop.f32.mrf.mxu0 }
  0xc4   : > { %1034 = vperm.xlu0 %3897, %v997_v56   ;;  %v4008_v30 = vpop.eup %4007  ;;  %v515_v15 = vadd.f32 %v4315_v23, %v470_v6  ;;  %v3790_v23 = vld [vmem:[%s5452_s5 + $0x78] sm:$0xff] }
  0xc5   : > { %v705_v33 = vmul.f32 %v4008_v30, %v690_v25  ;;  %vm710_vm2 = vweird.f32 %v4008_v30  ;;  %v4010_v55 = vpop.eup %4009  ;;  %2722 = vmatpush.bf16.msrb.mxu0 %v3790_v23  ;;  %v3786_v6 = vld [vmem:[%s5452_s5 + $0x58] sm:$0xff] }
  0xc6   : > { %vm711_vm4 = vmor %vm709_vm3, %vm710_vm2  ;;  %v4435_v62 = vadd.f32 1.0, %v4010_v55  ;;  %v4462_v22 = vadd.f32 %v4354_v9, %v515_v15  ;;  %v3787_v55 = vld [vmem:[%s5452_s5 + $0x60] sm:$0xff]  ;;  %v3796_v15 = vld [vmem:[%s5452_s5 + $0xa8] sm:$0xff] }
  0xc7   : > { %v706_v35 = vsub.f32 1.0, %v705_v33 }
  0xc8   : > { %4011 = vrcp.f32 %v4435_v62  ;;  %vm724_vm7 = vweird.f32 %v4435_v62  ;;  %v728_v23 = vand.u32 2147483647, %v4435_v62 }
  0xc9   : > { %v707_v20 = vmul.f32 %v4008_v30, %v706_v35  ;;  %2723 = vmatpush.bf16.msrb.mxu0 %v3789_v28 }
  0xca   : > { %v4332_v58 = vpop.f32.mrf.mxu1  ;;  %492 = vmatmul.bf16.gmra.mxu0 %v321_v21  ;;  %580 = vmatmul.bf16.gmra.mxu2 %v321_v21  ;;  %v4398_v31 = vpop.f32.mrf.mxu3  ;;  %v3780_v21 = vld [vmem:[%s5452_s5 + $0x28] sm:$0xff]  ;;  %vm729_vm9 = vcmp.eq.f32.partialorder %v728_v23, 8.507059e+37 }
  0xcb   : > { %3911 = vset.pattern.permute.xlu1 %v5454_v59  ;;  %3899 = vset.pattern.permute.xlu2 %v4074_v60  ;;  %v708_v40 = vadd.f32 %v4008_v30, %v707_v20  ;;  %v4480_v20 = vpop.f32.mrf.mxu0 }
  0xcc   : > { %3903 = vset.pattern.permute.xlu0 %v5454_v59  ;;  %1243 = vperm.xlu2 %3899, %v997_v56  }
  0xcd   : > { %1537 = vperm.xlu0 %3903, %v997_v56   ;;  %1541 = vperm.xlu1 %3911, %v4332_v58   ;;  %v712_v51 = vsel %vm711_vm4, %v4008_v30, %v708_v40  ;;  %v651_v30 = vsub.f32 0.0, %v4462_v22 }
  0xce   : > { %2680 = vmatpush.bf16.msra.mxu3 %v3780_v21  ;;  %v4464_v25 = vpop.eup %4011  ;;  %2724 = vmatpush.bf16.msrb.mxu0 %v3788_v46  ;;  %v553_v46 = vpop.f32.mrf.mxu2 }
  0xcf   : > { %v720_v33 = vmul.f32 %v4464_v25, %v4435_v62  ;;  %vm725_vm6 = vweird.f32 %v4464_v25 }
  0xd0   : > { %vm4536_vm8 = vmor %vm724_vm7, %vm725_vm6 }
  0xd2   : > { %v4358_v11 = vpop.f32.mrf.mxu1  ;;  %v4412_v37 = vpop.f32.mrf.mxu3  ;;  %2681 = vmatpush.bf16.msra.mxu3 %v3779_v27  ;;  %2725 = vmatpush.bf16.msrb.mxu0 %v3787_v55  ;;  %v3775_v27 = vld [vmem:[%s5452_s5] sm:$0xff] }
  0xd3   : > { %v4518_v5 = vpop.f32.mrf.mxu0 }
  0xd4   : > { %3900 = vset.pattern.permute.xlu2 %v4075_v1 }
  0xd5   : > { %3905 = vset.pattern.permute.xlu0 %v4072_v44  ;;  %3912 = vset.pattern.permute.xlu1 %v4076_v2 }
  0xd6   : > { %1341 = vperm.xlu2 %3900, %v997_v56   ;;  %1737 = vperm.xlu1 %3912, %v4332_v58  }
  0xd7   : > { %1039 = vperm.xlu0 %3905, %v4332_v58   ;;  %2682 = vmatpush.bf16.msra.mxu3 %v3778_v39 }
  0xd8   : > { %2726 = vmatpush.bf16.msrb.mxu0 %v3786_v6 }
  0xda   : > { %v4378_v19 = vpop.f32.mrf.mxu1  ;;  %v595_v53 = vpop.f32.mrf.mxu3 }
  0xdb   : > { %v596_v41 = vadd.f32 %v595_v53, %v551_v52  ;;  %v3798_v52 = vld [vmem:[%s5452_s5 + $0xb8] sm:$0xff] }
  0xdc   : > { %2766 = vmatpush.bf16.msrb.mxu2 %v3798_v52 }
  0xde   : > { %3901 = vset.pattern.permute.xlu2 %v5456_v10  ;;  %3913 = vset.pattern.permute.xlu1 %v4072_v44 }
  0xdf   : > { %3906 = vset.pattern.permute.xlu0 %v4071_v43  ;;  %1439 = vperm.xlu2 %3901, %v997_v56  }
  0xe0   : > { %1149 = vperm.xlu0 %3906, %v4332_v58   ;;  %1044 = vperm.xlu1 %3913, %v4358_v11  }
  0xe2   : > { %v4386_v24 = vpop.f32.mrf.mxu1 }
  0xe7   : > { %3904 = vset.pattern.permute.xlu2 %v4076_v2 }
  0xe8   : > { %3907 = vset.pattern.permute.xlu0 %v4074_v60  ;;  %3914 = vset.pattern.permute.xlu1 %v4071_v43 }
  0xe9   : > { %1733 = vperm.xlu2 %3904, %v997_v56   ;;  %1247 = vperm.xlu0 %3907, %v4332_v58   ;;  %v4428_v56 = vadd.f32 %v4354_v9, %v513_v50  ;;  %v668_v50 = vmul.f32 1.442695, %v651_v30 }
  0xea   : > { %1153 = vperm.xlu1 %3914, %v4358_v11   ;;  %v4396_v29 = vpop.f32.mrf.mxu1 }
  0xeb   : > { %v650_v4 = vsub.f32 0.0, %v4428_v56 }
  0xed   : > { %v666_v17 = vmul.f32 1.442695, %v650_v4 }
  0xef   : > { %4013 = vpow2.f32 %v666_v17 }
  0xf0   : > { %4015 = vpow2.f32 %v668_v50  ;;  %v597_v50 = vpop.f32.mrf.mxu3 }
  0xf1   : > { %3910 = vset.pattern.permute.xlu2 %v4070_v42  ;;  %3908 = vset.pattern.permute.xlu0 %v4075_v1  ;;  %v598_v6 = vadd.f32 %v597_v50, %v553_v46 }
  0xf2   : > { %3915 = vset.pattern.permute.xlu1 %v4074_v60  ;;  %1639 = vperm.xlu2 %3910, %v4332_v58   ;;  %v4410_v36 = vpop.f32.mrf.mxu1 }
  0xf3   : > { %1345 = vperm.xlu0 %3908, %v4332_v58   ;;  %1251 = vperm.xlu1 %3915, %v4358_v11  }
  0xf5   : > { %v4014_v40 = vpop.eup %4013 }
  0xf6   : > { %v4495_v53 = vadd.f32 1.0, %v4014_v40  ;;  %v4016_v21 = vpop.eup %4015  ;;  %v3795_v40 = vld [vmem:[%s5452_s5 + $0xa0] sm:$0xff] }
  0xf8   : > { %4017 = vrcp.f32 %v4495_v53  ;;  %vm739_vm11 = vweird.f32 %v4495_v53 }
  0xfa   : > { %1643 = vperm.xlu2 %3910, %v4358_v11   ;;  %v4420_v47 = vpop.f32.mrf.mxu1 }
  0xfb   : > { %3909 = vset.pattern.permute.xlu0 %v5456_v10  ;;  %3916 = vset.pattern.permute.xlu1 %v4075_v1 }
  0xfc   : > { %1443 = vperm.xlu0 %3909, %v4332_v58   ;;  %1349 = vperm.xlu1 %3916, %v4358_v11   ;;  %v717_v58 = vsel %vm714_vm5, %v716_v54, %v712_v51  ;;  %v721_v51 = vsub.f32 1.0, %v720_v33  ;;  %v3777_v54 = vld [vmem:[%s5452_s5 + $0x10] sm:$0xff] }
  0xfd   : > { %v914_v63 = vmul.f32 %v717_v58, %v4364_v12  ;;  %2683 = vmatpush.bf16.msra.mxu3 %v3777_v54  ;;  %v3785_v33 = vld [vmem:[%s5452_s5 + $0x50] sm:$0xff] }
  0xfe   : > { %v722_v58 = vmul.f32 %v4464_v25, %v721_v51  ;;  %2727 = vmatpush.bf16.msrb.mxu0 %v3785_v33 }
  0xff   : > { %v4439_v7 = vmul.f32 %v914_v63, %v596_v41  ;;  %v3797_v41 = vld [vmem:[%s5452_s5 + $0xb0] sm:$0xff]  ;;  %v3776_v63 = vld [vmem:[%s5452_s5 + $0x8] sm:$0xff] }
 0x100   : > { %2767 = vmatpush.bf16.msrb.mxu2 %v3797_v41 }
 0x101   : > { %2684 = vmatpush.bf16.msra.mxu3 %v3776_v63  ;;  %v3784_v63 = vld [vmem:[%s5452_s5 + $0x48] sm:$0xff] }
 0x102   : > { %3920 = vset.pattern.permute.xlu2 %v4071_v43  ;;  %v4441_v8 = vpop.f32.mrf.mxu1  ;;  %2728 = vmatpush.bf16.msrb.mxu0 %v3784_v63 }
 0x103   : > { %1157 = vperm.xlu2 %3920, %v4378_v19  }
 0x104   : > { %3924 = vset.pattern.permute.xlu0 %v4070_v42  ;;  %3917 = vset.pattern.permute.xlu1 %v5456_v10 }
 0x105   : > { %1447 = vperm.xlu1 %3917, %v4358_v11   ;;  %1647 = vperm.xlu0 %3924, %v4378_v19  }
 0x106   : > { %2768 = vmatpush.bf16.msrb.mxu2 %v3796_v15  ;;  %2685 = vmatpush.bf16.msra.mxu3 %v3775_v27  ;;  %v3783_v27 = vld [vmem:[%s5452_s5 + $0x40] sm:$0xff] }
 0x107   : > { %2729 = vmatpush.bf16.msrb.mxu0 %v3783_v27 }
 0x10a   : > { %v4476_v34 = vpop.f32.mrf.mxu1  ;;  %2769 = vmatpush.bf16.msrb.mxu2 %v3795_v40  ;;  %v518_v40 = vadd.f32 %v4320_v48, %v4480_v20 }
 0x10b   : > { %3921 = vset.pattern.permute.xlu2 %v4074_v60 }
 0x10c   : > { %1255 = vperm.xlu2 %3921, %v4378_v19  }
 0x10d   : > { %3918 = vset.pattern.permute.xlu1 %v5454_v59  ;;  %3934 = vset.pattern.permute.xlu0 %v4071_v43 }
 0x10e   : > { %1545 = vperm.xlu1 %3918, %v4358_v11   ;;  %1169 = vperm.xlu0 %3934, %v4410_v36  }
 0x114   : > { %3922 = vset.pattern.permute.xlu2 %v4075_v1 }
 0x115   : > { %1353 = vperm.xlu2 %3922, %v4378_v19  }
 0x116   : > { %3919 = vset.pattern.permute.xlu1 %v4072_v44  ;;  %3935 = vset.pattern.permute.xlu0 %v4074_v60 }
 0x117   : > { %1049 = vperm.xlu1 %3919, %v4378_v19   ;;  %1267 = vperm.xlu0 %3935, %v4410_v36   ;;  %v478_v15 = vpop.f32.mrf.mxu0 }
 0x118   : > { %v523_v23 = vadd.f32 %v4330_v57, %v478_v15  ;;  %v3791_v15 = vld [vmem:[%s5452_s5 + $0x80] sm:$0xff] }
 0x11a   : > { %v4600_v50 = vadd.f32 %v4354_v9, %v523_v23 }
 0x11c   : > { %v654_v63 = vsub.f32 0.0, %v4600_v50 }
 0x11d   : > { %3923 = vset.pattern.permute.xlu2 %v5456_v10  ;;  %v1146_v14 = vpop.permute.xlu2 %1145 }
 0x11e   : > { %1451 = vperm.xlu2 %3923, %v4378_v19   ;;  %v1200_v12 = vmul.f32 %v1146_v14, %v4439_v7  ;;  %v723_v14 = vadd.f32 %v4464_v25, %v722_v58 }
 0x11f   : > { %3926 = vset.pattern.permute.xlu1 %v4071_v43  ;;  %3936 = vset.pattern.permute.xlu0 %v4075_v1  ;;  %v4610_v20 = vpop.f32.mrf.mxu0 }
 0x120   : > { %v1214_v18 = vpack.c.bf16 %v1200_v12, %v1200_v12  ;;  %1161 = vperm.xlu1 %3926, %v4386_v24   ;;  %1365 = vperm.xlu0 %3936, %v4410_v36   ;;  %v730_v12 = vand.u32 2147483648, %v4435_v62  ;;  %v727_v62 = vsel %vm4536_vm8, %v4464_v25, %v723_v14  ;;  %v3805_v25 = vld [vmem:[%s5452_s5 + $0xf0] sm:$0xff] }
 0x122   : > { %1228 = vst [vmem:[#allocation2 + $0x4] sm:$0xf] %v1214_v18  ;;  %v3806_v18 = vld [vmem:[%s5452_s5 + $0xf8] sm:$0xff]  ;;  %v731_v51 = vor.u32 1.1754944e-38, %v730_v12  ;;  %v3804_v12 = vld [vmem:[%s5452_s5 + $0xe8] sm:$0xff] }
 0x123   : > { %2810 = vmatpush.bf16.msra.mxu1 %v3806_v18 }
 0x124   : > { %v732_v55 = vsel %vm729_vm9, %v731_v51, %v727_v62  ;;  %v3803_v62 = vld [vmem:[%s5452_s5 + $0xe0] sm:$0xff] }
 0x126   : > { %3925 = vset.pattern.permute.xlu2 %v4072_v44  ;;  %v1244_v35 = vpop.permute.xlu2 %1243 }
 0x127   : > { %1054 = vperm.xlu2 %3925, %v4386_v24   ;;  %v1298_v38 = vmul.f32 %v1244_v35, %v4439_v7  ;;  %v4543_v35 = vpop.eup %4017  ;;  %2811 = vmatpush.bf16.msra.mxu1 %v3805_v25  ;;  %v3792_v25 = vld [vmem:[%s5452_s5 + $0x88] sm:$0xff] }
 0x128   : > { %3927 = vset.pattern.permute.xlu1 %v4074_v60  ;;  %3945 = vset.pattern.permute.xlu0 %v4071_v43  ;;  %v735_v58 = vmul.f32 %v4543_v35, %v4495_v53  ;;  %vm740_vm10 = vweird.f32 %v4543_v35 }
 0x129   : > { %v1312_v45 = vpack.c.bf16 %v1298_v38, %v1298_v38  ;;  %1259 = vperm.xlu1 %3927, %v4386_v24   ;;  %1181 = vperm.xlu0 %3945, %v4476_v34   ;;  %vm4631_vm12 = vmor %vm739_vm11, %vm740_vm10 }
 0x12b   : > { %1326 = vst [vmem:[#allocation2 + $0x8] sm:$0xf] %v1312_v45  ;;  %v4552_v45 = vadd.f32 1.0, %v4016_v21  ;;  %v736_v21 = vsub.f32 1.0, %v735_v58  ;;  %2812 = vmatpush.bf16.msra.mxu1 %v3804_v12 }
 0x12d   : > { %4019 = vrcp.f32 %v4552_v45  ;;  %v737_v46 = vmul.f32 %v4543_v35, %v736_v21  ;;  %v3801_v21 = vld [vmem:[%s5452_s5 + $0xd0] sm:$0xff]  ;;  %v760_v12 = vand.u32 2147483648, %v4552_v45  ;;  %vm754_vm15 = vweird.f32 %v4552_v45 }
 0x12f   : > { %1059 = vperm.xlu2 %3925, %v4396_v29   ;;  %2813 = vmatpush.bf16.msra.mxu1 %v3803_v62  ;;  %v600_v62 = vpop.f32.mrf.mxu3 }
 0x130   : > { %v1342_v61 = vpop.permute.xlu2 %1341 }
 0x131   : > { %3928 = vset.pattern.permute.xlu1 %v4075_v1  ;;  %3946 = vset.pattern.permute.xlu0 %v4074_v60  ;;  %v1396_v4 = vmul.f32 %v1342_v61, %v4439_v7 }
 0x132   : > { %1357 = vperm.xlu1 %3928, %v4386_v24   ;;  %1279 = vperm.xlu0 %3946, %v4476_v34  }
 0x133   : > { %v1410_v17 = vpack.c.bf16 %v1396_v4, %v1396_v4  ;;  %v3794_v4 = vld [vmem:[%s5452_s5 + $0x98] sm:$0xff] }
 0x134   : > { %2770 = vmatpush.bf16.msrb.mxu2 %v3794_v4  ;;  %v745_v4 = vand.u32 2147483648, %v4495_v53 }
 0x135   : > { %1424 = vst [vmem:[#allocation2 + $0xc] sm:$0xf] %v1410_v17  ;;  %v1636_v30 = vpop.permute.xlu1 %1635  ;;  %v915_v17 = vmul.f32 %v732_v55, %v4403_v32 }
 0x136   : > { %v1690_v38 = vmul.f32 %v1636_v30, %v4439_v7  ;;  %v1035_v39 = vpop.permute.xlu0 %1034  ;;  %v3793_v30 = vld [vmem:[%s5452_s5 + $0x90] sm:$0xff] }
 0x137   : > { %v1102_v52 = vmul.f32 %v1035_v39, %v4439_v7  ;;  %3930 = vset.pattern.permute.xlu2 %v4071_v43  ;;  %v4582_v28 = vmul.f32 %v915_v17, %v598_v6  ;;  %v4593_v39 = vpop.eup %4019 }
 0x138   : > { %v1704_v54 = vpack.c.bf16 %v1690_v38, %v1690_v38  ;;  %1165 = vperm.xlu2 %3930, %v4396_v29   ;;  %2771 = vmatpush.bf16.msrb.mxu2 %v3793_v30  ;;  %v750_v55 = vmul.f32 %v4593_v39, %v4552_v45  ;;  %vm755_vm14 = vweird.f32 %v4593_v39 }
 0x139   : > { %v1116_v41 = vpack.c.bf16 %v1102_v52, %v1102_v52  ;;  %v1440_v61 = vpop.permute.xlu2 %1439  ;;  %vm4679_vm0 = vmor %vm754_vm15, %vm755_vm14 }
 0x13a   : > { %1718 = vst [vmem:[#allocation2 + $0x18] sm:$0xf] %v1704_v54  ;;  %3929 = vset.pattern.permute.xlu1 %v5456_v10  ;;  %3947 = vset.pattern.permute.xlu0 %v4075_v1  ;;  %v1494_v14 = vmul.f32 %v1440_v61, %v4439_v7  ;;  %v3802_v54 = vld [vmem:[%s5452_s5 + $0xd8] sm:$0xff]  ;;  %v738_v61 = vadd.f32 %v4543_v35, %v737_v46  ;;  %v751_v17 = vsub.f32 1.0, %v750_v55 }
 0x13b   : > { %1130 = vst [vmem:[#allocation2] sm:$0xf] %v1116_v41  ;;  %1455 = vperm.xlu1 %3929, %v4386_v24   ;;  %1377 = vperm.xlu0 %3947, %v4476_v34   ;;  %v4618_v41 = vadd.f32 %v4354_v9, %v518_v40  ;;  %v520_v40 = vadd.f32 %v4323_v49, %v4518_v5  ;;  %v4657_v5 = vpop.f32.mrf.mxu0 }
 0x13c   : > { %v1508_v18 = vpack.c.bf16 %v1494_v14, %v1494_v14  ;;  %2772 = vmatpush.bf16.msrb.mxu2 %v3792_v25  ;;  %v4624_v14 = vpop.f32.mrf.mxu1  ;;  %2814 = vmatpush.bf16.msra.mxu1 %v3802_v54  ;;  %v3800_v54 = vld [vmem:[%s5452_s5 + $0xc8] sm:$0xff] }
 0x13d   : > { %v652_v23 = vsub.f32 0.0, %v4618_v41 }
 0x13e   : > { %1522 = vst [vmem:[#allocation2 + $0x10] sm:$0xf] %v1508_v18 }
 0x13f   : > { %v1538_v33 = vpop.permute.xlu0 %1537  ;;  %v1542_v32 = vpop.permute.xlu1 %1541 }
 0x140   : > { %v1592_v57 = vmul.f32 %v1538_v33, %v4439_v7  ;;  %v1593_v38 = vmul.f32 %v1542_v32, %v4582_v28  ;;  %3931 = vset.pattern.permute.xlu2 %v4074_v60  ;;  %v674_v33 = vmul.f32 1.442695, %v654_v63  ;;  %2773 = vmatpush.bf16.msrb.mxu2 %v3791_v15  ;;  %v556_v32 = vpop.f32.mrf.mxu2 }
 0x141   : > { %1263 = vperm.xlu2 %3931, %v4396_v29   ;;  %2815 = vmatpush.bf16.msra.mxu1 %v3801_v21  ;;  %v601_v55 = vadd.f32 %v600_v62, %v556_v32  ;;  %v602_v32 = vpop.f32.mrf.mxu3 }
 0x142   : > { %v1606_v51 = vpack.c.bf16 %v1592_v57, %v1592_v57  ;;  %v1607_v52 = vpack.c.bf16 %v1593_v38, %v1593_v38  ;;  %v746_v57 = vor.u32 1.1754944e-38, %v745_v4  ;;  %4021 = vpow2.f32 %v674_v33 }
 0x143   : > { %3937 = vset.pattern.permute.xlu1 %v4072_v44  ;;  %3961 = vset.pattern.permute.xlu0 %v5454_v59  ;;  %v1734_v48 = vpop.permute.xlu2 %1733 }
 0x144   : > { %1620 = vst [vmem:[#allocation2 + $0x14] sm:$0xf] %v1606_v51  ;;  %v1788_v58 = vmul.f32 %v1734_v48, %v4439_v7  ;;  %1069 = vperm.xlu1 %3937, %v4420_v47   ;;  %1557 = vperm.xlu0 %3961, %v4396_v29   ;;  %v743_v7 = vand.u32 2147483647, %v4495_v53  ;;  %v742_v53 = vsel %vm4631_vm12, %v4543_v35, %v738_v61  ;;  %v670_v48 = vmul.f32 1.442695, %v652_v23 }
 0x145   : > { %1621 = vst [vmem:[#allocation2 + $0x34] sm:$0xf] %v1607_v52  ;;  %v752_v51 = vmul.f32 %v4593_v39, %v751_v17  ;;  %2816 = vmatpush.bf16.msra.mxu1 %v3800_v54 }
 0x146   : > { %v1802_v6 = vpack.c.bf16 %v1788_v58, %v1788_v58  ;;  %vm744_vm13 = vcmp.eq.f32.partialorder %v743_v7, 8.507059e+37  ;;  %v4660_v58 = vadd.f32 %v4354_v9, %v520_v40  ;;  %v3799_v7 = vld [vmem:[%s5452_s5 + $0xc0] sm:$0xff]  ;;  %4023 = vpow2.f32 %v670_v48 }
 0x147   : > { %v747_v46 = vsel %vm744_vm13, %v746_v57, %v742_v53  ;;  %v753_v4 = vadd.f32 %v4593_v39, %v752_v51  ;;  %v761_v57 = vor.u32 1.1754944e-38, %v760_v12 }
 0x148   : > { %1816 = vst [vmem:[#allocation2 + $0x1c] sm:$0xf] %v1802_v6  ;;  %v1738_v18 = vpop.permute.xlu1 %1737  ;;  %v916_v61 = vmul.f32 %v747_v46, %v4428_v56  ;;  %v4665_v6 = vpop.f32.mrf.mxu1  ;;  %v758_v56 = vand.u32 2147483647, %v4552_v45  ;;  %v653_v23 = vsub.f32 0.0, %v4660_v58 }
 0x149   : > { %v1789_v27 = vmul.f32 %v1738_v18, %v4582_v28  ;;  %v1040_v30 = vpop.permute.xlu0 %1039  ;;  %3932 = vset.pattern.permute.xlu2 %v4075_v1  ;;  %2817 = vmatpush.bf16.msra.mxu1 %v3799_v7  ;;  %v4022_v21 = vpop.eup %4021  ;;  %v757_v45 = vsel %vm4679_vm0, %v4593_v39, %v753_v4  ;;  %v3222_v46 = vld [vmem:[#allocation2] sm:$0xf] }
 0x14a   : > { %v1103_v38 = vmul.f32 %v1040_v30, %v4582_v28  ;;  %1361 = vperm.xlu2 %3932, %v4396_v29   ;;  %v4670_v15 = vmul.f32 %v916_v61, %v601_v55  ;;  %v558_v62 = vpop.f32.mrf.mxu2  ;;  %vm759_vm1 = vcmp.eq.f32.partialorder %v758_v56, 8.507059e+37  ;;  %v672_v54 = vmul.f32 1.442695, %v653_v23 }
 0x14b   : > { %v1803_v35 = vpack.c.bf16 %v1789_v27, %v1789_v27  ;;  %v762_v48 = vsel %vm759_vm1, %v761_v57, %v757_v45  ;;  %v603_v61 = vadd.f32 %v602_v32, %v558_v62 }
 0x14c   : > { %v1117_v52 = vpack.c.bf16 %v1103_v38, %v1103_v38  ;;  %3938 = vset.pattern.permute.xlu1 %v4071_v43  ;;  %3962 = vset.pattern.permute.xlu0 %v4072_v44  ;;  %v1640_v25 = vpop.permute.xlu2 %1639  ;;  %v4024_v39 = vpop.eup %4023  ;;  %v917_v4 = vmul.f32 %v762_v48, %v4462_v22 }
 0x14d   : > { %1817 = vst [vmem:[#allocation2 + $0x3c] sm:$0xf] %v1803_v35  ;;  %v1691_v49 = vmul.f32 %v1640_v25, %v4582_v28  ;;  %1173 = vperm.xlu1 %3938, %v4420_v47   ;;  %1064 = vperm.xlu0 %3962, %v4410_v36   ;;  %v4693_v25 = vadd.f32 1.0, %v4022_v21 }
 0x14e   : > { %1131 = vst [vmem:[#allocation2 + $0x20] sm:$0xf] %v1117_v52 }
 0x14f   : > { %v1705_v63 = vpack.c.bf16 %v1691_v49, %v1691_v49  ;;  %v485_v49 = vpop.f32.mrf.mxu0  ;;  %4025 = vrcp.f32 %v4693_v25  ;;  %vm799_vm2 = vweird.f32 %v4693_v25 }
 0x150   : > { %v4699_v7 = vpop.f32.mrf.mxu1  ;;  %v530_v12 = vadd.f32 %v4366_v13, %v485_v49  ;;  %4027 = vpow2.f32 %v672_v54 }
 0x151   : > { %1719 = vst [vmem:[#allocation2 + $0x38] sm:$0xf] %v1705_v63  ;;  %v4695_v63 = vadd.f32 1.0, %v4024_v39 }
 0x152   : > { %v1150_v17 = vpop.permute.xlu0 %1149  ;;  %v1045_v18 = vpop.permute.xlu1 %1044  ;;  %3933 = vset.pattern.permute.xlu2 %v5456_v10  ;;  %v4713_v45 = vadd.f32 %v4354_v9, %v530_v12 }
 0x153   : > { %v1201_v27 = vmul.f32 %v1150_v17, %v4582_v28  ;;  %v1104_v30 = vmul.f32 %v1045_v18, %v4670_v15  ;;  %1459 = vperm.xlu2 %3933, %v4396_v29   ;;  %v4703_v17 = vmul.f32 %v917_v4, %v603_v61  ;;  %4029 = vrcp.f32 %v4695_v63 }
 0x154   : > { %v1644_v33 = vpop.permute.xlu2 %1643  ;;  %vm769_vm7 = vweird.f32 %v4695_v63 }
 0x155   : > { %v1215_v38 = vpack.c.bf16 %v1201_v27, %v1201_v27  ;;  %v1118_v40 = vpack.c.bf16 %v1104_v30, %v1104_v30  ;;  %v1692_v35 = vmul.f32 %v1644_v33, %v4670_v15  ;;  %3939 = vset.pattern.permute.xlu1 %v4074_v60  ;;  %1079 = vperm.xlu0 %3962, %v4476_v34   ;;  %v3723_v51 = vld [vmem:[#allocation2 + $0x1c] sm:$0xf0]  ;;  %v3719_v27 = vld [vmem:[#allocation2 + $0x4] sm:$0xf]  ;;  %v4716_v62 = vpop.eup %4025 }
 0x156   : > { %1271 = vperm.xlu1 %3939, %v4420_v47   ;;  %v3223_v52 = vor.u32 %v3723_v51, %v3222_v46  ;;  %v657_v46 = vsub.f32 0.0, %v4713_v45  ;;  %v795_v51 = vmul.f32 %v4716_v62, %v4693_v25  ;;  %vm800_vm3 = vweird.f32 %v4716_v62 }
 0x157   : > { %1229 = vst [vmem:[#allocation2 + $0x24] sm:$0xf] %v1215_v38  ;;  %v1706_v55 = vpack.c.bf16 %v1692_v35, %v1692_v35  ;;  %v4028_v38 = vpop.eup %4027  ;;  %v4720_v35 = vpop.f32.mrf.mxu2  ;;  %vm4766_vm4 = vmor %vm799_vm2, %vm800_vm3 }
 0x158   : > { %1132 = vst [vmem:[#allocation2 + $0x40] sm:$0xf] %v1118_v40  ;;  %2686 = vmatmul.bf16.vlgmr.msra.gmra.mxu3 %v3223_v52  ;;  %v4718_v40 = vpop.f32.mrf.mxu3  ;;  %v4727_v39 = vadd.f32 1.0, %v4028_v38  ;;  %v680_v4 = vmul.f32 1.442695, %v657_v46 }
 0x159   : > { %1720 = vst [vmem:[#allocation2 + $0x58] sm:$0xf] %v1706_v55  ;;  %v4725_v52 = vpop.eup %4029 }
 0x15a   : > { %v765_v12 = vmul.f32 %v4725_v52, %v4695_v63  ;;  %4031 = vrcp.f32 %v4727_v39  ;;  %vm770_vm6 = vweird.f32 %v4725_v52  ;;  %vm784_vm11 = vweird.f32 %v4727_v39 }
 0x15b   : > { %v1248_v56 = vpop.permute.xlu0 %1247  ;;  %3941 = vset.pattern.permute.xlu2 %v4072_v44  ;;  %4033 = vpow2.f32 %v680_v4  ;;  %vm4791_vm8 = vmor %vm769_vm7, %vm770_vm6 }
 0x15c   : > { %v1299_v18 = vmul.f32 %v1248_v56, %v4582_v28  ;;  %v1154_v21 = vpop.permute.xlu1 %1153  ;;  %1074 = vperm.xlu2 %3941, %v4441_v8  }
 0x15d   : > { %v1202_v23 = vmul.f32 %v1154_v21, %v4670_v15  ;;  %1094 = vperm.xlu0 %3962, %v4699_v7   ;;  %v1158_v22 = vpop.permute.xlu2 %1157 }
 0x15e   : > { %v1313_v53 = vpack.c.bf16 %v1299_v18, %v1299_v18  ;;  %v1203_v13 = vmul.f32 %v1158_v22, %v4703_v17  ;;  %3940 = vset.pattern.permute.xlu1 %v4075_v1  ;;  %v3224_v30 = vld [vmem:[#allocation2 + $0x20] sm:$0xf0]  ;;  %v3230_v18 = vld [vmem:[#allocation2 + $0x8] sm:$0xf] }
 0x15f   : > { %v1216_v33 = vpack.c.bf16 %v1202_v23, %v1202_v23  ;;  %1369 = vperm.xlu1 %3940, %v4420_v47   ;;  %v3227_v32 = vor.u32 %v3719_v27, %v3224_v30  ;;  %v796_v23 = vsub.f32 1.0, %v795_v51 }
 0x160   : > { %1327 = vst [vmem:[#allocation2 + $0x28] sm:$0xf] %v1313_v53  ;;  %v1217_v57 = vpack.c.bf16 %v1203_v13, %v1203_v13  ;;  %v4741_v30 = vpop.f32.mrf.mxu3  ;;  %v4749_v46 = vpop.eup %4031 }
 0x161   : > { %1230 = vst [vmem:[#allocation2 + $0x44] sm:$0xf] %v1216_v33  ;;  %2730 = vmatmul.bf16.vlgmr.msrb.gmra.mxu0 %v3227_v32  ;;  %v797_v33 = vmul.f32 %v4716_v62, %v796_v23  ;;  %v766_v32 = vsub.f32 1.0, %v765_v12  ;;  %vm785_vm10 = vweird.f32 %v4749_v46 }
 0x162   : > { %1231 = vst [vmem:[#allocation2 + $0x64] sm:$0xf] %v1217_v57  ;;  %v4744_v57 = vpop.f32.mrf.mxu2  ;;  %vm4843_vm12 = vmor %vm784_vm11, %vm785_vm10 }
 0x163   : > { %v767_v23 = vmul.f32 %v4725_v52, %v766_v32  ;;  %v3720_v32 = vld [vmem:[#allocation2 + $0xc] sm:$0xf] }
 0x164   : > { %3942 = vset.pattern.permute.xlu2 %v4071_v43 }
 0x165   : > { %v1346_v54 = vpop.permute.xlu0 %1345  ;;  %v1252_v48 = vpop.permute.xlu1 %1251  ;;  %3963 = vset.pattern.permute.xlu0 %v4071_v43  ;;  %1177 = vperm.xlu2 %3942, %v4441_v8  }
 0x166   : > { %v1397_v55 = vmul.f32 %v1346_v54, %v4582_v28  ;;  %v1300_v49 = vmul.f32 %v1252_v48, %v4670_v15  ;;  %1193 = vperm.xlu0 %3963, %v4699_v7   ;;  %v1256_v61 = vpop.permute.xlu2 %1255 }
 0x167   : > { %v1301_v56 = vmul.f32 %v1256_v61, %v4703_v17  ;;  %3948 = vset.pattern.permute.xlu1 %v4072_v44  ;;  %v3724_v21 = vld [vmem:[#allocation2 + $0x24] sm:$0xf0] }
 0x168   : > { %v1411_v22 = vpack.c.bf16 %v1397_v55, %v1397_v55  ;;  %v1314_v53 = vpack.c.bf16 %v1300_v49, %v1300_v49  ;;  %1084 = vperm.xlu1 %3948, %v4624_v14   ;;  %v3231_v13 = vor.u32 %v3724_v21, %v3230_v18  ;;  %v3727_v48 = vld [vmem:[#allocation2 + $0x44] sm:$0xf]  ;;  %v803_v55 = vand.u32 2147483647, %v4693_v25  ;;  %v4034_v21 = vpop.eup %4033  ;;  %v610_v10 = vpop.f32.mrf.mxu3 }
 0x169   : > { %v1315_v27 = vpack.c.bf16 %v1301_v56, %v1301_v56  ;;  %v3256_v38 = vld [vmem:[#allocation2 + $0x60] sm:$0xf0]  ;;  %v805_v49 = vand.u32 2147483648, %v4693_v25  ;;  %v798_v18 = vadd.f32 %v4716_v62, %v797_v33  ;;  %v4777_v59 = vadd.f32 1.0, %v4034_v21 }
 0x16a   : > { %1425 = vst [vmem:[#allocation2 + $0x2c] sm:$0xf] %v1411_v22  ;;  %2774 = vmatmul.bf16.vlgmr.msrb.gmra.mxu2 %v3231_v13  ;;  %v3259_v56 = vor.u32 %v3727_v48, %v3256_v38  ;;  %v780_v13 = vmul.f32 %v4749_v46, %v4727_v39  ;;  %vm804_vm5 = vcmp.eq.f32.partialorder %v803_v55, 8.507059e+37  ;;  %v528_v21 = vadd.f32 %v4347_v3, %v4657_v5 }
 0x16b   : > { %1328 = vst [vmem:[#allocation2 + $0x48] sm:$0xf] %v1314_v53  ;;  %v773_v53 = vand.u32 2147483647, %v4695_v63  ;;  %v806_v48 = vor.u32 1.1754944e-38, %v805_v49  ;;  %4035 = vrcp.f32 %v4777_v59  ;;  %vm844_vm14 = vweird.f32 %v4777_v59 }
 0x16c   : > { %1329 = vst [vmem:[#allocation2 + $0x68] sm:$0xf] %v1315_v27 }
 0x16d   : > { %3943 = vset.pattern.permute.xlu2 %v4074_v60  ;;  %vm4795_vm9 = vcmp.eq.f32.partialorder %v773_v53, 8.507059e+37 }
 0x16e   : > { %v1444_v51 = vpop.permute.xlu0 %1443  ;;  %v1350_v54 = vpop.permute.xlu1 %1349  ;;  %3964 = vset.pattern.permute.xlu0 %v4074_v60  ;;  %1275 = vperm.xlu2 %3943, %v4441_v8  }
 0x16f   : > { %v1495_v61 = vmul.f32 %v1444_v51, %v4582_v28  ;;  %v1398_v4 = vmul.f32 %v1350_v54, %v4670_v15  ;;  %1291 = vperm.xlu0 %3964, %v4699_v7   ;;  %v1354_v12 = vpop.permute.xlu2 %1353  ;;  %v525_v51 = vadd.f32 %v4340_v0, %v4610_v20  ;;  %v566_v0 = vpop.f32.mrf.mxu2  ;;  %v781_v20 = vsub.f32 1.0, %v780_v13 }
 0x170   : > { %v1399_v22 = vmul.f32 %v1354_v12, %v4703_v17  ;;  %3949 = vset.pattern.permute.xlu1 %v4071_v43  ;;  %v775_v12 = vand.u32 2147483648, %v4695_v63 }
 0x171   : > { %v1509_v27 = vpack.c.bf16 %v1495_v61, %v1495_v61  ;;  %v1412_v33 = vpack.c.bf16 %v1398_v4, %v1398_v4  ;;  %1185 = vperm.xlu1 %3949, %v4624_v14   ;;  %2735 = vmatmul.bf16.gmra.mxu0 %v3259_v56  ;;  %v3232_v38 = vld [vmem:[#allocation2 + $0x28] sm:$0xf0]  ;;  %v802_v61 = vsel %vm4766_vm4, %v4716_v62, %v798_v18 }
 0x172   : > { %v1413_v25 = vpack.c.bf16 %v1399_v22, %v1399_v22  ;;  %v3235_v54 = vor.u32 %v3720_v32, %v3232_v38  ;;  %v768_v4 = vadd.f32 %v4725_v52, %v767_v23  ;;  %v4786_v56 = vadd.f32 %v4354_v9, %v525_v51  ;;  %v3262_v3 = vld [vmem:[#allocation2 + $0x48] sm:$0xf] }
 0x173   : > { %1523 = vst [vmem:[#allocation2 + $0x30] sm:$0xf] %v1509_v27  ;;  %v3732_v49 = vld [vmem:[#allocation2 + $0x64] sm:$0xf0]  ;;  %v807_v62 = vsel %vm804_vm5, %v806_v48, %v802_v61  ;;  %v776_v23 = vor.u32 1.1754944e-38, %v775_v12  ;;  %v4808_v27 = vpop.f32.mrf.mxu0  ;;  %v782_v32 = vmul.f32 %v4749_v46, %v781_v20  ;;  %v611_v51 = vadd.f32 %v610_v10, %v566_v0  ;;  %v4823_v10 = vpop.eup %4035 }
 0x174   : > { %1426 = vst [vmem:[#allocation2 + $0x4c] sm:$0xf] %v1412_v33  ;;  %2818 = vmatmul.bf16.vlgmr.msra.gmra.mxu1 %v3235_v54  ;;  %v772_v5 = vsel %vm4791_vm8, %v4725_v52, %v768_v4  ;;  %v3263_v33 = vor.u32 %v3732_v49, %v3262_v3  ;;  %v655_v52 = vsub.f32 0.0, %v4786_v56  ;;  %v4816_v54 = vadd.f32 %v4354_v9, %v528_v21  ;;  %v4830_v49 = vpop.f32.mrf.mxu3 }
 0x175   : > { %1427 = vst [vmem:[#allocation2 + $0x6c] sm:$0xf] %v1413_v25  ;;  %v920_v25 = vmul.f32 %v807_v62, %v4600_v50  ;;  %v777_v61 = vsel %vm4795_vm9, %v776_v23, %v772_v5  ;;  %v606_v20 = vadd.f32 %v4718_v40, %v4720_v35  ;;  %v783_v50 = vadd.f32 %v4749_v46, %v782_v32 }
 0x176   : > { %3944 = vset.pattern.permute.xlu2 %v4075_v1  ;;  %v790_v9 = vand.u32 2147483648, %v4727_v39  ;;  %v918_v21 = vmul.f32 %v777_v61, %v4618_v41  ;;  %v676_v62 = vmul.f32 1.442695, %v655_v52  ;;  %v656_v55 = vsub.f32 0.0, %v4816_v54 }
 0x177   : > { %v1448_v63 = vpop.permute.xlu1 %1447  ;;  %v1648_v22 = vpop.permute.xlu0 %1647  ;;  %3965 = vset.pattern.permute.xlu0 %v4075_v1  ;;  %1373 = vperm.xlu2 %3944, %v4441_v8   ;;  %v4828_v0 = vmul.f32 %v920_v25, %v611_v51  ;;  %v788_v35 = vand.u32 2147483647, %v4727_v39  ;;  %v840_v39 = vmul.f32 %v4823_v10, %v4777_v59  ;;  %v787_v3 = vsel %vm4843_vm12, %v4749_v46, %v783_v50 }
 0x178   : > { %v1496_v28 = vmul.f32 %v1448_v63, %v4670_v15  ;;  %v1693_v53 = vmul.f32 %v1648_v22, %v4703_v17  ;;  %1389 = vperm.xlu0 %3965, %v4699_v7   ;;  %v1452_v13 = vpop.permute.xlu2 %1451  ;;  %v4834_v40 = vpop.f32.mrf.mxu2  ;;  %v4839_v23 = vmul.f32 %v918_v21, %v606_v20  ;;  %v791_v5 = vor.u32 1.1754944e-38, %v790_v9 }
 0x179   : > { %v1497_v38 = vmul.f32 %v1452_v13, %v4703_v17  ;;  %3950 = vset.pattern.permute.xlu1 %v4074_v60  ;;  %4037 = vpow2.f32 %v676_v62  ;;  %v678_v32 = vmul.f32 1.442695, %v656_v55  ;;  %vm789_vm13 = vcmp.eq.f32.partialorder %v788_v35, 8.507059e+37 }
 0x17a   : > { %v1510_v48 = vpack.c.bf16 %v1496_v28, %v1496_v28  ;;  %v1707_v12 = vpack.c.bf16 %v1693_v53, %v1693_v53  ;;  %1283 = vperm.xlu1 %3950, %v4624_v14   ;;  %2779 = vmatmul.bf16.gmra.mxu2 %v3263_v33  ;;  %v841_v61 = vsub.f32 1.0, %v840_v39  ;;  %vm845_vm15 = vweird.f32 %v4823_v10 }
 0x17b   : > { %v1511_v4 = vpack.c.bf16 %v1497_v38, %v1497_v38  ;;  %v3728_v33 = vld [vmem:[#allocation2 + $0x4c] sm:$0xf]  ;;  %v4859_v51 = vpop.f32.mrf.mxu0  ;;  %4039 = vpow2.f32 %v678_v32  ;;  %vm4890_vm0 = vmor %vm844_vm14, %vm845_vm15 }
 0x17c   : > { %1524 = vst [vmem:[#allocation2 + $0x50] sm:$0xf] %v1510_v48  ;;  %v3264_v18 = vld [vmem:[#allocation2 + $0x68] sm:$0xf0]  ;;  %v792_v48 = vsel %vm789_vm13, %v791_v5, %v787_v3  ;;  %v4865_v50 = vpop.f32.mrf.mxu3  ;;  %v842_v62 = vmul.f32 %v4823_v10, %v841_v61 }
 0x17d   : > { %1721 = vst [vmem:[#allocation2 + $0x78] sm:$0xf] %v1707_v12  ;;  %v3267_v25 = vor.u32 %v3728_v33, %v3264_v18  ;;  %v919_v20 = vmul.f32 %v792_v48, %v4660_v58 }
 0x17e   : > { %1525 = vst [vmem:[#allocation2 + $0x70] sm:$0xf] %v1511_v4  ;;  %v608_v4 = vadd.f32 %v4741_v30, %v4744_v57 }
 0x17f   : > { %3952 = vset.pattern.permute.xlu2 %v4072_v44  ;;  %v4038_v9 = vpop.eup %4037 }
 0x180   : > { %v1546_v41 = vpop.permute.xlu1 %1545  ;;  %3966 = vset.pattern.permute.xlu0 %v4070_v42  ;;  %v1170_v22 = vpop.permute.xlu0 %1169  ;;  %1089 = vperm.xlu2 %3952, %v4665_v6   ;;  %v4871_v55 = vmul.f32 %v919_v20, %v608_v4  ;;  %v4879_v63 = vadd.f32 1.0, %v4038_v9 }
 0x181   : > { %v1594_v28 = vmul.f32 %v1546_v41, %v4670_v15  ;;  %v1206_v53 = vmul.f32 %v1170_v22, %v4828_v0  ;;  %1651 = vperm.xlu0 %3966, %v4386_v24   ;;  %v1055_v13 = vpop.permute.xlu2 %1054  ;;  %v4868_v21 = vpop.f32.mrf.mxu2  ;;  %v850_v22 = vand.u32 2147483648, %v4777_v59 }
 0x182   : > { %v1106_v38 = vmul.f32 %v1055_v13, %v4839_v23  ;;  %3951 = vset.pattern.permute.xlu1 %v4075_v1  ;;  %v4040_v39 = vpop.eup %4039  ;;  %v848_v13 = vand.u32 2147483647, %v4777_v59  ;;  %4041 = vrcp.f32 %v4879_v63  ;;  %v4903_v59 = vld [vmem:[%s5450_s3] ss:$0 sm:$0xff]  ;;  %vm814_vm2 = vweird.f32 %v4879_v63 }
 0x183   : > { %v1608_v46 = vpack.c.bf16 %v1594_v28, %v1594_v28  ;;  %v1220_v52 = vpack.c.bf16 %v1206_v53, %v1206_v53  ;;  %1381 = vperm.xlu1 %3951, %v4624_v14   ;;  %v493_v28 = vpop.f32.mrf.mxu0  ;;  %v843_v53 = vadd.f32 %v4823_v10, %v842_v62 }
 0x184   : > { %v1120_v12 = vpack.c.bf16 %v1106_v38, %v1106_v38  ;;  %2823 = vmatmul.bf16.gmra.mxu1 %v3267_v25  ;;  %v538_v32 = vadd.f32 %v4398_v31, %v493_v28  ;;  %v4895_v25 = vadd.f32 1.0, %v4040_v39  ;;  %vm849_vm1 = vcmp.eq.f32.partialorder %v848_v13, 8.507059e+37  ;;  %v617_v48 = vpop.f32.mrf.mxu3 }
 0x185   : > { %1622 = vst [vmem:[#allocation2 + $0x54] sm:$0xf] %v1608_v46  ;;  %v847_v46 = vsel %vm4890_vm0, %v4823_v10, %v843_v53 }
 0x186   : > { %1234 = vst [vmem:[#allocation2 + $0xc4] sm:$0xf] %v1220_v52  ;;  %v4906_v31 = vadd.f32 %v4903_v59, %v538_v32  ;;  %v5474_v52 = vmov 4   ;;  %4043 = vrcp.f32 %v4895_v25  ;;  %vm829_vm4 = vweird.f32 %v4895_v25 }
 0x187   : > { %1134 = vst [vmem:[#allocation2 + $0x80] sm:$0xf] %v1120_v12 }
 0x188   : > { %3953 = vset.pattern.permute.xlu2 %v4071_v43 }
 0x189   : > { %v1050_v35 = vpop.permute.xlu1 %1049  ;;  %v1268_v18 = vpop.permute.xlu0 %1267  ;;  %1663 = vperm.xlu0 %3966, %v4420_v47   ;;  %1189 = vperm.xlu2 %3953, %v4665_v6  }
 0x18a   : > { %v1105_v58 = vmul.f32 %v1050_v35, %v4703_v17  ;;  %v1304_v30 = vmul.f32 %v1268_v18, %v4828_v0  ;;  %v1060_v57 = vpop.permute.xlu2 %1059  ;;  %v573_v9 = vpop.f32.mrf.mxu2 }
 0x18b   : > { %v1107_v41 = vmul.f32 %v1060_v57, %v4871_v55  ;;  %3957 = vset.pattern.permute.xlu1 %v4076_v2  ;;  %v4917_v18 = vpop.eup %4041 }
 0x18c   : > { %v1119_v3 = vpack.c.bf16 %v1105_v58, %v1105_v58  ;;  %v1318_v5 = vpack.c.bf16 %v1304_v30, %v1304_v30  ;;  %1741 = vperm.xlu1 %3957, %v4358_v11   ;;  %v851_v11 = vor.u32 1.1754944e-38, %v850_v22  ;;  %v533_v58 = vadd.f32 %v4374_v16, %v4808_v27  ;;  %v3254_v22 = vld [vmem:[#allocation2 + $0x40] sm:$0xf]  ;;  %v4926_v16 = vpop.eup %4043 }
 0x18d   : > { %v1121_v33 = vpack.c.bf16 %v1107_v41, %v1107_v41  ;;  %v660_v30 = vsub.f32 0.0, %v4906_v31  ;;  %v810_v13 = vmul.f32 %v4917_v18, %v4879_v63  ;;  %vm815_vm3 = vweird.f32 %v4917_v18 }
 0x18e   : > { %1133 = vst [vmem:[#allocation2 + $0x60] sm:$0xf] %v1119_v3  ;;  %v852_v62 = vsel %vm849_vm1, %v851_v11, %v847_v46  ;;  %v4929_v27 = vadd.f32 %v4903_v59, %v533_v58  ;;  %vm830_vm5 = vweird.f32 %v4926_v16  ;;  %vm4977_vm6 = vmor %vm814_vm2, %vm815_vm3 }
 0x18f   : > { %1332 = vst [vmem:[#allocation2 + $0xc8] sm:$0xf] %v1318_v5  ;;  %v618_v5 = vadd.f32 %v617_v48, %v573_v9  ;;  %v923_v28 = vmul.f32 %v852_v62, %v4713_v45  ;;  %v686_v32 = vmul.f32 1.442695, %v660_v30  ;;  %v811_v46 = vsub.f32 1.0, %v810_v13  ;;  %vm4987_vm7 = vmor %vm829_vm4, %vm830_vm5 }
 0x190   : > { %1135 = vst [vmem:[#allocation2 + $0xa0] sm:$0xf] %v1121_v33  ;;  %v535_v33 = vadd.f32 %v4388_v26, %v4859_v51  ;;  %v825_v48 = vmul.f32 %v4926_v16, %v4895_v25 }
 0x191   : > { %3975 = vset.pattern.permute.xlu0 %v5474_v52  ;;  %3954 = vset.pattern.permute.xlu2 %v4074_v60  ;;  %v4933_v38 = vmul.f32 %v923_v28, %v618_v5  ;;  %4045 = vpow2.f32 %v686_v32  ;;  %v812_v30 = vmul.f32 %v4917_v18, %v811_v46  ;;  %v5475_v5 = vmov 5  }
 0x192   : > { %v1162_v12 = vpop.permute.xlu1 %1161  ;;  %v1366_v61 = vpop.permute.xlu0 %1365  ;;  %1463 = vperm.xlu0 %3975, %v4410_v36   ;;  %1287 = vperm.xlu2 %3954, %v4665_v6  }
 0x193   : > { %v1204_v10 = vmul.f32 %v1162_v12, %v4839_v23  ;;  %v1402_v4 = vmul.f32 %v1366_v61, %v4828_v0  ;;  %v1166_v20 = vpop.permute.xlu2 %1165  ;;  %v658_v61 = vsub.f32 0.0, %v4929_v27  ;;  %v813_v13 = vadd.f32 %v4917_v18, %v812_v30 }
 0x194   : > { %v1205_v35 = vmul.f32 %v1166_v20, %v4871_v55  ;;  %3959 = vset.pattern.permute.xlu1 %v4070_v42 }
 0x195   : > { %v1218_v57 = vpack.c.bf16 %v1204_v10, %v1204_v10  ;;  %v1416_v41 = vpack.c.bf16 %v1402_v4, %v1402_v4  ;;  %1655 = vperm.xlu1 %3959, %v4396_v29   ;;  %v3731_v39 = vld [vmem:[#allocation2 + $0x5c] sm:$0xf0]  ;;  %v4944_v10 = vadd.f32 %v4903_v59, %v535_v33  ;;  %v4946_v4 = vpop.f32.mrf.mxu1  ;;  %v818_v33 = vand.u32 2147483647, %v4879_v63 }
 0x196   : > { %v1219_v3 = vpack.c.bf16 %v1205_v35, %v1205_v35  ;;  %v3255_v53 = vor.u32 %v3731_v39, %v3254_v22  ;;  %v682_v22 = vmul.f32 1.442695, %v658_v61 }
 0x197   : > { %1232 = vst [vmem:[#allocation2 + $0x84] sm:$0xf] %v1218_v57  ;;  %v826_v57 = vsub.f32 1.0, %v825_v48  ;;  %v659_v39 = vsub.f32 0.0, %v4944_v10  ;;  %v3739_v28 = vld [vmem:[#allocation2 + $0x9c] sm:$0xf0] }
 0x198   : > { %1430 = vst [vmem:[#allocation2 + $0xcc] sm:$0xf] %v1416_v41  ;;  %2691 = vmatmul.bf16.gmra.mxu3 %v3255_v53  ;;  %v4046_v53 = vpop.eup %4045  ;;  %4047 = vpow2.f32 %v682_v22  ;;  %vm819_vm8 = vcmp.eq.f32.partialorder %v818_v33, 8.507059e+37 }
 0x199   : > { %1233 = vst [vmem:[#allocation2 + $0xa4] sm:$0xf] %v1219_v3  ;;  %v827_v32 = vmul.f32 %v4926_v16, %v826_v57  ;;  %v684_v46 = vmul.f32 1.442695, %v659_v39  ;;  %v5022_v39 = vpop.f32.mrf.mxu2 }
 0x19a   : > { %1471 = vperm.xlu0 %3975, %v4441_v8   ;;  %3955 = vset.pattern.permute.xlu2 %v4075_v1 }
 0x19b   : > { %v1260_v45 = vpop.permute.xlu1 %1259  ;;  %v1182_v11 = vpop.permute.xlu0 %1181  ;;  %1385 = vperm.xlu2 %3955, %v4665_v6   ;;  %4049 = vpow2.f32 %v684_v46 }
 0x19c   : > { %v1302_v12 = vmul.f32 %v1260_v45, %v4839_v23  ;;  %v1209_v26 = vmul.f32 %v1182_v11, %v4933_v38  ;;  %v1264_v51 = vpop.permute.xlu2 %1263 }
 0x19d   : > { %v1303_v20 = vmul.f32 %v1264_v51, %v4871_v55  ;;  %3967 = vset.pattern.permute.xlu1 %v4072_v44  ;;  %v820_v44 = vand.u32 2147483648, %v4879_v63  ;;  %v3286_v51 = vld [vmem:[#allocation2 + $0x80] sm:$0xf] }
 0x19e   : > { %v1316_v9 = vpack.c.bf16 %v1302_v12, %v1302_v12  ;;  %v1223_v62 = vpack.c.bf16 %v1209_v26, %v1209_v26  ;;  %1099 = vperm.xlu1 %3967, %v4946_v4   ;;  %v3735_v35 = vld [vmem:[#allocation2 + $0x84] sm:$0xf] }
 0x19f   : > { %v1317_v58 = vpack.c.bf16 %v1303_v20, %v1303_v20  ;;  %v3287_v20 = vor.u32 %v3739_v28, %v3286_v51 }
 0x1a0   : > { %1330 = vst [vmem:[#allocation2 + $0x88] sm:$0xf] %v1316_v9  ;;  %v3288_v41 = vld [vmem:[#allocation2 + $0xa0] sm:$0xf0]  ;;  %v4969_v9 = vadd.f32 1.0, %v4046_v53  ;;  %v4048_v53 = vpop.eup %4047 }
 0x1a1   : > { %1237 = vst [vmem:[#allocation2 + $0x124] sm:$0xf] %v1223_v62  ;;  %v3291_v3 = vor.u32 %v3735_v35, %v3288_v41  ;;  %v835_v62 = vand.u32 2147483648, %v4895_v25  ;;  %v833_v41 = vand.u32 2147483647, %v4895_v25 }
 0x1a2   : > { %1331 = vst [vmem:[#allocation2 + $0xa8] sm:$0xf] %v1317_v58  ;;  %3984 = vset.pattern.permute.xlu0 %v5475_v5  ;;  %4051 = vrcp.f32 %v4969_v9  ;;  %vm889_vm10 = vweird.f32 %v4969_v9 }
 0x1a3   : > { %2740 = vmatmul.bf16.gmra.mxu0 %v3291_v3  ;;  %1573 = vperm.xlu0 %3984, %v4476_v34   ;;  %v821_v3 = vor.u32 1.1754944e-38, %v820_v44  ;;  %vm834_vm9 = vcmp.eq.f32.partialorder %v833_v41, 8.507059e+37 }
 0x1a4   : > { %v1358_v45 = vpop.permute.xlu1 %1357  ;;  %v1280_v11 = vpop.permute.xlu0 %1279  ;;  %3956 = vset.pattern.permute.xlu2 %v5475_v5 }
 0x1a5   : > { %v1400_v48 = vmul.f32 %v1358_v45, %v4839_v23  ;;  %v1307_v12 = vmul.f32 %v1280_v11, %v4933_v38  ;;  %v1362_v26 = vpop.permute.xlu2 %1361  ;;  %1549 = vperm.xlu2 %3956, %v4378_v19   ;;  %v836_v45 = vor.u32 1.1754944e-38, %v835_v62 }
 0x1a6   : > { %v1401_v61 = vmul.f32 %v1362_v26, %v4871_v55  ;;  %3968 = vset.pattern.permute.xlu1 %v4071_v43  ;;  %v828_v43 = vadd.f32 %v4926_v16, %v827_v32  ;;  %v817_v32 = vsel %vm4977_vm6, %v4917_v18, %v813_v13  ;;  %v5001_v18 = vadd.f32 1.0, %v4048_v53 }
 0x1a7   : > { %v1414_v35 = vpack.c.bf16 %v1400_v48, %v1400_v48  ;;  %v1321_v58 = vpack.c.bf16 %v1307_v12, %v1307_v12  ;;  %1197 = vperm.xlu1 %3968, %v4946_v4   ;;  %v3294_v30 = vld [vmem:[#allocation2 + $0x88] sm:$0xf]  ;;  %v822_v13 = vsel %vm819_vm8, %v821_v3, %v817_v32  ;;  %v4050_v12 = vpop.eup %4049 }
 0x1a8   : > { %v1415_v22 = vpack.c.bf16 %v1401_v61, %v1401_v61  ;;  %2696 = vmatmul.bf16.gmra.mxu3 %v3287_v20  ;;  %v832_v25 = vsel %vm4987_vm7, %v4926_v16, %v828_v43  ;;  %v5009_v62 = vpop.eup %4051  ;;  %4053 = vrcp.f32 %v5001_v18  ;;  %vm859_vm14 = vweird.f32 %v5001_v18 }
 0x1a9   : > { %1428 = vst [vmem:[#allocation2 + $0x8c] sm:$0xf] %v1414_v35  ;;  %v3740_v63 = vld [vmem:[#allocation2 + $0xa4] sm:$0xf0]  ;;  %v837_v16 = vsel %vm834_vm9, %v836_v45, %v832_v25  ;;  %v613_v35 = vadd.f32 %v4830_v49, %v4834_v40  ;;  %vm890_vm11 = vweird.f32 %v5009_v62 }
 0x1aa   : > { %1335 = vst [vmem:[#allocation2 + $0x128] sm:$0xf] %v1321_v58  ;;  %v3295_v28 = vor.u32 %v3740_v63, %v3294_v30  ;;  %v921_v58 = vmul.f32 %v822_v13, %v4786_v56  ;;  %v922_v57 = vmul.f32 %v837_v16, %v4816_v54  ;;  %v885_v56 = vmul.f32 %v5009_v62, %v4969_v9  ;;  %vm5074_vm12 = vmor %vm889_vm10, %vm890_vm11 }
 0x1ab   : > { %1429 = vst [vmem:[#allocation2 + $0xac] sm:$0xf] %v1415_v22  ;;  %3989 = vset.pattern.permute.xlu0 %v4070_v42  ;;  %v5020_v22 = vpop.f32.mrf.mxu3  ;;  %v895_v16 = vand.u32 2147483648, %v4969_v9 }
 0x1ac   : > { %2784 = vmatmul.bf16.gmra.mxu2 %v3295_v28  ;;  %1675 = vperm.xlu0 %3989, %v4624_v14   ;;  %v5027_v49 = vmul.f32 %v921_v58, %v613_v35  ;;  %v886_v53 = vsub.f32 1.0, %v885_v56 }
 0x1ad   : > { %v1456_v44 = vpop.permute.xlu1 %1455  ;;  %v1378_v11 = vpop.permute.xlu0 %1377  ;;  %3958 = vset.pattern.permute.xlu2 %v4076_v2 }
 0x1ae   : > { %v1498_v33 = vmul.f32 %v1456_v44, %v4839_v23  ;;  %v1405_v46 = vmul.f32 %v1378_v11, %v4933_v38  ;;  %v1460_v48 = vpop.permute.xlu2 %1459  ;;  %1745 = vperm.xlu2 %3958, %v4378_v19   ;;  %v5015_v19 = vadd.f32 1.0, %v4050_v12  ;;  %v5037_v28 = vpop.eup %4053 }
 0x1af   : > { %v1499_v26 = vmul.f32 %v1460_v48, %v4871_v55  ;;  %3969 = vset.pattern.permute.xlu1 %v4074_v60  ;;  %v616_v60 = vadd.f32 %v4865_v50, %v4868_v21  ;;  %v855_v11 = vmul.f32 %v5037_v28, %v5001_v18  ;;  %vm860_vm15 = vweird.f32 %v5037_v28 }
 0x1b0   : > { %v1512_v51 = vpack.c.bf16 %v1498_v33, %v1498_v33  ;;  %v1419_v61 = vpack.c.bf16 %v1405_v46, %v1405_v46  ;;  %1295 = vperm.xlu1 %3969, %v4946_v4   ;;  %v3736_v20 = vld [vmem:[#allocation2 + $0x8c] sm:$0xf]  ;;  %4055 = vrcp.f32 %v5015_v19  ;;  %v887_v33 = vmul.f32 %v5009_v62, %v886_v53  ;;  %vm5115_vm2 = vmor %vm859_vm14, %vm860_vm15 }
 0x1b1   : > { %v1513_v30 = vpack.c.bf16 %v1499_v26, %v1499_v26  ;;  %v5031_v54 = vmul.f32 %v922_v57, %v616_v60  ;;  %v856_v48 = vsub.f32 1.0, %v855_v11  ;;  %v3814_v60 = vld [vmem:[%s5452_s5 + $0x138] sm:$0xff]  ;;  %vm874_vm0 = vweird.f32 %v5015_v19 }
 0x1b2   : > { %1526 = vst [vmem:[#allocation2 + $0x90] sm:$0xf] %v1512_v51  ;;  %v3296_v43 = vld [vmem:[#allocation2 + $0xa8] sm:$0xf0]  ;;  %v3830_v57 = vld [vmem:[%s5452_s5 + $0x1b8] sm:$0xff]  ;;  %2854 = vmatpush.bf16.msrb.mxu3 %v3814_v60 }
 0x1b3   : > { %1433 = vst [vmem:[#allocation2 + $0x12c] sm:$0xf] %v1419_v61  ;;  %v3299_v41 = vor.u32 %v3736_v20, %v3296_v43  ;;  %v5048_v46 = vpop.f32.mrf.mxu3  ;;  %v888_v61 = vadd.f32 %v5009_v62, %v887_v33  ;;  %v893_v20 = vand.u32 2147483647, %v4969_v9  ;;  %2942 = vmatpush.bf16.msra.mxu2 %v3830_v57  ;;  %v878_v43 = vand.u32 2147483647, %v5015_v19 }
 0x1b4   : > { %1527 = vst [vmem:[#allocation2 + $0xb0] sm:$0xf] %v1513_v30  ;;  %3994 = vset.pattern.permute.xlu0 %v4076_v2 }
 0x1b5   : > { %2828 = vmatmul.bf16.gmra.mxu1 %v3299_v41  ;;  %1777 = vperm.xlu0 %3994, %v4665_v6   ;;  %v892_v9 = vsel %vm5074_vm12, %v5009_v62, %v888_v61  ;;  %vm894_vm13 = vcmp.eq.f32.partialorder %v893_v20, 8.507059e+37  ;;  %v865_v62 = vand.u32 2147483648, %v5001_v18  ;;  %v3813_v61 = vld [vmem:[%s5452_s5 + $0x130] sm:$0xff]  ;;  %v880_v20 = vand.u32 2147483648, %v5015_v19 }
 0x1b6   : > { %v1070_v40 = vpop.permute.xlu1 %1069  ;;  %v1558_v50 = vpop.permute.xlu0 %1557  ;;  %3960 = vset.pattern.permute.xlu2 %v5475_v5  ;;  %2855 = vmatpush.bf16.msrb.mxu3 %v3813_v61  ;;  %vm879_vm5 = vcmp.eq.f32.partialorder %v878_v43, 8.507059e+37 }
 0x1b7   : > { %v1109_v21 = vmul.f32 %v1070_v40, %v5027_v49  ;;  %v1597_v63 = vmul.f32 %v1558_v50, %v4871_v55  ;;  %v1075_v3 = vpop.permute.xlu2 %1074  ;;  %1553 = vperm.xlu2 %3960, %v4386_v24   ;;  %v5044_v13 = vpop.eup %4055  ;;  %v896_v50 = vor.u32 1.1754944e-38, %v895_v16 }
 0x1b8   : > { %v1110_v32 = vmul.f32 %v1075_v3, %v5031_v54  ;;  %3970 = vset.pattern.permute.xlu1 %v4075_v1  ;;  %v5050_v1 = vpop.f32.mrf.mxu2  ;;  %v870_v12 = vmul.f32 %v5044_v13, %v5015_v19  ;;  %vm875_vm1 = vweird.f32 %v5044_v13 }
 0x1b9   : > { %v1123_v45 = vpack.c.bf16 %v1109_v21, %v1109_v21  ;;  %v1611_v25 = vpack.c.bf16 %v1597_v63, %v1597_v63  ;;  %1393 = vperm.xlu1 %3970, %v4946_v4   ;;  %v857_v63 = vmul.f32 %v5037_v28, %v856_v48  ;;  %v897_v3 = vsel %vm894_vm13, %v896_v50, %v892_v9  ;;  %vm5126_vm3 = vmor %vm874_vm0, %vm875_vm1 }
 0x1ba   : > { %v1124_v44 = vpack.c.bf16 %v1110_v32, %v1110_v32  ;;  %v871_v40 = vsub.f32 1.0, %v870_v12  ;;  %v866_v9 = vor.u32 1.1754944e-38, %v865_v62  ;;  %v623_v60 = vadd.f32 %v5048_v46, %v5050_v1 }
 0x1bb   : > { %1137 = vst [vmem:[#allocation2 + $0xe0] sm:$0xf] %v1123_v45  ;;  %v858_v32 = vadd.f32 %v5037_v28, %v857_v63  ;;  %v863_v45 = vand.u32 2147483647, %v5001_v18  ;;  %v625_v33 = vpop.f32.mrf.mxu3 }
 0x1bc   : > { %1625 = vst [vmem:[#allocation2 + $0xb4] sm:$0xf] %v1611_v25 }
 0x1bd   : > { %1138 = vst [vmem:[#allocation2 + $0x100] sm:$0xf] %v1124_v44  ;;  %3999 = vset.pattern.permute.xlu0 %v5475_v5  ;;  %vm864_vm4 = vcmp.eq.f32.partialorder %v863_v45, 8.507059e+37 }
 0x1be   : > { %1585 = vperm.xlu0 %3999, %v4699_v7  }
 0x1bf   : > { %v1174_v26 = vpop.permute.xlu1 %1173  ;;  %v1065_v51 = vpop.permute.xlu0 %1064  ;;  %3972 = vset.pattern.permute.xlu2 %v4076_v2 }
 0x1c0   : > { %v1207_v35 = vmul.f32 %v1174_v26, %v5027_v49  ;;  %v1108_v58 = vmul.f32 %v1065_v51, %v4828_v0  ;;  %v1178_v30 = vpop.permute.xlu2 %1177  ;;  %1753 = vperm.xlu2 %3972, %v4396_v29   ;;  %v581_v48 = vpop.f32.mrf.mxu2  ;;  %v3822_v26 = vld [vmem:[%s5452_s5 + $0x178] sm:$0xff] }
 0x1c1   : > { %v1208_v41 = vmul.f32 %v1178_v30, %v5031_v54  ;;  %3971 = vset.pattern.permute.xlu1 %v4076_v2  ;;  %v3838_v51 = vld [vmem:[%s5452_s5 + $0x1f8] sm:$0xff]  ;;  %2898 = vmatpush.bf16.msra.mxu0 %v3822_v26 }
 0x1c2   : > { %v1221_v29 = vpack.c.bf16 %v1207_v35, %v1207_v35  ;;  %v1122_v56 = vpack.c.bf16 %v1108_v58, %v1108_v58  ;;  %1749 = vperm.xlu1 %3971, %v4386_v24   ;;  %v872_v24 = vmul.f32 %v5044_v13, %v871_v40  ;;  %v626_v35 = vadd.f32 %v625_v33, %v581_v48  ;;  %v495_v40 = vpop.f32.mrf.mxu0 }
 0x1c3   : > { %v1222_v21 = vpack.c.bf16 %v1208_v41, %v1208_v41  ;;  %v926_v58 = vmul.f32 %v897_v3, %v4906_v31  ;;  %v3743_v31 = vld [vmem:[#allocation2 + $0xc4] sm:$0xf]  ;;  %2986 = vmatpush.bf16.msrb.mxu1 %v3838_v51  ;;  %v862_v3 = vsel %vm5115_vm2, %v5037_v28, %v858_v32  ;;  %v621_v51 = vadd.f32 %v5020_v22, %v5022_v39  ;;  %v5161_v43 = vpop.f32.mrf.mxu3 }
 0x1c4   : > { %1235 = vst [vmem:[#allocation2 + $0xe4] sm:$0xf] %v1221_v29  ;;  %v873_v57 = vadd.f32 %v5044_v13, %v872_v24  ;;  %v867_v33 = vsel %vm864_vm4, %v866_v9, %v862_v3  ;;  %v3812_v9 = vld [vmem:[%s5452_s5 + $0x128] sm:$0xff] }
 0x1c5   : > { %1136 = vst [vmem:[#allocation2 + $0xc0] sm:$0xf] %v1122_v56  ;;  %v5133_v19 = vmul.f32 %v926_v58, %v626_v35  ;;  %v3326_v35 = vld [vmem:[#allocation2 + $0xc8] sm:$0xf]  ;;  %2856 = vmatpush.bf16.msrb.mxu3 %v3812_v9 }
 0x1c6   : > { %1236 = vst [vmem:[#allocation2 + $0x104] sm:$0xf] %v1222_v21  ;;  %4003 = vset.pattern.permute.xlu0 %v4076_v2  ;;  %v3747_v21 = vld [vmem:[#allocation2 + $0xdc] sm:$0xf0] }
 0x1c7   : > { %v1080_v53 = vpop.permute.xlu0 %1079 }
 0x1c8   : > { %v1111_v25 = vmul.f32 %v1080_v53, %v4933_v38  ;;  %v1272_v44 = vpop.permute.xlu1 %1271  ;;  %3974 = vset.pattern.permute.xlu2 %v4070_v42  ;;  %v1276_v11 = vpop.permute.xlu2 %1275  ;;  %v881_v53 = vor.u32 1.1754944e-38, %v880_v20 }
 0x1c9   : > { %v1305_v12 = vmul.f32 %v1272_v44, %v5027_v49  ;;  %v1306_v16 = vmul.f32 %v1276_v11, %v5031_v54  ;;  %1659 = vperm.xlu2 %3974, %v4410_v36   ;;  %v877_v44 = vsel %vm5126_vm3, %v5044_v13, %v873_v57  ;;  %v3829_v13 = vld [vmem:[%s5452_s5 + $0x1b0] sm:$0xff] }
 0x1ca   : > { %v1125_v30 = vpack.c.bf16 %v1111_v25, %v1111_v25  ;;  %3973 = vset.pattern.permute.xlu1 %v5474_v52  ;;  %v540_v25 = vadd.f32 %v4412_v37, %v495_v40  ;;  %v882_v32 = vsel %vm879_vm5, %v881_v53, %v877_v44  ;;  %2943 = vmatpush.bf16.msra.mxu2 %v3829_v13 }
 0x1cb   : > { %v1319_v41 = vpack.c.bf16 %v1305_v12, %v1305_v12  ;;  %v1320_v29 = vpack.c.bf16 %v1306_v16, %v1306_v16  ;;  %1467 = vperm.xlu1 %3973, %v4420_v47   ;;  %v3320_v56 = vld [vmem:[#allocation2 + $0xe0] sm:$0xf0]  ;;  %v3821_v16 = vld [vmem:[%s5452_s5 + $0x170] sm:$0xff] }
 0x1cc   : > { %1139 = vst [vmem:[#allocation2 + $0x120] sm:$0xf] %v1125_v30  ;;  %v3318_v50 = vld [vmem:[#allocation2 + $0xc0] sm:$0xf]  ;;  %v3323_v63 = vor.u32 %v3743_v31, %v3320_v56  ;;  %v5151_v26 = vadd.f32 %v4903_v59, %v540_v25  ;;  %v924_v30 = vmul.f32 %v867_v33, %v4929_v27  ;;  %v925_v59 = vmul.f32 %v882_v32, %v4944_v10  ;;  %v3837_v56 = vld [vmem:[%s5452_s5 + $0x1f0] sm:$0xff]  ;;  %v3828_v32 = vld [vmem:[%s5452_s5 + $0x1a8] sm:$0xff] }
 0x1cd   : > { %1333 = vst [vmem:[#allocation2 + $0xe8] sm:$0xf] %v1319_v41  ;;  %v3319_v24 = vor.u32 %v3747_v21, %v3318_v50  ;;  %2899 = vmatpush.bf16.msra.mxu0 %v3821_v16  ;;  %v3751_v31 = vld [vmem:[#allocation2 + $0x104] sm:$0xf]  ;;  %2987 = vmatpush.bf16.msrb.mxu1 %v3837_v56 }
 0x1ce   : > { %1334 = vst [vmem:[#allocation2 + $0x108] sm:$0xf] %v1320_v29  ;;  %2745 = vmatmul.bf16.gmra.mxu0 %v3323_v63  ;;  %v661_v22 = vsub.f32 0.0, %v5151_v26  ;;  %v5164_v41 = vmul.f32 %v924_v30, %v621_v51  ;;  %v5166_v29 = vmul.f32 %v925_v59, %v623_v60  ;;  %v3352_v63 = vld [vmem:[#allocation2 + $0x120] sm:$0xf0]  ;;  %2944 = vmatpush.bf16.msra.mxu2 %v3828_v32  ;;  %v5195_v60 = vpop.f32.mrf.mxu2 }
 0x1cf   : > { %2701 = vmatmul.bf16.gmra.mxu3 %v3319_v24  ;;  %v1095_v62 = vpop.permute.xlu0 %1094  ;;  %v3350_v24 = vld [vmem:[#allocation2 + $0x100] sm:$0xf]  ;;  %v3355_v3 = vor.u32 %v3751_v31, %v3352_v63 }
 0x1d0   : > { %v1114_v11 = vmul.f32 %v1095_v62, %v5133_v19  ;;  %v688_v40 = vmul.f32 1.442695, %v661_v22  ;;  %v3744_v62 = vld [vmem:[#allocation2 + $0xcc] sm:$0xf] }
 0x1d1   : > { %v1370_v48 = vpop.permute.xlu1 %1369  ;;  %3977 = vset.pattern.permute.xlu2 %v5475_v5  ;;  %v1374_v28 = vpop.permute.xlu2 %1373 }
 0x1d2   : > { %v1128_v45 = vpack.c.bf16 %v1114_v11, %v1114_v11  ;;  %v1403_v12 = vmul.f32 %v1370_v48, %v5027_v49  ;;  %v1404_v37 = vmul.f32 %v1374_v28, %v5031_v54  ;;  %1565 = vperm.xlu2 %3977, %v4420_v47   ;;  %4057 = vpow2.f32 %v688_v40 }
 0x1d3   : > { %3976 = vset.pattern.permute.xlu1 %v5475_v5  ;;  %v3755_v1 = vld [vmem:[#allocation2 + $0x11c] sm:$0xf0] }
 0x1d4   : > { %1142 = vst [vmem:[#allocation2 + $0x180] sm:$0xf] %v1128_v45  ;;  %v1417_v61 = vpack.c.bf16 %v1403_v12, %v1403_v12  ;;  %v1418_v20 = vpack.c.bf16 %v1404_v37, %v1404_v37  ;;  %1561 = vperm.xlu1 %3976, %v4410_v36   ;;  %v3748_v58 = vld [vmem:[#allocation2 + $0xe4] sm:$0xf0]  ;;  %v3351_v44 = vor.u32 %v3755_v1, %v3350_v24 }
 0x1d5   : > { %v3327_v57 = vor.u32 %v3748_v58, %v3326_v35  ;;  %v3358_v12 = vld [vmem:[#allocation2 + $0x108] sm:$0xf] }
 0x1d6   : > { %1431 = vst [vmem:[#allocation2 + $0xec] sm:$0xf] %v1417_v61  ;;  %v3820_v35 = vld [vmem:[%s5452_s5 + $0x168] sm:$0xff] }
 0x1d7   : > { %1432 = vst [vmem:[#allocation2 + $0x10c] sm:$0xf] %v1418_v20  ;;  %2789 = vmatmul.bf16.gmra.mxu2 %v3327_v57  ;;  %v3756_v20 = vld [vmem:[#allocation2 + $0x124] sm:$0xf0]  ;;  %2900 = vmatpush.bf16.msra.mxu0 %v3820_v35 }
 0x1d8   : > { %v1194_v39 = vpop.permute.xlu0 %1193  ;;  %v3836_v58 = vld [vmem:[%s5452_s5 + $0x1e8] sm:$0xff]  ;;  %v4058_v30 = vpop.eup %4057  ;;  %v3359_v59 = vor.u32 %v3756_v20, %v3358_v12 }
 0x1d9   : > { %v1212_v27 = vmul.f32 %v1194_v39, %v5133_v19  ;;  %2988 = vmatpush.bf16.msrb.mxu1 %v3836_v58  ;;  %v5199_v39 = vadd.f32 1.0, %v4058_v30  ;;  %v3835_v58 = vld [vmem:[%s5452_s5 + $0x1e0] sm:$0xff]  ;;  %v3810_v30 = vld [vmem:[%s5452_s5 + $0x118] sm:$0xff] }
 0x1da   : > { %v1085_v46 = vpop.permute.xlu1 %1084  ;;  %3979 = vset.pattern.permute.xlu2 %v4076_v2  ;;  %v1090_v10 = vpop.permute.xlu2 %1089 }
 0x1db   : > { %v1226_v18 = vpack.c.bf16 %v1212_v27, %v1212_v27  ;;  %v1112_v50 = vmul.f32 %v1085_v46, %v5164_v41  ;;  %1761 = vperm.xlu2 %3979, %v4420_v47   ;;  %v1113_v21 = vmul.f32 %v1090_v10, %v5166_v29  ;;  %v2687_v11 = vpop.f32.mrf.mxu3  ;;  %v3811_v27 = vld [vmem:[%s5452_s5 + $0x120] sm:$0xff]  ;;  %4059 = vrcp.f32 %v5199_v39 }
 0x1dc   : > { %3978 = vset.pattern.permute.xlu1 %v4076_v2  ;;  %2857 = vmatpush.bf16.msrb.mxu3 %v3811_v27  ;;  %vm904_vm6 = vweird.f32 %v5199_v39 }
 0x1dd   : > { %1240 = vst [vmem:[#allocation2 + $0x184] sm:$0xf] %v1226_v18  ;;  %v1126_v53 = vpack.c.bf16 %v1112_v50, %v1112_v50  ;;  %v1127_v25 = vpack.c.bf16 %v1113_v21, %v1113_v21  ;;  %1757 = vperm.xlu1 %3978, %v4410_v36   ;;  %v3328_v47 = vld [vmem:[#allocation2 + $0xe8] sm:$0xf0]  ;;  %2989 = vmatpush.bf16.msrb.mxu1 %v3835_v58 }
 0x1de   : > { %2750 = vmatmul.bf16.gmra.mxu0 %v3355_v3  ;;  %v2731_v33 = vpop.f32.mrf.mxu0  ;;  %v3331_v48 = vor.u32 %v3744_v62, %v3328_v47  ;;  %v3752_v56 = vld [vmem:[#allocation2 + $0x10c] sm:$0xf]  ;;  %v628_v58 = vadd.f32 %v5161_v43, %v5195_v60 }
 0x1df   : > { %1140 = vst [vmem:[#allocation2 + $0x140] sm:$0xf] %v1126_v53  ;;  %2706 = vmatmul.bf16.gmra.mxu3 %v3351_v44  ;;  %v2732_v28 = vadd.f32 %v2731_v33, %v2687_v11  ;;  %v3360_v3 = vld [vmem:[#allocation2 + $0x128] sm:$0xf0]  ;;  %v3827_v53 = vld [vmem:[%s5452_s5 + $0x1a0] sm:$0xff] }
 0x1e0   : > { %1141 = vst [vmem:[#allocation2 + $0x160] sm:$0xf] %v1127_v25  ;;  %2833 = vmatmul.bf16.gmra.mxu1 %v3331_v48  ;;  %v3363_v44 = vor.u32 %v3752_v56, %v3360_v3  ;;  %2945 = vmatpush.bf16.msra.mxu2 %v3827_v53  ;;  %v908_v3 = vand.u32 2147483647, %v5199_v39 }
 0x1e1   : > { %v1292_v45 = vpop.permute.xlu0 %1291  ;;  %2858 = vmatpush.bf16.msrb.mxu3 %v3810_v30 }
 0x1e2   : > { %v1310_v36 = vmul.f32 %v1292_v45, %v5133_v19  ;;  %v3819_v45 = vld [vmem:[%s5452_s5 + $0x160] sm:$0xff]  ;;  %vm909_vm9 = vcmp.eq.f32.partialorder %v908_v3, 8.507059e+37 }
 0x1e3   : > { %v1186_v37 = vpop.permute.xlu1 %1185  ;;  %3981 = vset.pattern.permute.xlu2 %v4070_v42  ;;  %v1190_v13 = vpop.permute.xlu2 %1189  ;;  %2901 = vmatpush.bf16.msra.mxu0 %v3819_v45 }
 0x1e4   : > { %v1324_v16 = vpack.c.bf16 %v1310_v36, %v1310_v36  ;;  %v1210_v51 = vmul.f32 %v1186_v37, %v5164_v41  ;;  %1667 = vperm.xlu2 %3981, %v4441_v8   ;;  %v1211_v61 = vmul.f32 %v1190_v13, %v5166_v29  ;;  %v5218_v36 = vpop.eup %4059 }
 0x1e5   : > { %3980 = vset.pattern.permute.xlu1 %v5474_v52  ;;  %v900_v13 = vmul.f32 %v5218_v36, %v5199_v39  ;;  %vm905_vm7 = vweird.f32 %v5218_v36 }
 0x1e6   : > { %1338 = vst [vmem:[#allocation2 + $0x188] sm:$0xf] %v1324_v16  ;;  %v1224_v57 = vpack.c.bf16 %v1210_v51, %v1210_v51  ;;  %v1225_v22 = vpack.c.bf16 %v1211_v61, %v1211_v61  ;;  %1475 = vperm.xlu1 %3980, %v4476_v34   ;;  %v3382_v46 = vld [vmem:[#allocation2 + $0x140] sm:$0xf]  ;;  %vm5260_vm8 = vmor %vm904_vm6, %vm905_vm7 }
 0x1e7   : > { %2794 = vmatmul.bf16.gmra.mxu2 %v3359_v59  ;;  %v3763_v10 = vld [vmem:[#allocation2 + $0x15c] sm:$0xf0] }
 0x1e8   : > { %1238 = vst [vmem:[#allocation2 + $0x144] sm:$0xf] %v1224_v57  ;;  %v3383_v9 = vor.u32 %v3763_v10, %v3382_v46  ;;  %v3826_v46 = vld [vmem:[%s5452_s5 + $0x198] sm:$0xff] }
 0x1e9   : > { %1239 = vst [vmem:[#allocation2 + $0x164] sm:$0xf] %v1225_v22  ;;  %2946 = vmatpush.bf16.msra.mxu2 %v3826_v46 }
 0x1ea   : > { %v1390_v31 = vpop.permute.xlu0 %1389 }
 0x1eb   : > { %v1408_v1 = vmul.f32 %v1390_v31, %v5133_v19 }
 0x1ec   : > { %v1284_v40 = vpop.permute.xlu1 %1283  ;;  %3983 = vset.pattern.permute.xlu2 %v5475_v5  ;;  %v1288_v18 = vpop.permute.xlu2 %1287 }
 0x1ed   : > { %v1422_v50 = vpack.c.bf16 %v1408_v1, %v1408_v1  ;;  %v1308_v21 = vmul.f32 %v1284_v40, %v5164_v41  ;;  %1569 = vperm.xlu2 %3983, %v4441_v8   ;;  %v1309_v63 = vmul.f32 %v1288_v18, %v5166_v29  ;;  %v2775_v24 = vpop.f32.mrf.mxu2 }
 0x1ee   : > { %3982 = vset.pattern.permute.xlu1 %v4070_v42  ;;  %v2776_v25 = vadd.f32 %v2775_v24, %v2732_v28 }
 0x1ef   : > { %1436 = vst [vmem:[#allocation2 + $0x18c] sm:$0xf] %v1422_v50  ;;  %v1322_v62 = vpack.c.bf16 %v1308_v21, %v1308_v21  ;;  %v1323_v47 = vpack.c.bf16 %v1309_v63, %v1309_v63  ;;  %2711 = vmatmul.bf16.gmra.mxu3 %v3383_v9  ;;  %1671 = vperm.xlu1 %3982, %v4476_v34   ;;  %v3759_v11 = vld [vmem:[#allocation2 + $0x144] sm:$0xf]  ;;  %v3818_v21 = vld [vmem:[%s5452_s5 + $0x158] sm:$0xff]  ;;  %v910_v63 = vand.u32 2147483648, %v5199_v39 }
 0x1f0   : > { %2838 = vmatmul.bf16.gmra.mxu1 %v3363_v44  ;;  %v3384_v33 = vld [vmem:[#allocation2 + $0x160] sm:$0xf0]  ;;  %2902 = vmatpush.bf16.msra.mxu0 %v3818_v21 }
 0x1f1   : > { %1336 = vst [vmem:[#allocation2 + $0x148] sm:$0xf] %v1322_v62  ;;  %v2819_v48 = vpop.f32.mrf.mxu1  ;;  %v3387_v32 = vor.u32 %v3759_v11, %v3384_v33  ;;  %v3834_v11 = vld [vmem:[%s5452_s5 + $0x1d8] sm:$0xff]  ;;  %v3809_v33 = vld [vmem:[%s5452_s5 + $0x110] sm:$0xff] }
 0x1f2   : > { %1337 = vst [vmem:[#allocation2 + $0x168] sm:$0xf] %v1323_v47  ;;  %v5220_v28 = vadd.f32 %v2819_v48, %v2776_v25  ;;  %v911_v48 = vor.u32 1.1754944e-38, %v910_v63  ;;  %2859 = vmatpush.bf16.msrb.mxu3 %v3809_v33  ;;  %2990 = vmatpush.bf16.msrb.mxu1 %v3834_v11 }
 0x1f3   : > { %v1652_v12 = vpop.permute.xlu0 %1651  ;;  %2755 = vmatmul.bf16.gmra.mxu0 %v3387_v32 }
 0x1f4   : > { %v1694_v37 = vmul.f32 %v1652_v12, %v4839_v23 }
 0x1f5   : > { %v1382_v16 = vpop.permute.xlu1 %1381  ;;  %3986 = vset.pattern.permute.xlu2 %v4076_v2  ;;  %v1386_v51 = vpop.permute.xlu2 %1385 }
 0x1f6   : > { %v1708_v61 = vpack.c.bf16 %v1694_v37, %v1694_v37  ;;  %v1406_v20 = vmul.f32 %v1382_v16, %v5164_v41  ;;  %1769 = vperm.xlu2 %3986, %v4476_v34   ;;  %v1407_v35 = vmul.f32 %v1386_v51, %v5166_v29  ;;  %v901_v34 = vsub.f32 1.0, %v900_v13  ;;  %v3808_v13 = vld [vmem:[%s5452_s5 + $0x108] sm:$0xff] }
 0x1f7   : > { %3985 = vset.pattern.permute.xlu1 %v4076_v2  ;;  %2860 = vmatpush.bf16.msrb.mxu3 %v3808_v13 }
 0x1f8   : > { %1722 = vst [vmem:[#allocation2 + $0x98] sm:$0xf] %v1708_v61  ;;  %v1420_v59 = vpack.c.bf16 %v1406_v20, %v1406_v20  ;;  %v1421_v57 = vpack.c.bf16 %v1407_v35, %v1407_v35  ;;  %1765 = vperm.xlu1 %3985, %v4441_v8   ;;  %v3390_v22 = vld [vmem:[#allocation2 + $0x148] sm:$0xf]  ;;  %v902_v56 = vmul.f32 %v5218_v36, %v901_v34  ;;  %v3825_v61 = vld [vmem:[%s5452_s5 + $0x190] sm:$0xff]  ;;  %v5295_v34 = vpop.f32.mrf.mxu0 }
 0x1f9   : > { %v3764_v27 = vld [vmem:[#allocation2 + $0x164] sm:$0xf0]  ;;  %2947 = vmatpush.bf16.msra.mxu2 %v3825_v61  ;;  %v5319_v21 = vpop.f32.mrf.mxu1 }
 0x1fa   : > { %1434 = vst [vmem:[#allocation2 + $0x14c] sm:$0xf] %v1420_v59  ;;  %v3391_v31 = vor.u32 %v3764_v27, %v3390_v22  ;;  %v903_v24 = vadd.f32 %v5218_v36, %v902_v56 }
 0x1fb   : > { %1435 = vst [vmem:[#allocation2 + $0x16c] sm:$0xf] %v1421_v57  ;;  %v1664_v10 = vpop.permute.xlu0 %1663  ;;  %v3807_v57 = vld [vmem:[%s5452_s5 + $0x100] sm:$0xff] }
 0x1fc   : > { %v1697_v1 = vmul.f32 %v1664_v10, %v5027_v49  ;;  %2799 = vmatmul.bf16.gmra.mxu2 %v3391_v31  ;;  %v907_v39 = vsel %vm5260_vm8, %v5218_v36, %v903_v24  ;;  %2861 = vmatpush.bf16.msrb.mxu3 %v3807_v57  ;;  %v3816_v31 = vld [vmem:[%s5452_s5 + $0x148] sm:$0xff] }
 0x1fd   : > { %v912_v16 = vsel %vm909_vm9, %v911_v48, %v907_v39  ;;  %v3414_v48 = vld [vmem:[#allocation2 + $0x180] sm:$0xf] }
 0x1fe   : > { %v1711_v8 = vpack.c.bf16 %v1697_v1, %v1697_v1  ;;  %v1742_v40 = vpop.permute.xlu1 %1741  ;;  %3988 = vset.pattern.permute.xlu2 %v5474_v52  ;;  %v927_v30 = vmul.f32 %v912_v16, %v5151_v26  ;;  %v3833_v1 = vld [vmem:[%s5452_s5 + $0x1d0] sm:$0xff] }
 0x1ff   : > { %v1790_v18 = vmul.f32 %v1742_v40, %v4670_v15  ;;  %1483 = vperm.xlu2 %3988, %v4665_v6   ;;  %v1550_v50 = vpop.permute.xlu2 %1549  ;;  %v5313_v40 = vpop.f32.mrf.mxu2  ;;  %2991 = vmatpush.bf16.msrb.mxu1 %v3833_v1 }
 0x200   : > { %1725 = vst [vmem:[#allocation2 + $0xf8] sm:$0xf] %v1711_v8  ;;  %v1595_v9 = vmul.f32 %v1550_v50, %v4703_v17  ;;  %3987 = vset.pattern.permute.xlu1 %v5474_v52  ;;  %v5298_v43 = vmul.f32 %v927_v30, %v628_v58  ;;  %v5311_v8 = vpop.f32.mrf.mxu3  ;;  %v2736_v24 = vpop.f32.mrf.mxu0 }
 0x201   : > { %v1804_v53 = vpack.c.bf16 %v1790_v18, %v1790_v18  ;;  %1479 = vperm.xlu1 %3987, %v4624_v14   ;;  %v3760_v15 = vld [vmem:[#allocation2 + $0x14c] sm:$0xf]  ;;  %v2824_v13 = vpop.f32.mrf.mxu1 }
 0x202   : > { %v1609_v44 = vpack.c.bf16 %v1595_v9, %v1595_v9  ;;  %v3392_v62 = vld [vmem:[#allocation2 + $0x168] sm:$0xf0] }
 0x203   : > { %1818 = vst [vmem:[#allocation2 + $0x5c] sm:$0xf] %v1804_v53  ;;  %v3395_v47 = vor.u32 %v3760_v15, %v3392_v62 }
 0x204   : > { %1623 = vst [vmem:[#allocation2 + $0x74] sm:$0xf] %v1609_v44  ;;  %v1464_v32 = vpop.permute.xlu0 %1463 }
 0x205   : > { %v1500_v45 = vmul.f32 %v1464_v32, %v4828_v0  ;;  %2843 = vmatmul.bf16.gmra.mxu1 %v3395_v47  ;;  %v3832_v47 = vld [vmem:[%s5452_s5 + $0x1c8] sm:$0xff] }
 0x206   : > { %2992 = vmatpush.bf16.msrb.mxu1 %v3832_v47 }
 0x207   : > { %v1514_v12 = vpack.c.bf16 %v1500_v45, %v1500_v45  ;;  %v1656_v37 = vpop.permute.xlu1 %1655  ;;  %3991 = vset.pattern.permute.xlu2 %v5475_v5  ;;  %v2780_v39 = vpop.f32.mrf.mxu2 }
 0x208   : > { %v1695_v51 = vmul.f32 %v1656_v37, %v4871_v55  ;;  %1577 = vperm.xlu2 %3991, %v4624_v14   ;;  %v1746_v36 = vpop.permute.xlu2 %1745 }
 0x209   : > { %1528 = vst [vmem:[#allocation2 + $0xd0] sm:$0xf] %v1514_v12  ;;  %v1791_v20 = vmul.f32 %v1746_v36, %v4703_v17  ;;  %3990 = vset.pattern.permute.xlu1 %v4070_v42  ;;  %v3817_v17 = vld [vmem:[%s5452_s5 + $0x150] sm:$0xff]  ;;  %v5340_v36 = vpop.f32.mrf.mxu0  ;;  %v5356_v1 = vpop.f32.mrf.mxu1 }
 0x20a   : > { %v1709_v35 = vpack.c.bf16 %v1695_v51, %v1695_v51  ;;  %1679 = vperm.xlu1 %3990, %v4665_v6   ;;  %2903 = vmatpush.bf16.msra.mxu0 %v3817_v17 }
 0x20b   : > { %v1805_v59 = vpack.c.bf16 %v1791_v20, %v1791_v20 }
 0x20c   : > { %1723 = vst [vmem:[#allocation2 + $0xb8] sm:$0xf] %v1709_v35  ;;  %v1472_v22 = vpop.permute.xlu0 %1471 }
 0x20d   : > { %1819 = vst [vmem:[#allocation2 + $0x7c] sm:$0xf] %v1805_v59  ;;  %v1502_v27 = vmul.f32 %v1472_v22, %v5031_v54  ;;  %v3767_v22 = vld [vmem:[#allocation2 + $0x184] sm:$0xf] }
 0x20e   : > { %2904 = vmatpush.bf16.msra.mxu0 %v3816_v31 }
 0x20f   : > { %v1516_v26 = vpack.c.bf16 %v1502_v27, %v1502_v27 }
 0x210   : > { %3993 = vset.pattern.permute.xlu2 %v4076_v2  ;;  %v1100_v60 = vpop.permute.xlu1 %1099 }
 0x211   : > { %1530 = vst [vmem:[#allocation2 + $0x110] sm:$0xf] %v1516_v26  ;;  %v1115_v46 = vmul.f32 %v1100_v60, %v5298_v43  ;;  %1773 = vperm.xlu2 %3993, %v4624_v14   ;;  %v1554_v10 = vpop.permute.xlu2 %1553  ;;  %v3815_v14 = vld [vmem:[%s5452_s5 + $0x140] sm:$0xff]  ;;  %v5350_v60 = vpop.f32.mrf.mxu2 }
 0x212   : > { %v1596_v56 = vmul.f32 %v1554_v10, %v4839_v23  ;;  %3992 = vset.pattern.permute.xlu1 %v5475_v5  ;;  %2905 = vmatpush.bf16.msra.mxu0 %v3815_v14 }
 0x213   : > { %v1129_v18 = vpack.c.bf16 %v1115_v46, %v1115_v46  ;;  %1581 = vperm.xlu1 %3992, %v4665_v6   ;;  %v3824_v6 = vld [vmem:[%s5452_s5 + $0x188] sm:$0xff]  ;;  %v3831_v46 = vld [vmem:[%s5452_s5 + $0x1c0] sm:$0xff] }
 0x214   : > { %v1610_v50 = vpack.c.bf16 %v1596_v56, %v1596_v56  ;;  %2948 = vmatpush.bf16.msra.mxu2 %v3824_v6  ;;  %2993 = vmatpush.bf16.msrb.mxu1 %v3831_v46 }
 0x215   : > { %1143 = vst [vmem:[#allocation2 + $0x1a0] sm:$0xf] %v1129_v18  ;;  %v1574_v63 = vpop.permute.xlu0 %1573  ;;  %v3725_v18 = vld [vmem:[#allocation2 + $0x2c] sm:$0xf0] }
 0x216   : > { %1624 = vst [vmem:[#allocation2 + $0x94] sm:$0xf] %v1610_v50  ;;  %v1601_v9 = vmul.f32 %v1574_v63, %v4933_v38 }
 0x218   : > { %v1615_v3 = vpack.c.bf16 %v1601_v9, %v1601_v9 }
 0x219   : > { %3996 = vset.pattern.permute.xlu2 %v5474_v52  ;;  %v1198_v53 = vpop.permute.xlu1 %1197 }
 0x21a   : > { %1629 = vst [vmem:[#allocation2 + $0x134] sm:$0xf] %v1615_v3  ;;  %v1213_v15 = vmul.f32 %v1198_v53, %v5298_v43  ;;  %v1754_v25 = vpop.permute.xlu2 %1753  ;;  %1491 = vperm.xlu2 %3996, %v4946_v4   ;;  %v3238_v3 = vld [vmem:[#allocation2 + $0x10] sm:$0xf] }
 0x21b   : > { %v1793_v44 = vmul.f32 %v1754_v25, %v4871_v55  ;;  %3995 = vset.pattern.permute.xlu1 %v5474_v52  ;;  %v2692_v62 = vpop.f32.mrf.mxu3  ;;  %v3823_v55 = vld [vmem:[%s5452_s5 + $0x180] sm:$0xff]  ;;  %v3239_v6 = vor.u32 %v3725_v18, %v3238_v3  ;;  %v3422_v25 = vld [vmem:[#allocation2 + $0x188] sm:$0xf]  ;;  %v3272_v3 = vld [vmem:[#allocation2 + $0x70] sm:$0xf0] }
 0x21c   : > { %v1227_v11 = vpack.c.bf16 %v1213_v15, %v1213_v15  ;;  %v2737_v33 = vadd.f32 %v2736_v24, %v2692_v62  ;;  %1487 = vperm.xlu1 %3995, %v4699_v7   ;;  %v3771_v32 = vld [vmem:[#allocation2 + $0x19c] sm:$0xf0]  ;;  %2949 = vmatpush.bf16.msra.mxu2 %v3823_v55  ;;  %v3721_v55 = vld [vmem:[#allocation2 + $0x14] sm:$0xf] }
 0x21d   : > { %v1807_v45 = vpack.c.bf16 %v1793_v44, %v1793_v44  ;;  %v3415_v12 = vor.u32 %v3771_v32, %v3414_v48 }
 0x21e   : > { %1241 = vst [vmem:[#allocation2 + $0x1a4] sm:$0xf] %v1227_v11  ;;  %v2781_v52 = vadd.f32 %v2780_v39, %v2737_v33  ;;  %v1676_v37 = vpop.permute.xlu0 %1675 }
 0x21f   : > { %1821 = vst [vmem:[#allocation2 + $0xbc] sm:$0xf] %v1807_v45  ;;  %v1700_v16 = vmul.f32 %v1676_v37, %v5164_v41  ;;  %2716 = vmatmul.bf16.gmra.mxu3 %v3415_v12 }
 0x220   : > { %v5338_v51 = vadd.f32 %v2824_v13, %v2781_v52  ;;  %v3240_v52 = vld [vmem:[#allocation2 + $0x30] sm:$0xf0] }
 0x221   : > { %v1714_v61 = vpack.c.bf16 %v1700_v16, %v1700_v16 }
 0x222   : > { %3998 = vset.pattern.permute.xlu2 %v4070_v42  ;;  %v1296_v20 = vpop.permute.xlu1 %1295 }
 0x223   : > { %1728 = vst [vmem:[#allocation2 + $0x158] sm:$0xf] %v1714_v61  ;;  %v1311_v35 = vmul.f32 %v1296_v20, %v5298_v43  ;;  %v1660_v58 = vpop.permute.xlu2 %1659  ;;  %1687 = vperm.xlu2 %3998, %v4946_v4   ;;  %v5345_v30 = vpop.f32.mrf.mxu3 }
 0x224   : > { %v1696_v59 = vmul.f32 %v1660_v58, %v4828_v0  ;;  %3997 = vset.pattern.permute.xlu1 %v4070_v42  ;;  %v2741_v42 = vpop.f32.mrf.mxu0 }
 0x225   : > { %v1325_v57 = vpack.c.bf16 %v1311_v35, %v1311_v35  ;;  %1683 = vperm.xlu1 %3997, %v4699_v7   ;;  %v3416_v17 = vld [vmem:[#allocation2 + $0x1a0] sm:$0xf0]  ;;  %v3243_v35 = vor.u32 %v3721_v55, %v3240_v52  ;;  %v3278_v55 = vld [vmem:[#allocation2 + $0x58] sm:$0xf] }
 0x226   : > { %v1710_v27 = vpack.c.bf16 %v1696_v59, %v1696_v59  ;;  %v3419_v26 = vor.u32 %v3767_v22, %v3416_v17 }
 0x227   : > { %1339 = vst [vmem:[#allocation2 + $0x1a8] sm:$0xf] %v1325_v57  ;;  %v1778_v31 = vpop.permute.xlu0 %1777  ;;  %v3768_v57 = vld [vmem:[#allocation2 + $0x18c] sm:$0xf] }
 0x228   : > { %1724 = vst [vmem:[#allocation2 + $0xd8] sm:$0xf] %v1710_v27  ;;  %v1799_v10 = vmul.f32 %v1778_v31, %v5166_v29  ;;  %2760 = vmatmul.bf16.gmra.mxu0 %v3419_v26 }
 0x22a   : > { %v1813_v56 = vpack.c.bf16 %v1799_v10, %v1799_v10  ;;  %v3270_v10 = vld [vmem:[#allocation2 + $0x50] sm:$0xf] }
 0x22b   : > { %4001 = vset.pattern.permute.xlu2 %v4076_v2  ;;  %v1394_v50 = vpop.permute.xlu1 %1393  ;;  %v2697_v14 = vpop.f32.mrf.mxu3 }
 0x22c   : > { %1827 = vst [vmem:[#allocation2 + $0x17c] sm:$0xf] %v1813_v56  ;;  %v1409_v63 = vmul.f32 %v1394_v50, %v5298_v43  ;;  %v2742_v9 = vadd.f32 %v2741_v42, %v2697_v14  ;;  %v1566_v24 = vpop.permute.xlu2 %1565  ;;  %1781 = vperm.xlu2 %4001, %v4699_v7   ;;  %v2743_v39 = vpop.f32.mrf.mxu0  ;;  %v3246_v50 = vld [vmem:[#allocation2 + $0x18] sm:$0xf] }
 0x22d   : > { %v1599_v53 = vmul.f32 %v1566_v24, %v5027_v49  ;;  %4000 = vset.pattern.permute.xlu1 %v5475_v5 }
 0x22e   : > { %v1423_v15 = vpack.c.bf16 %v1409_v63, %v1409_v63  ;;  %1589 = vperm.xlu1 %4000, %v4946_v4   ;;  %v3772_v44 = vld [vmem:[#allocation2 + $0x1a4] sm:$0xf0] }
 0x22f   : > { %v1613_v62 = vpack.c.bf16 %v1599_v53, %v1599_v53  ;;  %v2785_v47 = vpop.f32.mrf.mxu2  ;;  %2862 = vmatmul.bf16.vlgmr.msrb.gmra.mxu3 %v3239_v6  ;;  %v3423_v11 = vor.u32 %v3772_v44, %v3422_v25  ;;  %v3729_v53 = vld [vmem:[#allocation2 + $0x54] sm:$0xf]  ;;  %v3248_v6 = vld [vmem:[#allocation2 + $0x38] sm:$0xf0] }
 0x230   : > { %1437 = vst [vmem:[#allocation2 + $0x1ac] sm:$0xf] %v1423_v15  ;;  %v2786_v33 = vadd.f32 %v2785_v47, %v2742_v9  ;;  %v1586_v48 = vpop.permute.xlu0 %1585  ;;  %v3275_v25 = vor.u32 %v3729_v53, %v3272_v3  ;;  %v3742_v3 = vld [vmem:[#allocation2 + $0xb4] sm:$0xf0] }
 0x231   : > { %1627 = vst [vmem:[#allocation2 + $0xf4] sm:$0xf] %v1613_v62  ;;  %v1604_v7 = vmul.f32 %v1586_v48, %v5133_v19  ;;  %2804 = vmatmul.bf16.gmra.mxu2 %v3423_v11 }
 0x232   : > { %v2829_v32 = vpop.f32.mrf.mxu1 }
 0x233   : > { %v1618_v5 = vpack.c.bf16 %v1604_v7, %v1604_v7  ;;  %v5365_v45 = vadd.f32 %v2829_v32, %v2786_v33  ;;  %v2699_v12 = vpop.f32.mrf.mxu3  ;;  %v3302_v7 = vld [vmem:[#allocation2 + $0x90] sm:$0xf] }
 0x234   : > { %v2744_v37 = vadd.f32 %v2743_v39, %v2699_v12  ;;  %v1750_v13 = vpop.permute.xlu1 %1749  ;;  %v3741_v32 = vld [vmem:[#allocation2 + $0xac] sm:$0xf0] }
 0x235   : > { %1632 = vst [vmem:[#allocation2 + $0x194] sm:$0xf] %v1618_v5  ;;  %v1792_v16 = vmul.f32 %v1750_v13, %v4839_v23  ;;  %v1762_v61 = vpop.permute.xlu2 %1761  ;;  %v3733_v23 = vld [vmem:[#allocation2 + $0x6c] sm:$0xf0]  ;;  %v3734_v5 = vld [vmem:[#allocation2 + $0x74] sm:$0xf0]  ;;  %v3303_v12 = vor.u32 %v3741_v32, %v3302_v7 }
 0x236   : > { %v1795_v20 = vmul.f32 %v1762_v61, %v5027_v49  ;;  %4002 = vset.pattern.permute.xlu1 %v4076_v2  ;;  %v3726_v2 = vld [vmem:[#allocation2 + $0x34] sm:$0xf0]  ;;  %v3271_v56 = vor.u32 %v3733_v23, %v3270_v10 }
 0x237   : > { %v1806_v58 = vpack.c.bf16 %v1792_v16, %v1792_v16  ;;  %v2787_v59 = vpop.f32.mrf.mxu2  ;;  %1785 = vperm.xlu1 %4002, %v4946_v4   ;;  %v3424_v22 = vld [vmem:[#allocation2 + $0x1a8] sm:$0xf0]  ;;  %v3247_v63 = vor.u32 %v3726_v2, %v3246_v50 }
 0x238   : > { %v1809_v17 = vpack.c.bf16 %v1795_v20, %v1795_v20  ;;  %v2788_v27 = vadd.f32 %v2787_v59, %v2744_v37  ;;  %2906 = vmatmul.bf16.vlgmr.msra.gmra.mxu0 %v3243_v35  ;;  %v3427_v26 = vor.u32 %v3768_v57, %v3424_v22  ;;  %v3279_v37 = vor.u32 %v3734_v5, %v3278_v55  ;;  %v3737_v57 = vld [vmem:[#allocation2 + $0x94] sm:$0xf] }
 0x239   : > { %1820 = vst [vmem:[#allocation2 + $0x9c] sm:$0xf] %v1806_v58 }
 0x23a   : > { %1823 = vst [vmem:[#allocation2 + $0xfc] sm:$0xf] %v1809_v17  ;;  %v2831_v31 = vpop.f32.mrf.mxu1  ;;  %2848 = vmatmul.bf16.gmra.mxu1 %v3427_v26  ;;  %v3304_v17 = vld [vmem:[#allocation2 + $0xb0] sm:$0xf0] }
 0x23b   : > { %v5371_v46 = vadd.f32 %v2831_v31, %v2788_v27  ;;  %v3280_v27 = vld [vmem:[#allocation2 + $0x78] sm:$0xf0]  ;;  %v3307_v26 = vor.u32 %v3737_v57, %v3304_v17 }
 0x23c   : > { %v3730_v31 = vld [vmem:[#allocation2 + $0x5c] sm:$0xf] }
 0x23d   : > { %v1468_v42 = vpop.permute.xlu1 %1467  ;;  %v3283_v10 = vor.u32 %v3730_v31, %v3280_v27 }
 0x23e   : > { %v1501_v18 = vmul.f32 %v1468_v42, %v5027_v49  ;;  %v1668_v4 = vpop.permute.xlu2 %1667  ;;  %v3722_v49 = vld [vmem:[#allocation2 + $0x1c] sm:$0xf] }
 0x23f   : > { %v1698_v14 = vmul.f32 %v1668_v4, %v5031_v54  ;;  %2867 = vmatmul.bf16.gmra.mxu3 %v3271_v56  ;;  %v3251_v11 = vor.u32 %v3722_v49, %v3248_v6 }
 0x240   : > { %v1515_v9 = vpack.c.bf16 %v1501_v18, %v1501_v18 }
 0x241   : > { %v1712_v24 = vpack.c.bf16 %v1698_v14, %v1698_v14  ;;  %2950 = vmatmul.bf16.vlgmr.msra.gmra.mxu2 %v3247_v63 }
 0x242   : > { %1529 = vst [vmem:[#allocation2 + $0xf0] sm:$0xf] %v1515_v9 }
 0x243   : > { %1726 = vst [vmem:[#allocation2 + $0x118] sm:$0xf] %v1712_v24  ;;  %v3334_v24 = vld [vmem:[#allocation2 + $0xd0] sm:$0xf] }
 0x246   : > { %v1562_v15 = vpop.permute.xlu1 %1561 }
 0x247   : > { %v1598_v44 = vmul.f32 %v1562_v15, %v4828_v0  ;;  %v1570_v62 = vpop.permute.xlu2 %1569 }
 0x248   : > { %v1600_v47 = vmul.f32 %v1570_v62, %v5031_v54  ;;  %2911 = vmatmul.bf16.gmra.mxu0 %v3275_v25 }
 0x249   : > { %v1612_v33 = vpack.c.bf16 %v1598_v44, %v1598_v44  ;;  %v3749_v4 = vld [vmem:[#allocation2 + $0xec] sm:$0xf0]  ;;  %v3310_v44 = vld [vmem:[#allocation2 + $0x98] sm:$0xf] }
 0x24a   : > { %v1614_v48 = vpack.c.bf16 %v1600_v47, %v1600_v47  ;;  %2994 = vmatmul.bf16.vlgmr.msrb.gmra.mxu1 %v3251_v11  ;;  %v3335_v6 = vor.u32 %v3749_v4, %v3334_v24  ;;  %v3311_v62 = vor.u32 %v3742_v3, %v3310_v44 }
 0x24b   : > { %1626 = vst [vmem:[#allocation2 + $0xd4] sm:$0xf] %v1612_v33  ;;  %v2746_v39 = vpop.f32.mrf.mxu0 }
 0x24c   : > { %1628 = vst [vmem:[#allocation2 + $0x114] sm:$0xf] %v1614_v48 }
 0x24f   : > { %v1758_v52 = vpop.permute.xlu1 %1757  ;;  %2872 = vmatmul.bf16.gmra.mxu3 %v3303_v12 }
 0x250   : > { %v1794_v13 = vmul.f32 %v1758_v52, %v4828_v0  ;;  %v1770_v16 = vpop.permute.xlu2 %1769 }
 0x251   : > { %v1797_v61 = vmul.f32 %v1770_v16, %v4933_v38  ;;  %2955 = vmatmul.bf16.gmra.mxu2 %v3279_v37  ;;  %v3336_v37 = vld [vmem:[#allocation2 + $0xf0] sm:$0xf0] }
 0x252   : > { %v1808_v20 = vpack.c.bf16 %v1794_v13, %v1794_v13  ;;  %v2702_v35 = vpop.f32.mrf.mxu3  ;;  %v3738_v13 = vld [vmem:[#allocation2 + $0x9c] sm:$0xf] }
 0x253   : > { %v1811_v58 = vpack.c.bf16 %v1797_v61, %v1797_v61  ;;  %v2747_v59 = vadd.f32 %v2746_v39, %v2702_v35  ;;  %v2748_v22 = vpop.f32.mrf.mxu0  ;;  %v3745_v39 = vld [vmem:[#allocation2 + $0xd4] sm:$0xf] }
 0x254   : > { %1822 = vst [vmem:[#allocation2 + $0xdc] sm:$0xf] %v1808_v20  ;;  %v3339_v61 = vor.u32 %v3745_v39, %v3336_v37  ;;  %v3312_v20 = vld [vmem:[#allocation2 + $0xb8] sm:$0xf0] }
 0x255   : > { %1825 = vst [vmem:[#allocation2 + $0x13c] sm:$0xf] %v1811_v58  ;;  %v3315_v35 = vor.u32 %v3738_v13, %v3312_v20  ;;  %v3344_v39 = vld [vmem:[#allocation2 + $0xf8] sm:$0xf0] }
 0x258   : > { %v1476_v23 = vpop.permute.xlu1 %1475  ;;  %2916 = vmatmul.bf16.gmra.mxu0 %v3307_v26 }
 0x259   : > { %v1503_v0 = vmul.f32 %v1476_v23, %v4933_v38  ;;  %v1484_v2 = vpop.permute.xlu2 %1483 }
 0x25a   : > { %v1505_v42 = vmul.f32 %v1484_v2, %v5166_v29  ;;  %v2704_v56 = vpop.f32.mrf.mxu3  ;;  %v2790_v18 = vpop.f32.mrf.mxu2  ;;  %2999 = vmatmul.bf16.gmra.mxu1 %v3283_v10  ;;  %v3366_v10 = vld [vmem:[#allocation2 + $0x110] sm:$0xf] }
 0x25b   : > { %v1517_v50 = vpack.c.bf16 %v1503_v0, %v1503_v0  ;;  %v2749_v14 = vadd.f32 %v2748_v22, %v2704_v56  ;;  %v2791_v63 = vadd.f32 %v2790_v18, %v2747_v59  ;;  %v2751_v15 = vpop.f32.mrf.mxu0  ;;  %v3342_v0 = vld [vmem:[#allocation2 + $0xd8] sm:$0xf] }
 0x25c   : > { %v1519_v9 = vpack.c.bf16 %v1505_v42, %v1505_v42 }
 0x25d   : > { %1531 = vst [vmem:[#allocation2 + $0x130] sm:$0xf] %v1517_v50  ;;  %v2834_v53 = vpop.f32.mrf.mxu1  ;;  %v3750_v50 = vld [vmem:[#allocation2 + $0xf4] sm:$0xf0] }
 0x25e   : > { %1533 = vst [vmem:[#allocation2 + $0x170] sm:$0xf] %v1519_v9  ;;  %v5381_v25 = vadd.f32 %v2834_v53, %v2791_v63  ;;  %v3753_v53 = vld [vmem:[#allocation2 + $0x114] sm:$0xf] }
 0x25f   : > { %2877 = vmatmul.bf16.gmra.mxu3 %v3335_v6 }
 0x261   : > { %v1672_v49 = vpop.permute.xlu1 %1671  ;;  %2960 = vmatmul.bf16.gmra.mxu2 %v3311_v62 }
 0x262   : > { %v1699_v47 = vmul.f32 %v1672_v49, %v4933_v38  ;;  %v2707_v11 = vpop.f32.mrf.mxu3  ;;  %v1578_v33 = vpop.permute.xlu2 %1577 }
 0x263   : > { %v2752_v48 = vadd.f32 %v2751_v15, %v2707_v11  ;;  %v1602_v7 = vmul.f32 %v1578_v33, %v5164_v41  ;;  %v2792_v32 = vpop.f32.mrf.mxu2  ;;  %v2753_v38 = vpop.f32.mrf.mxu0  ;;  %v3746_v11 = vld [vmem:[#allocation2 + $0xdc] sm:$0xf] }
 0x264   : > { %v1713_v5 = vpack.c.bf16 %v1699_v47, %v1699_v47  ;;  %v2793_v12 = vadd.f32 %v2792_v32, %v2749_v14  ;;  %v3757_v57 = vld [vmem:[#allocation2 + $0x12c] sm:$0xf0]  ;;  %v3343_v14 = vor.u32 %v3750_v50, %v3342_v0  ;;  %v3368_v47 = vld [vmem:[#allocation2 + $0x130] sm:$0xf0]  ;;  %v3376_v50 = vld [vmem:[#allocation2 + $0x138] sm:$0xf0] }
 0x265   : > { %v1616_v55 = vpack.c.bf16 %v1602_v7, %v1602_v7  ;;  %v2836_v52 = vpop.f32.mrf.mxu1  ;;  %v3367_v56 = vor.u32 %v3757_v57, %v3366_v10  ;;  %v3371_v7 = vor.u32 %v3753_v53, %v3368_v47 }
 0x266   : > { %1727 = vst [vmem:[#allocation2 + $0x138] sm:$0xf] %v1713_v5  ;;  %v5385_v16 = vadd.f32 %v2836_v52, %v2793_v12  ;;  %v3347_v12 = vor.u32 %v3746_v11, %v3344_v39 }
 0x267   : > { %1630 = vst [vmem:[#allocation2 + $0x154] sm:$0xf] %v1616_v55 }
 0x268   : > { %2921 = vmatmul.bf16.gmra.mxu0 %v3339_v61 }
 0x26a   : > { %v2709_v58 = vpop.f32.mrf.mxu3  ;;  %v1766_v59 = vpop.permute.xlu1 %1765  ;;  %3004 = vmatmul.bf16.gmra.mxu1 %v3315_v35 }
 0x26b   : > { %v2754_v22 = vadd.f32 %v2753_v38, %v2709_v58  ;;  %v1796_v17 = vmul.f32 %v1766_v59, %v5031_v54  ;;  %v2795_v27 = vpop.f32.mrf.mxu2  ;;  %v1774_v26 = vpop.permute.xlu2 %1773  ;;  %v3374_v38 = vld [vmem:[#allocation2 + $0x118] sm:$0xf] }
 0x26c   : > { %v2796_v31 = vadd.f32 %v2795_v27, %v2752_v48  ;;  %v1798_v23 = vmul.f32 %v1774_v26, %v5164_v41 }
 0x26d   : > { %v1810_v2 = vpack.c.bf16 %v1796_v17, %v1796_v17  ;;  %v2839_v42 = vpop.f32.mrf.mxu1  ;;  %v3758_v37 = vld [vmem:[#allocation2 + $0x134] sm:$0xf0] }
 0x26e   : > { %v1812_v18 = vpack.c.bf16 %v1798_v23, %v1798_v23  ;;  %v5389_v4 = vadd.f32 %v2839_v42, %v2796_v31  ;;  %v3375_v59 = vor.u32 %v3758_v37, %v3374_v38 }
 0x26f   : > { %1824 = vst [vmem:[#allocation2 + $0x11c] sm:$0xf] %v1810_v2  ;;  %2882 = vmatmul.bf16.gmra.mxu3 %v3367_v56 }
 0x270   : > { %1826 = vst [vmem:[#allocation2 + $0x15c] sm:$0xf] %v1812_v18  ;;  %v2756_v63 = vpop.f32.mrf.mxu0 }
 0x271   : > { %2965 = vmatmul.bf16.gmra.mxu2 %v3343_v14 }
 0x272   : > { %v2712_v54 = vpop.f32.mrf.mxu3 }
 0x273   : > { %v2757_v9 = vadd.f32 %v2756_v63, %v2712_v54  ;;  %v2797_v24 = vpop.f32.mrf.mxu2  ;;  %v1480_v3 = vpop.permute.xlu1 %1479 }
 0x274   : > { %v2798_v6 = vadd.f32 %v2797_v24, %v2754_v22  ;;  %v1504_v15 = vmul.f32 %v1480_v3, %v5164_v41  ;;  %v1492_v44 = vpop.permute.xlu2 %1491  ;;  %v3765_v22 = vld [vmem:[#allocation2 + $0x16c] sm:$0xf0] }
 0x275   : > { %v1507_v62 = vmul.f32 %v1492_v44, %v5298_v43  ;;  %v2841_v49 = vpop.f32.mrf.mxu1 }
 0x276   : > { %v1518_v33 = vpack.c.bf16 %v1504_v15, %v1504_v15  ;;  %v5393_v48 = vadd.f32 %v2841_v49, %v2798_v6  ;;  %v3754_v0 = vld [vmem:[#allocation2 + $0x11c] sm:$0xf]  ;;  %v3406_v15 = vld [vmem:[#allocation2 + $0x158] sm:$0xf]  ;;  %v3761_v49 = vld [vmem:[#allocation2 + $0x154] sm:$0xf] }
 0x277   : > { %v1521_v32 = vpack.c.bf16 %v1507_v62, %v1507_v62  ;;  %v3379_v54 = vor.u32 %v3754_v0, %v3376_v50 }
 0x278   : > { %1532 = vst [vmem:[#allocation2 + $0x150] sm:$0xf] %v1518_v33  ;;  %v2758_v5 = vpop.f32.mrf.mxu0  ;;  %2926 = vmatmul.bf16.gmra.mxu0 %v3371_v7  ;;  %v3762_v33 = vld [vmem:[#allocation2 + $0x15c] sm:$0xf] }
 0x279   : > { %1535 = vst [vmem:[#allocation2 + $0x1b0] sm:$0xf] %v1521_v32  ;;  %v3408_v32 = vld [vmem:[#allocation2 + $0x178] sm:$0xf0] }
 0x27a   : > { %v2714_v55 = vpop.f32.mrf.mxu3  ;;  %3009 = vmatmul.bf16.gmra.mxu1 %v3347_v12 }
 0x27b   : > { %v2759_v41 = vadd.f32 %v2758_v5, %v2714_v55  ;;  %v3411_v5 = vor.u32 %v3762_v33, %v3408_v32 }
 0x27c   : > { %v1680_v52 = vpop.permute.xlu1 %1679 }
 0x27d   : > { %v1701_v13 = vmul.f32 %v1680_v52, %v5166_v29  ;;  %v1688_v61 = vpop.permute.xlu2 %1687 }
 0x27e   : > { %v1703_v20 = vmul.f32 %v1688_v61, %v5298_v43 }
 0x27f   : > { %v1715_v35 = vpack.c.bf16 %v1701_v13, %v1701_v13  ;;  %v2800_v58 = vpop.f32.mrf.mxu2  ;;  %v3398_v57 = vld [vmem:[#allocation2 + $0x150] sm:$0xf] }
 0x280   : > { %v1717_v17 = vpack.c.bf16 %v1703_v20, %v1703_v20  ;;  %v2801_v27 = vadd.f32 %v2800_v58, %v2757_v9  ;;  %v3399_v26 = vor.u32 %v3765_v22, %v3398_v57 }
 0x281   : > { %1729 = vst [vmem:[#allocation2 + $0x178] sm:$0xf] %v1715_v35  ;;  %2970 = vmatmul.bf16.gmra.mxu2 %v3375_v59 }
 0x282   : > { %1731 = vst [vmem:[#allocation2 + $0x1b8] sm:$0xf] %v1717_v17  ;;  %v2844_v31 = vpop.f32.mrf.mxu1  ;;  %2887 = vmatmul.bf16.gmra.mxu3 %v3399_v26  ;;  %v3769_v26 = vld [vmem:[#allocation2 + $0x194] sm:$0xf] }
 0x283   : > { %v5397_v23 = vadd.f32 %v2844_v31, %v2801_v27 }
 0x285   : > { %v1582_v10 = vpop.permute.xlu1 %1581 }
 0x286   : > { %v1603_v2 = vmul.f32 %v1582_v10, %v5166_v29  ;;  %v1782_v42 = vpop.permute.xlu2 %1781 }
 0x287   : > { %v1800_v56 = vmul.f32 %v1782_v42, %v5133_v19  ;;  %v2802_v18 = vpop.f32.mrf.mxu2 }
 0x288   : > { %v1617_v14 = vpack.c.bf16 %v1603_v2, %v1603_v2  ;;  %v2803_v63 = vadd.f32 %v2802_v18, %v2759_v41  ;;  %v3766_v53 = vld [vmem:[#allocation2 + $0x174] sm:$0xf0]  ;;  %v3773_v41 = vld [vmem:[#allocation2 + $0x1ac] sm:$0xf0] }
 0x289   : > { %v1814_v9 = vpack.c.bf16 %v1800_v56, %v1800_v56  ;;  %v3407_v44 = vor.u32 %v3766_v53, %v3406_v15  ;;  %v3774_v35 = vld [vmem:[#allocation2 + $0x1b4] sm:$0xf0] }
 0x28a   : > { %1631 = vst [vmem:[#allocation2 + $0x174] sm:$0xf] %v1617_v14  ;;  %v2846_v24 = vpop.f32.mrf.mxu1  ;;  %3014 = vmatmul.bf16.gmra.mxu1 %v3379_v54 }
 0x28b   : > { %1828 = vst [vmem:[#allocation2 + $0x19c] sm:$0xf] %v1814_v9  ;;  %v5401_v3 = vadd.f32 %v2846_v24, %v2803_v63 }
 0x28e   : > { %v1488_v6 = vpop.permute.xlu1 %1487 }
 0x28f   : > { %v1506_v29 = vmul.f32 %v1488_v6, %v5133_v19 }
 0x291   : > { %v1520_v62 = vpack.c.bf16 %v1506_v29, %v1506_v29  ;;  %2975 = vmatmul.bf16.gmra.mxu2 %v3407_v44  ;;  %v3400_v47 = vld [vmem:[#allocation2 + $0x170] sm:$0xf0]  ;;  %v2734_v29 = vadd.f32 %v5295_v34, %v5311_v8  ;;  %v2739_v8 = vadd.f32 %v5340_v36, %v5345_v30 }
 0x292   : > { %v3403_v11 = vor.u32 %v3761_v49, %v3400_v47  ;;  %v3770_v14 = vld [vmem:[#allocation2 + $0x19c] sm:$0xf] }
 0x293   : > { %1534 = vst [vmem:[#allocation2 + $0x190] sm:$0xf] %v1520_v62  ;;  %v2778_v49 = vadd.f32 %v5313_v40, %v2734_v29 }
 0x294   : > { %2931 = vmatmul.bf16.gmra.mxu0 %v3403_v11 }
 0x295   : > { %v2822_v33 = vadd.f32 %v5319_v21, %v2778_v49  ;;  %v2783_v21 = vadd.f32 %v5350_v60, %v2739_v8 }
 0x297   : > { %v1684_v7 = vpop.permute.xlu1 %1683  ;;  %v2827_v36 = vadd.f32 %v5356_v1, %v2783_v21 }
 0x298   : > { %v1702_v39 = vmul.f32 %v1684_v7, %v5133_v19 }
 0x29a   : > { %v1716_v12 = vpack.c.bf16 %v1702_v39, %v1702_v39  ;;  %3019 = vmatmul.bf16.gmra.mxu1 %v3411_v5  ;;  %v3430_v55 = vld [vmem:[#allocation2 + $0x190] sm:$0xf] }
 0x29b   : > { %v3431_v52 = vor.u32 %v3773_v41, %v3430_v55 }
 0x29c   : > { %1730 = vst [vmem:[#allocation2 + $0x198] sm:$0xf] %v1716_v12 }
 0x29d   : > { %2892 = vmatmul.bf16.gmra.mxu3 %v3431_v52 }
 0x2a0   : > { %v1590_v37 = vpop.permute.xlu1 %1589 }
 0x2a1   : > { %v1605_v13 = vmul.f32 %v1590_v37, %v5298_v43 }
 0x2a2   : > { %v2717_v61 = vpop.f32.mrf.mxu3 }
 0x2a3   : > { %v1619_v20 = vpack.c.bf16 %v1605_v13, %v1605_v13  ;;  %v3438_v38 = vld [vmem:[#allocation2 + $0x198] sm:$0xf] }
 0x2a4   : > { %v3439_v58 = vor.u32 %v3774_v35, %v3438_v38 }
 0x2a5   : > { %1633 = vst [vmem:[#allocation2 + $0x1b4] sm:$0xf] %v1619_v20  ;;  %v2761_v59 = vpop.f32.mrf.mxu0 }
 0x2a6   : > { %v2762_v57 = vadd.f32 %v2761_v59, %v2717_v61  ;;  %2980 = vmatmul.bf16.gmra.mxu2 %v3439_v58 }
 0x2a9   : > { %v1786_v19 = vpop.permute.xlu1 %1785 }
 0x2aa   : > { %v1801_v22 = vmul.f32 %v1786_v19, %v5298_v43  ;;  %v2719_v17 = vpop.f32.mrf.mxu3 }
 0x2ac   : > { %v1815_v27 = vpack.c.bf16 %v1801_v22, %v1801_v22  ;;  %v3432_v31 = vld [vmem:[#allocation2 + $0x1b0] sm:$0xf0] }
 0x2ad   : > { %v2763_v10 = vpop.f32.mrf.mxu0  ;;  %v3435_v0 = vor.u32 %v3769_v26, %v3432_v31 }
 0x2ae   : > { %1829 = vst [vmem:[#allocation2 + $0x1bc] sm:$0xf] %v1815_v27  ;;  %v2764_v2 = vadd.f32 %v2763_v10, %v2719_v17 }
 0x2af   : > { %2936 = vmatmul.bf16.gmra.mxu0 %v3435_v0 }
 0x2b2   : > { %v2863_v42 = vpop.f32.mrf.mxu3 }
 0x2b3   : > { %v2864_v32 = vadd.f32 %v2863_v42, %v5220_v28 }
 0x2b4   : > { %v2805_v56 = vpop.f32.mrf.mxu2 }
 0x2b5   : > { %v2806_v18 = vadd.f32 %v2805_v56, %v2762_v57  ;;  %v2907_v50 = vpop.f32.mrf.mxu0  ;;  %v3440_v63 = vld [vmem:[#allocation2 + $0x1b8] sm:$0xf0] }
 0x2b6   : > { %v3443_v54 = vor.u32 %v3770_v14, %v3440_v63  ;;  %v2908_v12 = vadd.f32 %v2907_v50, %v2864_v32 }
 0x2b7   : > { %v2849_v9 = vpop.f32.mrf.mxu1 }
 0x2b8   : > { %v5407_v24 = vadd.f32 %v2849_v9, %v2806_v18  ;;  %3024 = vmatmul.bf16.gmra.mxu1 %v3443_v54 }
 0x2ba   : > { %v2865_v43 = vpop.f32.mrf.mxu3 }
 0x2bb   : > { %v2866_v39 = vadd.f32 %v2865_v43, %v2822_v33 }
 0x2bc   : > { %v2807_v53 = vpop.f32.mrf.mxu2 }
 0x2bd   : > { %v2808_v6 = vadd.f32 %v2807_v53, %v2764_v2  ;;  %v2909_v15 = vpop.f32.mrf.mxu0 }
 0x2be   : > { %v2910_v41 = vadd.f32 %v2909_v15, %v2866_v39 }
 0x2bf   : > { %v2851_v44 = vpop.f32.mrf.mxu1 }
 0x2c0   : > { %v5411_v62 = vadd.f32 %v2851_v44, %v2808_v6 }
 0x2c2   : > { %v2868_v47 = vpop.f32.mrf.mxu3 }
 0x2c3   : > { %v2869_v30 = vadd.f32 %v2868_v47, %v5338_v51 }
 0x2c4   : > { %v2951_v11 = vpop.f32.mrf.mxu2 }
 0x2c5   : > { %v2912_v7 = vpop.f32.mrf.mxu0  ;;  %v2952_v52 = vadd.f32 %v2951_v11, %v2908_v12 }
 0x2c6   : > { %v2913_v19 = vadd.f32 %v2912_v7, %v2869_v30 }
 0x2c7   : > { %v2995_v5 = vpop.f32.mrf.mxu1 }
 0x2c8   : > { %v2996_v61 = vadd.f32 %v2995_v5, %v2952_v52 }
 0x2ca   : > { %v2870_v55 = vpop.f32.mrf.mxu3 }
 0x2cb   : > { %v2871_v59 = vadd.f32 %v2870_v55, %v2827_v36 }
 0x2cc   : > { %v2953_v34 = vpop.f32.mrf.mxu2 }
 0x2cd   : > { %v2954_v37 = vadd.f32 %v2953_v34, %v2910_v41  ;;  %v2914_v40 = vpop.f32.mrf.mxu0 }
 0x2ce   : > { %v2915_v60 = vadd.f32 %v2914_v40, %v2871_v59 }
 0x2cf   : > { %v2997_v13 = vpop.f32.mrf.mxu1 }
 0x2d0   : > { %v2998_v20 = vadd.f32 %v2997_v13, %v2954_v37 }
 0x2d2   : > { %v3842_v28 = vpack.c.bf16 %v2998_v20, %v2996_v61  ;;  %v2873_v38 = vpop.f32.mrf.mxu3 }
 0x2d3   : > { %v2874_v51 = vadd.f32 %v2873_v38, %v5365_v45 }
 0x2d4   : > { %3843 = vst [vmem:[%s5423_s14] sm:$0xff] %v3842_v28   ;;  %v2956_v35 = vpop.f32.mrf.mxu2 }
 0x2d5   : > { %v2917_v58 = vpop.f32.mrf.mxu0  ;;  %v2957_v17 = vadd.f32 %v2956_v35, %v2913_v19 }
 0x2d6   : > { %v2918_v14 = vadd.f32 %v2917_v58, %v2874_v51 }
 0x2d7   : > { %v3000_v57 = vpop.f32.mrf.mxu1 }
 0x2d8   : > { %v3001_v10 = vadd.f32 %v3000_v57, %v2957_v17 }
 0x2da   : > { %v2875_v22 = vpop.f32.mrf.mxu3 }
 0x2db   : > { %v2876_v18 = vadd.f32 %v2875_v22, %v5371_v46 }
 0x2dc   : > { %v2958_v27 = vpop.f32.mrf.mxu2 }
 0x2dd   : > { %v2959_v26 = vadd.f32 %v2958_v27, %v2915_v60  ;;  %v2919_v0 = vpop.f32.mrf.mxu0 }
 0x2de   : > { %v2920_v54 = vadd.f32 %v2919_v0, %v2876_v18 }
 0x2df   : > { %v3002_v31 = vpop.f32.mrf.mxu1 }
 0x2e0   : > { %v3003_v2 = vadd.f32 %v3002_v31, %v2959_v26 }
 0x2e2   : > { %v3847_v42 = vpack.c.bf16 %v3003_v2, %v3001_v10  ;;  %v2878_v1 = vpop.f32.mrf.mxu3 }
 0x2e3   : > { %v2879_v45 = vadd.f32 %v2878_v1, %v5381_v25 }
 0x2e4   : > { %3874 = vst [vmem:[%s5423_s14 + $0x8] sm:$0xff] %v3847_v42   ;;  %v2961_v56 = vpop.f32.mrf.mxu2 }
 0x2e5   : > { %v2922_v63 = vpop.f32.mrf.mxu0  ;;  %v2962_v9 = vadd.f32 %v2961_v56, %v2918_v14 }
 0x2e6   : > { %v2923_v32 = vadd.f32 %v2922_v63, %v2879_v45 }
 0x2e7   : > { %v3005_v50 = vpop.f32.mrf.mxu1 }
 0x2e8   : > { %v3006_v29 = vadd.f32 %v3005_v50, %v2962_v9 }
 0x2ea   : > { %v2880_v6 = vpop.f32.mrf.mxu3 }
 0x2eb   : > { %v2881_v46 = vadd.f32 %v2880_v6, %v5385_v16 }
 0x2ec   : > { %v2963_v43 = vpop.f32.mrf.mxu2 }
 0x2ed   : > { %v2964_v53 = vadd.f32 %v2963_v43, %v2920_v54  ;;  %v2924_v47 = vpop.f32.mrf.mxu0 }
 0x2ee   : > { %v2925_v39 = vadd.f32 %v2924_v47, %v2881_v46 }
 0x2ef   : > { %v3007_v15 = vpop.f32.mrf.mxu1 }
 0x2f0   : > { %v3008_v44 = vadd.f32 %v3007_v15, %v2964_v53 }
 0x2f2   : > { %v3852_v49 = vpack.c.bf16 %v3008_v44, %v3006_v29  ;;  %v2883_v7 = vpop.f32.mrf.mxu3 }
 0x2f3   : > { %v2884_v25 = vadd.f32 %v2883_v7, %v5389_v4 }
 0x2f4   : > { %3875 = vst [vmem:[%s5423_s14 + $0x10] sm:$0xff] %v3852_v49   ;;  %v2966_v11 = vpop.f32.mrf.mxu2 }
 0x2f5   : > { %v2967_v5 = vadd.f32 %v2966_v11, %v2923_v32  ;;  %v2927_v41 = vpop.f32.mrf.mxu0 }
 0x2f6   : > { %v2928_v21 = vadd.f32 %v2927_v41, %v2884_v25 }
 0x2f7   : > { %v3010_v33 = vpop.f32.mrf.mxu1 }
 0x2f8   : > { %v3011_v34 = vadd.f32 %v3010_v33, %v2967_v5 }
 0x2fa   : > { %v2885_v40 = vpop.f32.mrf.mxu3 }
 0x2fb   : > { %v2886_v16 = vadd.f32 %v2885_v40, %v5393_v48 }
 0x2fc   : > { %v2968_v12 = vpop.f32.mrf.mxu2 }
 0x2fd   : > { %v2969_v55 = vadd.f32 %v2968_v12, %v2925_v39  ;;  %v2929_v20 = vpop.f32.mrf.mxu0 }
 0x2fe   : > { %v2930_v28 = vadd.f32 %v2929_v20, %v2886_v16 }
 0x2ff   : > { %v3012_v52 = vpop.f32.mrf.mxu1 }
 0x300   : > { %v3013_v8 = vadd.f32 %v3012_v52, %v2969_v55 }
 0x302   : > { %v3857_v37 = vpack.c.bf16 %v3013_v8, %v3011_v34 }
 0x304   : > { %3876 = vst [vmem:[%s5423_s14 + $0x18] sm:$0xff] %v3857_v37   ;;  %v2971_v13 = vpop.f32.mrf.mxu2 }
 0x305   : > { %v2888_v38 = vpop.f32.mrf.mxu3  ;;  %v2972_v35 = vadd.f32 %v2971_v13, %v2928_v21 }
 0x306   : > { %v2889_v4 = vadd.f32 %v2888_v38, %v5397_v23 }
 0x307   : > { %v3015_v61 = vpop.f32.mrf.mxu1 }
 0x308   : > { %v3016_v59 = vadd.f32 %v3015_v61, %v2972_v35 }
 0x30c   : > { %v2973_v36 = vpop.f32.mrf.mxu2 }
 0x30d   : > { %v2974_v30 = vadd.f32 %v2973_v36, %v2930_v28  ;;  %v2890_v17 = vpop.f32.mrf.mxu3 }
 0x30e   : > { %v2891_v27 = vadd.f32 %v2890_v17, %v5401_v3 }
 0x30f   : > { %v3017_v58 = vpop.f32.mrf.mxu1 }
 0x310   : > { %v3018_v57 = vadd.f32 %v3017_v58, %v2974_v30 }
 0x311   : > { %v2932_v19 = vpop.f32.mrf.mxu0 }
 0x312   : > { %v3862_v60 = vpack.c.bf16 %v3018_v57, %v3016_v59  ;;  %v2933_v26 = vadd.f32 %v2932_v19, %v2889_v4 }
 0x314   : > { %3877 = vst [vmem:[%s5423_s14 + $0x20] sm:$0xff] %v3862_v60   ;;  %v2976_v22 = vpop.f32.mrf.mxu2 }
 0x315   : > { %v2977_v0 = vadd.f32 %v2976_v22, %v2933_v26 }
 0x317   : > { %v3020_v48 = vpop.f32.mrf.mxu1 }
 0x318   : > { %v3021_v1 = vadd.f32 %v3020_v48, %v2977_v0 }
 0x319   : > { %v2934_v31 = vpop.f32.mrf.mxu0 }
 0x31a   : > { %v2935_v10 = vadd.f32 %v2934_v31, %v2891_v27 }
 0x31c   : > { %v2978_v2 = vpop.f32.mrf.mxu2 }
 0x31d   : > { %v2979_v42 = vadd.f32 %v2978_v2, %v2935_v10 }
 0x31f   : > { %v3022_v56 = vpop.f32.mrf.mxu1 }
 0x320   : > { %v3023_v51 = vadd.f32 %v3022_v56, %v2979_v42  ;;  %v2893_v50 = vpop.f32.mrf.mxu3 }
 0x321   : > { %v2894_v3 = vadd.f32 %v2893_v50, %v5407_v24 }
 0x322   : > { %v3867_v18 = vpack.c.bf16 %v3023_v51, %v3021_v1 }
 0x324   : > { %3878 = vst [vmem:[%s5423_s14 + $0x28] sm:$0xff] %v3867_v18  }
 0x328   : > { %v2895_v54 = vpop.f32.mrf.mxu3 }
 0x329   : > { %v2981_v63 = vpop.f32.mrf.mxu2  ;;  %v2896_v43 = vadd.f32 %v2895_v54, %v5411_v62 }
 0x32c   : > { %v2937_v14 = vpop.f32.mrf.mxu0 }
 0x32d   : > { %v2938_v53 = vadd.f32 %v2937_v14, %v2894_v3 }
 0x32f   : > { %v2982_v29 = vadd.f32 %v2981_v63, %v2938_v53 }
 0x331   : > { %v2983_v15 = vpop.f32.mrf.mxu2 }
 0x334   : > { %v2939_v23 = vpop.f32.mrf.mxu0 }
 0x335   : > { %v3025_v9 = vpop.f32.mrf.mxu1  ;;  %v2940_v6 = vadd.f32 %v2939_v23, %v2896_v43 }
 0x336   : > { %v3026_v47 = vadd.f32 %v3025_v9, %v2982_v29 }
 0x337   : > { %v2984_v44 = vadd.f32 %v2983_v15, %v2940_v6 }
 0x33d   : > { %v3027_v49 = vpop.f32.mrf.mxu1 }
 0x33e   : > { %v3028_v11 = vadd.f32 %v3027_v49, %v2984_v44 }
 0x340   : > { %v3872_v45 = vpack.c.bf16 %v3028_v11, %v3026_v47 }
 0x342   : > { %3879 = vst [vmem:[%s5423_s14 + $0x30] sm:$0xff] %v3872_v45  }
 0x343 PF: > { %s16_s21 = sadd.s32 1, %s4068_s21  }
 0x344   : > { %p13_p4 = scmp.ge.s32.totalorder %s16_s21, 4  }
 0x346   :  { %15 = sbr.rel (!%p13_p4) target bundleno = 1 (0x1), region = 77 }

</bundles_post_ra>
